<compile_context>
chip_gen: v7x
topology: tpu7x:2x2x1
jax: 0.10.0
libtpu: 0.0.40
codegen_flags: <defaults>
</compile_context>

<pallas_src>
import functools

import jax
import jax.numpy as jnp
from jax.experimental import pallas as pl
from jax.experimental.pallas import tpu as pltpu


def _round_up(v, m):
    return ((v + m - 1) // m) * m


# ----------------------------------------------------------------------------
# Pallas kernel: tiled matmul (bf16 MXU inputs, f32 accumulation directly in
# the output block) with fused bias (+ optional ReLU) epilogue.
# ----------------------------------------------------------------------------
def _matmul_bias_kernel(a_ref, b_ref, bias_ref, o_ref, *, apply_relu):
    k = pl.program_id(2)

    @pl.when(k == 0)
    def _():
        o_ref[...] = jnp.zeros_like(o_ref)

    o_ref[...] += jnp.dot(a_ref[...], b_ref[...],
                          preferred_element_type=jnp.float32)

    @pl.when(k == pl.num_programs(2) - 1)
    def _():
        r = o_ref[...] + bias_ref[...]
        if apply_relu:
            r = jnp.maximum(r, 0.0)
        o_ref[...] = r


def matmul_bias(a, w_p, b_p, n_out, *, relu):
    """(M,K) f32 @ pre-padded bf16 (Kp,Np) weight + bias[1,Np] -> (M,n_out) f32."""
    M, K = a.shape
    Kp, Np = w_p.shape
    assert K <= Kp and n_out <= Np

    tm = min(256, _round_up(M, 8))
    Mp = _round_up(M, tm)
    tk = 256 if Kp % 256 == 0 else 128
    tn = 256 if Np % 256 == 0 else 128
    # Keep at least two blocks on a parallel axis when possible (v7x has two
    # TensorCores; a 1-block parallel grid leaves half the chip idle).
    if (Mp // tm) * (Np // tn) < 2 and tn == 256:
        tn = 128

    a_p = a.astype(jnp.bfloat16)
    if (Mp, Kp) != (M, K):
        a_p = jnp.pad(a_p, ((0, Mp - M), (0, Kp - K)))

    cost = pl.CostEstimate(
        flops=2 * Mp * Kp * Np,
        transcendentals=0,
        bytes_accessed=Mp * Kp * 2 + Kp * Np * 2 + Np * 4 + Mp * Np * 4)

    out = pl.pallas_call(
        functools.partial(_matmul_bias_kernel, apply_relu=relu),
        out_shape=jax.ShapeDtypeStruct((Mp, Np), jnp.float32),
        grid_spec=pltpu.PrefetchScalarGridSpec(
            num_scalar_prefetch=0,
            grid=(Mp // tm, Np // tn, Kp // tk),
            in_specs=[
                pl.BlockSpec((tm, tk), lambda i, j, k: (i, k)),
                pl.BlockSpec((tk, tn), lambda i, j, k: (k, j)),
                pl.BlockSpec((1, tn), lambda i, j, k: (0, j)),
            ],
            out_specs=pl.BlockSpec((tm, tn), lambda i, j, k: (i, j)),
        ),
        compiler_params=pltpu.CompilerParams(
            dimension_semantics=("parallel", "parallel", "arbitrary"),
            vmem_limit_bytes=32 * 1024 * 1024),
        cost_estimate=cost,
    )(a_p, w_p, b_p)

    if (M, n_out) != (Mp, Np):
        out = out[:M, :n_out]
    return out


# ----------------------------------------------------------------------------
# Conv (im2col glue + Pallas matmul) and pooling helpers
# ----------------------------------------------------------------------------
def _im2col(x, kh, kw, stride, pad):
    """x: (N,H,W,C) -> patches (N*OH*OW, kh*kw*C), OH, OW."""
    n, h, w, c = x.shape
    xp = jnp.pad(x, ((0, 0), (pad, pad), (pad, pad), (0, 0)))
    oh = (h + 2 * pad - kh) // stride + 1
    ow = (w + 2 * pad - kw) // stride + 1
    cols = []
    for i in range(kh):
        for j in range(kw):
            cols.append(xp[:, i:i + oh * stride:stride,
                           j:j + ow * stride:stride, :])
    patches = jnp.concatenate(cols, axis=-1)          # (N, OH, OW, kh*kw*C)
    return patches.reshape(n * oh * ow, kh * kw * c), oh, ow
    # TODO(synk): at large resolutions fold this kh*kw window walk into the
    # Pallas grid (shifted-window DMA) to avoid the 9x/49x HBM patch buffer;
    # at 32x32 / batch 2 the patch buffers total <2 MB so JAX glue is kept.


def conv_relu(x, wb, *, kh, kw, stride, pad, n_out):
    """conv(no bias) + folded BatchNorm bias + ReLU.  x is NHWC."""
    w_p, b_p = wb
    n = x.shape[0]
    if kh == 1 and kw == 1 and stride == 1 and pad == 0:
        oh, ow = x.shape[1], x.shape[2]
        cols = x.reshape(n * oh * ow, x.shape[3])
    else:
        cols, oh, ow = _im2col(x, kh, kw, stride, pad)
    y = matmul_bias(cols, w_p, b_p, n_out, relu=True)
    return y.reshape(n, oh, ow, n_out)


def maxpool2d(x, k, stride, pad=0):
    """MaxPool2d, ceil_mode=True, PyTorch semantics (last window must start
    inside the input or left padding).  x is NHWC."""
    n, h, w, c = x.shape

    def osize(s):
        o = -(-(s + 2 * pad - k) // stride) + 1       # ceil
        if (o - 1) * stride >= s + pad:
            o -= 1
        return o

    oh, ow = osize(h), osize(w)
    pad_b = max(0, (oh - 1) * stride + k - h - pad)
    pad_r = max(0, (ow - 1) * stride + k - w - pad)
    xp = jnp.pad(x, ((0, 0), (pad, pad_b), (pad, pad_r), (0, 0)),
                 constant_values=-jnp.inf)
    out = None
    for i in range(k):
        for j in range(k):
            win = xp[:, i:i + oh * stride:stride, j:j + ow * stride:stride, :]
            out = win if out is None else jnp.maximum(out, win)
    return out


# ----------------------------------------------------------------------------
# Deterministic parameter construction (BN folded, fused, pre-padded, bf16)
# ----------------------------------------------------------------------------
# (cin, c1, c3r, c3, c5r, c5, pool_proj)
_INCEPTION_CFG = {
    '3a': (192, 64, 96, 128, 16, 32, 32),
    '3b': (256, 128, 128, 192, 32, 96, 64),
    '4a': (480, 192, 96, 208, 16, 48, 64),
    '4b': (512, 160, 112, 224, 24, 64, 64),
    '4c': (512, 128, 128, 256, 24, 64, 64),
    '4d': (512, 112, 144, 288, 32, 64, 64),
    '4e': (528, 256, 160, 320, 32, 128, 128),
    '5a': (832, 256, 160, 320, 32, 128, 128),
    '5b': (832, 384, 192, 384, 48, 128, 128),
}


def _conv_eff(key, cin, cout, k):
    """BasicConv2d: conv weight with eval-mode BN folded in, plus bias."""
    k1, k2, k3 = jax.random.split(key, 3)
    std = (2.0 / (k * k * cin)) ** 0.5
    w = jax.random.normal(k1, (k, k, cin, cout), jnp.float32) * std
    gamma = 1.0 + 0.01 * jax.random.normal(k2, (cout,), jnp.float32)
    beta = 0.01 * jax.random.normal(k3, (cout,), jnp.float32)
    scale = gamma / jnp.sqrt(1.0 + 1e-3)   # running_mean=0, running_var=1, eps=1e-3
    return w * scale, beta


def _init_linear(key, cin, cout):
    k1, k2 = jax.random.split(key)
    w = jax.random.normal(k1, (cin, cout), jnp.float32) * (1.0 / cin) ** 0.5
    b = 0.01 * jax.random.normal(k2, (cout,), jnp.float32)
    return w, b


def _pack(w, b):
    """Pre-pad weight to (Kp,Np) (128-multiples), cast bf16; bias -> f32 (1,Np)."""
    if w.ndim == 4:
        kh, kw, cin, cout = w.shape
        wmat = w.reshape(kh * kw * cin, cout)
    else:
        wmat = w
    K, N = wmat.shape
    Kp, Np = _round_up(K, 128), _round_up(N, 128)
    w_p = jnp.pad(wmat, ((0, Kp - K), (0, Np - N))).astype(jnp.bfloat16)
    b_p = jnp.pad(b, (0, Np - N)).reshape(1, Np).astype(jnp.float32)
    return w_p, b_p


def _incep_params(keys, cin, c1, c3r, c3, c5r, c5, pp):
    w1, b1 = _conv_eff(next(keys), cin, c1, 1)
    w2a, b2a = _conv_eff(next(keys), cin, c3r, 1)
    w2b, b2b = _conv_eff(next(keys), c3r, c3, 3)
    w3a, b3a = _conv_eff(next(keys), cin, c5r, 1)
    w3b, b3b = _conv_eff(next(keys), c5r, c5, 3)
    w4, b4 = _conv_eff(next(keys), cin, pp, 1)

    # Fused 1x1: column order [b2a | b3a | b1] so the 3x3 reduce inputs are a
    # contiguous slice of the fused output (no extra concat needed).
    wf = jnp.concatenate([w2a, w3a, w1], axis=-1)
    bf = jnp.concatenate([b2a, b3a, b1])

    # Fused 3x3: block-diagonal (c3r->c3, c5r->c5) over the concatenated
    # [branch2_reduce | branch3_reduce] channels.
    w33 = jnp.zeros((3, 3, c3r + c5r, c3 + c5), jnp.float32)
    w33 = w33.at[:, :, :c3r, :c3].set(w2b)
    w33 = w33.at[:, :, c3r:, c3:].set(w3b)
    b33 = jnp.concatenate([b2b, b3b])

    return dict(p1=_pack(wf, bf), p33=_pack(w33, b33), p4=_pack(w4, b4))


def make_params(key, dim_out):
    keys = iter(jax.random.split(key, 128))
    p = {
        'conv1': _pack(*_conv_eff(next(keys), 3, 64, 7)),
        'conv2': _pack(*_conv_eff(next(keys), 64, 64, 1)),
        'conv3': _pack(*_conv_eff(next(keys), 64, 192, 3)),
    }
    for name, cfg in _INCEPTION_CFG.items():
        p[name] = _incep_params(keys, *cfg)
    p['fc'] = _pack(*_init_linear(next(keys), 1024, 1000))
    p['l'] = _pack(*_init_linear(next(keys), 1000, dim_out))
    return p


# ----------------------------------------------------------------------------
# Forward pass
# ----------------------------------------------------------------------------
def _transform_input(x_nchw):
    # torchvision googlenet(transform_input=True)
    x0 = x_nchw[:, 0:1] * (0.229 / 0.5) + (0.485 - 0.5) / 0.5
    x1 = x_nchw[:, 1:2] * (0.224 / 0.5) + (0.456 - 0.5) / 0.5
    x2 = x_nchw[:, 2:3] * (0.225 / 0.5) + (0.406 - 0.5) / 0.5
    return jnp.concatenate([x0, x1, x2], axis=1)


def _inception(x, p, cfg):
    cin, c1, c3r, c3, c5r, c5, pp = cfg
    # One fused 1x1 matmul for branch2-reduce, branch3-reduce and branch1.
    t = conv_relu(x, p['p1'], kh=1, kw=1, stride=1, pad=0,
                  n_out=c3r + c5r + c1)
    red = t[..., :c3r + c5r]
    b1 = t[..., c3r + c5r:]
    # One fused (block-diagonal) 3x3 matmul producing [branch2 | branch3].
    b23 = conv_relu(red, p['p33'], kh=3, kw=3, stride=1, pad=1, n_out=c3 + c5)
    # Branch4: maxpool + 1x1.
    b4 = conv_relu(maxpool2d(x, 3, 1, pad=1), p['p4'], kh=1, kw=1, stride=1,
                   pad=0, n_out=pp)
    return jnp.concatenate([b1, b23, b4], axis=-1)


def forward(params, x_nchw, dim_out):
    x = _transform_input(x_nchw)
    x = jnp.transpose(x, (0, 2, 3, 1))                 # NCHW -> NHWC

    x = conv_relu(x, params['conv1'], kh=7, kw=7, stride=2, pad=3, n_out=64)
    x = maxpool2d(x, 3, 2)
    x = conv_relu(x, params['conv2'], kh=1, kw=1, stride=1, pad=0, n_out=64)
    x = conv_relu(x, params['conv3'], kh=3, kw=3, stride=1, pad=1, n_out=192)
    x = maxpool2d(x, 3, 2)
    x = _inception(x, params['3a'], _INCEPTION_CFG['3a'])
    x = _inception(x, params['3b'], _INCEPTION_CFG['3b'])
    x = maxpool2d(x, 3, 2)
    for name in ('4a', '4b', '4c', '4d', '4e'):
        x = _inception(x, params[name], _INCEPTION_CFG[name])
    x = maxpool2d(x, 2, 2)
    x = _inception(x, params['5a'], _INCEPTION_CFG['5a'])
    x = _inception(x, params['5b'], _INCEPTION_CFG['5b'])

    x = jnp.mean(x, axis=(1, 2))                       # AdaptiveAvgPool2d((1,1))
    # Dropout(p=0.2) is identity in eval mode.
    x = matmul_bias(x, *params['fc'], 1000, relu=False)     # googlenet fc
    # nn.Flatten() is a no-op on (N, 1000).
    x = matmul_bias(x, *params['l'], dim_out, relu=False)   # Linear(1000, dim_out)
    return x


if __name__ == "__main__":
    key = jax.random.PRNGKey(0)
    pkey, xkey = jax.random.split(key)
    dim_out = 16
    params = make_params(pkey, dim_out)
    x = jax.random.normal(xkey, (2, 3, 32, 32), jnp.float32)

    fwd = jax.jit(functools.partial(forward, dim_out=dim_out))
    out = fwd(params, x)
    out = jax.block_until_ready(out)
    assert out.shape == (2, dim_out)
    assert bool(jnp.all(jnp.isfinite(out)))
    print("KERNEL_OK")
</pallas_src>

<mosaic_0001>
module attributes {stable_mosaic.version = 11 : i64} {
  func.func @_matmul_bias_kernel(%arg0: i32, %arg1: i32, %arg2: i32, %arg3: memref<256x256xbf16, #tpu.memory_space<vmem>>, %arg4: memref<256x128xbf16, #tpu.memory_space<vmem>>, %arg5: memref<1x128xf32, #tpu.memory_space<vmem>>, %arg6: memref<256x128xf32, #tpu.memory_space<vmem>>) attributes {dimension_semantics = [#tpu.dimension_semantics<parallel>, #tpu.dimension_semantics<parallel>, #tpu.dimension_semantics<arbitrary>], iteration_bounds = array<i64: 2, 1, 1>, scalar_prefetch = 0 : i64, scratch_operands = 0 : i64, tpu.core_type = #tpu.core_type<tc>, window_params = [{transform_indices = @transform_0, window_bounds = array<i64: 256, 256>}, {transform_indices = @transform_1, window_bounds = array<i64: 256, 128>}, {transform_indices = @transform_2, window_bounds = array<i64: 1, 128>}, {transform_indices = @transform_3, window_bounds = array<i64: 256, 128>}]} {
    %c0_i32 = arith.constant 0 : i32
    %0 = arith.cmpi eq, %arg2, %c0_i32 : i32
    %1 = arith.extui %0 : i1 to i32
    %c0_i32_0 = arith.constant 0 : i32
    %2 = arith.cmpi ne, %1, %c0_i32_0 : i32
    scf.if %2 {
      %cst_10 = arith.constant 0.000000e+00 : f32
      %12 = vector.broadcast %cst_10 : f32 to vector<256x128xf32>
      %c0_11 = arith.constant 0 : index
      %c0_12 = arith.constant 0 : index
      %13 = vector.load %arg6[%c0_11, %c0_12] : memref<256x128xf32, #tpu.memory_space<vmem>>, vector<256x128xf32>
      tpu.vector_store %arg6[%c0_11, %c0_12], %12 {strides = array<i32>} : memref<256x128xf32, #tpu.memory_space<vmem>>, vector<256x128xf32>,
    } else {
    }
    %c0 = arith.constant 0 : index
    %c0_1 = arith.constant 0 : index
    %3 = vector.load %arg6[%c0, %c0_1] : memref<256x128xf32, #tpu.memory_space<vmem>>, vector<256x128xf32>
    %c0_2 = arith.constant 0 : index
    %c0_3 = arith.constant 0 : index
    %4 = vector.load %arg3[%c0_2, %c0_3] : memref<256x256xbf16, #tpu.memory_space<vmem>>, vector<256x256xbf16>
    %c0_4 = arith.constant 0 : index
    %c0_5 = arith.constant 0 : index
    %5 = vector.load %arg4[%c0_4, %c0_5] : memref<256x128xbf16, #tpu.memory_space<vmem>>, vector<256x128xbf16>
    %cst = arith.constant dense<0.000000e+00> : vector<256x128xf32>
    %6 = tpu.matmul %4, %5, %cst {dimension_numbers = #tpu.dot_dimension_numbers<[1], [0], [0], [1], [0, 0, 1, 1], [], []>} : vector<256x256xbf16>, vector<256x128xbf16>, vector<256x128xf32> -> vector<256x128xf32>
    %7 = arith.addf %3, %6 : vector<256x128xf32>
    %c0_6 = arith.constant 0 : index
    %c0_7 = arith.constant 0 : index
    %8 = vector.load %arg6[%c0_6, %c0_7] : memref<256x128xf32, #tpu.memory_space<vmem>>, vector<256x128xf32>
    tpu.vector_store %arg6[%c0_6, %c0_7], %7 {strides = array<i32>} : memref<256x128xf32, #tpu.memory_space<vmem>>, vector<256x128xf32>,
    %c0_i32_8 = arith.constant 0 : i32
    %9 = arith.cmpi eq, %arg2, %c0_i32_8 : i32
    %10 = arith.extui %9 : i1 to i32
    %c0_i32_9 = arith.constant 0 : i32
    %11 = arith.cmpi ne, %10, %c0_i32_9 : i32
    scf.if %11 {
      %c0_10 = arith.constant 0 : index
      %c0_11 = arith.constant 0 : index
      %12 = vector.load %arg6[%c0_10, %c0_11] : memref<256x128xf32, #tpu.memory_space<vmem>>, vector<256x128xf32>
      %c0_12 = arith.constant 0 : index
      %c0_13 = arith.constant 0 : index
      %13 = vector.load %arg5[%c0_12, %c0_13] : memref<1x128xf32, #tpu.memory_space<vmem>>, vector<1x128xf32>
      %14 = vector.broadcast %13 : vector<1x128xf32> to vector<256x128xf32>
      %15 = arith.addf %12, %14 : vector<256x128xf32>
      %cst_14 = arith.constant 0.000000e+00 : f32
      %16 = vector.broadcast %cst_14 : f32 to vector<256x128xf32>
      %17 = arith.maximumf %15, %16 : vector<256x128xf32>
      %c0_15 = arith.constant 0 : index
      %c0_16 = arith.constant 0 : index
      %18 = vector.load %arg6[%c0_15, %c0_16] : memref<256x128xf32, #tpu.memory_space<vmem>>, vector<256x128xf32>
      tpu.vector_store %arg6[%c0_15, %c0_16], %17 {strides = array<i32>} : memref<256x128xf32, #tpu.memory_space<vmem>>, vector<256x128xf32>,
    } else {
    }
    return
  }
  func.func @transform_0(%arg0: i32, %arg1: i32, %arg2: i32) -> (i32, i32) {
    %c0_i32 = arith.constant 0 : i32
    return %arg0, %arg2 : i32, i32
  }
  func.func @transform_1(%arg0: i32, %arg1: i32, %arg2: i32) -> (i32, i32) {
    %c0_i32 = arith.constant 0 : i32
    return %arg2, %arg1 : i32, i32
  }
  func.func @transform_2(%arg0: i32, %arg1: i32, %arg2: i32) -> (i32, i32) {
    %c0_i32 = arith.constant 0 : i32
    %c0_i32_0 = arith.constant 0 : i32
    return %c0_i32, %arg1 : i32, i32
  }
  func.func @transform_3(%arg0: i32, %arg1: i32, %arg2: i32) -> (i32, i32) {
    %c0_i32 = arith.constant 0 : i32
    return %arg0, %arg1 : i32, i32
  }
}

module attributes {stable_mosaic.version = 11 : i64} {
  func.func @_matmul_bias_kernel(%arg0: i32, %arg1: i32, %arg2: i32, %arg3: memref<128x128xbf16, #tpu.memory_space<vmem>>, %arg4: memref<128x128xbf16, #tpu.memory_space<vmem>>, %arg5: memref<1x128xf32, #tpu.memory_space<vmem>>, %arg6: memref<128x128xf32, #tpu.memory_space<vmem>>) attributes {dimension_semantics = [#tpu.dimension_semantics<parallel>, #tpu.dimension_semantics<parallel>, #tpu.dimension_semantics<arbitrary>], iteration_bounds = array<i64: 1, 1, 1>, scalar_prefetch = 0 : i64, scratch_operands = 0 : i64, tpu.core_type = #tpu.core_type<tc>, window_params = [{transform_indices = @transform_0, window_bounds = array<i64: 128, 128>}, {transform_indices = @transform_1, window_bounds = array<i64: 128, 128>}, {transform_indices = @transform_2, window_bounds = array<i64: 1, 128>}, {transform_indices = @transform_3, window_bounds = array<i64: 128, 128>}]} {
    %c0_i32 = arith.constant 0 : i32
    %0 = arith.cmpi eq, %arg2, %c0_i32 : i32
    %1 = arith.extui %0 : i1 to i32
    %c0_i32_0 = arith.constant 0 : i32
    %2 = arith.cmpi ne, %1, %c0_i32_0 : i32
    scf.if %2 {
      %cst_10 = arith.constant 0.000000e+00 : f32
      %12 = vector.broadcast %cst_10 : f32 to vector<128x128xf32>
      %c0_11 = arith.constant 0 : index
      %c0_12 = arith.constant 0 : index
      %13 = vector.load %arg6[%c0_11, %c0_12] : memref<128x128xf32, #tpu.memory_space<vmem>>, vector<128x128xf32>
      tpu.vector_store %arg6[%c0_11, %c0_12], %12 {strides = array<i32>} : memref<128x128xf32, #tpu.memory_space<vmem>>, vector<128x128xf32>,
    } else {
    }
    %c0 = arith.constant 0 : index
    %c0_1 = arith.constant 0 : index
    %3 = vector.load %arg6[%c0, %c0_1] : memref<128x128xf32, #tpu.memory_space<vmem>>, vector<128x128xf32>
    %c0_2 = arith.constant 0 : index
    %c0_3 = arith.constant 0 : index
    %4 = vector.load %arg3[%c0_2, %c0_3] : memref<128x128xbf16, #tpu.memory_space<vmem>>, vector<128x128xbf16>
    %c0_4 = arith.constant 0 : index
    %c0_5 = arith.constant 0 : index
    %5 = vector.load %arg4[%c0_4, %c0_5] : memref<128x128xbf16, #tpu.memory_space<vmem>>, vector<128x128xbf16>
    %cst = arith.constant dense<0.000000e+00> : vector<128x128xf32>
    %6 = tpu.matmul %4, %5, %cst {dimension_numbers = #tpu.dot_dimension_numbers<[1], [0], [0], [1], [0, 0, 1, 1], [], []>} : vector<128x128xbf16>, vector<128x128xbf16>, vector<128x128xf32> -> vector<128x128xf32>
    %7 = arith.addf %3, %6 : vector<128x128xf32>
    %c0_6 = arith.constant 0 : index
    %c0_7 = arith.constant 0 : index
    %8 = vector.load %arg6[%c0_6, %c0_7] : memref<128x128xf32, #tpu.memory_space<vmem>>, vector<128x128xf32>
    tpu.vector_store %arg6[%c0_6, %c0_7], %7 {strides = array<i32>} : memref<128x128xf32, #tpu.memory_space<vmem>>, vector<128x128xf32>,
    %c0_i32_8 = arith.constant 0 : i32
    %9 = arith.cmpi eq, %arg2, %c0_i32_8 : i32
    %10 = arith.extui %9 : i1 to i32
    %c0_i32_9 = arith.constant 0 : i32
    %11 = arith.cmpi ne, %10, %c0_i32_9 : i32
    scf.if %11 {
      %c0_10 = arith.constant 0 : index
      %c0_11 = arith.constant 0 : index
      %12 = vector.load %arg6[%c0_10, %c0_11] : memref<128x128xf32, #tpu.memory_space<vmem>>, vector<128x128xf32>
      %c0_12 = arith.constant 0 : index
      %c0_13 = arith.constant 0 : index
      %13 = vector.load %arg5[%c0_12, %c0_13] : memref<1x128xf32, #tpu.memory_space<vmem>>, vector<1x128xf32>
      %14 = vector.broadcast %13 : vector<1x128xf32> to vector<128x128xf32>
      %15 = arith.addf %12, %14 : vector<128x128xf32>
      %cst_14 = arith.constant 0.000000e+00 : f32
      %16 = vector.broadcast %cst_14 : f32 to vector<128x128xf32>
      %17 = arith.maximumf %15, %16 : vector<128x128xf32>
      %c0_15 = arith.constant 0 : index
      %c0_16 = arith.constant 0 : index
      %18 = vector.load %arg6[%c0_15, %c0_16] : memref<128x128xf32, #tpu.memory_space<vmem>>, vector<128x128xf32>
      tpu.vector_store %arg6[%c0_15, %c0_16], %17 {strides = array<i32>} : memref<128x128xf32, #tpu.memory_space<vmem>>, vector<128x128xf32>,
    } else {
    }
    return
  }
  func.func @transform_0(%arg0: i32, %arg1: i32, %arg2: i32) -> (i32, i32) {
    %c0_i32 = arith.constant 0 : i32
    return %arg0, %arg2 : i32, i32
  }
  func.func @transform_1(%arg0: i32, %arg1: i32, %arg2: i32) -> (i32, i32) {
    %c0_i32 = arith.constant 0 : i32
    return %arg2, %arg1 : i32, i32
  }
  func.func @transform_2(%arg0: i32, %arg1: i32, %arg2: i32) -> (i32, i32) {
    %c0_i32 = arith.constant 0 : i32
    %c0_i32_0 = arith.constant 0 : i32
    return %c0_i32, %arg1 : i32, i32
  }
  func.func @transform_3(%arg0: i32, %arg1: i32, %arg2: i32) -> (i32, i32) {
    %c0_i32 = arith.constant 0 : i32
    return %arg0, %arg1 : i32, i32
  }
}

module attributes {stable_mosaic.version = 11 : i64} {
  func.func @_matmul_bias_kernel(%arg0: i32, %arg1: i32, %arg2: i32, %arg3: memref<128x128xbf16, #tpu.memory_space<vmem>>, %arg4: memref<128x128xbf16, #tpu.memory_space<vmem>>, %arg5: memref<1x128xf32, #tpu.memory_space<vmem>>, %arg6: memref<128x128xf32, #tpu.memory_space<vmem>>) attributes {dimension_semantics = [#tpu.dimension_semantics<parallel>, #tpu.dimension_semantics<parallel>, #tpu.dimension_semantics<arbitrary>], iteration_bounds = array<i64: 1, 2, 5>, scalar_prefetch = 0 : i64, scratch_operands = 0 : i64, tpu.core_type = #tpu.core_type<tc>, window_params = [{transform_indices = @transform_0, window_bounds = array<i64: 128, 128>}, {transform_indices = @transform_1, window_bounds = array<i64: 128, 128>}, {transform_indices = @transform_2, window_bounds = array<i64: 1, 128>}, {transform_indices = @transform_3, window_bounds = array<i64: 128, 128>}]} {
    %c0_i32 = arith.constant 0 : i32
    %0 = arith.cmpi eq, %arg2, %c0_i32 : i32
    %1 = arith.extui %0 : i1 to i32
    %c0_i32_0 = arith.constant 0 : i32
    %2 = arith.cmpi ne, %1, %c0_i32_0 : i32
    scf.if %2 {
      %cst_9 = arith.constant 0.000000e+00 : f32
      %12 = vector.broadcast %cst_9 : f32 to vector<128x128xf32>
      %c0_10 = arith.constant 0 : index
      %c0_11 = arith.constant 0 : index
      %13 = vector.load %arg6[%c0_10, %c0_11] : memref<128x128xf32, #tpu.memory_space<vmem>>, vector<128x128xf32>
      tpu.vector_store %arg6[%c0_10, %c0_11], %12 {strides = array<i32>} : memref<128x128xf32, #tpu.memory_space<vmem>>, vector<128x128xf32>,
    } else {
    }
    %c0 = arith.constant 0 : index
    %c0_1 = arith.constant 0 : index
    %3 = vector.load %arg6[%c0, %c0_1] : memref<128x128xf32, #tpu.memory_space<vmem>>, vector<128x128xf32>
    %c0_2 = arith.constant 0 : index
    %c0_3 = arith.constant 0 : index
    %4 = vector.load %arg3[%c0_2, %c0_3] : memref<128x128xbf16, #tpu.memory_space<vmem>>, vector<128x128xbf16>
    %c0_4 = arith.constant 0 : index
    %c0_5 = arith.constant 0 : index
    %5 = vector.load %arg4[%c0_4, %c0_5] : memref<128x128xbf16, #tpu.memory_space<vmem>>, vector<128x128xbf16>
    %cst = arith.constant dense<0.000000e+00> : vector<128x128xf32>
    %6 = tpu.matmul %4, %5, %cst {dimension_numbers = #tpu.dot_dimension_numbers<[1], [0], [0], [1], [0, 0, 1, 1], [], []>} : vector<128x128xbf16>, vector<128x128xbf16>, vector<128x128xf32> -> vector<128x128xf32>
    %7 = arith.addf %3, %6 : vector<128x128xf32>
    %c0_6 = arith.constant 0 : index
    %c0_7 = arith.constant 0 : index
    %8 = vector.load %arg6[%c0_6, %c0_7] : memref<128x128xf32, #tpu.memory_space<vmem>>, vector<128x128xf32>
    tpu.vector_store %arg6[%c0_6, %c0_7], %7 {strides = array<i32>} : memref<128x128xf32, #tpu.memory_space<vmem>>, vector<128x128xf32>,
    %c4_i32 = arith.constant 4 : i32
    %9 = arith.cmpi eq, %arg2, %c4_i32 : i32
    %10 = arith.extui %9 : i1 to i32
    %c0_i32_8 = arith.constant 0 : i32
    %11 = arith.cmpi ne, %10, %c0_i32_8 : i32
    scf.if %11 {
      %c0_9 = arith.constant 0 : index
      %c0_10 = arith.constant 0 : index
      %12 = vector.load %arg6[%c0_9, %c0_10] : memref<128x128xf32, #tpu.memory_space<vmem>>, vector<128x128xf32>
      %c0_11 = arith.constant 0 : index
      %c0_12 = arith.constant 0 : index
      %13 = vector.load %arg5[%c0_11, %c0_12] : memref<1x128xf32, #tpu.memory_space<vmem>>, vector<1x128xf32>
      %14 = vector.broadcast %13 : vector<1x128xf32> to vector<128x128xf32>
      %15 = arith.addf %12, %14 : vector<128x128xf32>
      %cst_13 = arith.constant 0.000000e+00 : f32
      %16 = vector.broadcast %cst_13 : f32 to vector<128x128xf32>
      %17 = arith.maximumf %15, %16 : vector<128x128xf32>
      %c0_14 = arith.constant 0 : index
      %c0_15 = arith.constant 0 : index
      %18 = vector.load %arg6[%c0_14, %c0_15] : memref<128x128xf32, #tpu.memory_space<vmem>>, vector<128x128xf32>
      tpu.vector_store %arg6[%c0_14, %c0_15], %17 {strides = array<i32>} : memref<128x128xf32, #tpu.memory_space<vmem>>, vector<128x128xf32>,
    } else {
    }
    return
  }
  func.func @transform_0(%arg0: i32, %arg1: i32, %arg2: i32) -> (i32, i32) {
    %c0_i32 = arith.constant 0 : i32
    return %arg0, %arg2 : i32, i32
  }
  func.func @transform_1(%arg0: i32, %arg1: i32, %arg2: i32) -> (i32, i32) {
    %c0_i32 = arith.constant 0 : i32
    return %arg2, %arg1 : i32, i32
  }
  func.func @transform_2(%arg0: i32, %arg1: i32, %arg2: i32) -> (i32, i32) {
    %c0_i32 = arith.constant 0 : i32
    %c0_i32_0 = arith.constant 0 : i32
    return %c0_i32, %arg1 : i32, i32
  }
  func.func @transform_3(%arg0: i32, %arg1: i32, %arg2: i32) -> (i32, i32) {
    %c0_i32 = arith.constant 0 : i32
    return %arg0, %arg1 : i32, i32
  }
}

module attributes {stable_mosaic.version = 11 : i64} {
  func.func @_matmul_bias_kernel(%arg0: i32, %arg1: i32, %arg2: i32, %arg3: memref<32x256xbf16, #tpu.memory_space<vmem>>, %arg4: memref<256x128xbf16, #tpu.memory_space<vmem>>, %arg5: memref<1x128xf32, #tpu.memory_space<vmem>>, %arg6: memref<32x128xf32, #tpu.memory_space<vmem>>) attributes {dimension_semantics = [#tpu.dimension_semantics<parallel>, #tpu.dimension_semantics<parallel>, #tpu.dimension_semantics<arbitrary>], iteration_bounds = array<i64: 1, 2, 1>, scalar_prefetch = 0 : i64, scratch_operands = 0 : i64, tpu.core_type = #tpu.core_type<tc>, window_params = [{transform_indices = @transform_0, window_bounds = array<i64: 32, 256>}, {transform_indices = @transform_1, window_bounds = array<i64: 256, 128>}, {transform_indices = @transform_2, window_bounds = array<i64: 1, 128>}, {transform_indices = @transform_3, window_bounds = array<i64: 32, 128>}]} {
    %c0_i32 = arith.constant 0 : i32
    %0 = arith.cmpi eq, %arg2, %c0_i32 : i32
    %1 = arith.extui %0 : i1 to i32
    %c0_i32_0 = arith.constant 0 : i32
    %2 = arith.cmpi ne, %1, %c0_i32_0 : i32
    scf.if %2 {
      %cst_10 = arith.constant 0.000000e+00 : f32
      %12 = vector.broadcast %cst_10 : f32 to vector<32x128xf32>
      %c0_11 = arith.constant 0 : index
      %c0_12 = arith.constant 0 : index
      %13 = vector.load %arg6[%c0_11, %c0_12] : memref<32x128xf32, #tpu.memory_space<vmem>>, vector<32x128xf32>
      tpu.vector_store %arg6[%c0_11, %c0_12], %12 {strides = array<i32>} : memref<32x128xf32, #tpu.memory_space<vmem>>, vector<32x128xf32>,
    } else {
    }
    %c0 = arith.constant 0 : index
    %c0_1 = arith.constant 0 : index
    %3 = vector.load %arg6[%c0, %c0_1] : memref<32x128xf32, #tpu.memory_space<vmem>>, vector<32x128xf32>
    %c0_2 = arith.constant 0 : index
    %c0_3 = arith.constant 0 : index
    %4 = vector.load %arg3[%c0_2, %c0_3] : memref<32x256xbf16, #tpu.memory_space<vmem>>, vector<32x256xbf16>
    %c0_4 = arith.constant 0 : index
    %c0_5 = arith.constant 0 : index
    %5 = vector.load %arg4[%c0_4, %c0_5] : memref<256x128xbf16, #tpu.memory_space<vmem>>, vector<256x128xbf16>
    %cst = arith.constant dense<0.000000e+00> : vector<32x128xf32>
    %6 = tpu.matmul %4, %5, %cst {dimension_numbers = #tpu.dot_dimension_numbers<[1], [0], [0], [1], [0, 0, 1, 1], [], []>} : vector<32x256xbf16>, vector<256x128xbf16>, vector<32x128xf32> -> vector<32x128xf32>
    %7 = arith.addf %3, %6 : vector<32x128xf32>
    %c0_6 = arith.constant 0 : index
    %c0_7 = arith.constant 0 : index
    %8 = vector.load %arg6[%c0_6, %c0_7] : memref<32x128xf32, #tpu.memory_space<vmem>>, vector<32x128xf32>
    tpu.vector_store %arg6[%c0_6, %c0_7], %7 {strides = array<i32>} : memref<32x128xf32, #tpu.memory_space<vmem>>, vector<32x128xf32>,
    %c0_i32_8 = arith.constant 0 : i32
    %9 = arith.cmpi eq, %arg2, %c0_i32_8 : i32
    %10 = arith.extui %9 : i1 to i32
    %c0_i32_9 = arith.constant 0 : i32
    %11 = arith.cmpi ne, %10, %c0_i32_9 : i32
    scf.if %11 {
      %c0_10 = arith.constant 0 : index
      %c0_11 = arith.constant 0 : index
      %12 = vector.load %arg6[%c0_10, %c0_11] : memref<32x128xf32, #tpu.memory_space<vmem>>, vector<32x128xf32>
      %c0_12 = arith.constant 0 : index
      %c0_13 = arith.constant 0 : index
      %13 = vector.load %arg5[%c0_12, %c0_13] : memref<1x128xf32, #tpu.memory_space<vmem>>, vector<1x128xf32>
      %14 = vector.broadcast %13 : vector<1x128xf32> to vector<32x128xf32>
      %15 = arith.addf %12, %14 : vector<32x128xf32>
      %cst_14 = arith.constant 0.000000e+00 : f32
      %16 = vector.broadcast %cst_14 : f32 to vector<32x128xf32>
      %17 = arith.maximumf %15, %16 : vector<32x128xf32>
      %c0_15 = arith.constant 0 : index
      %c0_16 = arith.constant 0 : index
      %18 = vector.load %arg6[%c0_15, %c0_16] : memref<32x128xf32, #tpu.memory_space<vmem>>, vector<32x128xf32>
      tpu.vector_store %arg6[%c0_15, %c0_16], %17 {strides = array<i32>} : memref<32x128xf32, #tpu.memory_space<vmem>>, vector<32x128xf32>,
    } else {
    }
    return
  }
  func.func @transform_0(%arg0: i32, %arg1: i32, %arg2: i32) -> (i32, i32) {
    %c0_i32 = arith.constant 0 : i32
    return %arg0, %arg2 : i32, i32
  }
  func.func @transform_1(%arg0: i32, %arg1: i32, %arg2: i32) -> (i32, i32) {
    %c0_i32 = arith.constant 0 : i32
    return %arg2, %arg1 : i32, i32
  }
  func.func @transform_2(%arg0: i32, %arg1: i32, %arg2: i32) -> (i32, i32) {
    %c0_i32 = arith.constant 0 : i32
    %c0_i32_0 = arith.constant 0 : i32
    return %c0_i32, %arg1 : i32, i32
  }
  func.func @transform_3(%arg0: i32, %arg1: i32, %arg2: i32) -> (i32, i32) {
    %c0_i32 = arith.constant 0 : i32
    return %arg0, %arg1 : i32, i32
  }
}

module attributes {stable_mosaic.version = 11 : i64} {
  func.func @_matmul_bias_kernel(%arg0: i32, %arg1: i32, %arg2: i32, %arg3: memref<32x256xbf16, #tpu.memory_space<vmem>>, %arg4: memref<256x128xbf16, #tpu.memory_space<vmem>>, %arg5: memref<1x128xf32, #tpu.memory_space<vmem>>, %arg6: memref<32x128xf32, #tpu.memory_space<vmem>>) attributes {dimension_semantics = [#tpu.dimension_semantics<parallel>, #tpu.dimension_semantics<parallel>, #tpu.dimension_semantics<arbitrary>], iteration_bounds = array<i64: 1, 2, 4>, scalar_prefetch = 0 : i64, scratch_operands = 0 : i64, tpu.core_type = #tpu.core_type<tc>, window_params = [{transform_indices = @transform_0, window_bounds = array<i64: 32, 256>}, {transform_indices = @transform_1, window_bounds = array<i64: 256, 128>}, {transform_indices = @transform_2, window_bounds = array<i64: 1, 128>}, {transform_indices = @transform_3, window_bounds = array<i64: 32, 128>}]} {
    %c0_i32 = arith.constant 0 : i32
    %0 = arith.cmpi eq, %arg2, %c0_i32 : i32
    %1 = arith.extui %0 : i1 to i32
    %c0_i32_0 = arith.constant 0 : i32
    %2 = arith.cmpi ne, %1, %c0_i32_0 : i32
    scf.if %2 {
      %cst_9 = arith.constant 0.000000e+00 : f32
      %12 = vector.broadcast %cst_9 : f32 to vector<32x128xf32>
      %c0_10 = arith.constant 0 : index
      %c0_11 = arith.constant 0 : index
      %13 = vector.load %arg6[%c0_10, %c0_11] : memref<32x128xf32, #tpu.memory_space<vmem>>, vector<32x128xf32>
      tpu.vector_store %arg6[%c0_10, %c0_11], %12 {strides = array<i32>} : memref<32x128xf32, #tpu.memory_space<vmem>>, vector<32x128xf32>,
    } else {
    }
    %c0 = arith.constant 0 : index
    %c0_1 = arith.constant 0 : index
    %3 = vector.load %arg6[%c0, %c0_1] : memref<32x128xf32, #tpu.memory_space<vmem>>, vector<32x128xf32>
    %c0_2 = arith.constant 0 : index
    %c0_3 = arith.constant 0 : index
    %4 = vector.load %arg3[%c0_2, %c0_3] : memref<32x256xbf16, #tpu.memory_space<vmem>>, vector<32x256xbf16>
    %c0_4 = arith.constant 0 : index
    %c0_5 = arith.constant 0 : index
    %5 = vector.load %arg4[%c0_4, %c0_5] : memref<256x128xbf16, #tpu.memory_space<vmem>>, vector<256x128xbf16>
    %cst = arith.constant dense<0.000000e+00> : vector<32x128xf32>
    %6 = tpu.matmul %4, %5, %cst {dimension_numbers = #tpu.dot_dimension_numbers<[1], [0], [0], [1], [0, 0, 1, 1], [], []>} : vector<32x256xbf16>, vector<256x128xbf16>, vector<32x128xf32> -> vector<32x128xf32>
    %7 = arith.addf %3, %6 : vector<32x128xf32>
    %c0_6 = arith.constant 0 : index
    %c0_7 = arith.constant 0 : index
    %8 = vector.load %arg6[%c0_6, %c0_7] : memref<32x128xf32, #tpu.memory_space<vmem>>, vector<32x128xf32>
    tpu.vector_store %arg6[%c0_6, %c0_7], %7 {strides = array<i32>} : memref<32x128xf32, #tpu.memory_space<vmem>>, vector<32x128xf32>,
    %c3_i32 = arith.constant 3 : i32
    %9 = arith.cmpi eq, %arg2, %c3_i32 : i32
    %10 = arith.extui %9 : i1 to i32
    %c0_i32_8 = arith.constant 0 : i32
    %11 = arith.cmpi ne, %10, %c0_i32_8 : i32
    scf.if %11 {
      %c0_9 = arith.constant 0 : index
      %c0_10 = arith.constant 0 : index
      %12 = vector.load %arg6[%c0_9, %c0_10] : memref<32x128xf32, #tpu.memory_space<vmem>>, vector<32x128xf32>
      %c0_11 = arith.constant 0 : index
      %c0_12 = arith.constant 0 : index
      %13 = vector.load %arg5[%c0_11, %c0_12] : memref<1x128xf32, #tpu.memory_space<vmem>>, vector<1x128xf32>
      %14 = vector.broadcast %13 : vector<1x128xf32> to vector<32x128xf32>
      %15 = arith.addf %12, %14 : vector<32x128xf32>
      %cst_13 = arith.constant 0.000000e+00 : f32
      %16 = vector.broadcast %cst_13 : f32 to vector<32x128xf32>
      %17 = arith.maximumf %15, %16 : vector<32x128xf32>
      %c0_14 = arith.constant 0 : index
      %c0_15 = arith.constant 0 : index
      %18 = vector.load %arg6[%c0_14, %c0_15] : memref<32x128xf32, #tpu.memory_space<vmem>>, vector<32x128xf32>
      tpu.vector_store %arg6[%c0_14, %c0_15], %17 {strides = array<i32>} : memref<32x128xf32, #tpu.memory_space<vmem>>, vector<32x128xf32>,
    } else {
    }
    return
  }
  func.func @transform_0(%arg0: i32, %arg1: i32, %arg2: i32) -> (i32, i32) {
    %c0_i32 = arith.constant 0 : i32
    return %arg0, %arg2 : i32, i32
  }
  func.func @transform_1(%arg0: i32, %arg1: i32, %arg2: i32) -> (i32, i32) {
    %c0_i32 = arith.constant 0 : i32
    return %arg2, %arg1 : i32, i32
  }
  func.func @transform_2(%arg0: i32, %arg1: i32, %arg2: i32) -> (i32, i32) {
    %c0_i32 = arith.constant 0 : i32
    %c0_i32_0 = arith.constant 0 : i32
    return %c0_i32, %arg1 : i32, i32
  }
  func.func @transform_3(%arg0: i32, %arg1: i32, %arg2: i32) -> (i32, i32) {
    %c0_i32 = arith.constant 0 : i32
    return %arg0, %arg1 : i32, i32
  }
}

module attributes {stable_mosaic.version = 11 : i64} {
  func.func @_matmul_bias_kernel(%arg0: i32, %arg1: i32, %arg2: i32, %arg3: memref<32x256xbf16, #tpu.memory_space<vmem>>, %arg4: memref<256x128xbf16, #tpu.memory_space<vmem>>, %arg5: memref<1x128xf32, #tpu.memory_space<vmem>>, %arg6: memref<32x128xf32, #tpu.memory_space<vmem>>) attributes {dimension_semantics = [#tpu.dimension_semantics<parallel>, #tpu.dimension_semantics<parallel>, #tpu.dimension_semantics<arbitrary>], iteration_bounds = array<i64: 1, 1, 1>, scalar_prefetch = 0 : i64, scratch_operands = 0 : i64, tpu.core_type = #tpu.core_type<tc>, window_params = [{transform_indices = @transform_0, window_bounds = array<i64: 32, 256>}, {transform_indices = @transform_1, window_bounds = array<i64: 256, 128>}, {transform_indices = @transform_2, window_bounds = array<i64: 1, 128>}, {transform_indices = @transform_3, window_bounds = array<i64: 32, 128>}]} {
    %c0_i32 = arith.constant 0 : i32
    %0 = arith.cmpi eq, %arg2, %c0_i32 : i32
    %1 = arith.extui %0 : i1 to i32
    %c0_i32_0 = arith.constant 0 : i32
    %2 = arith.cmpi ne, %1, %c0_i32_0 : i32
    scf.if %2 {
      %cst_10 = arith.constant 0.000000e+00 : f32
      %12 = vector.broadcast %cst_10 : f32 to vector<32x128xf32>
      %c0_11 = arith.constant 0 : index
      %c0_12 = arith.constant 0 : index
      %13 = vector.load %arg6[%c0_11, %c0_12] : memref<32x128xf32, #tpu.memory_space<vmem>>, vector<32x128xf32>
      tpu.vector_store %arg6[%c0_11, %c0_12], %12 {strides = array<i32>} : memref<32x128xf32, #tpu.memory_space<vmem>>, vector<32x128xf32>,
    } else {
    }
    %c0 = arith.constant 0 : index
    %c0_1 = arith.constant 0 : index
    %3 = vector.load %arg6[%c0, %c0_1] : memref<32x128xf32, #tpu.memory_space<vmem>>, vector<32x128xf32>
    %c0_2 = arith.constant 0 : index
    %c0_3 = arith.constant 0 : index
    %4 = vector.load %arg3[%c0_2, %c0_3] : memref<32x256xbf16, #tpu.memory_space<vmem>>, vector<32x256xbf16>
    %c0_4 = arith.constant 0 : index
    %c0_5 = arith.constant 0 : index
    %5 = vector.load %arg4[%c0_4, %c0_5] : memref<256x128xbf16, #tpu.memory_space<vmem>>, vector<256x128xbf16>
    %cst = arith.constant dense<0.000000e+00> : vector<32x128xf32>
    %6 = tpu.matmul %4, %5, %cst {dimension_numbers = #tpu.dot_dimension_numbers<[1], [0], [0], [1], [0, 0, 1, 1], [], []>} : vector<32x256xbf16>, vector<256x128xbf16>, vector<32x128xf32> -> vector<32x128xf32>
    %7 = arith.addf %3, %6 : vector<32x128xf32>
    %c0_6 = arith.constant 0 : index
    %c0_7 = arith.constant 0 : index
    %8 = vector.load %arg6[%c0_6, %c0_7] : memref<32x128xf32, #tpu.memory_space<vmem>>, vector<32x128xf32>
    tpu.vector_store %arg6[%c0_6, %c0_7], %7 {strides = array<i32>} : memref<32x128xf32, #tpu.memory_space<vmem>>, vector<32x128xf32>,
    %c0_i32_8 = arith.constant 0 : i32
    %9 = arith.cmpi eq, %arg2, %c0_i32_8 : i32
    %10 = arith.extui %9 : i1 to i32
    %c0_i32_9 = arith.constant 0 : i32
    %11 = arith.cmpi ne, %10, %c0_i32_9 : i32
    scf.if %11 {
      %c0_10 = arith.constant 0 : index
      %c0_11 = arith.constant 0 : index
      %12 = vector.load %arg6[%c0_10, %c0_11] : memref<32x128xf32, #tpu.memory_space<vmem>>, vector<32x128xf32>
      %c0_12 = arith.constant 0 : index
      %c0_13 = arith.constant 0 : index
      %13 = vector.load %arg5[%c0_12, %c0_13] : memref<1x128xf32, #tpu.memory_space<vmem>>, vector<1x128xf32>
      %14 = vector.broadcast %13 : vector<1x128xf32> to vector<32x128xf32>
      %15 = arith.addf %12, %14 : vector<32x128xf32>
      %cst_14 = arith.constant 0.000000e+00 : f32
      %16 = vector.broadcast %cst_14 : f32 to vector<32x128xf32>
      %17 = arith.maximumf %15, %16 : vector<32x128xf32>
      %c0_15 = arith.constant 0 : index
      %c0_16 = arith.constant 0 : index
      %18 = vector.load %arg6[%c0_15, %c0_16] : memref<32x128xf32, #tpu.memory_space<vmem>>, vector<32x128xf32>
      tpu.vector_store %arg6[%c0_15, %c0_16], %17 {strides = array<i32>} : memref<32x128xf32, #tpu.memory_space<vmem>>, vector<32x128xf32>,
    } else {
    }
    return
  }
  func.func @transform_0(%arg0: i32, %arg1: i32, %arg2: i32) -> (i32, i32) {
    %c0_i32 = arith.constant 0 : i32
    return %arg0, %arg2 : i32, i32
  }
  func.func @transform_1(%arg0: i32, %arg1: i32, %arg2: i32) -> (i32, i32) {
    %c0_i32 = arith.constant 0 : i32
    return %arg2, %arg1 : i32, i32
  }
  func.func @transform_2(%arg0: i32, %arg1: i32, %arg2: i32) -> (i32, i32) {
    %c0_i32 = arith.constant 0 : i32
    %c0_i32_0 = arith.constant 0 : i32
    return %c0_i32, %arg1 : i32, i32
  }
  func.func @transform_3(%arg0: i32, %arg1: i32, %arg2: i32) -> (i32, i32) {
    %c0_i32 = arith.constant 0 : i32
    return %arg0, %arg1 : i32, i32
  }
}

module attributes {stable_mosaic.version = 11 : i64} {
  func.func @_matmul_bias_kernel(%arg0: i32, %arg1: i32, %arg2: i32, %arg3: memref<32x256xbf16, #tpu.memory_space<vmem>>, %arg4: memref<256x128xbf16, #tpu.memory_space<vmem>>, %arg5: memref<1x128xf32, #tpu.memory_space<vmem>>, %arg6: memref<32x128xf32, #tpu.memory_space<vmem>>) attributes {dimension_semantics = [#tpu.dimension_semantics<parallel>, #tpu.dimension_semantics<parallel>, #tpu.dimension_semantics<arbitrary>], iteration_bounds = array<i64: 1, 3, 1>, scalar_prefetch = 0 : i64, scratch_operands = 0 : i64, tpu.core_type = #tpu.core_type<tc>, window_params = [{transform_indices = @transform_0, window_bounds = array<i64: 32, 256>}, {transform_indices = @transform_1, window_bounds = array<i64: 256, 128>}, {transform_indices = @transform_2, window_bounds = array<i64: 1, 128>}, {transform_indices = @transform_3, window_bounds = array<i64: 32, 128>}]} {
    %c0_i32 = arith.constant 0 : i32
    %0 = arith.cmpi eq, %arg2, %c0_i32 : i32
    %1 = arith.extui %0 : i1 to i32
    %c0_i32_0 = arith.constant 0 : i32
    %2 = arith.cmpi ne, %1, %c0_i32_0 : i32
    scf.if %2 {
      %cst_10 = arith.constant 0.000000e+00 : f32
      %12 = vector.broadcast %cst_10 : f32 to vector<32x128xf32>
      %c0_11 = arith.constant 0 : index
      %c0_12 = arith.constant 0 : index
      %13 = vector.load %arg6[%c0_11, %c0_12] : memref<32x128xf32, #tpu.memory_space<vmem>>, vector<32x128xf32>
      tpu.vector_store %arg6[%c0_11, %c0_12], %12 {strides = array<i32>} : memref<32x128xf32, #tpu.memory_space<vmem>>, vector<32x128xf32>,
    } else {
    }
    %c0 = arith.constant 0 : index
    %c0_1 = arith.constant 0 : index
    %3 = vector.load %arg6[%c0, %c0_1] : memref<32x128xf32, #tpu.memory_space<vmem>>, vector<32x128xf32>
    %c0_2 = arith.constant 0 : index
    %c0_3 = arith.constant 0 : index
    %4 = vector.load %arg3[%c0_2, %c0_3] : memref<32x256xbf16, #tpu.memory_space<vmem>>, vector<32x256xbf16>
    %c0_4 = arith.constant 0 : index
    %c0_5 = arith.constant 0 : index
    %5 = vector.load %arg4[%c0_4, %c0_5] : memref<256x128xbf16, #tpu.memory_space<vmem>>, vector<256x128xbf16>
    %cst = arith.constant dense<0.000000e+00> : vector<32x128xf32>
    %6 = tpu.matmul %4, %5, %cst {dimension_numbers = #tpu.dot_dimension_numbers<[1], [0], [0], [1], [0, 0, 1, 1], [], []>} : vector<32x256xbf16>, vector<256x128xbf16>, vector<32x128xf32> -> vector<32x128xf32>
    %7 = arith.addf %3, %6 : vector<32x128xf32>
    %c0_6 = arith.constant 0 : index
    %c0_7 = arith.constant 0 : index
    %8 = vector.load %arg6[%c0_6, %c0_7] : memref<32x128xf32, #tpu.memory_space<vmem>>, vector<32x128xf32>
    tpu.vector_store %arg6[%c0_6, %c0_7], %7 {strides = array<i32>} : memref<32x128xf32, #tpu.memory_space<vmem>>, vector<32x128xf32>,
    %c0_i32_8 = arith.constant 0 : i32
    %9 = arith.cmpi eq, %arg2, %c0_i32_8 : i32
    %10 = arith.extui %9 : i1 to i32
    %c0_i32_9 = arith.constant 0 : i32
    %11 = arith.cmpi ne, %10, %c0_i32_9 : i32
    scf.if %11 {
      %c0_10 = arith.constant 0 : index
      %c0_11 = arith.constant 0 : index
      %12 = vector.load %arg6[%c0_10, %c0_11] : memref<32x128xf32, #tpu.memory_space<vmem>>, vector<32x128xf32>
      %c0_12 = arith.constant 0 : index
      %c0_13 = arith.constant 0 : index
      %13 = vector.load %arg5[%c0_12, %c0_13] : memref<1x128xf32, #tpu.memory_space<vmem>>, vector<1x128xf32>
      %14 = vector.broadcast %13 : vector<1x128xf32> to vector<32x128xf32>
      %15 = arith.addf %12, %14 : vector<32x128xf32>
      %cst_14 = arith.constant 0.000000e+00 : f32
      %16 = vector.broadcast %cst_14 : f32 to vector<32x128xf32>
      %17 = arith.maximumf %15, %16 : vector<32x128xf32>
      %c0_15 = arith.constant 0 : index
      %c0_16 = arith.constant 0 : index
      %18 = vector.load %arg6[%c0_15, %c0_16] : memref<32x128xf32, #tpu.memory_space<vmem>>, vector<32x128xf32>
      tpu.vector_store %arg6[%c0_15, %c0_16], %17 {strides = array<i32>} : memref<32x128xf32, #tpu.memory_space<vmem>>, vector<32x128xf32>,
    } else {
    }
    return
  }
  func.func @transform_0(%arg0: i32, %arg1: i32, %arg2: i32) -> (i32, i32) {
    %c0_i32 = arith.constant 0 : i32
    return %arg0, %arg2 : i32, i32
  }
  func.func @transform_1(%arg0: i32, %arg1: i32, %arg2: i32) -> (i32, i32) {
    %c0_i32 = arith.constant 0 : i32
    return %arg2, %arg1 : i32, i32
  }
  func.func @transform_2(%arg0: i32, %arg1: i32, %arg2: i32) -> (i32, i32) {
    %c0_i32 = arith.constant 0 : i32
    %c0_i32_0 = arith.constant 0 : i32
    return %c0_i32, %arg1 : i32, i32
  }
  func.func @transform_3(%arg0: i32, %arg1: i32, %arg2: i32) -> (i32, i32) {
    %c0_i32 = arith.constant 0 : i32
    return %arg0, %arg1 : i32, i32
  }
}

module attributes {stable_mosaic.version = 11 : i64} {
  func.func @_matmul_bias_kernel(%arg0: i32, %arg1: i32, %arg2: i32, %arg3: memref<32x256xbf16, #tpu.memory_space<vmem>>, %arg4: memref<256x128xbf16, #tpu.memory_space<vmem>>, %arg5: memref<1x128xf32, #tpu.memory_space<vmem>>, %arg6: memref<32x128xf32, #tpu.memory_space<vmem>>) attributes {dimension_semantics = [#tpu.dimension_semantics<parallel>, #tpu.dimension_semantics<parallel>, #tpu.dimension_semantics<arbitrary>], iteration_bounds = array<i64: 1, 3, 6>, scalar_prefetch = 0 : i64, scratch_operands = 0 : i64, tpu.core_type = #tpu.core_type<tc>, window_params = [{transform_indices = @transform_0, window_bounds = array<i64: 32, 256>}, {transform_indices = @transform_1, window_bounds = array<i64: 256, 128>}, {transform_indices = @transform_2, window_bounds = array<i64: 1, 128>}, {transform_indices = @transform_3, window_bounds = array<i64: 32, 128>}]} {
    %c0_i32 = arith.constant 0 : i32
    %0 = arith.cmpi eq, %arg2, %c0_i32 : i32
    %1 = arith.extui %0 : i1 to i32
    %c0_i32_0 = arith.constant 0 : i32
    %2 = arith.cmpi ne, %1, %c0_i32_0 : i32
    scf.if %2 {
      %cst_9 = arith.constant 0.000000e+00 : f32
      %12 = vector.broadcast %cst_9 : f32 to vector<32x128xf32>
      %c0_10 = arith.constant 0 : index
      %c0_11 = arith.constant 0 : index
      %13 = vector.load %arg6[%c0_10, %c0_11] : memref<32x128xf32, #tpu.memory_space<vmem>>, vector<32x128xf32>
      tpu.vector_store %arg6[%c0_10, %c0_11], %12 {strides = array<i32>} : memref<32x128xf32, #tpu.memory_space<vmem>>, vector<32x128xf32>,
    } else {
    }
    %c0 = arith.constant 0 : index
    %c0_1 = arith.constant 0 : index
    %3 = vector.load %arg6[%c0, %c0_1] : memref<32x128xf32, #tpu.memory_space<vmem>>, vector<32x128xf32>
    %c0_2 = arith.constant 0 : index
    %c0_3 = arith.constant 0 : index
    %4 = vector.load %arg3[%c0_2, %c0_3] : memref<32x256xbf16, #tpu.memory_space<vmem>>, vector<32x256xbf16>
    %c0_4 = arith.constant 0 : index
    %c0_5 = arith.constant 0 : index
    %5 = vector.load %arg4[%c0_4, %c0_5] : memref<256x128xbf16, #tpu.memory_space<vmem>>, vector<256x128xbf16>
    %cst = arith.constant dense<0.000000e+00> : vector<32x128xf32>
    %6 = tpu.matmul %4, %5, %cst {dimension_numbers = #tpu.dot_dimension_numbers<[1], [0], [0], [1], [0, 0, 1, 1], [], []>} : vector<32x256xbf16>, vector<256x128xbf16>, vector<32x128xf32> -> vector<32x128xf32>
    %7 = arith.addf %3, %6 : vector<32x128xf32>
    %c0_6 = arith.constant 0 : index
    %c0_7 = arith.constant 0 : index
    %8 = vector.load %arg6[%c0_6, %c0_7] : memref<32x128xf32, #tpu.memory_space<vmem>>, vector<32x128xf32>
    tpu.vector_store %arg6[%c0_6, %c0_7], %7 {strides = array<i32>} : memref<32x128xf32, #tpu.memory_space<vmem>>, vector<32x128xf32>,
    %c5_i32 = arith.constant 5 : i32
    %9 = arith.cmpi eq, %arg2, %c5_i32 : i32
    %10 = arith.extui %9 : i1 to i32
    %c0_i32_8 = arith.constant 0 : i32
    %11 = arith.cmpi ne, %10, %c0_i32_8 : i32
    scf.if %11 {
      %c0_9 = arith.constant 0 : index
      %c0_10 = arith.constant 0 : index
      %12 = vector.load %arg6[%c0_9, %c0_10] : memref<32x128xf32, #tpu.memory_space<vmem>>, vector<32x128xf32>
      %c0_11 = arith.constant 0 : index
      %c0_12 = arith.constant 0 : index
      %13 = vector.load %arg5[%c0_11, %c0_12] : memref<1x128xf32, #tpu.memory_space<vmem>>, vector<1x128xf32>
      %14 = vector.broadcast %13 : vector<1x128xf32> to vector<32x128xf32>
      %15 = arith.addf %12, %14 : vector<32x128xf32>
      %cst_13 = arith.constant 0.000000e+00 : f32
      %16 = vector.broadcast %cst_13 : f32 to vector<32x128xf32>
      %17 = arith.maximumf %15, %16 : vector<32x128xf32>
      %c0_14 = arith.constant 0 : index
      %c0_15 = arith.constant 0 : index
      %18 = vector.load %arg6[%c0_14, %c0_15] : memref<32x128xf32, #tpu.memory_space<vmem>>, vector<32x128xf32>
      tpu.vector_store %arg6[%c0_14, %c0_15], %17 {strides = array<i32>} : memref<32x128xf32, #tpu.memory_space<vmem>>, vector<32x128xf32>,
    } else {
    }
    return
  }
  func.func @transform_0(%arg0: i32, %arg1: i32, %arg2: i32) -> (i32, i32) {
    %c0_i32 = arith.constant 0 : i32
    return %arg0, %arg2 : i32, i32
  }
  func.func @transform_1(%arg0: i32, %arg1: i32, %arg2: i32) -> (i32, i32) {
    %c0_i32 = arith.constant 0 : i32
    return %arg2, %arg1 : i32, i32
  }
  func.func @transform_2(%arg0: i32, %arg1: i32, %arg2: i32) -> (i32, i32) {
    %c0_i32 = arith.constant 0 : i32
    %c0_i32_0 = arith.constant 0 : i32
    return %c0_i32, %arg1 : i32, i32
  }
  func.func @transform_3(%arg0: i32, %arg1: i32, %arg2: i32) -> (i32, i32) {
    %c0_i32 = arith.constant 0 : i32
    return %arg0, %arg1 : i32, i32
  }
}

module attributes {stable_mosaic.version = 11 : i64} {
  func.func @_matmul_bias_kernel(%arg0: i32, %arg1: i32, %arg2: i32, %arg3: memref<8x256xbf16, #tpu.memory_space<vmem>>, %arg4: memref<256x128xbf16, #tpu.memory_space<vmem>>, %arg5: memref<1x128xf32, #tpu.memory_space<vmem>>, %arg6: memref<8x128xf32, #tpu.memory_space<vmem>>) attributes {dimension_semantics = [#tpu.dimension_semantics<parallel>, #tpu.dimension_semantics<parallel>, #tpu.dimension_semantics<arbitrary>], iteration_bounds = array<i64: 1, 3, 2>, scalar_prefetch = 0 : i64, scratch_operands = 0 : i64, tpu.core_type = #tpu.core_type<tc>, window_params = [{transform_indices = @transform_0, window_bounds = array<i64: 8, 256>}, {transform_indices = @transform_1, window_bounds = array<i64: 256, 128>}, {transform_indices = @transform_2, window_bounds = array<i64: 1, 128>}, {transform_indices = @transform_3, window_bounds = array<i64: 8, 128>}]} {
    %c0_i32 = arith.constant 0 : i32
    %0 = arith.cmpi eq, %arg2, %c0_i32 : i32
    %1 = arith.extui %0 : i1 to i32
    %c0_i32_0 = arith.constant 0 : i32
    %2 = arith.cmpi ne, %1, %c0_i32_0 : i32
    scf.if %2 {
      %cst_9 = arith.constant 0.000000e+00 : f32
      %12 = vector.broadcast %cst_9 : f32 to vector<8x128xf32>
      %c0_10 = arith.constant 0 : index
      %c0_11 = arith.constant 0 : index
      %13 = vector.load %arg6[%c0_10, %c0_11] : memref<8x128xf32, #tpu.memory_space<vmem>>, vector<8x128xf32>
      tpu.vector_store %arg6[%c0_10, %c0_11], %12 {strides = array<i32>} : memref<8x128xf32, #tpu.memory_space<vmem>>, vector<8x128xf32>,
    } else {
    }
    %c0 = arith.constant 0 : index
    %c0_1 = arith.constant 0 : index
    %3 = vector.load %arg6[%c0, %c0_1] : memref<8x128xf32, #tpu.memory_space<vmem>>, vector<8x128xf32>
    %c0_2 = arith.constant 0 : index
    %c0_3 = arith.constant 0 : index
    %4 = vector.load %arg3[%c0_2, %c0_3] : memref<8x256xbf16, #tpu.memory_space<vmem>>, vector<8x256xbf16>
    %c0_4 = arith.constant 0 : index
    %c0_5 = arith.constant 0 : index
    %5 = vector.load %arg4[%c0_4, %c0_5] : memref<256x128xbf16, #tpu.memory_space<vmem>>, vector<256x128xbf16>
    %cst = arith.constant dense<0.000000e+00> : vector<8x128xf32>
    %6 = tpu.matmul %4, %5, %cst {dimension_numbers = #tpu.dot_dimension_numbers<[1], [0], [0], [1], [0, 0, 1, 1], [], []>} : vector<8x256xbf16>, vector<256x128xbf16>, vector<8x128xf32> -> vector<8x128xf32>
    %7 = arith.addf %3, %6 : vector<8x128xf32>
    %c0_6 = arith.constant 0 : index
    %c0_7 = arith.constant 0 : index
    %8 = vector.load %arg6[%c0_6, %c0_7] : memref<8x128xf32, #tpu.memory_space<vmem>>, vector<8x128xf32>
    tpu.vector_store %arg6[%c0_6, %c0_7], %7 {strides = array<i32>} : memref<8x128xf32, #tpu.memory_space<vmem>>, vector<8x128xf32>,
    %c1_i32 = arith.constant 1 : i32
    %9 = arith.cmpi eq, %arg2, %c1_i32 : i32
    %10 = arith.extui %9 : i1 to i32
    %c0_i32_8 = arith.constant 0 : i32
    %11 = arith.cmpi ne, %10, %c0_i32_8 : i32
    scf.if %11 {
      %c0_9 = arith.constant 0 : index
      %c0_10 = arith.constant 0 : index
      %12 = vector.load %arg6[%c0_9, %c0_10] : memref<8x128xf32, #tpu.memory_space<vmem>>, vector<8x128xf32>
      %c0_11 = arith.constant 0 : index
      %c0_12 = arith.constant 0 : index
      %13 = vector.load %arg5[%c0_11, %c0_12] : memref<1x128xf32, #tpu.memory_space<vmem>>, vector<1x128xf32>
      %14 = vector.broadcast %13 : vector<1x128xf32> to vector<8x128xf32>
      %15 = arith.addf %12, %14 : vector<8x128xf32>
      %cst_13 = arith.constant 0.000000e+00 : f32
      %16 = vector.broadcast %cst_13 : f32 to vector<8x128xf32>
      %17 = arith.maximumf %15, %16 : vector<8x128xf32>
      %c0_14 = arith.constant 0 : index
      %c0_15 = arith.constant 0 : index
      %18 = vector.load %arg6[%c0_14, %c0_15] : memref<8x128xf32, #tpu.memory_space<vmem>>, vector<8x128xf32>
      tpu.vector_store %arg6[%c0_14, %c0_15], %17 {strides = array<i32>} : memref<8x128xf32, #tpu.memory_space<vmem>>, vector<8x128xf32>,
    } else {
    }
    return
  }
  func.func @transform_0(%arg0: i32, %arg1: i32, %arg2: i32) -> (i32, i32) {
    %c0_i32 = arith.constant 0 : i32
    return %arg0, %arg2 : i32, i32
  }
  func.func @transform_1(%arg0: i32, %arg1: i32, %arg2: i32) -> (i32, i32) {
    %c0_i32 = arith.constant 0 : i32
    return %arg2, %arg1 : i32, i32
  }
  func.func @transform_2(%arg0: i32, %arg1: i32, %arg2: i32) -> (i32, i32) {
    %c0_i32 = arith.constant 0 : i32
    %c0_i32_0 = arith.constant 0 : i32
    return %c0_i32, %arg1 : i32, i32
  }
  func.func @transform_3(%arg0: i32, %arg1: i32, %arg2: i32) -> (i32, i32) {
    %c0_i32 = arith.constant 0 : i32
    return %arg0, %arg1 : i32, i32
  }
}

module attributes {stable_mosaic.version = 11 : i64} {
  func.func @_matmul_bias_kernel(%arg0: i32, %arg1: i32, %arg2: i32, %arg3: memref<8x256xbf16, #tpu.memory_space<vmem>>, %arg4: memref<256x128xbf16, #tpu.memory_space<vmem>>, %arg5: memref<1x128xf32, #tpu.memory_space<vmem>>, %arg6: memref<8x128xf32, #tpu.memory_space<vmem>>) attributes {dimension_semantics = [#tpu.dimension_semantics<parallel>, #tpu.dimension_semantics<parallel>, #tpu.dimension_semantics<arbitrary>], iteration_bounds = array<i64: 1, 2, 4>, scalar_prefetch = 0 : i64, scratch_operands = 0 : i64, tpu.core_type = #tpu.core_type<tc>, window_params = [{transform_indices = @transform_0, window_bounds = array<i64: 8, 256>}, {transform_indices = @transform_1, window_bounds = array<i64: 256, 128>}, {transform_indices = @transform_2, window_bounds = array<i64: 1, 128>}, {transform_indices = @transform_3, window_bounds = array<i64: 8, 128>}]} {
    %c0_i32 = arith.constant 0 : i32
    %0 = arith.cmpi eq, %arg2, %c0_i32 : i32
    %1 = arith.extui %0 : i1 to i32
    %c0_i32_0 = arith.constant 0 : i32
    %2 = arith.cmpi ne, %1, %c0_i32_0 : i32
    scf.if %2 {
      %cst_9 = arith.constant 0.000000e+00 : f32
      %12 = vector.broadcast %cst_9 : f32 to vector<8x128xf32>
      %c0_10 = arith.constant 0 : index
      %c0_11 = arith.constant 0 : index
      %13 = vector.load %arg6[%c0_10, %c0_11] : memref<8x128xf32, #tpu.memory_space<vmem>>, vector<8x128xf32>
      tpu.vector_store %arg6[%c0_10, %c0_11], %12 {strides = array<i32>} : memref<8x128xf32, #tpu.memory_space<vmem>>, vector<8x128xf32>,
    } else {
    }
    %c0 = arith.constant 0 : index
    %c0_1 = arith.constant 0 : index
    %3 = vector.load %arg6[%c0, %c0_1] : memref<8x128xf32, #tpu.memory_space<vmem>>, vector<8x128xf32>
    %c0_2 = arith.constant 0 : index
    %c0_3 = arith.constant 0 : index
    %4 = vector.load %arg3[%c0_2, %c0_3] : memref<8x256xbf16, #tpu.memory_space<vmem>>, vector<8x256xbf16>
    %c0_4 = arith.constant 0 : index
    %c0_5 = arith.constant 0 : index
    %5 = vector.load %arg4[%c0_4, %c0_5] : memref<256x128xbf16, #tpu.memory_space<vmem>>, vector<256x128xbf16>
    %cst = arith.constant dense<0.000000e+00> : vector<8x128xf32>
    %6 = tpu.matmul %4, %5, %cst {dimension_numbers = #tpu.dot_dimension_numbers<[1], [0], [0], [1], [0, 0, 1, 1], [], []>} : vector<8x256xbf16>, vector<256x128xbf16>, vector<8x128xf32> -> vector<8x128xf32>
    %7 = arith.addf %3, %6 : vector<8x128xf32>
    %c0_6 = arith.constant 0 : index
    %c0_7 = arith.constant 0 : index
    %8 = vector.load %arg6[%c0_6, %c0_7] : memref<8x128xf32, #tpu.memory_space<vmem>>, vector<8x128xf32>
    tpu.vector_store %arg6[%c0_6, %c0_7], %7 {strides = array<i32>} : memref<8x128xf32, #tpu.memory_space<vmem>>, vector<8x128xf32>,
    %c3_i32 = arith.constant 3 : i32
    %9 = arith.cmpi eq, %arg2, %c3_i32 : i32
    %10 = arith.extui %9 : i1 to i32
    %c0_i32_8 = arith.constant 0 : i32
    %11 = arith.cmpi ne, %10, %c0_i32_8 : i32
    scf.if %11 {
      %c0_9 = arith.constant 0 : index
      %c0_10 = arith.constant 0 : index
      %12 = vector.load %arg6[%c0_9, %c0_10] : memref<8x128xf32, #tpu.memory_space<vmem>>, vector<8x128xf32>
      %c0_11 = arith.constant 0 : index
      %c0_12 = arith.constant 0 : index
      %13 = vector.load %arg5[%c0_11, %c0_12] : memref<1x128xf32, #tpu.memory_space<vmem>>, vector<1x128xf32>
      %14 = vector.broadcast %13 : vector<1x128xf32> to vector<8x128xf32>
      %15 = arith.addf %12, %14 : vector<8x128xf32>
      %cst_13 = arith.constant 0.000000e+00 : f32
      %16 = vector.broadcast %cst_13 : f32 to vector<8x128xf32>
      %17 = arith.maximumf %15, %16 : vector<8x128xf32>
      %c0_14 = arith.constant 0 : index
      %c0_15 = arith.constant 0 : index
      %18 = vector.load %arg6[%c0_14, %c0_15] : memref<8x128xf32, #tpu.memory_space<vmem>>, vector<8x128xf32>
      tpu.vector_store %arg6[%c0_14, %c0_15], %17 {strides = array<i32>} : memref<8x128xf32, #tpu.memory_space<vmem>>, vector<8x128xf32>,
    } else {
    }
    return
  }
  func.func @transform_0(%arg0: i32, %arg1: i32, %arg2: i32) -> (i32, i32) {
    %c0_i32 = arith.constant 0 : i32
    return %arg0, %arg2 : i32, i32
  }
  func.func @transform_1(%arg0: i32, %arg1: i32, %arg2: i32) -> (i32, i32) {
    %c0_i32 = arith.constant 0 : i32
    return %arg2, %arg1 : i32, i32
  }
  func.func @transform_2(%arg0: i32, %arg1: i32, %arg2: i32) -> (i32, i32) {
    %c0_i32 = arith.constant 0 : i32
    %c0_i32_0 = arith.constant 0 : i32
    return %c0_i32, %arg1 : i32, i32
  }
  func.func @transform_3(%arg0: i32, %arg1: i32, %arg2: i32) -> (i32, i32) {
    %c0_i32 = arith.constant 0 : i32
    return %arg0, %arg1 : i32, i32
  }
}

module attributes {stable_mosaic.version = 11 : i64} {
  func.func @_matmul_bias_kernel(%arg0: i32, %arg1: i32, %arg2: i32, %arg3: memref<8x256xbf16, #tpu.memory_space<vmem>>, %arg4: memref<256x128xbf16, #tpu.memory_space<vmem>>, %arg5: memref<1x128xf32, #tpu.memory_space<vmem>>, %arg6: memref<8x128xf32, #tpu.memory_space<vmem>>) attributes {dimension_semantics = [#tpu.dimension_semantics<parallel>, #tpu.dimension_semantics<parallel>, #tpu.dimension_semantics<arbitrary>], iteration_bounds = array<i64: 1, 1, 2>, scalar_prefetch = 0 : i64, scratch_operands = 0 : i64, tpu.core_type = #tpu.core_type<tc>, window_params = [{transform_indices = @transform_0, window_bounds = array<i64: 8, 256>}, {transform_indices = @transform_1, window_bounds = array<i64: 256, 128>}, {transform_indices = @transform_2, window_bounds = array<i64: 1, 128>}, {transform_indices = @transform_3, window_bounds = array<i64: 8, 128>}]} {
    %c0_i32 = arith.constant 0 : i32
    %0 = arith.cmpi eq, %arg2, %c0_i32 : i32
    %1 = arith.extui %0 : i1 to i32
    %c0_i32_0 = arith.constant 0 : i32
    %2 = arith.cmpi ne, %1, %c0_i32_0 : i32
    scf.if %2 {
      %cst_9 = arith.constant 0.000000e+00 : f32
      %12 = vector.broadcast %cst_9 : f32 to vector<8x128xf32>
      %c0_10 = arith.constant 0 : index
      %c0_11 = arith.constant 0 : index
      %13 = vector.load %arg6[%c0_10, %c0_11] : memref<8x128xf32, #tpu.memory_space<vmem>>, vector<8x128xf32>
      tpu.vector_store %arg6[%c0_10, %c0_11], %12 {strides = array<i32>} : memref<8x128xf32, #tpu.memory_space<vmem>>, vector<8x128xf32>,
    } else {
    }
    %c0 = arith.constant 0 : index
    %c0_1 = arith.constant 0 : index
    %3 = vector.load %arg6[%c0, %c0_1] : memref<8x128xf32, #tpu.memory_space<vmem>>, vector<8x128xf32>
    %c0_2 = arith.constant 0 : index
    %c0_3 = arith.constant 0 : index
    %4 = vector.load %arg3[%c0_2, %c0_3] : memref<8x256xbf16, #tpu.memory_space<vmem>>, vector<8x256xbf16>
    %c0_4 = arith.constant 0 : index
    %c0_5 = arith.constant 0 : index
    %5 = vector.load %arg4[%c0_4, %c0_5] : memref<256x128xbf16, #tpu.memory_space<vmem>>, vector<256x128xbf16>
    %cst = arith.constant dense<0.000000e+00> : vector<8x128xf32>
    %6 = tpu.matmul %4, %5, %cst {dimension_numbers = #tpu.dot_dimension_numbers<[1], [0], [0], [1], [0, 0, 1, 1], [], []>} : vector<8x256xbf16>, vector<256x128xbf16>, vector<8x128xf32> -> vector<8x128xf32>
    %7 = arith.addf %3, %6 : vector<8x128xf32>
    %c0_6 = arith.constant 0 : index
    %c0_7 = arith.constant 0 : index
    %8 = vector.load %arg6[%c0_6, %c0_7] : memref<8x128xf32, #tpu.memory_space<vmem>>, vector<8x128xf32>
    tpu.vector_store %arg6[%c0_6, %c0_7], %7 {strides = array<i32>} : memref<8x128xf32, #tpu.memory_space<vmem>>, vector<8x128xf32>,
    %c1_i32 = arith.constant 1 : i32
    %9 = arith.cmpi eq, %arg2, %c1_i32 : i32
    %10 = arith.extui %9 : i1 to i32
    %c0_i32_8 = arith.constant 0 : i32
    %11 = arith.cmpi ne, %10, %c0_i32_8 : i32
    scf.if %11 {
      %c0_9 = arith.constant 0 : index
      %c0_10 = arith.constant 0 : index
      %12 = vector.load %arg6[%c0_9, %c0_10] : memref<8x128xf32, #tpu.memory_space<vmem>>, vector<8x128xf32>
      %c0_11 = arith.constant 0 : index
      %c0_12 = arith.constant 0 : index
      %13 = vector.load %arg5[%c0_11, %c0_12] : memref<1x128xf32, #tpu.memory_space<vmem>>, vector<1x128xf32>
      %14 = vector.broadcast %13 : vector<1x128xf32> to vector<8x128xf32>
      %15 = arith.addf %12, %14 : vector<8x128xf32>
      %cst_13 = arith.constant 0.000000e+00 : f32
      %16 = vector.broadcast %cst_13 : f32 to vector<8x128xf32>
      %17 = arith.maximumf %15, %16 : vector<8x128xf32>
      %c0_14 = arith.constant 0 : index
      %c0_15 = arith.constant 0 : index
      %18 = vector.load %arg6[%c0_14, %c0_15] : memref<8x128xf32, #tpu.memory_space<vmem>>, vector<8x128xf32>
      tpu.vector_store %arg6[%c0_14, %c0_15], %17 {strides = array<i32>} : memref<8x128xf32, #tpu.memory_space<vmem>>, vector<8x128xf32>,
    } else {
    }
    return
  }
  func.func @transform_0(%arg0: i32, %arg1: i32, %arg2: i32) -> (i32, i32) {
    %c0_i32 = arith.constant 0 : i32
    return %arg0, %arg2 : i32, i32
  }
  func.func @transform_1(%arg0: i32, %arg1: i32, %arg2: i32) -> (i32, i32) {
    %c0_i32 = arith.constant 0 : i32
    return %arg2, %arg1 : i32, i32
  }
  func.func @transform_2(%arg0: i32, %arg1: i32, %arg2: i32) -> (i32, i32) {
    %c0_i32 = arith.constant 0 : i32
    %c0_i32_0 = arith.constant 0 : i32
    return %c0_i32, %arg1 : i32, i32
  }
  func.func @transform_3(%arg0: i32, %arg1: i32, %arg2: i32) -> (i32, i32) {
    %c0_i32 = arith.constant 0 : i32
    return %arg0, %arg1 : i32, i32
  }
}

module attributes {stable_mosaic.version = 11 : i64} {
  func.func @_matmul_bias_kernel(%arg0: i32, %arg1: i32, %arg2: i32, %arg3: memref<8x256xbf16, #tpu.memory_space<vmem>>, %arg4: memref<256x128xbf16, #tpu.memory_space<vmem>>, %arg5: memref<1x128xf32, #tpu.memory_space<vmem>>, %arg6: memref<8x128xf32, #tpu.memory_space<vmem>>) attributes {dimension_semantics = [#tpu.dimension_semantics<parallel>, #tpu.dimension_semantics<parallel>, #tpu.dimension_semantics<arbitrary>], iteration_bounds = array<i64: 1, 3, 5>, scalar_prefetch = 0 : i64, scratch_operands = 0 : i64, tpu.core_type = #tpu.core_type<tc>, window_params = [{transform_indices = @transform_0, window_bounds = array<i64: 8, 256>}, {transform_indices = @transform_1, window_bounds = array<i64: 256, 128>}, {transform_indices = @transform_2, window_bounds = array<i64: 1, 128>}, {transform_indices = @transform_3, window_bounds = array<i64: 8, 128>}]} {
    %c0_i32 = arith.constant 0 : i32
    %0 = arith.cmpi eq, %arg2, %c0_i32 : i32
    %1 = arith.extui %0 : i1 to i32
    %c0_i32_0 = arith.constant 0 : i32
    %2 = arith.cmpi ne, %1, %c0_i32_0 : i32
    scf.if %2 {
      %cst_9 = arith.constant 0.000000e+00 : f32
      %12 = vector.broadcast %cst_9 : f32 to vector<8x128xf32>
      %c0_10 = arith.constant 0 : index
      %c0_11 = arith.constant 0 : index
      %13 = vector.load %arg6[%c0_10, %c0_11] : memref<8x128xf32, #tpu.memory_space<vmem>>, vector<8x128xf32>
      tpu.vector_store %arg6[%c0_10, %c0_11], %12 {strides = array<i32>} : memref<8x128xf32, #tpu.memory_space<vmem>>, vector<8x128xf32>,
    } else {
    }
    %c0 = arith.constant 0 : index
    %c0_1 = arith.constant 0 : index
    %3 = vector.load %arg6[%c0, %c0_1] : memref<8x128xf32, #tpu.memory_space<vmem>>, vector<8x128xf32>
    %c0_2 = arith.constant 0 : index
    %c0_3 = arith.constant 0 : index
    %4 = vector.load %arg3[%c0_2, %c0_3] : memref<8x256xbf16, #tpu.memory_space<vmem>>, vector<8x256xbf16>
    %c0_4 = arith.constant 0 : index
    %c0_5 = arith.constant 0 : index
    %5 = vector.load %arg4[%c0_4, %c0_5] : memref<256x128xbf16, #tpu.memory_space<vmem>>, vector<256x128xbf16>
    %cst = arith.constant dense<0.000000e+00> : vector<8x128xf32>
    %6 = tpu.matmul %4, %5, %cst {dimension_numbers = #tpu.dot_dimension_numbers<[1], [0], [0], [1], [0, 0, 1, 1], [], []>} : vector<8x256xbf16>, vector<256x128xbf16>, vector<8x128xf32> -> vector<8x128xf32>
    %7 = arith.addf %3, %6 : vector<8x128xf32>
    %c0_6 = arith.constant 0 : index
    %c0_7 = arith.constant 0 : index
    %8 = vector.load %arg6[%c0_6, %c0_7] : memref<8x128xf32, #tpu.memory_space<vmem>>, vector<8x128xf32>
    tpu.vector_store %arg6[%c0_6, %c0_7], %7 {strides = array<i32>} : memref<8x128xf32, #tpu.memory_space<vmem>>, vector<8x128xf32>,
    %c4_i32 = arith.constant 4 : i32
    %9 = arith.cmpi eq, %arg2, %c4_i32 : i32
    %10 = arith.extui %9 : i1 to i32
    %c0_i32_8 = arith.constant 0 : i32
    %11 = arith.cmpi ne, %10, %c0_i32_8 : i32
    scf.if %11 {
      %c0_9 = arith.constant 0 : index
      %c0_10 = arith.constant 0 : index
      %12 = vector.load %arg6[%c0_9, %c0_10] : memref<8x128xf32, #tpu.memory_space<vmem>>, vector<8x128xf32>
      %c0_11 = arith.constant 0 : index
      %c0_12 = arith.constant 0 : index
      %13 = vector.load %arg5[%c0_11, %c0_12] : memref<1x128xf32, #tpu.memory_space<vmem>>, vector<1x128xf32>
      %14 = vector.broadcast %13 : vector<1x128xf32> to vector<8x128xf32>
      %15 = arith.addf %12, %14 : vector<8x128xf32>
      %cst_13 = arith.constant 0.000000e+00 : f32
      %16 = vector.broadcast %cst_13 : f32 to vector<8x128xf32>
      %17 = arith.maximumf %15, %16 : vector<8x128xf32>
      %c0_14 = arith.constant 0 : index
      %c0_15 = arith.constant 0 : index
      %18 = vector.load %arg6[%c0_14, %c0_15] : memref<8x128xf32, #tpu.memory_space<vmem>>, vector<8x128xf32>
      tpu.vector_store %arg6[%c0_14, %c0_15], %17 {strides = array<i32>} : memref<8x128xf32, #tpu.memory_space<vmem>>, vector<8x128xf32>,
    } else {
    }
    return
  }
  func.func @transform_0(%arg0: i32, %arg1: i32, %arg2: i32) -> (i32, i32) {
    %c0_i32 = arith.constant 0 : i32
    return %arg0, %arg2 : i32, i32
  }
  func.func @transform_1(%arg0: i32, %arg1: i32, %arg2: i32) -> (i32, i32) {
    %c0_i32 = arith.constant 0 : i32
    return %arg2, %arg1 : i32, i32
  }
  func.func @transform_2(%arg0: i32, %arg1: i32, %arg2: i32) -> (i32, i32) {
    %c0_i32 = arith.constant 0 : i32
    %c0_i32_0 = arith.constant 0 : i32
    return %c0_i32, %arg1 : i32, i32
  }
  func.func @transform_3(%arg0: i32, %arg1: i32, %arg2: i32) -> (i32, i32) {
    %c0_i32 = arith.constant 0 : i32
    return %arg0, %arg1 : i32, i32
  }
}

module attributes {stable_mosaic.version = 11 : i64} {
  func.func @_matmul_bias_kernel(%arg0: i32, %arg1: i32, %arg2: i32, %arg3: memref<8x128xbf16, #tpu.memory_space<vmem>>, %arg4: memref<128x128xbf16, #tpu.memory_space<vmem>>, %arg5: memref<1x128xf32, #tpu.memory_space<vmem>>, %arg6: memref<8x128xf32, #tpu.memory_space<vmem>>) attributes {dimension_semantics = [#tpu.dimension_semantics<parallel>, #tpu.dimension_semantics<parallel>, #tpu.dimension_semantics<arbitrary>], iteration_bounds = array<i64: 1, 3, 11>, scalar_prefetch = 0 : i64, scratch_operands = 0 : i64, tpu.core_type = #tpu.core_type<tc>, window_params = [{transform_indices = @transform_0, window_bounds = array<i64: 8, 128>}, {transform_indices = @transform_1, window_bounds = array<i64: 128, 128>}, {transform_indices = @transform_2, window_bounds = array<i64: 1, 128>}, {transform_indices = @transform_3, window_bounds = array<i64: 8, 128>}]} {
    %c0_i32 = arith.constant 0 : i32
    %0 = arith.cmpi eq, %arg2, %c0_i32 : i32
    %1 = arith.extui %0 : i1 to i32
    %c0_i32_0 = arith.constant 0 : i32
    %2 = arith.cmpi ne, %1, %c0_i32_0 : i32
    scf.if %2 {
      %cst_9 = arith.constant 0.000000e+00 : f32
      %12 = vector.broadcast %cst_9 : f32 to vector<8x128xf32>
      %c0_10 = arith.constant 0 : index
      %c0_11 = arith.constant 0 : index
      %13 = vector.load %arg6[%c0_10, %c0_11] : memref<8x128xf32, #tpu.memory_space<vmem>>, vector<8x128xf32>
      tpu.vector_store %arg6[%c0_10, %c0_11], %12 {strides = array<i32>} : memref<8x128xf32, #tpu.memory_space<vmem>>, vector<8x128xf32>,
    } else {
    }
    %c0 = arith.constant 0 : index
    %c0_1 = arith.constant 0 : index
    %3 = vector.load %arg6[%c0, %c0_1] : memref<8x128xf32, #tpu.memory_space<vmem>>, vector<8x128xf32>
    %c0_2 = arith.constant 0 : index
    %c0_3 = arith.constant 0 : index
    %4 = vector.load %arg3[%c0_2, %c0_3] : memref<8x128xbf16, #tpu.memory_space<vmem>>, vector<8x128xbf16>
    %c0_4 = arith.constant 0 : index
    %c0_5 = arith.constant 0 : index
    %5 = vector.load %arg4[%c0_4, %c0_5] : memref<128x128xbf16, #tpu.memory_space<vmem>>, vector<128x128xbf16>
    %cst = arith.constant dense<0.000000e+00> : vector<8x128xf32>
    %6 = tpu.matmul %4, %5, %cst {dimension_numbers = #tpu.dot_dimension_numbers<[1], [0], [0], [1], [0, 0, 1, 1], [], []>} : vector<8x128xbf16>, vector<128x128xbf16>, vector<8x128xf32> -> vector<8x128xf32>
    %7 = arith.addf %3, %6 : vector<8x128xf32>
    %c0_6 = arith.constant 0 : index
    %c0_7 = arith.constant 0 : index
    %8 = vector.load %arg6[%c0_6, %c0_7] : memref<8x128xf32, #tpu.memory_space<vmem>>, vector<8x128xf32>
    tpu.vector_store %arg6[%c0_6, %c0_7], %7 {strides = array<i32>} : memref<8x128xf32, #tpu.memory_space<vmem>>, vector<8x128xf32>,
    %c10_i32 = arith.constant 10 : i32
    %9 = arith.cmpi eq, %arg2, %c10_i32 : i32
    %10 = arith.extui %9 : i1 to i32
    %c0_i32_8 = arith.constant 0 : i32
    %11 = arith.cmpi ne, %10, %c0_i32_8 : i32
    scf.if %11 {
      %c0_9 = arith.constant 0 : index
      %c0_10 = arith.constant 0 : index
      %12 = vector.load %arg6[%c0_9, %c0_10] : memref<8x128xf32, #tpu.memory_space<vmem>>, vector<8x128xf32>
      %c0_11 = arith.constant 0 : index
      %c0_12 = arith.constant 0 : index
      %13 = vector.load %arg5[%c0_11, %c0_12] : memref<1x128xf32, #tpu.memory_space<vmem>>, vector<1x128xf32>
      %14 = vector.broadcast %13 : vector<1x128xf32> to vector<8x128xf32>
      %15 = arith.addf %12, %14 : vector<8x128xf32>
      %cst_13 = arith.constant 0.000000e+00 : f32
      %16 = vector.broadcast %cst_13 : f32 to vector<8x128xf32>
      %17 = arith.maximumf %15, %16 : vector<8x128xf32>
      %c0_14 = arith.constant 0 : index
      %c0_15 = arith.constant 0 : index
      %18 = vector.load %arg6[%c0_14, %c0_15] : memref<8x128xf32, #tpu.memory_space<vmem>>, vector<8x128xf32>
      tpu.vector_store %arg6[%c0_14, %c0_15], %17 {strides = array<i32>} : memref<8x128xf32, #tpu.memory_space<vmem>>, vector<8x128xf32>,
    } else {
    }
    return
  }
  func.func @transform_0(%arg0: i32, %arg1: i32, %arg2: i32) -> (i32, i32) {
    %c0_i32 = arith.constant 0 : i32
    return %arg0, %arg2 : i32, i32
  }
  func.func @transform_1(%arg0: i32, %arg1: i32, %arg2: i32) -> (i32, i32) {
    %c0_i32 = arith.constant 0 : i32
    return %arg2, %arg1 : i32, i32
  }
  func.func @transform_2(%arg0: i32, %arg1: i32, %arg2: i32) -> (i32, i32) {
    %c0_i32 = arith.constant 0 : i32
    %c0_i32_0 = arith.constant 0 : i32
    return %c0_i32, %arg1 : i32, i32
  }
  func.func @transform_3(%arg0: i32, %arg1: i32, %arg2: i32) -> (i32, i32) {
    %c0_i32 = arith.constant 0 : i32
    return %arg0, %arg1 : i32, i32
  }
}

module attributes {stable_mosaic.version = 11 : i64} {
  func.func @_matmul_bias_kernel(%arg0: i32, %arg1: i32, %arg2: i32, %arg3: memref<8x128xbf16, #tpu.memory_space<vmem>>, %arg4: memref<128x128xbf16, #tpu.memory_space<vmem>>, %arg5: memref<1x128xf32, #tpu.memory_space<vmem>>, %arg6: memref<8x128xf32, #tpu.memory_space<vmem>>) attributes {dimension_semantics = [#tpu.dimension_semantics<parallel>, #tpu.dimension_semantics<parallel>, #tpu.dimension_semantics<arbitrary>], iteration_bounds = array<i64: 1, 3, 13>, scalar_prefetch = 0 : i64, scratch_operands = 0 : i64, tpu.core_type = #tpu.core_type<tc>, window_params = [{transform_indices = @transform_0, window_bounds = array<i64: 8, 128>}, {transform_indices = @transform_1, window_bounds = array<i64: 128, 128>}, {transform_indices = @transform_2, window_bounds = array<i64: 1, 128>}, {transform_indices = @transform_3, window_bounds = array<i64: 8, 128>}]} {
    %c0_i32 = arith.constant 0 : i32
    %0 = arith.cmpi eq, %arg2, %c0_i32 : i32
    %1 = arith.extui %0 : i1 to i32
    %c0_i32_0 = arith.constant 0 : i32
    %2 = arith.cmpi ne, %1, %c0_i32_0 : i32
    scf.if %2 {
      %cst_9 = arith.constant 0.000000e+00 : f32
      %12 = vector.broadcast %cst_9 : f32 to vector<8x128xf32>
      %c0_10 = arith.constant 0 : index
      %c0_11 = arith.constant 0 : index
      %13 = vector.load %arg6[%c0_10, %c0_11] : memref<8x128xf32, #tpu.memory_space<vmem>>, vector<8x128xf32>
      tpu.vector_store %arg6[%c0_10, %c0_11], %12 {strides = array<i32>} : memref<8x128xf32, #tpu.memory_space<vmem>>, vector<8x128xf32>,
    } else {
    }
    %c0 = arith.constant 0 : index
    %c0_1 = arith.constant 0 : index
    %3 = vector.load %arg6[%c0, %c0_1] : memref<8x128xf32, #tpu.memory_space<vmem>>, vector<8x128xf32>
    %c0_2 = arith.constant 0 : index
    %c0_3 = arith.constant 0 : index
    %4 = vector.load %arg3[%c0_2, %c0_3] : memref<8x128xbf16, #tpu.memory_space<vmem>>, vector<8x128xbf16>
    %c0_4 = arith.constant 0 : index
    %c0_5 = arith.constant 0 : index
    %5 = vector.load %arg4[%c0_4, %c0_5] : memref<128x128xbf16, #tpu.memory_space<vmem>>, vector<128x128xbf16>
    %cst = arith.constant dense<0.000000e+00> : vector<8x128xf32>
    %6 = tpu.matmul %4, %5, %cst {dimension_numbers = #tpu.dot_dimension_numbers<[1], [0], [0], [1], [0, 0, 1, 1], [], []>} : vector<8x128xbf16>, vector<128x128xbf16>, vector<8x128xf32> -> vector<8x128xf32>
    %7 = arith.addf %3, %6 : vector<8x128xf32>
    %c0_6 = arith.constant 0 : index
    %c0_7 = arith.constant 0 : index
    %8 = vector.load %arg6[%c0_6, %c0_7] : memref<8x128xf32, #tpu.memory_space<vmem>>, vector<8x128xf32>
    tpu.vector_store %arg6[%c0_6, %c0_7], %7 {strides = array<i32>} : memref<8x128xf32, #tpu.memory_space<vmem>>, vector<8x128xf32>,
    %c12_i32 = arith.constant 12 : i32
    %9 = arith.cmpi eq, %arg2, %c12_i32 : i32
    %10 = arith.extui %9 : i1 to i32
    %c0_i32_8 = arith.constant 0 : i32
    %11 = arith.cmpi ne, %10, %c0_i32_8 : i32
    scf.if %11 {
      %c0_9 = arith.constant 0 : index
      %c0_10 = arith.constant 0 : index
      %12 = vector.load %arg6[%c0_9, %c0_10] : memref<8x128xf32, #tpu.memory_space<vmem>>, vector<8x128xf32>
      %c0_11 = arith.constant 0 : index
      %c0_12 = arith.constant 0 : index
      %13 = vector.load %arg5[%c0_11, %c0_12] : memref<1x128xf32, #tpu.memory_space<vmem>>, vector<1x128xf32>
      %14 = vector.broadcast %13 : vector<1x128xf32> to vector<8x128xf32>
      %15 = arith.addf %12, %14 : vector<8x128xf32>
      %cst_13 = arith.constant 0.000000e+00 : f32
      %16 = vector.broadcast %cst_13 : f32 to vector<8x128xf32>
      %17 = arith.maximumf %15, %16 : vector<8x128xf32>
      %c0_14 = arith.constant 0 : index
      %c0_15 = arith.constant 0 : index
      %18 = vector.load %arg6[%c0_14, %c0_15] : memref<8x128xf32, #tpu.memory_space<vmem>>, vector<8x128xf32>
      tpu.vector_store %arg6[%c0_14, %c0_15], %17 {strides = array<i32>} : memref<8x128xf32, #tpu.memory_space<vmem>>, vector<8x128xf32>,
    } else {
    }
    return
  }
  func.func @transform_0(%arg0: i32, %arg1: i32, %arg2: i32) -> (i32, i32) {
    %c0_i32 = arith.constant 0 : i32
    return %arg0, %arg2 : i32, i32
  }
  func.func @transform_1(%arg0: i32, %arg1: i32, %arg2: i32) -> (i32, i32) {
    %c0_i32 = arith.constant 0 : i32
    return %arg2, %arg1 : i32, i32
  }
  func.func @transform_2(%arg0: i32, %arg1: i32, %arg2: i32) -> (i32, i32) {
    %c0_i32 = arith.constant 0 : i32
    %c0_i32_0 = arith.constant 0 : i32
    return %c0_i32, %arg1 : i32, i32
  }
  func.func @transform_3(%arg0: i32, %arg1: i32, %arg2: i32) -> (i32, i32) {
    %c0_i32 = arith.constant 0 : i32
    return %arg0, %arg1 : i32, i32
  }
}

module attributes {stable_mosaic.version = 11 : i64} {
  func.func @_matmul_bias_kernel(%arg0: i32, %arg1: i32, %arg2: i32, %arg3: memref<8x128xbf16, #tpu.memory_space<vmem>>, %arg4: memref<128x256xbf16, #tpu.memory_space<vmem>>, %arg5: memref<1x256xf32, #tpu.memory_space<vmem>>, %arg6: memref<8x256xf32, #tpu.memory_space<vmem>>) attributes {dimension_semantics = [#tpu.dimension_semantics<parallel>, #tpu.dimension_semantics<parallel>, #tpu.dimension_semantics<arbitrary>], iteration_bounds = array<i64: 1, 2, 5>, scalar_prefetch = 0 : i64, scratch_operands = 0 : i64, tpu.core_type = #tpu.core_type<tc>, window_params = [{transform_indices = @transform_0, window_bounds = array<i64: 8, 128>}, {transform_indices = @transform_1, window_bounds = array<i64: 128, 256>}, {transform_indices = @transform_2, window_bounds = array<i64: 1, 256>}, {transform_indices = @transform_3, window_bounds = array<i64: 8, 256>}]} {
    %c0_i32 = arith.constant 0 : i32
    %0 = arith.cmpi eq, %arg2, %c0_i32 : i32
    %1 = arith.extui %0 : i1 to i32
    %c0_i32_0 = arith.constant 0 : i32
    %2 = arith.cmpi ne, %1, %c0_i32_0 : i32
    scf.if %2 {
      %cst_9 = arith.constant 0.000000e+00 : f32
      %12 = vector.broadcast %cst_9 : f32 to vector<8x256xf32>
      %c0_10 = arith.constant 0 : index
      %c0_11 = arith.constant 0 : index
      %13 = vector.load %arg6[%c0_10, %c0_11] : memref<8x256xf32, #tpu.memory_space<vmem>>, vector<8x256xf32>
      tpu.vector_store %arg6[%c0_10, %c0_11], %12 {strides = array<i32>} : memref<8x256xf32, #tpu.memory_space<vmem>>, vector<8x256xf32>,
    } else {
    }
    %c0 = arith.constant 0 : index
    %c0_1 = arith.constant 0 : index
    %3 = vector.load %arg6[%c0, %c0_1] : memref<8x256xf32, #tpu.memory_space<vmem>>, vector<8x256xf32>
    %c0_2 = arith.constant 0 : index
    %c0_3 = arith.constant 0 : index
    %4 = vector.load %arg3[%c0_2, %c0_3] : memref<8x128xbf16, #tpu.memory_space<vmem>>, vector<8x128xbf16>
    %c0_4 = arith.constant 0 : index
    %c0_5 = arith.constant 0 : index
    %5 = vector.load %arg4[%c0_4, %c0_5] : memref<128x256xbf16, #tpu.memory_space<vmem>>, vector<128x256xbf16>
    %cst = arith.constant dense<0.000000e+00> : vector<8x256xf32>
    %6 = tpu.matmul %4, %5, %cst {dimension_numbers = #tpu.dot_dimension_numbers<[1], [0], [0], [1], [0, 0, 1, 1], [], []>} : vector<8x128xbf16>, vector<128x256xbf16>, vector<8x256xf32> -> vector<8x256xf32>
    %7 = arith.addf %3, %6 : vector<8x256xf32>
    %c0_6 = arith.constant 0 : index
    %c0_7 = arith.constant 0 : index
    %8 = vector.load %arg6[%c0_6, %c0_7] : memref<8x256xf32, #tpu.memory_space<vmem>>, vector<8x256xf32>
    tpu.vector_store %arg6[%c0_6, %c0_7], %7 {strides = array<i32>} : memref<8x256xf32, #tpu.memory_space<vmem>>, vector<8x256xf32>,
    %c4_i32 = arith.constant 4 : i32
    %9 = arith.cmpi eq, %arg2, %c4_i32 : i32
    %10 = arith.extui %9 : i1 to i32
    %c0_i32_8 = arith.constant 0 : i32
    %11 = arith.cmpi ne, %10, %c0_i32_8 : i32
    scf.if %11 {
      %c0_9 = arith.constant 0 : index
      %c0_10 = arith.constant 0 : index
      %12 = vector.load %arg6[%c0_9, %c0_10] : memref<8x256xf32, #tpu.memory_space<vmem>>, vector<8x256xf32>
      %c0_11 = arith.constant 0 : index
      %c0_12 = arith.constant 0 : index
      %13 = vector.load %arg5[%c0_11, %c0_12] : memref<1x256xf32, #tpu.memory_space<vmem>>, vector<1x256xf32>
      %14 = vector.broadcast %13 : vector<1x256xf32> to vector<8x256xf32>
      %15 = arith.addf %12, %14 : vector<8x256xf32>
      %cst_13 = arith.constant 0.000000e+00 : f32
      %16 = vector.broadcast %cst_13 : f32 to vector<8x256xf32>
      %17 = arith.maximumf %15, %16 : vector<8x256xf32>
      %c0_14 = arith.constant 0 : index
      %c0_15 = arith.constant 0 : index
      %18 = vector.load %arg6[%c0_14, %c0_15] : memref<8x256xf32, #tpu.memory_space<vmem>>, vector<8x256xf32>
      tpu.vector_store %arg6[%c0_14, %c0_15], %17 {strides = array<i32>} : memref<8x256xf32, #tpu.memory_space<vmem>>, vector<8x256xf32>,
    } else {
    }
    return
  }
  func.func @transform_0(%arg0: i32, %arg1: i32, %arg2: i32) -> (i32, i32) {
    %c0_i32 = arith.constant 0 : i32
    return %arg0, %arg2 : i32, i32
  }
  func.func @transform_1(%arg0: i32, %arg1: i32, %arg2: i32) -> (i32, i32) {
    %c0_i32 = arith.constant 0 : i32
    return %arg2, %arg1 : i32, i32
  }
  func.func @transform_2(%arg0: i32, %arg1: i32, %arg2: i32) -> (i32, i32) {
    %c0_i32 = arith.constant 0 : i32
    %c0_i32_0 = arith.constant 0 : i32
    return %c0_i32, %arg1 : i32, i32
  }
  func.func @transform_3(%arg0: i32, %arg1: i32, %arg2: i32) -> (i32, i32) {
    %c0_i32 = arith.constant 0 : i32
    return %arg0, %arg1 : i32, i32
  }
}

module attributes {stable_mosaic.version = 11 : i64} {
  func.func @_matmul_bias_kernel(%arg0: i32, %arg1: i32, %arg2: i32, %arg3: memref<8x256xbf16, #tpu.memory_space<vmem>>, %arg4: memref<256x256xbf16, #tpu.memory_space<vmem>>, %arg5: memref<1x256xf32, #tpu.memory_space<vmem>>, %arg6: memref<8x256xf32, #tpu.memory_space<vmem>>) attributes {dimension_semantics = [#tpu.dimension_semantics<parallel>, #tpu.dimension_semantics<parallel>, #tpu.dimension_semantics<arbitrary>], iteration_bounds = array<i64: 1, 2, 7>, scalar_prefetch = 0 : i64, scratch_operands = 0 : i64, tpu.core_type = #tpu.core_type<tc>, window_params = [{transform_indices = @transform_0, window_bounds = array<i64: 8, 256>}, {transform_indices = @transform_1, window_bounds = array<i64: 256, 256>}, {transform_indices = @transform_2, window_bounds = array<i64: 1, 256>}, {transform_indices = @transform_3, window_bounds = array<i64: 8, 256>}]} {
    %c0_i32 = arith.constant 0 : i32
    %0 = arith.cmpi eq, %arg2, %c0_i32 : i32
    %1 = arith.extui %0 : i1 to i32
    %c0_i32_0 = arith.constant 0 : i32
    %2 = arith.cmpi ne, %1, %c0_i32_0 : i32
    scf.if %2 {
      %cst_9 = arith.constant 0.000000e+00 : f32
      %12 = vector.broadcast %cst_9 : f32 to vector<8x256xf32>
      %c0_10 = arith.constant 0 : index
      %c0_11 = arith.constant 0 : index
      %13 = vector.load %arg6[%c0_10, %c0_11] : memref<8x256xf32, #tpu.memory_space<vmem>>, vector<8x256xf32>
      tpu.vector_store %arg6[%c0_10, %c0_11], %12 {strides = array<i32>} : memref<8x256xf32, #tpu.memory_space<vmem>>, vector<8x256xf32>,
    } else {
    }
    %c0 = arith.constant 0 : index
    %c0_1 = arith.constant 0 : index
    %3 = vector.load %arg6[%c0, %c0_1] : memref<8x256xf32, #tpu.memory_space<vmem>>, vector<8x256xf32>
    %c0_2 = arith.constant 0 : index
    %c0_3 = arith.constant 0 : index
    %4 = vector.load %arg3[%c0_2, %c0_3] : memref<8x256xbf16, #tpu.memory_space<vmem>>, vector<8x256xbf16>
    %c0_4 = arith.constant 0 : index
    %c0_5 = arith.constant 0 : index
    %5 = vector.load %arg4[%c0_4, %c0_5] : memref<256x256xbf16, #tpu.memory_space<vmem>>, vector<256x256xbf16>
    %cst = arith.constant dense<0.000000e+00> : vector<8x256xf32>
    %6 = tpu.matmul %4, %5, %cst {dimension_numbers = #tpu.dot_dimension_numbers<[1], [0], [0], [1], [0, 0, 1, 1], [], []>} : vector<8x256xbf16>, vector<256x256xbf16>, vector<8x256xf32> -> vector<8x256xf32>
    %7 = arith.addf %3, %6 : vector<8x256xf32>
    %c0_6 = arith.constant 0 : index
    %c0_7 = arith.constant 0 : index
    %8 = vector.load %arg6[%c0_6, %c0_7] : memref<8x256xf32, #tpu.memory_space<vmem>>, vector<8x256xf32>
    tpu.vector_store %arg6[%c0_6, %c0_7], %7 {strides = array<i32>} : memref<8x256xf32, #tpu.memory_space<vmem>>, vector<8x256xf32>,
    %c6_i32 = arith.constant 6 : i32
    %9 = arith.cmpi eq, %arg2, %c6_i32 : i32
    %10 = arith.extui %9 : i1 to i32
    %c0_i32_8 = arith.constant 0 : i32
    %11 = arith.cmpi ne, %10, %c0_i32_8 : i32
    scf.if %11 {
      %c0_9 = arith.constant 0 : index
      %c0_10 = arith.constant 0 : index
      %12 = vector.load %arg6[%c0_9, %c0_10] : memref<8x256xf32, #tpu.memory_space<vmem>>, vector<8x256xf32>
      %c0_11 = arith.constant 0 : index
      %c0_12 = arith.constant 0 : index
      %13 = vector.load %arg5[%c0_11, %c0_12] : memref<1x256xf32, #tpu.memory_space<vmem>>, vector<1x256xf32>
      %14 = vector.broadcast %13 : vector<1x256xf32> to vector<8x256xf32>
      %15 = arith.addf %12, %14 : vector<8x256xf32>
      %cst_13 = arith.constant 0.000000e+00 : f32
      %16 = vector.broadcast %cst_13 : f32 to vector<8x256xf32>
      %17 = arith.maximumf %15, %16 : vector<8x256xf32>
      %c0_14 = arith.constant 0 : index
      %c0_15 = arith.constant 0 : index
      %18 = vector.load %arg6[%c0_14, %c0_15] : memref<8x256xf32, #tpu.memory_space<vmem>>, vector<8x256xf32>
      tpu.vector_store %arg6[%c0_14, %c0_15], %17 {strides = array<i32>} : memref<8x256xf32, #tpu.memory_space<vmem>>, vector<8x256xf32>,
    } else {
    }
    return
  }
  func.func @transform_0(%arg0: i32, %arg1: i32, %arg2: i32) -> (i32, i32) {
    %c0_i32 = arith.constant 0 : i32
    return %arg0, %arg2 : i32, i32
  }
  func.func @transform_1(%arg0: i32, %arg1: i32, %arg2: i32) -> (i32, i32) {
    %c0_i32 = arith.constant 0 : i32
    return %arg2, %arg1 : i32, i32
  }
  func.func @transform_2(%arg0: i32, %arg1: i32, %arg2: i32) -> (i32, i32) {
    %c0_i32 = arith.constant 0 : i32
    %c0_i32_0 = arith.constant 0 : i32
    return %c0_i32, %arg1 : i32, i32
  }
  func.func @transform_3(%arg0: i32, %arg1: i32, %arg2: i32) -> (i32, i32) {
    %c0_i32 = arith.constant 0 : i32
    return %arg0, %arg1 : i32, i32
  }
}

module attributes {stable_mosaic.version = 11 : i64} {
  func.func @_matmul_bias_kernel(%arg0: i32, %arg1: i32, %arg2: i32, %arg3: memref<8x128xbf16, #tpu.memory_space<vmem>>, %arg4: memref<128x128xbf16, #tpu.memory_space<vmem>>, %arg5: memref<1x128xf32, #tpu.memory_space<vmem>>, %arg6: memref<8x128xf32, #tpu.memory_space<vmem>>) attributes {dimension_semantics = [#tpu.dimension_semantics<parallel>, #tpu.dimension_semantics<parallel>, #tpu.dimension_semantics<arbitrary>], iteration_bounds = array<i64: 1, 1, 5>, scalar_prefetch = 0 : i64, scratch_operands = 0 : i64, tpu.core_type = #tpu.core_type<tc>, window_params = [{transform_indices = @transform_0, window_bounds = array<i64: 8, 128>}, {transform_indices = @transform_1, window_bounds = array<i64: 128, 128>}, {transform_indices = @transform_2, window_bounds = array<i64: 1, 128>}, {transform_indices = @transform_3, window_bounds = array<i64: 8, 128>}]} {
    %c0_i32 = arith.constant 0 : i32
    %0 = arith.cmpi eq, %arg2, %c0_i32 : i32
    %1 = arith.extui %0 : i1 to i32
    %c0_i32_0 = arith.constant 0 : i32
    %2 = arith.cmpi ne, %1, %c0_i32_0 : i32
    scf.if %2 {
      %cst_9 = arith.constant 0.000000e+00 : f32
      %12 = vector.broadcast %cst_9 : f32 to vector<8x128xf32>
      %c0_10 = arith.constant 0 : index
      %c0_11 = arith.constant 0 : index
      %13 = vector.load %arg6[%c0_10, %c0_11] : memref<8x128xf32, #tpu.memory_space<vmem>>, vector<8x128xf32>
      tpu.vector_store %arg6[%c0_10, %c0_11], %12 {strides = array<i32>} : memref<8x128xf32, #tpu.memory_space<vmem>>, vector<8x128xf32>,
    } else {
    }
    %c0 = arith.constant 0 : index
    %c0_1 = arith.constant 0 : index
    %3 = vector.load %arg6[%c0, %c0_1] : memref<8x128xf32, #tpu.memory_space<vmem>>, vector<8x128xf32>
    %c0_2 = arith.constant 0 : index
    %c0_3 = arith.constant 0 : index
    %4 = vector.load %arg3[%c0_2, %c0_3] : memref<8x128xbf16, #tpu.memory_space<vmem>>, vector<8x128xbf16>
    %c0_4 = arith.constant 0 : index
    %c0_5 = arith.constant 0 : index
    %5 = vector.load %arg4[%c0_4, %c0_5] : memref<128x128xbf16, #tpu.memory_space<vmem>>, vector<128x128xbf16>
    %cst = arith.constant dense<0.000000e+00> : vector<8x128xf32>
    %6 = tpu.matmul %4, %5, %cst {dimension_numbers = #tpu.dot_dimension_numbers<[1], [0], [0], [1], [0, 0, 1, 1], [], []>} : vector<8x128xbf16>, vector<128x128xbf16>, vector<8x128xf32> -> vector<8x128xf32>
    %7 = arith.addf %3, %6 : vector<8x128xf32>
    %c0_6 = arith.constant 0 : index
    %c0_7 = arith.constant 0 : index
    %8 = vector.load %arg6[%c0_6, %c0_7] : memref<8x128xf32, #tpu.memory_space<vmem>>, vector<8x128xf32>
    tpu.vector_store %arg6[%c0_6, %c0_7], %7 {strides = array<i32>} : memref<8x128xf32, #tpu.memory_space<vmem>>, vector<8x128xf32>,
    %c4_i32 = arith.constant 4 : i32
    %9 = arith.cmpi eq, %arg2, %c4_i32 : i32
    %10 = arith.extui %9 : i1 to i32
    %c0_i32_8 = arith.constant 0 : i32
    %11 = arith.cmpi ne, %10, %c0_i32_8 : i32
    scf.if %11 {
      %c0_9 = arith.constant 0 : index
      %c0_10 = arith.constant 0 : index
      %12 = vector.load %arg6[%c0_9, %c0_10] : memref<8x128xf32, #tpu.memory_space<vmem>>, vector<8x128xf32>
      %c0_11 = arith.constant 0 : index
      %c0_12 = arith.constant 0 : index
      %13 = vector.load %arg5[%c0_11, %c0_12] : memref<1x128xf32, #tpu.memory_space<vmem>>, vector<1x128xf32>
      %14 = vector.broadcast %13 : vector<1x128xf32> to vector<8x128xf32>
      %15 = arith.addf %12, %14 : vector<8x128xf32>
      %cst_13 = arith.constant 0.000000e+00 : f32
      %16 = vector.broadcast %cst_13 : f32 to vector<8x128xf32>
      %17 = arith.maximumf %15, %16 : vector<8x128xf32>
      %c0_14 = arith.constant 0 : index
      %c0_15 = arith.constant 0 : index
      %18 = vector.load %arg6[%c0_14, %c0_15] : memref<8x128xf32, #tpu.memory_space<vmem>>, vector<8x128xf32>
      tpu.vector_store %arg6[%c0_14, %c0_15], %17 {strides = array<i32>} : memref<8x128xf32, #tpu.memory_space<vmem>>, vector<8x128xf32>,
    } else {
    }
    return
  }
  func.func @transform_0(%arg0: i32, %arg1: i32, %arg2: i32) -> (i32, i32) {
    %c0_i32 = arith.constant 0 : i32
    return %arg0, %arg2 : i32, i32
  }
  func.func @transform_1(%arg0: i32, %arg1: i32, %arg2: i32) -> (i32, i32) {
    %c0_i32 = arith.constant 0 : i32
    return %arg2, %arg1 : i32, i32
  }
  func.func @transform_2(%arg0: i32, %arg1: i32, %arg2: i32) -> (i32, i32) {
    %c0_i32 = arith.constant 0 : i32
    %c0_i32_0 = arith.constant 0 : i32
    return %c0_i32, %arg1 : i32, i32
  }
  func.func @transform_3(%arg0: i32, %arg1: i32, %arg2: i32) -> (i32, i32) {
    %c0_i32 = arith.constant 0 : i32
    return %arg0, %arg1 : i32, i32
  }
}

module attributes {stable_mosaic.version = 11 : i64} {
  func.func @_matmul_bias_kernel(%arg0: i32, %arg1: i32, %arg2: i32, %arg3: memref<8x128xbf16, #tpu.memory_space<vmem>>, %arg4: memref<128x256xbf16, #tpu.memory_space<vmem>>, %arg5: memref<1x256xf32, #tpu.memory_space<vmem>>, %arg6: memref<8x256xf32, #tpu.memory_space<vmem>>) attributes {dimension_semantics = [#tpu.dimension_semantics<parallel>, #tpu.dimension_semantics<parallel>, #tpu.dimension_semantics<arbitrary>], iteration_bounds = array<i64: 1, 2, 7>, scalar_prefetch = 0 : i64, scratch_operands = 0 : i64, tpu.core_type = #tpu.core_type<tc>, window_params = [{transform_indices = @transform_0, window_bounds = array<i64: 8, 128>}, {transform_indices = @transform_1, window_bounds = array<i64: 128, 256>}, {transform_indices = @transform_2, window_bounds = array<i64: 1, 256>}, {transform_indices = @transform_3, window_bounds = array<i64: 8, 256>}]} {
    %c0_i32 = arith.constant 0 : i32
    %0 = arith.cmpi eq, %arg2, %c0_i32 : i32
    %1 = arith.extui %0 : i1 to i32
    %c0_i32_0 = arith.constant 0 : i32
    %2 = arith.cmpi ne, %1, %c0_i32_0 : i32
    scf.if %2 {
      %cst_9 = arith.constant 0.000000e+00 : f32
      %12 = vector.broadcast %cst_9 : f32 to vector<8x256xf32>
      %c0_10 = arith.constant 0 : index
      %c0_11 = arith.constant 0 : index
      %13 = vector.load %arg6[%c0_10, %c0_11] : memref<8x256xf32, #tpu.memory_space<vmem>>, vector<8x256xf32>
      tpu.vector_store %arg6[%c0_10, %c0_11], %12 {strides = array<i32>} : memref<8x256xf32, #tpu.memory_space<vmem>>, vector<8x256xf32>,
    } else {
    }
    %c0 = arith.constant 0 : index
    %c0_1 = arith.constant 0 : index
    %3 = vector.load %arg6[%c0, %c0_1] : memref<8x256xf32, #tpu.memory_space<vmem>>, vector<8x256xf32>
    %c0_2 = arith.constant 0 : index
    %c0_3 = arith.constant 0 : index
    %4 = vector.load %arg3[%c0_2, %c0_3] : memref<8x128xbf16, #tpu.memory_space<vmem>>, vector<8x128xbf16>
    %c0_4 = arith.constant 0 : index
    %c0_5 = arith.constant 0 : index
    %5 = vector.load %arg4[%c0_4, %c0_5] : memref<128x256xbf16, #tpu.memory_space<vmem>>, vector<128x256xbf16>
    %cst = arith.constant dense<0.000000e+00> : vector<8x256xf32>
    %6 = tpu.matmul %4, %5, %cst {dimension_numbers = #tpu.dot_dimension_numbers<[1], [0], [0], [1], [0, 0, 1, 1], [], []>} : vector<8x128xbf16>, vector<128x256xbf16>, vector<8x256xf32> -> vector<8x256xf32>
    %7 = arith.addf %3, %6 : vector<8x256xf32>
    %c0_6 = arith.constant 0 : index
    %c0_7 = arith.constant 0 : index
    %8 = vector.load %arg6[%c0_6, %c0_7] : memref<8x256xf32, #tpu.memory_space<vmem>>, vector<8x256xf32>
    tpu.vector_store %arg6[%c0_6, %c0_7], %7 {strides = array<i32>} : memref<8x256xf32, #tpu.memory_space<vmem>>, vector<8x256xf32>,
    %c6_i32 = arith.constant 6 : i32
    %9 = arith.cmpi eq, %arg2, %c6_i32 : i32
    %10 = arith.extui %9 : i1 to i32
    %c0_i32_8 = arith.constant 0 : i32
    %11 = arith.cmpi ne, %10, %c0_i32_8 : i32
    scf.if %11 {
      %c0_9 = arith.constant 0 : index
      %c0_10 = arith.constant 0 : index
      %12 = vector.load %arg6[%c0_9, %c0_10] : memref<8x256xf32, #tpu.memory_space<vmem>>, vector<8x256xf32>
      %c0_11 = arith.constant 0 : index
      %c0_12 = arith.constant 0 : index
      %13 = vector.load %arg5[%c0_11, %c0_12] : memref<1x256xf32, #tpu.memory_space<vmem>>, vector<1x256xf32>
      %14 = vector.broadcast %13 : vector<1x256xf32> to vector<8x256xf32>
      %15 = arith.addf %12, %14 : vector<8x256xf32>
      %cst_13 = arith.constant 0.000000e+00 : f32
      %16 = vector.broadcast %cst_13 : f32 to vector<8x256xf32>
      %17 = arith.maximumf %15, %16 : vector<8x256xf32>
      %c0_14 = arith.constant 0 : index
      %c0_15 = arith.constant 0 : index
      %18 = vector.load %arg6[%c0_14, %c0_15] : memref<8x256xf32, #tpu.memory_space<vmem>>, vector<8x256xf32>
      tpu.vector_store %arg6[%c0_14, %c0_15], %17 {strides = array<i32>} : memref<8x256xf32, #tpu.memory_space<vmem>>, vector<8x256xf32>,
    } else {
    }
    return
  }
  func.func @transform_0(%arg0: i32, %arg1: i32, %arg2: i32) -> (i32, i32) {
    %c0_i32 = arith.constant 0 : i32
    return %arg0, %arg2 : i32, i32
  }
  func.func @transform_1(%arg0: i32, %arg1: i32, %arg2: i32) -> (i32, i32) {
    %c0_i32 = arith.constant 0 : i32
    return %arg2, %arg1 : i32, i32
  }
  func.func @transform_2(%arg0: i32, %arg1: i32, %arg2: i32) -> (i32, i32) {
    %c0_i32 = arith.constant 0 : i32
    %c0_i32_0 = arith.constant 0 : i32
    return %c0_i32, %arg1 : i32, i32
  }
  func.func @transform_3(%arg0: i32, %arg1: i32, %arg2: i32) -> (i32, i32) {
    %c0_i32 = arith.constant 0 : i32
    return %arg0, %arg1 : i32, i32
  }
}

module attributes {stable_mosaic.version = 11 : i64} {
  func.func @_matmul_bias_kernel(%arg0: i32, %arg1: i32, %arg2: i32, %arg3: memref<8x128xbf16, #tpu.memory_space<vmem>>, %arg4: memref<128x128xbf16, #tpu.memory_space<vmem>>, %arg5: memref<1x128xf32, #tpu.memory_space<vmem>>, %arg6: memref<8x128xf32, #tpu.memory_space<vmem>>) attributes {dimension_semantics = [#tpu.dimension_semantics<parallel>, #tpu.dimension_semantics<parallel>, #tpu.dimension_semantics<arbitrary>], iteration_bounds = array<i64: 1, 1, 7>, scalar_prefetch = 0 : i64, scratch_operands = 0 : i64, tpu.core_type = #tpu.core_type<tc>, window_params = [{transform_indices = @transform_0, window_bounds = array<i64: 8, 128>}, {transform_indices = @transform_1, window_bounds = array<i64: 128, 128>}, {transform_indices = @transform_2, window_bounds = array<i64: 1, 128>}, {transform_indices = @transform_3, window_bounds = array<i64: 8, 128>}]} {
    %c0_i32 = arith.constant 0 : i32
    %0 = arith.cmpi eq, %arg2, %c0_i32 : i32
    %1 = arith.extui %0 : i1 to i32
    %c0_i32_0 = arith.constant 0 : i32
    %2 = arith.cmpi ne, %1, %c0_i32_0 : i32
    scf.if %2 {
      %cst_9 = arith.constant 0.000000e+00 : f32
      %12 = vector.broadcast %cst_9 : f32 to vector<8x128xf32>
      %c0_10 = arith.constant 0 : index
      %c0_11 = arith.constant 0 : index
      %13 = vector.load %arg6[%c0_10, %c0_11] : memref<8x128xf32, #tpu.memory_space<vmem>>, vector<8x128xf32>
      tpu.vector_store %arg6[%c0_10, %c0_11], %12 {strides = array<i32>} : memref<8x128xf32, #tpu.memory_space<vmem>>, vector<8x128xf32>,
    } else {
    }
    %c0 = arith.constant 0 : index
    %c0_1 = arith.constant 0 : index
    %3 = vector.load %arg6[%c0, %c0_1] : memref<8x128xf32, #tpu.memory_space<vmem>>, vector<8x128xf32>
    %c0_2 = arith.constant 0 : index
    %c0_3 = arith.constant 0 : index
    %4 = vector.load %arg3[%c0_2, %c0_3] : memref<8x128xbf16, #tpu.memory_space<vmem>>, vector<8x128xbf16>
    %c0_4 = arith.constant 0 : index
    %c0_5 = arith.constant 0 : index
    %5 = vector.load %arg4[%c0_4, %c0_5] : memref<128x128xbf16, #tpu.memory_space<vmem>>, vector<128x128xbf16>
    %cst = arith.constant dense<0.000000e+00> : vector<8x128xf32>
    %6 = tpu.matmul %4, %5, %cst {dimension_numbers = #tpu.dot_dimension_numbers<[1], [0], [0], [1], [0, 0, 1, 1], [], []>} : vector<8x128xbf16>, vector<128x128xbf16>, vector<8x128xf32> -> vector<8x128xf32>
    %7 = arith.addf %3, %6 : vector<8x128xf32>
    %c0_6 = arith.constant 0 : index
    %c0_7 = arith.constant 0 : index
    %8 = vector.load %arg6[%c0_6, %c0_7] : memref<8x128xf32, #tpu.memory_space<vmem>>, vector<8x128xf32>
    tpu.vector_store %arg6[%c0_6, %c0_7], %7 {strides = array<i32>} : memref<8x128xf32, #tpu.memory_space<vmem>>, vector<8x128xf32>,
    %c6_i32 = arith.constant 6 : i32
    %9 = arith.cmpi eq, %arg2, %c6_i32 : i32
    %10 = arith.extui %9 : i1 to i32
    %c0_i32_8 = arith.constant 0 : i32
    %11 = arith.cmpi ne, %10, %c0_i32_8 : i32
    scf.if %11 {
      %c0_9 = arith.constant 0 : index
      %c0_10 = arith.constant 0 : index
      %12 = vector.load %arg6[%c0_9, %c0_10] : memref<8x128xf32, #tpu.memory_space<vmem>>, vector<8x128xf32>
      %c0_11 = arith.constant 0 : index
      %c0_12 = arith.constant 0 : index
      %13 = vector.load %arg5[%c0_11, %c0_12] : memref<1x128xf32, #tpu.memory_space<vmem>>, vector<1x128xf32>
      %14 = vector.broadcast %13 : vector<1x128xf32> to vector<8x128xf32>
      %15 = arith.addf %12, %14 : vector<8x128xf32>
      %cst_13 = arith.constant 0.000000e+00 : f32
      %16 = vector.broadcast %cst_13 : f32 to vector<8x128xf32>
      %17 = arith.maximumf %15, %16 : vector<8x128xf32>
      %c0_14 = arith.constant 0 : index
      %c0_15 = arith.constant 0 : index
      %18 = vector.load %arg6[%c0_14, %c0_15] : memref<8x128xf32, #tpu.memory_space<vmem>>, vector<8x128xf32>
      tpu.vector_store %arg6[%c0_14, %c0_15], %17 {strides = array<i32>} : memref<8x128xf32, #tpu.memory_space<vmem>>, vector<8x128xf32>,
    } else {
    }
    return
  }
  func.func @transform_0(%arg0: i32, %arg1: i32, %arg2: i32) -> (i32, i32) {
    %c0_i32 = arith.constant 0 : i32
    return %arg0, %arg2 : i32, i32
  }
  func.func @transform_1(%arg0: i32, %arg1: i32, %arg2: i32) -> (i32, i32) {
    %c0_i32 = arith.constant 0 : i32
    return %arg2, %arg1 : i32, i32
  }
  func.func @transform_2(%arg0: i32, %arg1: i32, %arg2: i32) -> (i32, i32) {
    %c0_i32 = arith.constant 0 : i32
    %c0_i32_0 = arith.constant 0 : i32
    return %c0_i32, %arg1 : i32, i32
  }
  func.func @transform_3(%arg0: i32, %arg1: i32, %arg2: i32) -> (i32, i32) {
    %c0_i32 = arith.constant 0 : i32
    return %arg0, %arg1 : i32, i32
  }
}

module attributes {stable_mosaic.version = 11 : i64} {
  func.func @_matmul_bias_kernel(%arg0: i32, %arg1: i32, %arg2: i32, %arg3: memref<8x128xbf16, #tpu.memory_space<vmem>>, %arg4: memref<128x128xbf16, #tpu.memory_space<vmem>>, %arg5: memref<1x128xf32, #tpu.memory_space<vmem>>, %arg6: memref<8x128xf32, #tpu.memory_space<vmem>>) attributes {dimension_semantics = [#tpu.dimension_semantics<parallel>, #tpu.dimension_semantics<parallel>, #tpu.dimension_semantics<arbitrary>], iteration_bounds = array<i64: 1, 5, 7>, scalar_prefetch = 0 : i64, scratch_operands = 0 : i64, tpu.core_type = #tpu.core_type<tc>, window_params = [{transform_indices = @transform_0, window_bounds = array<i64: 8, 128>}, {transform_indices = @transform_1, window_bounds = array<i64: 128, 128>}, {transform_indices = @transform_2, window_bounds = array<i64: 1, 128>}, {transform_indices = @transform_3, window_bounds = array<i64: 8, 128>}]} {
    %c0_i32 = arith.constant 0 : i32
    %0 = arith.cmpi eq, %arg2, %c0_i32 : i32
    %1 = arith.extui %0 : i1 to i32
    %c0_i32_0 = arith.constant 0 : i32
    %2 = arith.cmpi ne, %1, %c0_i32_0 : i32
    scf.if %2 {
      %cst_9 = arith.constant 0.000000e+00 : f32
      %12 = vector.broadcast %cst_9 : f32 to vector<8x128xf32>
      %c0_10 = arith.constant 0 : index
      %c0_11 = arith.constant 0 : index
      %13 = vector.load %arg6[%c0_10, %c0_11] : memref<8x128xf32, #tpu.memory_space<vmem>>, vector<8x128xf32>
      tpu.vector_store %arg6[%c0_10, %c0_11], %12 {strides = array<i32>} : memref<8x128xf32, #tpu.memory_space<vmem>>, vector<8x128xf32>,
    } else {
    }
    %c0 = arith.constant 0 : index
    %c0_1 = arith.constant 0 : index
    %3 = vector.load %arg6[%c0, %c0_1] : memref<8x128xf32, #tpu.memory_space<vmem>>, vector<8x128xf32>
    %c0_2 = arith.constant 0 : index
    %c0_3 = arith.constant 0 : index
    %4 = vector.load %arg3[%c0_2, %c0_3] : memref<8x128xbf16, #tpu.memory_space<vmem>>, vector<8x128xbf16>
    %c0_4 = arith.constant 0 : index
    %c0_5 = arith.constant 0 : index
    %5 = vector.load %arg4[%c0_4, %c0_5] : memref<128x128xbf16, #tpu.memory_space<vmem>>, vector<128x128xbf16>
    %cst = arith.constant dense<0.000000e+00> : vector<8x128xf32>
    %6 = tpu.matmul %4, %5, %cst {dimension_numbers = #tpu.dot_dimension_numbers<[1], [0], [0], [1], [0, 0, 1, 1], [], []>} : vector<8x128xbf16>, vector<128x128xbf16>, vector<8x128xf32> -> vector<8x128xf32>
    %7 = arith.addf %3, %6 : vector<8x128xf32>
    %c0_6 = arith.constant 0 : index
    %c0_7 = arith.constant 0 : index
    %8 = vector.load %arg6[%c0_6, %c0_7] : memref<8x128xf32, #tpu.memory_space<vmem>>, vector<8x128xf32>
    tpu.vector_store %arg6[%c0_6, %c0_7], %7 {strides = array<i32>} : memref<8x128xf32, #tpu.memory_space<vmem>>, vector<8x128xf32>,
    %c6_i32 = arith.constant 6 : i32
    %9 = arith.cmpi eq, %arg2, %c6_i32 : i32
    %10 = arith.extui %9 : i1 to i32
    %c0_i32_8 = arith.constant 0 : i32
    %11 = arith.cmpi ne, %10, %c0_i32_8 : i32
    scf.if %11 {
      %c0_9 = arith.constant 0 : index
      %c0_10 = arith.constant 0 : index
      %12 = vector.load %arg6[%c0_9, %c0_10] : memref<8x128xf32, #tpu.memory_space<vmem>>, vector<8x128xf32>
      %c0_11 = arith.constant 0 : index
      %c0_12 = arith.constant 0 : index
      %13 = vector.load %arg5[%c0_11, %c0_12] : memref<1x128xf32, #tpu.memory_space<vmem>>, vector<1x128xf32>
      %14 = vector.broadcast %13 : vector<1x128xf32> to vector<8x128xf32>
      %15 = arith.addf %12, %14 : vector<8x128xf32>
      %cst_13 = arith.constant 0.000000e+00 : f32
      %16 = vector.broadcast %cst_13 : f32 to vector<8x128xf32>
      %17 = arith.maximumf %15, %16 : vector<8x128xf32>
      %c0_14 = arith.constant 0 : index
      %c0_15 = arith.constant 0 : index
      %18 = vector.load %arg6[%c0_14, %c0_15] : memref<8x128xf32, #tpu.memory_space<vmem>>, vector<8x128xf32>
      tpu.vector_store %arg6[%c0_14, %c0_15], %17 {strides = array<i32>} : memref<8x128xf32, #tpu.memory_space<vmem>>, vector<8x128xf32>,
    } else {
    }
    return
  }
  func.func @transform_0(%arg0: i32, %arg1: i32, %arg2: i32) -> (i32, i32) {
    %c0_i32 = arith.constant 0 : i32
    return %arg0, %arg2 : i32, i32
  }
  func.func @transform_1(%arg0: i32, %arg1: i32, %arg2: i32) -> (i32, i32) {
    %c0_i32 = arith.constant 0 : i32
    return %arg2, %arg1 : i32, i32
  }
  func.func @transform_2(%arg0: i32, %arg1: i32, %arg2: i32) -> (i32, i32) {
    %c0_i32 = arith.constant 0 : i32
    %c0_i32_0 = arith.constant 0 : i32
    return %c0_i32, %arg1 : i32, i32
  }
  func.func @transform_3(%arg0: i32, %arg1: i32, %arg2: i32) -> (i32, i32) {
    %c0_i32 = arith.constant 0 : i32
    return %arg0, %arg1 : i32, i32
  }
}

module attributes {stable_mosaic.version = 11 : i64} {
  func.func @_matmul_bias_kernel(%arg0: i32, %arg1: i32, %arg2: i32, %arg3: memref<8x128xbf16, #tpu.memory_space<vmem>>, %arg4: memref<128x256xbf16, #tpu.memory_space<vmem>>, %arg5: memref<1x256xf32, #tpu.memory_space<vmem>>, %arg6: memref<8x256xf32, #tpu.memory_space<vmem>>) attributes {dimension_semantics = [#tpu.dimension_semantics<parallel>, #tpu.dimension_semantics<parallel>, #tpu.dimension_semantics<arbitrary>], iteration_bounds = array<i64: 1, 2, 17>, scalar_prefetch = 0 : i64, scratch_operands = 0 : i64, tpu.core_type = #tpu.core_type<tc>, window_params = [{transform_indices = @transform_0, window_bounds = array<i64: 8, 128>}, {transform_indices = @transform_1, window_bounds = array<i64: 128, 256>}, {transform_indices = @transform_2, window_bounds = array<i64: 1, 256>}, {transform_indices = @transform_3, window_bounds = array<i64: 8, 256>}]} {
    %c0_i32 = arith.constant 0 : i32
    %0 = arith.cmpi eq, %arg2, %c0_i32 : i32
    %1 = arith.extui %0 : i1 to i32
    %c0_i32_0 = arith.constant 0 : i32
    %2 = arith.cmpi ne, %1, %c0_i32_0 : i32
    scf.if %2 {
      %cst_9 = arith.constant 0.000000e+00 : f32
      %12 = vector.broadcast %cst_9 : f32 to vector<8x256xf32>
      %c0_10 = arith.constant 0 : index
      %c0_11 = arith.constant 0 : index
      %13 = vector.load %arg6[%c0_10, %c0_11] : memref<8x256xf32, #tpu.memory_space<vmem>>, vector<8x256xf32>
      tpu.vector_store %arg6[%c0_10, %c0_11], %12 {strides = array<i32>} : memref<8x256xf32, #tpu.memory_space<vmem>>, vector<8x256xf32>,
    } else {
    }
    %c0 = arith.constant 0 : index
    %c0_1 = arith.constant 0 : index
    %3 = vector.load %arg6[%c0, %c0_1] : memref<8x256xf32, #tpu.memory_space<vmem>>, vector<8x256xf32>
    %c0_2 = arith.constant 0 : index
    %c0_3 = arith.constant 0 : index
    %4 = vector.load %arg3[%c0_2, %c0_3] : memref<8x128xbf16, #tpu.memory_space<vmem>>, vector<8x128xbf16>
    %c0_4 = arith.constant 0 : index
    %c0_5 = arith.constant 0 : index
    %5 = vector.load %arg4[%c0_4, %c0_5] : memref<128x256xbf16, #tpu.memory_space<vmem>>, vector<128x256xbf16>
    %cst = arith.constant dense<0.000000e+00> : vector<8x256xf32>
    %6 = tpu.matmul %4, %5, %cst {dimension_numbers = #tpu.dot_dimension_numbers<[1], [0], [0], [1], [0, 0, 1, 1], [], []>} : vector<8x128xbf16>, vector<128x256xbf16>, vector<8x256xf32> -> vector<8x256xf32>
    %7 = arith.addf %3, %6 : vector<8x256xf32>
    %c0_6 = arith.constant 0 : index
    %c0_7 = arith.constant 0 : index
    %8 = vector.load %arg6[%c0_6, %c0_7] : memref<8x256xf32, #tpu.memory_space<vmem>>, vector<8x256xf32>
    tpu.vector_store %arg6[%c0_6, %c0_7], %7 {strides = array<i32>} : memref<8x256xf32, #tpu.memory_space<vmem>>, vector<8x256xf32>,
    %c16_i32 = arith.constant 16 : i32
    %9 = arith.cmpi eq, %arg2, %c16_i32 : i32
    %10 = arith.extui %9 : i1 to i32
    %c0_i32_8 = arith.constant 0 : i32
    %11 = arith.cmpi ne, %10, %c0_i32_8 : i32
    scf.if %11 {
      %c0_9 = arith.constant 0 : index
      %c0_10 = arith.constant 0 : index
      %12 = vector.load %arg6[%c0_9, %c0_10] : memref<8x256xf32, #tpu.memory_space<vmem>>, vector<8x256xf32>
      %c0_11 = arith.constant 0 : index
      %c0_12 = arith.constant 0 : index
      %13 = vector.load %arg5[%c0_11, %c0_12] : memref<1x256xf32, #tpu.memory_space<vmem>>, vector<1x256xf32>
      %14 = vector.broadcast %13 : vector<1x256xf32> to vector<8x256xf32>
      %15 = arith.addf %12, %14 : vector<8x256xf32>
      %cst_13 = arith.constant 0.000000e+00 : f32
      %16 = vector.broadcast %cst_13 : f32 to vector<8x256xf32>
      %17 = arith.maximumf %15, %16 : vector<8x256xf32>
      %c0_14 = arith.constant 0 : index
      %c0_15 = arith.constant 0 : index
      %18 = vector.load %arg6[%c0_14, %c0_15] : memref<8x256xf32, #tpu.memory_space<vmem>>, vector<8x256xf32>
      tpu.vector_store %arg6[%c0_14, %c0_15], %17 {strides = array<i32>} : memref<8x256xf32, #tpu.memory_space<vmem>>, vector<8x256xf32>,
    } else {
    }
    return
  }
  func.func @transform_0(%arg0: i32, %arg1: i32, %arg2: i32) -> (i32, i32) {
    %c0_i32 = arith.constant 0 : i32
    return %arg0, %arg2 : i32, i32
  }
  func.func @transform_1(%arg0: i32, %arg1: i32, %arg2: i32) -> (i32, i32) {
    %c0_i32 = arith.constant 0 : i32
    return %arg2, %arg1 : i32, i32
  }
  func.func @transform_2(%arg0: i32, %arg1: i32, %arg2: i32) -> (i32, i32) {
    %c0_i32 = arith.constant 0 : i32
    %c0_i32_0 = arith.constant 0 : i32
    return %c0_i32, %arg1 : i32, i32
  }
  func.func @transform_3(%arg0: i32, %arg1: i32, %arg2: i32) -> (i32, i32) {
    %c0_i32 = arith.constant 0 : i32
    return %arg0, %arg1 : i32, i32
  }
}

module attributes {stable_mosaic.version = 11 : i64} {
  func.func @_matmul_bias_kernel(%arg0: i32, %arg1: i32, %arg2: i32, %arg3: memref<8x256xbf16, #tpu.memory_space<vmem>>, %arg4: memref<256x256xbf16, #tpu.memory_space<vmem>>, %arg5: memref<1x256xf32, #tpu.memory_space<vmem>>, %arg6: memref<8x256xf32, #tpu.memory_space<vmem>>) attributes {dimension_semantics = [#tpu.dimension_semantics<parallel>, #tpu.dimension_semantics<parallel>, #tpu.dimension_semantics<arbitrary>], iteration_bounds = array<i64: 1, 4, 4>, scalar_prefetch = 0 : i64, scratch_operands = 0 : i64, tpu.core_type = #tpu.core_type<tc>, window_params = [{transform_indices = @transform_0, window_bounds = array<i64: 8, 256>}, {transform_indices = @transform_1, window_bounds = array<i64: 256, 256>}, {transform_indices = @transform_2, window_bounds = array<i64: 1, 256>}, {transform_indices = @transform_3, window_bounds = array<i64: 8, 256>}]} {
    %c0_i32 = arith.constant 0 : i32
    %0 = arith.cmpi eq, %arg2, %c0_i32 : i32
    %1 = arith.extui %0 : i1 to i32
    %c0_i32_0 = arith.constant 0 : i32
    %2 = arith.cmpi ne, %1, %c0_i32_0 : i32
    scf.if %2 {
      %cst_9 = arith.constant 0.000000e+00 : f32
      %12 = vector.broadcast %cst_9 : f32 to vector<8x256xf32>
      %c0_10 = arith.constant 0 : index
      %c0_11 = arith.constant 0 : index
      %13 = vector.load %arg6[%c0_10, %c0_11] : memref<8x256xf32, #tpu.memory_space<vmem>>, vector<8x256xf32>
      tpu.vector_store %arg6[%c0_10, %c0_11], %12 {strides = array<i32>} : memref<8x256xf32, #tpu.memory_space<vmem>>, vector<8x256xf32>,
    } else {
    }
    %c0 = arith.constant 0 : index
    %c0_1 = arith.constant 0 : index
    %3 = vector.load %arg6[%c0, %c0_1] : memref<8x256xf32, #tpu.memory_space<vmem>>, vector<8x256xf32>
    %c0_2 = arith.constant 0 : index
    %c0_3 = arith.constant 0 : index
    %4 = vector.load %arg3[%c0_2, %c0_3] : memref<8x256xbf16, #tpu.memory_space<vmem>>, vector<8x256xbf16>
    %c0_4 = arith.constant 0 : index
    %c0_5 = arith.constant 0 : index
    %5 = vector.load %arg4[%c0_4, %c0_5] : memref<256x256xbf16, #tpu.memory_space<vmem>>, vector<256x256xbf16>
    %cst = arith.constant dense<0.000000e+00> : vector<8x256xf32>
    %6 = tpu.matmul %4, %5, %cst {dimension_numbers = #tpu.dot_dimension_numbers<[1], [0], [0], [1], [0, 0, 1, 1], [], []>} : vector<8x256xbf16>, vector<256x256xbf16>, vector<8x256xf32> -> vector<8x256xf32>
    %7 = arith.addf %3, %6 : vector<8x256xf32>
    %c0_6 = arith.constant 0 : index
    %c0_7 = arith.constant 0 : index
    %8 = vector.load %arg6[%c0_6, %c0_7] : memref<8x256xf32, #tpu.memory_space<vmem>>, vector<8x256xf32>
    tpu.vector_store %arg6[%c0_6, %c0_7], %7 {strides = array<i32>} : memref<8x256xf32, #tpu.memory_space<vmem>>, vector<8x256xf32>,
    %c3_i32 = arith.constant 3 : i32
    %9 = arith.cmpi eq, %arg2, %c3_i32 : i32
    %10 = arith.extui %9 : i1 to i32
    %c0_i32_8 = arith.constant 0 : i32
    %11 = arith.cmpi ne, %10, %c0_i32_8 : i32
    scf.if %11 {
      %c0_9 = arith.constant 0 : index
      %c0_10 = arith.constant 0 : index
      %12 = vector.load %arg6[%c0_9, %c0_10] : memref<8x256xf32, #tpu.memory_space<vmem>>, vector<8x256xf32>
      %c0_11 = arith.constant 0 : index
      %c0_12 = arith.constant 0 : index
      %13 = vector.load %arg5[%c0_11, %c0_12] : memref<1x256xf32, #tpu.memory_space<vmem>>, vector<1x256xf32>
      %14 = vector.broadcast %13 : vector<1x256xf32> to vector<8x256xf32>
      %15 = arith.addf %12, %14 : vector<8x256xf32>
      %c0_13 = arith.constant 0 : index
      %c0_14 = arith.constant 0 : index
      %16 = vector.load %arg6[%c0_13, %c0_14] : memref<8x256xf32, #tpu.memory_space<vmem>>, vector<8x256xf32>
      tpu.vector_store %arg6[%c0_13, %c0_14], %15 {strides = array<i32>} : memref<8x256xf32, #tpu.memory_space<vmem>>, vector<8x256xf32>,
    } else {
    }
    return
  }
  func.func @transform_0(%arg0: i32, %arg1: i32, %arg2: i32) -> (i32, i32) {
    %c0_i32 = arith.constant 0 : i32
    return %arg0, %arg2 : i32, i32
  }
  func.func @transform_1(%arg0: i32, %arg1: i32, %arg2: i32) -> (i32, i32) {
    %c0_i32 = arith.constant 0 : i32
    return %arg2, %arg1 : i32, i32
  }
  func.func @transform_2(%arg0: i32, %arg1: i32, %arg2: i32) -> (i32, i32) {
    %c0_i32 = arith.constant 0 : i32
    %c0_i32_0 = arith.constant 0 : i32
    return %c0_i32, %arg1 : i32, i32
  }
  func.func @transform_3(%arg0: i32, %arg1: i32, %arg2: i32) -> (i32, i32) {
    %c0_i32 = arith.constant 0 : i32
    return %arg0, %arg1 : i32, i32
  }
}

module attributes {stable_mosaic.version = 11 : i64} {
  func.func @_matmul_bias_kernel(%arg0: i32, %arg1: i32, %arg2: i32, %arg3: memref<8x256xbf16, #tpu.memory_space<vmem>>, %arg4: memref<256x128xbf16, #tpu.memory_space<vmem>>, %arg5: memref<1x128xf32, #tpu.memory_space<vmem>>, %arg6: memref<8x128xf32, #tpu.memory_space<vmem>>) attributes {dimension_semantics = [#tpu.dimension_semantics<parallel>, #tpu.dimension_semantics<parallel>, #tpu.dimension_semantics<arbitrary>], iteration_bounds = array<i64: 1, 1, 4>, scalar_prefetch = 0 : i64, scratch_operands = 0 : i64, tpu.core_type = #tpu.core_type<tc>, window_params = [{transform_indices = @transform_0, window_bounds = array<i64: 8, 256>}, {transform_indices = @transform_1, window_bounds = array<i64: 256, 128>}, {transform_indices = @transform_2, window_bounds = array<i64: 1, 128>}, {transform_indices = @transform_3, window_bounds = array<i64: 8, 128>}]} {
    %c0_i32 = arith.constant 0 : i32
    %0 = arith.cmpi eq, %arg2, %c0_i32 : i32
    %1 = arith.extui %0 : i1 to i32
    %c0_i32_0 = arith.constant 0 : i32
    %2 = arith.cmpi ne, %1, %c0_i32_0 : i32
    scf.if %2 {
      %cst_9 = arith.constant 0.000000e+00 : f32
      %12 = vector.broadcast %cst_9 : f32 to vector<8x128xf32>
      %c0_10 = arith.constant 0 : index
      %c0_11 = arith.constant 0 : index
      %13 = vector.load %arg6[%c0_10, %c0_11] : memref<8x128xf32, #tpu.memory_space<vmem>>, vector<8x128xf32>
      tpu.vector_store %arg6[%c0_10, %c0_11], %12 {strides = array<i32>} : memref<8x128xf32, #tpu.memory_space<vmem>>, vector<8x128xf32>,
    } else {
    }
    %c0 = arith.constant 0 : index
    %c0_1 = arith.constant 0 : index
    %3 = vector.load %arg6[%c0, %c0_1] : memref<8x128xf32, #tpu.memory_space<vmem>>, vector<8x128xf32>
    %c0_2 = arith.constant 0 : index
    %c0_3 = arith.constant 0 : index
    %4 = vector.load %arg3[%c0_2, %c0_3] : memref<8x256xbf16, #tpu.memory_space<vmem>>, vector<8x256xbf16>
    %c0_4 = arith.constant 0 : index
    %c0_5 = arith.constant 0 : index
    %5 = vector.load %arg4[%c0_4, %c0_5] : memref<256x128xbf16, #tpu.memory_space<vmem>>, vector<256x128xbf16>
    %cst = arith.constant dense<0.000000e+00> : vector<8x128xf32>
    %6 = tpu.matmul %4, %5, %cst {dimension_numbers = #tpu.dot_dimension_numbers<[1], [0], [0], [1], [0, 0, 1, 1], [], []>} : vector<8x256xbf16>, vector<256x128xbf16>, vector<8x128xf32> -> vector<8x128xf32>
    %7 = arith.addf %3, %6 : vector<8x128xf32>
    %c0_6 = arith.constant 0 : index
    %c0_7 = arith.constant 0 : index
    %8 = vector.load %arg6[%c0_6, %c0_7] : memref<8x128xf32, #tpu.memory_space<vmem>>, vector<8x128xf32>
    tpu.vector_store %arg6[%c0_6, %c0_7], %7 {strides = array<i32>} : memref<8x128xf32, #tpu.memory_space<vmem>>, vector<8x128xf32>,
    %c3_i32 = arith.constant 3 : i32
    %9 = arith.cmpi eq, %arg2, %c3_i32 : i32
    %10 = arith.extui %9 : i1 to i32
    %c0_i32_8 = arith.constant 0 : i32
    %11 = arith.cmpi ne, %10, %c0_i32_8 : i32
    scf.if %11 {
      %c0_9 = arith.constant 0 : index
      %c0_10 = arith.constant 0 : index
      %12 = vector.load %arg6[%c0_9, %c0_10] : memref<8x128xf32, #tpu.memory_space<vmem>>, vector<8x128xf32>
      %c0_11 = arith.constant 0 : index
      %c0_12 = arith.constant 0 : index
      %13 = vector.load %arg5[%c0_11, %c0_12] : memref<1x128xf32, #tpu.memory_space<vmem>>, vector<1x128xf32>
      %14 = vector.broadcast %13 : vector<1x128xf32> to vector<8x128xf32>
      %15 = arith.addf %12, %14 : vector<8x128xf32>
      %c0_13 = arith.constant 0 : index
      %c0_14 = arith.constant 0 : index
      %16 = vector.load %arg6[%c0_13, %c0_14] : memref<8x128xf32, #tpu.memory_space<vmem>>, vector<8x128xf32>
      tpu.vector_store %arg6[%c0_13, %c0_14], %15 {strides = array<i32>} : memref<8x128xf32, #tpu.memory_space<vmem>>, vector<8x128xf32>,
    } else {
    }
    return
  }
  func.func @transform_0(%arg0: i32, %arg1: i32, %arg2: i32) -> (i32, i32) {
    %c0_i32 = arith.constant 0 : i32
    return %arg0, %arg2 : i32, i32
  }
  func.func @transform_1(%arg0: i32, %arg1: i32, %arg2: i32) -> (i32, i32) {
    %c0_i32 = arith.constant 0 : i32
    return %arg2, %arg1 : i32, i32
  }
  func.func @transform_2(%arg0: i32, %arg1: i32, %arg2: i32) -> (i32, i32) {
    %c0_i32 = arith.constant 0 : i32
    %c0_i32_0 = arith.constant 0 : i32
    return %c0_i32, %arg1 : i32, i32
  }
  func.func @transform_3(%arg0: i32, %arg1: i32, %arg2: i32) -> (i32, i32) {
    %c0_i32 = arith.constant 0 : i32
    return %arg0, %arg1 : i32, i32
  }
}

</mosaic_0001>

<bundles_post_ra>
// kernel: forward.32
= control target key start
LH: loop header
LB: loop body
LE: loop exit
PB: predicated region body
PF: predicated region fallthrough
CT: control target
= control target key end

     0   :  { %s1458_s12 = smov 0   ;;  %s1460_s13 = smov 0   ;;  %s1651_s0 = inlined_call_operand.vmem [shape: bf16[512,256], index: 0, kind: input, shape index: {}]   ;;  %s1652_s1 = inlined_call_operand.vmem [shape: bf16[256,128], index: 1, kind: input, shape index: {}]   ;;  %s1653_s2 = inlined_call_operand.vmem [shape: f32[1,128], index: 2, kind: input, shape index: {}]   ;;  %s1654_s3 = inlined_call_operand.vmem [shape: f32[512,128], index: 3, kind: output, shape index: {}]  }
   0x1   :  { %s1462_s14 = smov 0  }
   0x2 LB: > { %s32_s15 = sadd.s32 1, %s1432_s13  ;;  %p1139_p0 = scmp.ge.s32.totalorder %s1436_s14, 1  ;;  %s1436_s14 = sphi %s1462_s14, %s13_s14   ;;  %s1432_s13 = sphi %s1460_s13, %s1656_s13   ;;  %s1428_s12 = sphi %s1458_s12, %s1655_s12  }
   0x3   : > { %p34_p1 = scmp.ge.s32.totalorder %s32_s15, 2  ;;  %p191_p2 = scmp.lt.s32.totalorder %s1436_s14, 3 }
   0x5   : > { %s1658_s15 = smov (%p34_p1, %s32_s15), 0  ;;  %p192_p3 = pnand %p1139_p0, %p191_p2 }
   0x6   : > { %v1350_v0 = vld [vmem:[%s1652_s1 + $0x40] sm:$0xff] (!%p192_p3)   ;;  %s1140_s18 = sshll.u32 (!%p192_p3), %s1428_s12, 5  ;;  %v1352_v2 = vld [vmem:[%s1652_s1 + $0x48] sm:$0xff] (!%p192_p3)   ;;  %v1354_v4 = vld [vmem:[%s1652_s1 + $0x50] sm:$0xff] (!%p192_p3)  }
   0x7   : > { %195 = sbr.rel (%p192_p3) target bundleno = 317 (0x13d), region = 32  ;;  %v1351_v1 = vld [vmem:[%s1652_s1] sm:$0xff] (!%p192_p3)   ;;  %1197 = vmatprep.subr.bf16.mxu0 (!%p192_p3), %v1350_v0  ;;  %1309 = vmatprep.subr.bf16.mxu1 (!%p192_p3), %v1350_v0  ;;  %v1353_v3 = vld [vmem:[%s1652_s1 + $0x8] sm:$0xff] (!%p192_p3)   ;;  %p236_p4 = scmp.lt.s32.totalorder (!%p192_p3), %s1140_s18, 63  ;;  %v1355_v5 = vld [vmem:[%s1652_s1 + $0x10] sm:$0xff] (!%p192_p3)  }
   0x8   : > { %1198 = vmatpush3.bf16.msra.mxu0 (!%p192_p3), %v1351_v1  ;;  %1317 = vmatpush3.bf16.msra.mxu1 (!%p192_p3), %v1351_v1  ;;  %v1356_v6 = vld [vmem:[%s1652_s1 + $0x58] sm:$0xff] (!%p192_p3)   ;;  %v1358_v8 = vld [vmem:[%s1652_s1 + $0x60] sm:$0xff] (!%p192_p3)   ;;  %v1360_v10 = vld [vmem:[%s1652_s1 + $0x68] sm:$0xff] (!%p192_p3)  }
   0x9   : > { %1199 = vmatprep.subr.bf16.mxu0 (!%p192_p3), %v1352_v2  ;;  %1310 = vmatprep.subr.bf16.mxu1 (!%p192_p3), %v1352_v2  ;;  %v1357_v7 = vld [vmem:[%s1652_s1 + $0x18] sm:$0xff] (!%p192_p3)   ;;  %v1359_v9 = vld [vmem:[%s1652_s1 + $0x20] sm:$0xff] (!%p192_p3)   ;;  %v1361_v13 = vld [vmem:[%s1652_s1 + $0x28] sm:$0xff] (!%p192_p3)  }
   0xa   : > { %v1362_v14 = vld [vmem:[%s1652_s1 + $0x70] sm:$0xff] (!%p192_p3)   ;;  %v1364_v16 = vld [vmem:[%s1652_s1 + $0x78] sm:$0xff] (!%p192_p3)   ;;  %v1569_v56 = vld [vmem:[%s1653_s2] ss:$0 sm:$0xff] (!%p192_p3) }
   0xb   : > { %v1363_v15 = vld [vmem:[%s1652_s1 + $0x30] sm:$0xff] (!%p192_p3)   ;;  %v1365_v17 = vld [vmem:[%s1652_s1 + $0x38] sm:$0xff] (!%p192_p3)  }
   0xc   : > { %1200 = vmatpush3.bf16.msra.mxu0 (!%p192_p3), %v1353_v3  ;;  %1318 = vmatpush3.bf16.msra.mxu1 (!%p192_p3), %v1353_v3 }
   0xd   : > { %1201 = vmatprep.subr.bf16.mxu0 (!%p192_p3), %v1354_v4  ;;  %1311 = vmatprep.subr.bf16.mxu1 (!%p192_p3), %v1354_v4 }
   0xe   : > { %s1660_s18 = smov (!%p236_p4, %s1140_s18), 63 }
   0xf   : > { %s1196_s6 = sshll.u32 %s1660_s18, 3 }
  0x10   : > { %1202 = vmatpush3.bf16.msra.mxu0 %v1355_v5  ;;  %1319 = vmatpush3.bf16.msra.mxu1 %v1355_v5  ;;  %s1511_s11 = scalar_lea.vmem %s1651_s0, %s1196_s6  ;;  %s1578_s8 = scalar_lea.vmem %s1654_s3, %s1196_s6 }
  0x11   : > { %1203 = vmatprep.subr.bf16.mxu0 %v1356_v6  ;;  %1312 = vmatprep.subr.bf16.mxu1 %v1356_v6  ;;  %v1368_v11 = vld [vmem:[%s1511_s11 + $0x4] ss:$8 sps:$4 sm:$0xff]   ;;  %v1366_v18 = vld [vmem:[%s1511_s11] ss:$8 sps:$4 sm:$0xff]   ;;  %v1372_v20 = vld [vmem:[%s1511_s11 + $0x14] ss:$8 sps:$4 sm:$0xff]  }
  0x12   : > { %v1371_v12 = vld [vmem:[%s1511_s11 + $0x84] ss:$8 sps:$4 sm:$0xff]   ;;  %688 = vmatprep.mubr.bf16.mxu0 %v1368_v11  ;;  %v1369_v19 = vld [vmem:[%s1511_s11 + $0x80] ss:$8 sps:$4 sm:$0xff]   ;;  %v1374_v21 = vld [vmem:[%s1511_s11 + $0x94] ss:$8 sps:$4 sm:$0xff]  }
  0x13   : > { %752 = vmatprep.mubr.bf16.mxu1 %v1371_v12  ;;  %v1376_v22 = vld [vmem:[%s1511_s11 + $0x10] ss:$8 sps:$4 sm:$0xff]   ;;  %v1378_v24 = vld [vmem:[%s1511_s11 + $0x24] ss:$8 sps:$4 sm:$0xff]   ;;  %v1382_v26 = vld [vmem:[%s1511_s11 + $0x20] ss:$8 sps:$4 sm:$0xff]  }
  0x14   : > { %1204 = vmatpush3.bf16.msra.mxu0 %v1357_v7  ;;  %1320 = vmatpush3.bf16.msra.mxu1 %v1357_v7  ;;  %v1377_v23 = vld [vmem:[%s1511_s11 + $0x90] ss:$8 sps:$4 sm:$0xff]   ;;  %v1380_v25 = vld [vmem:[%s1511_s11 + $0xa4] ss:$8 sps:$4 sm:$0xff]   ;;  %v1383_v27 = vld [vmem:[%s1511_s11 + $0xa0] ss:$8 sps:$4 sm:$0xff]  }
  0x15   : > { %1205 = vmatprep.subr.bf16.mxu0 %v1358_v8  ;;  %1313 = vmatprep.subr.bf16.mxu1 %v1358_v8  ;;  %v1384_v28 = vld [vmem:[%s1511_s11 + $0x34] ss:$8 sps:$4 sm:$0xff]   ;;  %v1388_v30 = vld [vmem:[%s1511_s11 + $0x30] ss:$8 sps:$4 sm:$0xff]   ;;  %v1390_v32 = vld [vmem:[%s1511_s11 + $0x44] ss:$8 sps:$4 sm:$0xff]  }
  0x16   : > { %v1386_v29 = vld [vmem:[%s1511_s11 + $0xb4] ss:$8 sps:$4 sm:$0xff]   ;;  %v1389_v31 = vld [vmem:[%s1511_s11 + $0xb0] ss:$8 sps:$4 sm:$0xff]   ;;  %v1392_v33 = vld [vmem:[%s1511_s11 + $0xc4] ss:$8 sps:$4 sm:$0xff]  }
  0x17   : > { %v1394_v34 = vld [vmem:[%s1511_s11 + $0x40] ss:$8 sps:$4 sm:$0xff]   ;;  %v1396_v36 = vld [vmem:[%s1511_s11 + $0x54] ss:$8 sps:$4 sm:$0xff]   ;;  %v1400_v38 = vld [vmem:[%s1511_s11 + $0x50] ss:$8 sps:$4 sm:$0xff]  }
  0x18   : > { %1206 = vmatpush3.bf16.msra.mxu0 %v1359_v9  ;;  %1321 = vmatpush3.bf16.msra.mxu1 %v1359_v9  ;;  %v1395_v35 = vld [vmem:[%s1511_s11 + $0xc0] ss:$8 sps:$4 sm:$0xff]   ;;  %v1398_v37 = vld [vmem:[%s1511_s11 + $0xd4] ss:$8 sps:$4 sm:$0xff]   ;;  %v1401_v39 = vld [vmem:[%s1511_s11 + $0xd0] ss:$8 sps:$4 sm:$0xff]  }
  0x19   : > { %1207 = vmatprep.subr.bf16.mxu0 %v1360_v10  ;;  %1314 = vmatprep.subr.bf16.mxu1 %v1360_v10  ;;  %v1402_v40 = vld [vmem:[%s1511_s11 + $0x64] ss:$8 sps:$4 sm:$0xff]   ;;  %v1406_v42 = vld [vmem:[%s1511_s11 + $0x60] ss:$8 sps:$4 sm:$0xff]   ;;  %v1408_v44 = vld [vmem:[%s1511_s11 + $0x74] ss:$8 sps:$4 sm:$0xff]  }
  0x1a   : > { %v1404_v41 = vld [vmem:[%s1511_s11 + $0xe4] ss:$8 sps:$4 sm:$0xff]   ;;  %v1407_v43 = vld [vmem:[%s1511_s11 + $0xe0] ss:$8 sps:$4 sm:$0xff]   ;;  %v1410_v45 = vld [vmem:[%s1511_s11 + $0xf4] ss:$8 sps:$4 sm:$0xff]  }
  0x1b   : > { %v1412_v46 = vld [vmem:[%s1511_s11 + $0x70] ss:$8 sps:$4 sm:$0xff]  }
  0x1c   : > { %1208 = vmatpush3.bf16.msra.mxu0 %v1361_v13  ;;  %1322 = vmatpush3.bf16.msra.mxu1 %v1361_v13  ;;  %v1413_v47 = vld [vmem:[%s1511_s11 + $0xf0] ss:$8 sps:$4 sm:$0xff]  }
  0x1d   : > { %1209 = vmatprep.subr.bf16.mxu0 %v1362_v14  ;;  %1315 = vmatprep.subr.bf16.mxu1 %v1362_v14 }
  0x20   : > { %1210 = vmatpush3.bf16.msra.mxu0 %v1363_v15  ;;  %1323 = vmatpush3.bf16.msra.mxu1 %v1363_v15 }
  0x21   : > { %1211 = vmatprep.subr.bf16.mxu0 %v1364_v16  ;;  %1316 = vmatprep.subr.bf16.mxu1 %v1364_v16 }
  0x24   : > { %1212 = vmatpush3.bf16.msra.mxu0 %v1365_v17  ;;  %1324 = vmatpush3.bf16.msra.mxu1 %v1365_v17 }
  0x27   : > { %689 = vmatmul.mubr.bf16.vlgmr.msra.gmra.mrb[0].mxu0 %v1366_v18  ;;  %753 = vmatmul.mubr.bf16.vlgmr.msra.gmra.mrb[0].mxu1 %v1369_v19 }
  0x28   : > { %696 = vmatprep.mubr.bf16.mxu0 %v1372_v20  ;;  %760 = vmatprep.mubr.bf16.mxu1 %v1374_v21 }
  0x2f   : > { %697 = vmatmul.mubr.bf16.gmra.mrb[4].mxu0 %v1376_v22  ;;  %761 = vmatmul.mubr.bf16.gmra.mrb[4].mxu1 %v1377_v23 }
  0x30   : > { %704 = vmatprep.mubr.bf16.mxu0 %v1378_v24  ;;  %768 = vmatprep.mubr.bf16.mxu1 %v1380_v25 }
  0x37   : > { %705 = vmatmul.mubr.bf16.gmra.mrb[8].mxu0 %v1382_v26  ;;  %769 = vmatmul.mubr.bf16.gmra.mrb[8].mxu1 %v1383_v27 }
  0x38   : > { %712 = vmatprep.mubr.bf16.mxu0 %v1384_v28  ;;  %776 = vmatprep.mubr.bf16.mxu1 %v1386_v29 }
  0x3f   : > { %713 = vmatmul.mubr.bf16.gmra.mrb[12].mxu0 %v1388_v30  ;;  %777 = vmatmul.mubr.bf16.gmra.mrb[12].mxu1 %v1389_v31 }
  0x40   : > { %720 = vmatprep.mubr.bf16.mxu0 %v1390_v32  ;;  %784 = vmatprep.mubr.bf16.mxu1 %v1392_v33 }
  0x47   : > { %721 = vmatmul.mubr.bf16.gmra.mrb[16].mxu0 %v1394_v34  ;;  %785 = vmatmul.mubr.bf16.gmra.mrb[16].mxu1 %v1395_v35 }
  0x48   : > { %728 = vmatprep.mubr.bf16.mxu0 %v1396_v36  ;;  %792 = vmatprep.mubr.bf16.mxu1 %v1398_v37 }
  0x4f   : > { %729 = vmatmul.mubr.bf16.gmra.mrb[20].mxu0 %v1400_v38  ;;  %793 = vmatmul.mubr.bf16.gmra.mrb[20].mxu1 %v1401_v39 }
  0x50   : > { %736 = vmatprep.mubr.bf16.mxu0 %v1402_v40  ;;  %800 = vmatprep.mubr.bf16.mxu1 %v1404_v41 }
  0x57   : > { %737 = vmatmul.mubr.bf16.gmra.mrb[24].mxu0 %v1406_v42  ;;  %801 = vmatmul.mubr.bf16.gmra.mrb[24].mxu1 %v1407_v43 }
  0x58   : > { %744 = vmatprep.mubr.bf16.mxu0 %v1408_v44  ;;  %808 = vmatprep.mubr.bf16.mxu1 %v1410_v45 }
  0x5f   : > { %745 = vmatmul.mubr.bf16.gmra.mrb[28].mxu0 %v1412_v46  ;;  %809 = vmatmul.mubr.bf16.gmra.mrb[28].mxu1 %v1413_v47 }
  0xfa   : > { %v1213_v48 = vpop.f32.mrb[0].mxu0  ;;  %v1261_v49 = vpop.f32.mrb[0].mxu1 }
  0xfb   : > { %v1214_v50 = vpop.f32.mrb[1].mxu0  ;;  %v1262_v51 = vpop.f32.mrb[1].mxu1 }
  0xfc   : > { %v1215_v52 = vadd.f32 %v1214_v50, %v1213_v48  ;;  %v1263_v53 = vadd.f32 %v1262_v51, %v1261_v49  ;;  %v1216_v54 = vpop.f32.mrb[2].mxu0  ;;  %v1264_v55 = vpop.f32.mrb[2].mxu1 }
  0xfd   : > { %v1217_v57 = vpop.f32.mrb[3].mxu0  ;;  %v1265_v58 = vpop.f32.mrb[3].mxu1 }
  0xfe   : > { %v1218_v59 = vadd.f32 %v1217_v57, %v1216_v54  ;;  %v1266_v60 = vadd.f32 %v1265_v58, %v1264_v55  ;;  %v923_v61 = vadd.f32 %v1215_v52, %v1569_v56  ;;  %v939_v62 = vadd.f32 %v1263_v53, %v1569_v56 }
 0x100   : > { %v955_v63 = vmax.f32 %v923_v61, 0.0  ;;  %v971_v0 = vmax.f32 %v939_v62, 0.0  ;;  %v924_v1 = vadd.f32 %v1218_v59, %v1569_v56  ;;  %v940_v2 = vadd.f32 %v1266_v60, %v1569_v56 }
 0x102   : > { %v1219_v3 = vpop.f32.mrb[4].mxu0  ;;  %v1267_v4 = vpop.f32.mrb[4].mxu1  ;;  %987 = vst [vmem:[%s1578_s8] sm:$0xff] %v955_v63  ;;  %1003 = vst [vmem:[%s1578_s8 + $0x80] sm:$0xff] %v971_v0  ;;  %v956_v7 = vmax.f32 %v924_v1, 0.0  ;;  %v972_v8 = vmax.f32 %v940_v2, 0.0 }
 0x103   : > { %v1220_v5 = vpop.f32.mrb[5].mxu0  ;;  %v1268_v6 = vpop.f32.mrb[5].mxu1 }
 0x104   : > { %v1221_v9 = vadd.f32 %v1220_v5, %v1219_v3  ;;  %v1269_v10 = vadd.f32 %v1268_v6, %v1267_v4  ;;  %v1222_v11 = vpop.f32.mrb[6].mxu0  ;;  %v1270_v12 = vpop.f32.mrb[6].mxu1  ;;  %988 = vst [vmem:[%s1578_s8 + $0x8] sm:$0xff] %v956_v7  ;;  %1004 = vst [vmem:[%s1578_s8 + $0x88] sm:$0xff] %v972_v8 }
 0x105   : > { %v1223_v13 = vpop.f32.mrb[7].mxu0  ;;  %v1271_v14 = vpop.f32.mrb[7].mxu1 }
 0x106   : > { %v1224_v15 = vadd.f32 %v1223_v13, %v1222_v11  ;;  %v1272_v16 = vadd.f32 %v1271_v14, %v1270_v12  ;;  %v925_v17 = vadd.f32 %v1221_v9, %v1569_v56  ;;  %v941_v18 = vadd.f32 %v1269_v10, %v1569_v56 }
 0x108   : > { %v957_v19 = vmax.f32 %v925_v17, 0.0  ;;  %v973_v20 = vmax.f32 %v941_v18, 0.0  ;;  %v926_v21 = vadd.f32 %v1224_v15, %v1569_v56  ;;  %v942_v22 = vadd.f32 %v1272_v16, %v1569_v56 }
 0x10a   : > { %v1225_v23 = vpop.f32.mrb[8].mxu0  ;;  %v1273_v24 = vpop.f32.mrb[8].mxu1  ;;  %989 = vst [vmem:[%s1578_s8 + $0x10] sm:$0xff] %v957_v19  ;;  %1005 = vst [vmem:[%s1578_s8 + $0x90] sm:$0xff] %v973_v20  ;;  %v958_v27 = vmax.f32 %v926_v21, 0.0  ;;  %v974_v28 = vmax.f32 %v942_v22, 0.0 }
 0x10b   : > { %v1226_v25 = vpop.f32.mrb[9].mxu0  ;;  %v1274_v26 = vpop.f32.mrb[9].mxu1 }
 0x10c   : > { %v1227_v29 = vadd.f32 %v1226_v25, %v1225_v23  ;;  %v1275_v30 = vadd.f32 %v1274_v26, %v1273_v24  ;;  %v1228_v31 = vpop.f32.mrb[10].mxu0  ;;  %v1276_v32 = vpop.f32.mrb[10].mxu1  ;;  %990 = vst [vmem:[%s1578_s8 + $0x18] sm:$0xff] %v958_v27  ;;  %1006 = vst [vmem:[%s1578_s8 + $0x98] sm:$0xff] %v974_v28 }
 0x10d   : > { %v1229_v33 = vpop.f32.mrb[11].mxu0  ;;  %v1277_v34 = vpop.f32.mrb[11].mxu1 }
 0x10e   : > { %v1230_v35 = vadd.f32 %v1229_v33, %v1228_v31  ;;  %v1278_v36 = vadd.f32 %v1277_v34, %v1276_v32  ;;  %v927_v37 = vadd.f32 %v1227_v29, %v1569_v56  ;;  %v943_v38 = vadd.f32 %v1275_v30, %v1569_v56 }
 0x110   : > { %v959_v39 = vmax.f32 %v927_v37, 0.0  ;;  %v975_v40 = vmax.f32 %v943_v38, 0.0  ;;  %v928_v41 = vadd.f32 %v1230_v35, %v1569_v56  ;;  %v944_v42 = vadd.f32 %v1278_v36, %v1569_v56 }
 0x112   : > { %v1231_v43 = vpop.f32.mrb[12].mxu0  ;;  %v1279_v44 = vpop.f32.mrb[12].mxu1  ;;  %991 = vst [vmem:[%s1578_s8 + $0x20] sm:$0xff] %v959_v39  ;;  %1007 = vst [vmem:[%s1578_s8 + $0xa0] sm:$0xff] %v975_v40  ;;  %v960_v47 = vmax.f32 %v928_v41, 0.0  ;;  %v976_v48 = vmax.f32 %v944_v42, 0.0 }
 0x113   : > { %v1232_v45 = vpop.f32.mrb[13].mxu0  ;;  %v1280_v46 = vpop.f32.mrb[13].mxu1 }
 0x114   : > { %v1233_v49 = vadd.f32 %v1232_v45, %v1231_v43  ;;  %v1281_v50 = vadd.f32 %v1280_v46, %v1279_v44  ;;  %v1234_v51 = vpop.f32.mrb[14].mxu0  ;;  %v1282_v52 = vpop.f32.mrb[14].mxu1  ;;  %992 = vst [vmem:[%s1578_s8 + $0x28] sm:$0xff] %v960_v47  ;;  %1008 = vst [vmem:[%s1578_s8 + $0xa8] sm:$0xff] %v976_v48 }
 0x115   : > { %v1235_v53 = vpop.f32.mrb[15].mxu0  ;;  %v1283_v54 = vpop.f32.mrb[15].mxu1 }
 0x116   : > { %v1236_v55 = vadd.f32 %v1235_v53, %v1234_v51  ;;  %v1284_v57 = vadd.f32 %v1283_v54, %v1282_v52  ;;  %v929_v58 = vadd.f32 %v1233_v49, %v1569_v56  ;;  %v945_v59 = vadd.f32 %v1281_v50, %v1569_v56 }
 0x118   : > { %v961_v60 = vmax.f32 %v929_v58, 0.0  ;;  %v977_v61 = vmax.f32 %v945_v59, 0.0  ;;  %v930_v62 = vadd.f32 %v1236_v55, %v1569_v56  ;;  %v946_v63 = vadd.f32 %v1284_v57, %v1569_v56 }
 0x11a   : > { %v1237_v0 = vpop.f32.mrb[16].mxu0  ;;  %v1285_v1 = vpop.f32.mrb[16].mxu1  ;;  %993 = vst [vmem:[%s1578_s8 + $0x30] sm:$0xff] %v961_v60  ;;  %1009 = vst [vmem:[%s1578_s8 + $0xb0] sm:$0xff] %v977_v61  ;;  %v962_v4 = vmax.f32 %v930_v62, 0.0  ;;  %v978_v5 = vmax.f32 %v946_v63, 0.0 }
 0x11b   : > { %v1238_v2 = vpop.f32.mrb[17].mxu0  ;;  %v1286_v3 = vpop.f32.mrb[17].mxu1 }
 0x11c   : > { %v1239_v6 = vadd.f32 %v1238_v2, %v1237_v0  ;;  %v1287_v7 = vadd.f32 %v1286_v3, %v1285_v1  ;;  %v1240_v8 = vpop.f32.mrb[18].mxu0  ;;  %v1288_v9 = vpop.f32.mrb[18].mxu1  ;;  %994 = vst [vmem:[%s1578_s8 + $0x38] sm:$0xff] %v962_v4  ;;  %1010 = vst [vmem:[%s1578_s8 + $0xb8] sm:$0xff] %v978_v5 }
 0x11d   : > { %v1241_v10 = vpop.f32.mrb[19].mxu0  ;;  %v1289_v11 = vpop.f32.mrb[19].mxu1 }
 0x11e   : > { %v1242_v12 = vadd.f32 %v1241_v10, %v1240_v8  ;;  %v1290_v13 = vadd.f32 %v1289_v11, %v1288_v9  ;;  %v931_v14 = vadd.f32 %v1239_v6, %v1569_v56  ;;  %v947_v15 = vadd.f32 %v1287_v7, %v1569_v56 }
 0x120   : > { %v963_v16 = vmax.f32 %v931_v14, 0.0  ;;  %v979_v17 = vmax.f32 %v947_v15, 0.0  ;;  %v932_v18 = vadd.f32 %v1242_v12, %v1569_v56  ;;  %v948_v19 = vadd.f32 %v1290_v13, %v1569_v56 }
 0x122   : > { %v1243_v20 = vpop.f32.mrb[20].mxu0  ;;  %v1291_v21 = vpop.f32.mrb[20].mxu1  ;;  %995 = vst [vmem:[%s1578_s8 + $0x40] sm:$0xff] %v963_v16  ;;  %1011 = vst [vmem:[%s1578_s8 + $0xc0] sm:$0xff] %v979_v17  ;;  %v964_v24 = vmax.f32 %v932_v18, 0.0  ;;  %v980_v25 = vmax.f32 %v948_v19, 0.0 }
 0x123   : > { %v1244_v22 = vpop.f32.mrb[21].mxu0  ;;  %v1292_v23 = vpop.f32.mrb[21].mxu1 }
 0x124   : > { %v1245_v26 = vadd.f32 %v1244_v22, %v1243_v20  ;;  %v1293_v27 = vadd.f32 %v1292_v23, %v1291_v21  ;;  %v1246_v28 = vpop.f32.mrb[22].mxu0  ;;  %v1294_v29 = vpop.f32.mrb[22].mxu1  ;;  %996 = vst [vmem:[%s1578_s8 + $0x48] sm:$0xff] %v964_v24  ;;  %1012 = vst [vmem:[%s1578_s8 + $0xc8] sm:$0xff] %v980_v25 }
 0x125   : > { %v1247_v30 = vpop.f32.mrb[23].mxu0  ;;  %v1295_v31 = vpop.f32.mrb[23].mxu1 }
 0x126   : > { %v1248_v32 = vadd.f32 %v1247_v30, %v1246_v28  ;;  %v1296_v33 = vadd.f32 %v1295_v31, %v1294_v29  ;;  %v933_v34 = vadd.f32 %v1245_v26, %v1569_v56  ;;  %v949_v35 = vadd.f32 %v1293_v27, %v1569_v56 }
 0x128   : > { %v965_v36 = vmax.f32 %v933_v34, 0.0  ;;  %v981_v37 = vmax.f32 %v949_v35, 0.0  ;;  %v934_v38 = vadd.f32 %v1248_v32, %v1569_v56  ;;  %v950_v39 = vadd.f32 %v1296_v33, %v1569_v56 }
 0x12a   : > { %v1249_v40 = vpop.f32.mrb[24].mxu0  ;;  %v1297_v41 = vpop.f32.mrb[24].mxu1  ;;  %997 = vst [vmem:[%s1578_s8 + $0x50] sm:$0xff] %v965_v36  ;;  %1013 = vst [vmem:[%s1578_s8 + $0xd0] sm:$0xff] %v981_v37  ;;  %v966_v44 = vmax.f32 %v934_v38, 0.0  ;;  %v982_v45 = vmax.f32 %v950_v39, 0.0 }
 0x12b   : > { %v1250_v42 = vpop.f32.mrb[25].mxu0  ;;  %v1298_v43 = vpop.f32.mrb[25].mxu1 }
 0x12c   : > { %v1251_v46 = vadd.f32 %v1250_v42, %v1249_v40  ;;  %v1299_v47 = vadd.f32 %v1298_v43, %v1297_v41  ;;  %v1252_v48 = vpop.f32.mrb[26].mxu0  ;;  %v1300_v49 = vpop.f32.mrb[26].mxu1  ;;  %998 = vst [vmem:[%s1578_s8 + $0x58] sm:$0xff] %v966_v44  ;;  %1014 = vst [vmem:[%s1578_s8 + $0xd8] sm:$0xff] %v982_v45 }
 0x12d   : > { %v1253_v50 = vpop.f32.mrb[27].mxu0  ;;  %v1301_v51 = vpop.f32.mrb[27].mxu1 }
 0x12e   : > { %v1254_v52 = vadd.f32 %v1253_v50, %v1252_v48  ;;  %v1302_v53 = vadd.f32 %v1301_v51, %v1300_v49  ;;  %v935_v54 = vadd.f32 %v1251_v46, %v1569_v56  ;;  %v951_v55 = vadd.f32 %v1299_v47, %v1569_v56 }
 0x130   : > { %v967_v57 = vmax.f32 %v935_v54, 0.0  ;;  %v983_v58 = vmax.f32 %v951_v55, 0.0  ;;  %v936_v59 = vadd.f32 %v1254_v52, %v1569_v56  ;;  %v952_v60 = vadd.f32 %v1302_v53, %v1569_v56 }
 0x132   : > { %v1255_v61 = vpop.f32.mrb[28].mxu0  ;;  %v1303_v62 = vpop.f32.mrb[28].mxu1  ;;  %999 = vst [vmem:[%s1578_s8 + $0x60] sm:$0xff] %v967_v57  ;;  %1015 = vst [vmem:[%s1578_s8 + $0xe0] sm:$0xff] %v983_v58  ;;  %v968_v1 = vmax.f32 %v936_v59, 0.0  ;;  %v984_v2 = vmax.f32 %v952_v60, 0.0 }
 0x133   : > { %v1256_v63 = vpop.f32.mrb[29].mxu0  ;;  %v1304_v0 = vpop.f32.mrb[29].mxu1 }
 0x134   : > { %v1257_v3 = vadd.f32 %v1256_v63, %v1255_v61  ;;  %v1305_v4 = vadd.f32 %v1304_v0, %v1303_v62  ;;  %v1258_v5 = vpop.f32.mrb[30].mxu0  ;;  %v1306_v6 = vpop.f32.mrb[30].mxu1  ;;  %1000 = vst [vmem:[%s1578_s8 + $0x68] sm:$0xff] %v968_v1  ;;  %1016 = vst [vmem:[%s1578_s8 + $0xe8] sm:$0xff] %v984_v2 }
 0x135   : > { %v1259_v7 = vpop.f32.mrb[31].mxu0  ;;  %v1307_v8 = vpop.f32.mrb[31].mxu1 }
 0x136   : > { %v1260_v9 = vadd.f32 %v1259_v7, %v1258_v5  ;;  %v1308_v10 = vadd.f32 %v1307_v8, %v1306_v6  ;;  %v937_v11 = vadd.f32 %v1257_v3, %v1569_v56  ;;  %v953_v12 = vadd.f32 %v1305_v4, %v1569_v56 }
 0x138   : > { %v969_v13 = vmax.f32 %v937_v11, 0.0  ;;  %v985_v14 = vmax.f32 %v953_v12, 0.0  ;;  %v938_v15 = vadd.f32 %v1260_v9, %v1569_v56  ;;  %v954_v16 = vadd.f32 %v1308_v10, %v1569_v56 }
 0x13a   : > { %1001 = vst [vmem:[%s1578_s8 + $0x70] sm:$0xff] %v969_v13  ;;  %1017 = vst [vmem:[%s1578_s8 + $0xf0] sm:$0xff] %v985_v14  ;;  %v970_v17 = vmax.f32 %v938_v15, 0.0  ;;  %v986_v18 = vmax.f32 %v954_v16, 0.0 }
 0x13c   : > { %1002 = vst [vmem:[%s1578_s8 + $0x78] sm:$0xff] %v970_v17  ;;  %1018 = vst [vmem:[%s1578_s8 + $0xf8] sm:$0xff] %v986_v18 }
 0x13d PF: > { %s13_s14 = sadd.s32 1, %s1436_s14   ;;  %s1655_s12 = smov %s1432_s13 }
 0x13e   : > { %p10_p5 = scmp.ge.s32.totalorder %s13_s14, 4   ;;  %s1656_s13 = smov %s1658_s15 }
 0x140   :  { %12 = sbr.rel (!%p10_p5) target bundleno = 2 (0x2), region = 76 }

// kernel: forward.33
= control target key start
LH: loop header
LB: loop body
LE: loop exit
PB: predicated region body
PF: predicated region fallthrough
CT: control target
= control target key end

     0   :  { %s603_s1 = inlined_call_operand.vmem [shape: bf16[128,128], index: 1, kind: input, shape index: {}]   ;;  %s604_s0 = inlined_call_operand.vmem [shape: bf16[128,128], index: 0, kind: input, shape index: {}]   ;;  %s605_s2 = inlined_call_operand.vmem [shape: f32[1,128], index: 2, kind: input, shape index: {}]   ;;  %s606_s3 = inlined_call_operand.vmem [shape: f32[128,128], index: 3, kind: output, shape index: {}]  }
   0x1   :  { %v468_v0 = vld [vmem:[%s603_s1] sm:$0xff]   ;;  %v469_v1 = vld [vmem:[%s603_s1 + $0x8] sm:$0xff]   ;;  %v470_v2 = vld [vmem:[%s603_s1 + $0x10] sm:$0xff]  }
   0x2   :  { %419 = vmatprep.subr.bf16.mxu0 %v468_v0  ;;  %451 = vmatprep.subr.bf16.mxu1 %v468_v0  ;;  %v471_v3 = vld [vmem:[%s603_s1 + $0x18] sm:$0xff]   ;;  %v476_v4 = vld [vmem:[%s604_s0] sm:$0xff]   ;;  %v473_v7 = vld [vmem:[%s603_s1 + $0x28] sm:$0xff]  }
   0x3   :  { %420 = vmatpush3.bf16.msra.mxu0 %v468_v0  ;;  %459 = vmatpush3.bf16.msra.mxu1 %v468_v0  ;;  %v477_v5 = vld [vmem:[%s604_s0 + $0x20] sm:$0xff]   ;;  %v474_v8 = vld [vmem:[%s603_s1 + $0x30] sm:$0xff]   ;;  %v475_v9 = vld [vmem:[%s603_s1 + $0x38] sm:$0xff]  }
   0x4   :  { %421 = vmatprep.subr.bf16.mxu0 %v469_v1  ;;  %452 = vmatprep.subr.bf16.mxu1 %v469_v1  ;;  %v472_v6 = vld [vmem:[%s603_s1 + $0x20] sm:$0xff]   ;;  %v478_v10 = vld [vmem:[%s604_s0 + $0x8] sm:$0xff]   ;;  %v480_v12 = vld [vmem:[%s604_s0 + $0x10] sm:$0xff]  }
   0x5   :  { %435 = vmatprep.mubr.bf16.mxu0 %v476_v4  ;;  %443 = vmatprep.mubr.bf16.mxu1 %v477_v5  ;;  %v479_v11 = vld [vmem:[%s604_s0 + $0x28] sm:$0xff]   ;;  %v481_v13 = vld [vmem:[%s604_s0 + $0x30] sm:$0xff]   ;;  %v482_v14 = vld [vmem:[%s604_s0 + $0x18] sm:$0xff]  }
   0x6   :  { %v483_v15 = vld [vmem:[%s604_s0 + $0x38] sm:$0xff]   ;;  %v402_v17 = vld [vmem:[%s605_s2] ss:$0 sm:$0xff] }
   0x7   :  { %422 = vmatpush3.bf16.msra.mxu0 %v469_v1  ;;  %460 = vmatpush3.bf16.msra.mxu1 %v469_v1 }
   0x8   :  { %423 = vmatprep.subr.bf16.mxu0 %v470_v2  ;;  %453 = vmatprep.subr.bf16.mxu1 %v470_v2 }
   0xb   :  { %424 = vmatpush3.bf16.msra.mxu0 %v470_v2  ;;  %461 = vmatpush3.bf16.msra.mxu1 %v470_v2 }
   0xc   :  { %425 = vmatprep.subr.bf16.mxu0 %v471_v3  ;;  %454 = vmatprep.subr.bf16.mxu1 %v471_v3 }
   0xf   :  { %426 = vmatpush3.bf16.msra.mxu0 %v471_v3  ;;  %462 = vmatpush3.bf16.msra.mxu1 %v471_v3 }
  0x10   :  { %427 = vmatprep.subr.bf16.mxu0 %v472_v6  ;;  %455 = vmatprep.subr.bf16.mxu1 %v472_v6 }
  0x13   :  { %428 = vmatpush3.bf16.msra.mxu0 %v472_v6  ;;  %463 = vmatpush3.bf16.msra.mxu1 %v472_v6 }
  0x14   :  { %429 = vmatprep.subr.bf16.mxu0 %v473_v7  ;;  %456 = vmatprep.subr.bf16.mxu1 %v473_v7 }
  0x17   :  { %430 = vmatpush3.bf16.msra.mxu0 %v473_v7  ;;  %464 = vmatpush3.bf16.msra.mxu1 %v473_v7 }
  0x18   :  { %431 = vmatprep.subr.bf16.mxu0 %v474_v8  ;;  %457 = vmatprep.subr.bf16.mxu1 %v474_v8 }
  0x1b   :  { %432 = vmatpush3.bf16.msra.mxu0 %v474_v8  ;;  %465 = vmatpush3.bf16.msra.mxu1 %v474_v8 }
  0x1c   :  { %433 = vmatprep.subr.bf16.mxu0 %v475_v9  ;;  %458 = vmatprep.subr.bf16.mxu1 %v475_v9 }
  0x1f   :  { %434 = vmatpush3.bf16.msra.mxu0 %v475_v9  ;;  %466 = vmatpush3.bf16.msra.mxu1 %v475_v9 }
  0x22   :  { %436 = vmatmul.mubr.bf16.vlgmr.msra.gmra.mrb[0].mxu0 %v478_v10  ;;  %444 = vmatmul.mubr.bf16.vlgmr.msra.gmra.mrb[0].mxu1 %v479_v11 }
  0x23   :  { %439 = vmatprep.mubr.bf16.mxu0 %v480_v12  ;;  %447 = vmatprep.mubr.bf16.mxu1 %v481_v13 }
  0x2a   :  { %440 = vmatmul.mubr.bf16.gmra.mrb[4].mxu0 %v482_v14  ;;  %448 = vmatmul.mubr.bf16.gmra.mrb[4].mxu1 %v483_v15 }
  0xf5   :  { %v437_v16 = vpop.f32.mrb[0].mxu0  ;;  %v445_v18 = vpop.f32.mrb[0].mxu1 }
  0xf6   :  { %v213_v19 = vpop.f32.mrb[1].mxu0  ;;  %v245_v20 = vpop.f32.mrb[1].mxu1  ;;  %v336_v23 = vadd.f32 %v437_v16, %v402_v17  ;;  %v344_v24 = vadd.f32 %v445_v18, %v402_v17 }
  0xf7   :  { %v438_v21 = vpop.f32.mrb[2].mxu0  ;;  %v446_v22 = vpop.f32.mrb[2].mxu1  ;;  %v334_v27 = vadd.f32 %v402_v17, %v213_v19  ;;  %v342_v28 = vadd.f32 %v402_v17, %v245_v20 }
  0xf8   :  { %v216_v25 = vpop.f32.mrb[3].mxu0  ;;  %v248_v26 = vpop.f32.mrb[3].mxu1  ;;  %v352_v29 = vmax.f32 %v336_v23, 0.0  ;;  %v360_v30 = vmax.f32 %v344_v24, 0.0  ;;  %v337_v31 = vadd.f32 %v438_v21, %v402_v17  ;;  %v345_v32 = vadd.f32 %v446_v22, %v402_v17 }
  0xf9   :  { %v350_v33 = vmax.f32 %v334_v27, 0.0  ;;  %v358_v34 = vmax.f32 %v342_v28, 0.0  ;;  %v335_v35 = vadd.f32 %v402_v17, %v216_v25  ;;  %v343_v36 = vadd.f32 %v402_v17, %v248_v26 }
  0xfa   :  { %368 = vst [vmem:[%s606_s3 + $0x10] sm:$0xff] %v352_v29  ;;  %376 = vst [vmem:[%s606_s3 + $0x50] sm:$0xff] %v360_v30  ;;  %v353_v37 = vmax.f32 %v337_v31, 0.0  ;;  %v361_v38 = vmax.f32 %v345_v32, 0.0 }
  0xfb   :  { %366 = vst [vmem:[%s606_s3] sm:$0xff] %v350_v33  ;;  %374 = vst [vmem:[%s606_s3 + $0x40] sm:$0xff] %v358_v34  ;;  %v351_v39 = vmax.f32 %v335_v35, 0.0  ;;  %v359_v40 = vmax.f32 %v343_v36, 0.0 }
  0xfc   :  { %369 = vst [vmem:[%s606_s3 + $0x18] sm:$0xff] %v353_v37  ;;  %377 = vst [vmem:[%s606_s3 + $0x58] sm:$0xff] %v361_v38 }
  0xfd   :  { %v441_v41 = vpop.f32.mrb[4].mxu0  ;;  %v449_v42 = vpop.f32.mrb[4].mxu1  ;;  %367 = vst [vmem:[%s606_s3 + $0x8] sm:$0xff] %v351_v39  ;;  %375 = vst [vmem:[%s606_s3 + $0x48] sm:$0xff] %v359_v40 }
  0xfe   :  { %v229_v43 = vpop.f32.mrb[5].mxu0  ;;  %v261_v44 = vpop.f32.mrb[5].mxu1  ;;  %v340_v47 = vadd.f32 %v441_v41, %v402_v17  ;;  %v348_v48 = vadd.f32 %v449_v42, %v402_v17 }
  0xff   :  { %v442_v45 = vpop.f32.mrb[6].mxu0  ;;  %v450_v46 = vpop.f32.mrb[6].mxu1  ;;  %v338_v51 = vadd.f32 %v402_v17, %v229_v43  ;;  %v346_v52 = vadd.f32 %v402_v17, %v261_v44 }
 0x100   :  { %v232_v49 = vpop.f32.mrb[7].mxu0  ;;  %v264_v50 = vpop.f32.mrb[7].mxu1  ;;  %v356_v53 = vmax.f32 %v340_v47, 0.0  ;;  %v364_v54 = vmax.f32 %v348_v48, 0.0  ;;  %v341_v55 = vadd.f32 %v442_v45, %v402_v17  ;;  %v349_v56 = vadd.f32 %v450_v46, %v402_v17 }
 0x101   :  { %v354_v57 = vmax.f32 %v338_v51, 0.0  ;;  %v362_v58 = vmax.f32 %v346_v52, 0.0  ;;  %v339_v59 = vadd.f32 %v402_v17, %v232_v49  ;;  %v347_v60 = vadd.f32 %v402_v17, %v264_v50 }
 0x102   :  { %372 = vst [vmem:[%s606_s3 + $0x30] sm:$0xff] %v356_v53  ;;  %380 = vst [vmem:[%s606_s3 + $0x70] sm:$0xff] %v364_v54  ;;  %v357_v61 = vmax.f32 %v341_v55, 0.0  ;;  %v365_v62 = vmax.f32 %v349_v56, 0.0 }
 0x103   :  { %370 = vst [vmem:[%s606_s3 + $0x20] sm:$0xff] %v354_v57  ;;  %378 = vst [vmem:[%s606_s3 + $0x60] sm:$0xff] %v362_v58  ;;  %v355_v63 = vmax.f32 %v339_v59, 0.0  ;;  %v363_v0 = vmax.f32 %v347_v60, 0.0 }
 0x104   :  { %373 = vst [vmem:[%s606_s3 + $0x38] sm:$0xff] %v357_v61  ;;  %381 = vst [vmem:[%s606_s3 + $0x78] sm:$0xff] %v365_v62 }
 0x105   :  { %371 = vst [vmem:[%s606_s3 + $0x28] sm:$0xff] %v355_v63  ;;  %379 = vst [vmem:[%s606_s3 + $0x68] sm:$0xff] %v363_v0 }

// kernel: forward.34
= control target key start
LH: loop header
LB: loop body
LE: loop exit
PB: predicated region body
PF: predicated region fallthrough
CT: control target
= control target key end

     0   :  { %s1655_s0 = inlined_call_operand.vmem [shape: bf16[128,640], index: 0, kind: input, shape index: {}]   ;;  %s1656_s1 = inlined_call_operand.vmem [shape: bf16[640,256], index: 1, kind: input, shape index: {}]   ;;  %s1657_s2 = inlined_call_operand.vmem [shape: f32[1,256], index: 2, kind: input, shape index: {}]   ;;  %s1658_s3 = inlined_call_operand.vmem [shape: f32[128,256], index: 3, kind: output, shape index: {}]  }
   0x1   :  { %1660 = sst [smem:[#allocation6_spill]] %s1655_s0 }
   0x2   :  { %1661 = sst [smem:[#allocation7_spill]] %s1656_s1 }
   0x3   :  { %s1328_s12 = smov 0   ;;  %s1330_s13 = smov 0  }
   0x4   :  { %s1332_s14 = smov 0   ;;  %s1334_s15 = smov 0  }
   0x5   :  { %s1336_s16 = smov 0   ;;  %s1338_s17 = smov 0  }
   0x6   :  { %s1340_s18 = smov 0   ;;  %s1342_s19 = smov 0  }
   0x7   :  { %s1344_s20 = smov 0   ;;  %s1346_s21 = smov 0  }
   0x8   :  { %s1348_s22 = smov 0  }
   0x9 LB: > { %s1012_s23 = sadd.s32 4294967295, %s1305_s22   ;;  %s25_s24 = sadd.s32 1, %s1297_s20  ;;  %s1305_s22 = sphi %s1348_s22, %s13_s22   ;;  %s1301_s21 = sphi %s1346_s21, %s1678_s21   ;;  %s1297_s20 = sphi %s1344_s20, %s1677_s20   ;;  %s1293_s19 = sphi %s1342_s19, %s1676_s19   ;;  %s1289_s18 = sphi %s1340_s18, %s1675_s18   ;;  %s1285_s17 = sphi %s1338_s17, %s1674_s17   ;;  %s1281_s16 = sphi %s1336_s16, %s1673_s16   ;;  %s1277_s15 = sphi %s1334_s15, %s1672_s15   ;;  %s1273_s14 = sphi %s1332_s14, %s1671_s14   ;;  %s1269_s13 = sphi %s1330_s13, %s1670_s13   ;;  %s1265_s12 = sphi %s1328_s12, %s1669_s12  }
   0xa   : > { %p26_p0 = scmp.ge.s32.totalorder %s25_s24, 5  ;;  %s28_s25 = sadd.s32 1, %s1301_s21 }
   0xb   : > { %s41_s26 = sadd.s32 1, %s1285_s17  ;;  %p48_p1 = scmp.ne.s32.totalorder %s1285_s17, %s1281_s16 }
   0xc   : > { %s1680_s24 = smov (%p26_p0, %s25_s24), 0  ;;  %s1682_s25 = smov (!%p26_p0, %s28_s25), %s1301_s21 }
   0xd   : > { %s37_s27 = ssub.s32 %s1297_s20, %s1680_s24  ;;  %p49_p2 = scmp.eq.s32.totalorder %s1305_s22, 0 }
   0xe   : > { %p30_p3 = scmp.ge.s32.totalorder %s1682_s25, 2  ;;  %p39_p4 = scmp.eq.s32.totalorder %s37_s27, 0 }
   0xf   : > { %p1395_p5 = por %p49_p2, %p48_p1  ;;  %s69_s29 = sadd.s32 1, %s1277_s15 }
  0x10   : > { %s1684_s25 = smov (%p30_p3, %s1682_s25), 0  ;;  %p76_p6 = scmp.ne.s32.totalorder %s1277_s15, %s1273_s14 }
  0x11   : > { %1663 = sst [smem:[#allocation5_spill]] %s1684_s25  ;;  %s65_s4 = ssub.s32 %s1301_s21, %s1684_s25 }
  0x12   : > { %s1403_s30 = scalar_select %p39_p4, %s1285_s17, %s41_s26  }
  0x13   : > { %s66_s5 = sor.u32 %s65_s4, %s37_s27  ;;  %p121_p7 = scmp.eq.s32.totalorder %s65_s4, 0 }
  0x14   : > { %p67_p8 = scmp.eq.s32.totalorder %s66_s5, 0  ;;  %p1409_p9 = por %p76_p6, %p49_p2 }
  0x15   : > { %s123_s7 = sadd.s32 1, %s1269_s13  ;;  %p133_p10 = scmp.ne.s32.totalorder %s1269_s13, %s1265_s12 }
  0x16   : > { %s1417_s8 = scalar_select %p67_p8, %s1277_s15, %s69_s29  }
  0x17   : > { %s1420_s9 = scalar_select %p121_p7, %s1269_s13, %s123_s7  }
  0x18   : > { %p134_p11 = scmp.eq.s32.totalorder %s1012_s23, 9  ;;  %p1015_p13 = scmp.ge.s32.totalorder %s1305_s22, 10 }
  0x1a   : > { %p1422_p12 = por %p134_p11, %p133_p10  ;;  %156 = sbr.rel (%p1015_p13) target bundleno = 73 (0x49), region = 16 }
  0x21   : > { %159 = sbr.rel (!%p1395_p5) target bundleno = 53 (0x35), region = 20  ;;  %s161_s11 = sand.u32 (%p1395_p5), 1, %s1285_s17  }
  0x22   : > { %s1017_s26 = sshll.u32 (%p1395_p5), %s1297_s20, 2  ;;  %s1016_s27 = sshll.u32 (%p1395_p5), %s161_s11, 6 }
  0x23   : > { %s1666_s0 = sld [smem:[#allocation6_spill]] (%p1395_p5)  ;;  %s163_s23 = scalar_lea.vmem (%p1395_p5), [#allocation2], %s1016_s27 }
  0x29   : > { %s1434_s5 = scalar_lea.vmem %s1666_s0, %s1017_s26 }
  0x2a   : > { %v184_v0 = vld [vmem:[%s1434_s5] sm:$0xf]  ;;  %v186_v1 = vld [vmem:[%s1434_s5 + $0x14] sm:$0xf]  ;;  %v188_v2 = vld [vmem:[%s1434_s5 + $0x28] sm:$0xf] }
  0x2b   : > { %185 = vst [vmem:[%s163_s23] sm:$0xf] %v184_v0  ;;  %187 = vst [vmem:[%s163_s23 + $0x4] sm:$0xf] %v186_v1  ;;  %v190_v3 = vld [vmem:[%s1434_s5 + $0x3c] sm:$0xf] }
  0x2c   : > { %v192_v4 = vld [vmem:[%s1434_s5 + $0x50] sm:$0xf]  ;;  %189 = vst [vmem:[%s163_s23 + $0x8] sm:$0xf] %v188_v2  ;;  %191 = vst [vmem:[%s163_s23 + $0xc] sm:$0xf] %v190_v3 }
  0x2d   : > { %193 = vst [vmem:[%s163_s23 + $0x10] sm:$0xf] %v192_v4  ;;  %v194_v5 = vld [vmem:[%s1434_s5 + $0x64] sm:$0xf]  ;;  %v196_v6 = vld [vmem:[%s1434_s5 + $0x78] sm:$0xf] }
  0x2e   : > { %v198_v7 = vld [vmem:[%s1434_s5 + $0x8c] sm:$0xf]  ;;  %195 = vst [vmem:[%s163_s23 + $0x14] sm:$0xf] %v194_v5  ;;  %197 = vst [vmem:[%s163_s23 + $0x18] sm:$0xf] %v196_v6 }
  0x2f   : > { %199 = vst [vmem:[%s163_s23 + $0x1c] sm:$0xf] %v198_v7  ;;  %v200_v8 = vld [vmem:[%s1434_s5 + $0xa0] sm:$0xf]  ;;  %v202_v9 = vld [vmem:[%s1434_s5 + $0xb4] sm:$0xf] }
  0x30   : > { %v204_v10 = vld [vmem:[%s1434_s5 + $0xc8] sm:$0xf]  ;;  %201 = vst [vmem:[%s163_s23 + $0x20] sm:$0xf] %v200_v8  ;;  %203 = vst [vmem:[%s163_s23 + $0x24] sm:$0xf] %v202_v9 }
  0x31   : > { %205 = vst [vmem:[%s163_s23 + $0x28] sm:$0xf] %v204_v10  ;;  %v206_v11 = vld [vmem:[%s1434_s5 + $0xdc] sm:$0xf]  ;;  %v208_v12 = vld [vmem:[%s1434_s5 + $0xf0] sm:$0xf] }
  0x32   : > { %v210_v13 = vld [vmem:[%s1434_s5 + $0x104] sm:$0xf]  ;;  %207 = vst [vmem:[%s163_s23 + $0x2c] sm:$0xf] %v206_v11  ;;  %209 = vst [vmem:[%s163_s23 + $0x30] sm:$0xf] %v208_v12 }
  0x33   : > { %211 = vst [vmem:[%s163_s23 + $0x34] sm:$0xf] %v210_v13  ;;  %v212_v14 = vld [vmem:[%s1434_s5 + $0x118] sm:$0xf]  ;;  %v214_v15 = vld [vmem:[%s1434_s5 + $0x12c] sm:$0xf] }
  0x34   : > { %213 = vst [vmem:[%s163_s23 + $0x38] sm:$0xf] %v212_v14  ;;  %215 = vst [vmem:[%s163_s23 + $0x3c] sm:$0xf] %v214_v15 }
  0x35 PF: > { %270 = sbr.rel (!%p1409_p9) target bundleno = 73 (0x49), region = 61  ;;  %s272_s28 = sand.u32 (%p1409_p9), 1, %s1277_s15  }
  0x36   : > { %s1049_s7 = sshll.u32 (%p1409_p9), %s1297_s20, 5  ;;  %s1018_s11 = sshll.u32 (%p1409_p9), %s272_s28, 6 }
  0x37   : > { %s277_s26 = sadd.s32 (%p1409_p9), %s1301_s21, %s1049_s7  ;;  %s1667_s1 = sld [smem:[#allocation7_spill]] (%p1409_p9) }
  0x38   : > { %s1021_s27 = sshll.u32 (%p1409_p9), %s277_s26, 2  ;;  %s274_s6 = scalar_lea.vmem (%p1409_p9), [#allocation3], %s1018_s11 }
  0x3d   : > { %s1460_s0 = scalar_lea.vmem %s1667_s1, %s1021_s27 }
  0x3e   : > { %v295_v16 = vld [vmem:[%s1460_s0] sm:$0xf]  ;;  %v297_v17 = vld [vmem:[%s1460_s0 + $0x8] sm:$0xf]  ;;  %v299_v18 = vld [vmem:[%s1460_s0 + $0x10] sm:$0xf] }
  0x3f   : > { %296 = vst [vmem:[%s274_s6] sm:$0xf] %v295_v16  ;;  %298 = vst [vmem:[%s274_s6 + $0x4] sm:$0xf] %v297_v17  ;;  %v301_v19 = vld [vmem:[%s1460_s0 + $0x18] sm:$0xf] }
  0x40   : > { %300 = vst [vmem:[%s274_s6 + $0x8] sm:$0xf] %v299_v18  ;;  %v303_v20 = vld [vmem:[%s1460_s0 + $0x20] sm:$0xf]  ;;  %v305_v21 = vld [vmem:[%s1460_s0 + $0x28] sm:$0xf] }
  0x41   : > { %302 = vst [vmem:[%s274_s6 + $0xc] sm:$0xf] %v301_v19  ;;  %304 = vst [vmem:[%s274_s6 + $0x10] sm:$0xf] %v303_v20  ;;  %v307_v22 = vld [vmem:[%s1460_s0 + $0x30] sm:$0xf] }
  0x42   : > { %306 = vst [vmem:[%s274_s6 + $0x14] sm:$0xf] %v305_v21  ;;  %v309_v23 = vld [vmem:[%s1460_s0 + $0x38] sm:$0xf]  ;;  %v311_v24 = vld [vmem:[%s1460_s0 + $0x40] sm:$0xf] }
  0x43   : > { %308 = vst [vmem:[%s274_s6 + $0x18] sm:$0xf] %v307_v22  ;;  %310 = vst [vmem:[%s274_s6 + $0x1c] sm:$0xf] %v309_v23  ;;  %v313_v25 = vld [vmem:[%s1460_s0 + $0x48] sm:$0xf] }
  0x44   : > { %312 = vst [vmem:[%s274_s6 + $0x20] sm:$0xf] %v311_v24  ;;  %v315_v26 = vld [vmem:[%s1460_s0 + $0x50] sm:$0xf]  ;;  %v317_v27 = vld [vmem:[%s1460_s0 + $0x58] sm:$0xf] }
  0x45   : > { %314 = vst [vmem:[%s274_s6 + $0x24] sm:$0xf] %v313_v25  ;;  %316 = vst [vmem:[%s274_s6 + $0x28] sm:$0xf] %v315_v26  ;;  %v319_v28 = vld [vmem:[%s1460_s0 + $0x60] sm:$0xf] }
  0x46   : > { %318 = vst [vmem:[%s274_s6 + $0x2c] sm:$0xf] %v317_v27  ;;  %v321_v29 = vld [vmem:[%s1460_s0 + $0x68] sm:$0xf]  ;;  %v323_v30 = vld [vmem:[%s1460_s0 + $0x70] sm:$0xf] }
  0x47   : > { %320 = vst [vmem:[%s274_s6 + $0x30] sm:$0xf] %v319_v28  ;;  %322 = vst [vmem:[%s274_s6 + $0x34] sm:$0xf] %v321_v29  ;;  %v325_v31 = vld [vmem:[%s1460_s0 + $0x78] sm:$0xf] }
  0x48   : > { %324 = vst [vmem:[%s274_s6 + $0x38] sm:$0xf] %v323_v30  ;;  %326 = vst [vmem:[%s274_s6 + $0x3c] sm:$0xf] %v325_v31 }
  0x49 PF: > { %p1022_p0 = scmp.ge.s32.totalorder %s1305_s22, 1  ;;  %p386_p1 = scmp.lt.s32.totalorder %s1305_s22, 11 }
  0x4b   : > { %p387_p2 = pnand %p1022_p0, %p386_p1 }
  0x4c   : > { %s393_s5 = sand.u32 (!%p387_p2), 1, %s1281_s16   ;;  %s400_s23 = sand.u32 (!%p387_p2), 1, %s1273_s14  }
  0x4d   : > { %390 = sbr.rel (%p387_p2) target bundleno = 376 (0x178), region = 106  ;;  %s1023_s28 = sshll.u32 (!%p387_p2), %s393_s5, 6 }
  0x4e   : > { %s1024_s7 = sshll.u32 (!%p387_p2), %s400_s23, 6  ;;  %s426_s11 = sand.u32 (!%p387_p2), 1, %s1265_s12  }
  0x4f   : > { %p431_p3 = scmp.lt.s32.totalorder (!%p387_p2), %s1293_s19, 1  ;;  %s1025_s0 = sshll.u32 (!%p387_p2), %s426_s11, 7 }
  0x50   : > { %s1491_s6 = scalar_lea.vmem (!%p387_p2), [#allocation2], %s1023_s28  ;;  %s1493_s1 = scalar_lea.vmem (!%p387_p2), [#allocation3], %s1024_s7 }
  0x51   : > { %s1495_s25 = scalar_lea.vmem (!%p387_p2), [#allocation4], %s1025_s0  ;;  %p1026_p4 = scmp.ne.s32.totalorder (!%p387_p2), %s1289_s18, 0 }
  0x54   : > { %s1485_s26 = scalar_select %p431_p3, %s1293_s19, 1 }
  0x55   : > { %439 = sbr.rel (%p1026_p4) target bundleno = 94 (0x5e), region = 118  ;;  %v1307_v32 = vmov (!%p1026_p4), 0.0  }
  0x56   : > { %s433_s4 = scalar_lea.vmem %s1657_s2, %s1485_s26  ;;  %440 = vst [vmem:[%s1495_s25] sm:$0xff] (!%p1026_p4), %v1307_v32  ;;  %441 = vst [vmem:[%s1495_s25 + $0x8] sm:$0xff] (!%p1026_p4), %v1307_v32 }
  0x57   : > { %442 = vst [vmem:[%s1495_s25 + $0x10] sm:$0xff] (!%p1026_p4), %v1307_v32  ;;  %443 = vst [vmem:[%s1495_s25 + $0x18] sm:$0xff] (!%p1026_p4), %v1307_v32 }
  0x58   : > { %444 = vst [vmem:[%s1495_s25 + $0x20] sm:$0xff] (!%p1026_p4), %v1307_v32  ;;  %445 = vst [vmem:[%s1495_s25 + $0x28] sm:$0xff] (!%p1026_p4), %v1307_v32 }
  0x59   : > { %446 = vst [vmem:[%s1495_s25 + $0x30] sm:$0xff] (!%p1026_p4), %v1307_v32  ;;  %447 = vst [vmem:[%s1495_s25 + $0x38] sm:$0xff] (!%p1026_p4), %v1307_v32 }
  0x5a   : > { %448 = vst [vmem:[%s1495_s25 + $0x40] sm:$0xff] (!%p1026_p4), %v1307_v32  ;;  %449 = vst [vmem:[%s1495_s25 + $0x48] sm:$0xff] (!%p1026_p4), %v1307_v32 }
  0x5b   : > { %450 = vst [vmem:[%s1495_s25 + $0x50] sm:$0xff] (!%p1026_p4), %v1307_v32  ;;  %451 = vst [vmem:[%s1495_s25 + $0x58] sm:$0xff] (!%p1026_p4), %v1307_v32 }
  0x5c   : > { %452 = vst [vmem:[%s1495_s25 + $0x60] sm:$0xff] %v1307_v32  ;;  %453 = vst [vmem:[%s1495_s25 + $0x68] sm:$0xff] %v1307_v32 }
  0x5d   : > { %454 = vst [vmem:[%s1495_s25 + $0x70] sm:$0xff] %v1307_v32  ;;  %455 = vst [vmem:[%s1495_s25 + $0x78] sm:$0xff] %v1307_v32 }
  0x5e PF: > { %v1203_v33 = vld [vmem:[%s1493_s1] sm:$0xff]   ;;  %v1204_v34 = vld [vmem:[%s1493_s1 + $0x8] sm:$0xff]   ;;  %v1205_v35 = vld [vmem:[%s1493_s1 + $0x10] sm:$0xff]   ;;  %p1043_p5 = scmp.ne.s32.totalorder %s1289_s18, 4 }
  0x5f   : > { %1066 = vmatprep.subr.bf16.mxu0 %v1203_v33  ;;  %1098 = vmatprep.subr.bf16.mxu1 %v1203_v33  ;;  %v1206_v36 = vld [vmem:[%s1493_s1 + $0x18] sm:$0xff]   ;;  %v1211_v37 = vld [vmem:[%s1491_s6] sm:$0xff]   ;;  %v1208_v40 = vld [vmem:[%s1493_s1 + $0x28] sm:$0xff]  }
  0x60   : > { %1067 = vmatpush3.bf16.msra.mxu0 %v1203_v33  ;;  %1106 = vmatpush3.bf16.msra.mxu1 %v1203_v33  ;;  %v1212_v38 = vld [vmem:[%s1491_s6 + $0x20] sm:$0xff]   ;;  %v1209_v41 = vld [vmem:[%s1493_s1 + $0x30] sm:$0xff]   ;;  %v1210_v42 = vld [vmem:[%s1493_s1 + $0x38] sm:$0xff]  }
  0x61   : > { %1068 = vmatprep.subr.bf16.mxu0 %v1204_v34  ;;  %1099 = vmatprep.subr.bf16.mxu1 %v1204_v34  ;;  %v1207_v39 = vld [vmem:[%s1493_s1 + $0x20] sm:$0xff]   ;;  %v1213_v43 = vld [vmem:[%s1491_s6 + $0x8] sm:$0xff]   ;;  %v1215_v45 = vld [vmem:[%s1491_s6 + $0x10] sm:$0xff]  }
  0x62   : > { %1082 = vmatprep.mubr.bf16.mxu0 %v1211_v37  ;;  %1090 = vmatprep.mubr.bf16.mxu1 %v1212_v38  ;;  %v1214_v44 = vld [vmem:[%s1491_s6 + $0x28] sm:$0xff]   ;;  %v1216_v46 = vld [vmem:[%s1491_s6 + $0x30] sm:$0xff]   ;;  %v1217_v47 = vld [vmem:[%s1491_s6 + $0x18] sm:$0xff]  }
  0x63   : > { %v1218_v48 = vld [vmem:[%s1491_s6 + $0x38] sm:$0xff]   ;;  %v458_v49 = vld [vmem:[%s1495_s25 + $0x10] sm:$0xff]  ;;  %v456_v51 = vld [vmem:[%s1495_s25] sm:$0xff] }
  0x64   : > { %1069 = vmatpush3.bf16.msra.mxu0 %v1204_v34  ;;  %1107 = vmatpush3.bf16.msra.mxu1 %v1204_v34  ;;  %v466_v50 = vld [vmem:[%s1495_s25 + $0x50] sm:$0xff]  ;;  %v464_v52 = vld [vmem:[%s1495_s25 + $0x40] sm:$0xff]  ;;  %v459_v55 = vld [vmem:[%s1495_s25 + $0x18] sm:$0xff] }
  0x65   : > { %1070 = vmatprep.subr.bf16.mxu0 %v1205_v35  ;;  %1100 = vmatprep.subr.bf16.mxu1 %v1205_v35  ;;  %v467_v56 = vld [vmem:[%s1495_s25 + $0x58] sm:$0xff]  ;;  %v457_v61 = vld [vmem:[%s1495_s25 + $0x8] sm:$0xff]  ;;  %v462_v9 = vld [vmem:[%s1495_s25 + $0x30] sm:$0xff] }
  0x66   : > { %v465_v62 = vld [vmem:[%s1495_s25 + $0x48] sm:$0xff]  ;;  %v470_v10 = vld [vmem:[%s1495_s25 + $0x70] sm:$0xff]  ;;  %v460_v11 = vld [vmem:[%s1495_s25 + $0x20] sm:$0xff] }
  0x67   : > { %v468_v12 = vld [vmem:[%s1495_s25 + $0x60] sm:$0xff]  ;;  %v463_v15 = vld [vmem:[%s1495_s25 + $0x38] sm:$0xff]  ;;  %v461_v21 = vld [vmem:[%s1495_s25 + $0x28] sm:$0xff] }
  0x68   : > { %1071 = vmatpush3.bf16.msra.mxu0 %v1205_v35  ;;  %1108 = vmatpush3.bf16.msra.mxu1 %v1205_v35  ;;  %v471_v16 = vld [vmem:[%s1495_s25 + $0x78] sm:$0xff]  ;;  %v469_v22 = vld [vmem:[%s1495_s25 + $0x68] sm:$0xff]  ;;  %v1044_v34 = vld [vmem:[%s433_s4] ss:$0 sm:$0xff] (!%p1043_p5) }
  0x69   : > { %1072 = vmatprep.subr.bf16.mxu0 %v1206_v36  ;;  %1101 = vmatprep.subr.bf16.mxu1 %v1206_v36 }
  0x6c   : > { %1073 = vmatpush3.bf16.msra.mxu0 %v1206_v36  ;;  %1109 = vmatpush3.bf16.msra.mxu1 %v1206_v36 }
  0x6d   : > { %1074 = vmatprep.subr.bf16.mxu0 %v1207_v39  ;;  %1102 = vmatprep.subr.bf16.mxu1 %v1207_v39 }
  0x70   : > { %1075 = vmatpush3.bf16.msra.mxu0 %v1207_v39  ;;  %1110 = vmatpush3.bf16.msra.mxu1 %v1207_v39 }
  0x71   : > { %1076 = vmatprep.subr.bf16.mxu0 %v1208_v40  ;;  %1103 = vmatprep.subr.bf16.mxu1 %v1208_v40 }
  0x74   : > { %1077 = vmatpush3.bf16.msra.mxu0 %v1208_v40  ;;  %1111 = vmatpush3.bf16.msra.mxu1 %v1208_v40 }
  0x75   : > { %1078 = vmatprep.subr.bf16.mxu0 %v1209_v41  ;;  %1104 = vmatprep.subr.bf16.mxu1 %v1209_v41 }
  0x78   : > { %1079 = vmatpush3.bf16.msra.mxu0 %v1209_v41  ;;  %1112 = vmatpush3.bf16.msra.mxu1 %v1209_v41 }
  0x79   : > { %1080 = vmatprep.subr.bf16.mxu0 %v1210_v42  ;;  %1105 = vmatprep.subr.bf16.mxu1 %v1210_v42 }
  0x7c   : > { %1081 = vmatpush3.bf16.msra.mxu0 %v1210_v42  ;;  %1113 = vmatpush3.bf16.msra.mxu1 %v1210_v42 }
  0x7f   : > { %1083 = vmatmul.mubr.bf16.vlgmr.msra.gmra.mrb[0].mxu0 %v1213_v43  ;;  %1091 = vmatmul.mubr.bf16.vlgmr.msra.gmra.mrb[0].mxu1 %v1214_v44 }
  0x80   : > { %1086 = vmatprep.mubr.bf16.mxu0 %v1215_v45  ;;  %1094 = vmatprep.mubr.bf16.mxu1 %v1216_v46 }
  0x87   : > { %1087 = vmatmul.mubr.bf16.gmra.mrb[4].mxu0 %v1217_v47  ;;  %1095 = vmatmul.mubr.bf16.gmra.mrb[4].mxu1 %v1218_v48 }
 0x152   : > { %v1084_v53 = vpop.f32.mrb[0].mxu0  ;;  %v1092_v54 = vpop.f32.mrb[0].mxu1 }
 0x153   : > { %v699_v57 = vadd.f32 %v1084_v53, %v458_v49  ;;  %v707_v58 = vadd.f32 %v1092_v54, %v466_v50  ;;  %v634_v59 = vpop.f32.mrb[1].mxu0  ;;  %v666_v60 = vpop.f32.mrb[1].mxu1 }
 0x154   : > { %v697_v63 = vadd.f32 %v634_v59, %v456_v51  ;;  %v705_v0 = vadd.f32 %v666_v60, %v464_v52  ;;  %v1085_v1 = vpop.f32.mrb[2].mxu0  ;;  %v1093_v2 = vpop.f32.mrb[2].mxu1 }
 0x155   : > { %715 = vst [vmem:[%s1495_s25 + $0x10] sm:$0xff] %v699_v57  ;;  %723 = vst [vmem:[%s1495_s25 + $0x50] sm:$0xff] %v707_v58  ;;  %v700_v3 = vadd.f32 %v1085_v1, %v459_v55  ;;  %v708_v4 = vadd.f32 %v1093_v2, %v467_v56  ;;  %v637_v5 = vpop.f32.mrb[3].mxu0  ;;  %v669_v6 = vpop.f32.mrb[3].mxu1 }
 0x156   : > { %713 = vst [vmem:[%s1495_s25] sm:$0xff] %v697_v63  ;;  %721 = vst [vmem:[%s1495_s25 + $0x40] sm:$0xff] %v705_v0  ;;  %v698_v7 = vadd.f32 %v637_v5, %v457_v61  ;;  %v706_v8 = vadd.f32 %v669_v6, %v465_v62 }
 0x157   : > { %716 = vst [vmem:[%s1495_s25 + $0x18] sm:$0xff] %v700_v3  ;;  %724 = vst [vmem:[%s1495_s25 + $0x58] sm:$0xff] %v708_v4 }
 0x158   : > { %714 = vst [vmem:[%s1495_s25 + $0x8] sm:$0xff] %v698_v7  ;;  %722 = vst [vmem:[%s1495_s25 + $0x48] sm:$0xff] %v706_v8 }
 0x15a   : > { %v1088_v13 = vpop.f32.mrb[4].mxu0  ;;  %v1096_v14 = vpop.f32.mrb[4].mxu1  ;;  %732 = sbr.rel (%p1043_p5) target bundleno = 366 (0x16e), region = 122 }
 0x15b   : > { %v703_v17 = vadd.f32 %v1088_v13, %v462_v9  ;;  %v711_v18 = vadd.f32 %v1096_v14, %v470_v10  ;;  %v650_v19 = vpop.f32.mrb[5].mxu0  ;;  %v682_v20 = vpop.f32.mrb[5].mxu1 }
 0x15c   : > { %v701_v23 = vadd.f32 %v650_v19, %v460_v11  ;;  %v709_v24 = vadd.f32 %v682_v20, %v468_v12  ;;  %v1089_v25 = vpop.f32.mrb[6].mxu0  ;;  %v1097_v26 = vpop.f32.mrb[6].mxu1  ;;  %v735_v38 = vld [vmem:[%s1495_s25 + $0x10] sm:$0xff] (!%p1043_p5) }
 0x15d   : > { %719 = vst [vmem:[%s1495_s25 + $0x30] sm:$0xff] %v703_v17  ;;  %727 = vst [vmem:[%s1495_s25 + $0x70] sm:$0xff] %v711_v18  ;;  %v704_v27 = vadd.f32 %v1089_v25, %v463_v15  ;;  %v712_v28 = vadd.f32 %v1097_v26, %v471_v16  ;;  %v653_v29 = vpop.f32.mrb[7].mxu0  ;;  %v685_v30 = vpop.f32.mrb[7].mxu1  ;;  %v733_v33 = vld [vmem:[%s1495_s25] sm:$0xff] (!%p1043_p5)  ;;  %v758_v41 = vadd.f32 (!%p1043_p5), %v1044_v34, %v735_v38  ;;  %v743_v53 = vld [vmem:[%s1495_s25 + $0x50] sm:$0xff] (!%p1043_p5) }
 0x15e   : > { %717 = vst [vmem:[%s1495_s25 + $0x20] sm:$0xff] %v701_v23  ;;  %725 = vst [vmem:[%s1495_s25 + $0x60] sm:$0xff] %v709_v24  ;;  %v702_v31 = vadd.f32 %v653_v29, %v461_v21  ;;  %v710_v32 = vadd.f32 %v685_v30, %v469_v22  ;;  %v756_v36 = vadd.f32 (!%p1043_p5), %v1044_v34, %v733_v33  ;;  %v736_v39 = vld [vmem:[%s1495_s25 + $0x18] sm:$0xff] (!%p1043_p5)  ;;  %v741_v51 = vld [vmem:[%s1495_s25 + $0x40] sm:$0xff] (!%p1043_p5) }
 0x15f   : > { %720 = vst [vmem:[%s1495_s25 + $0x38] sm:$0xff] %v704_v27  ;;  %728 = vst [vmem:[%s1495_s25 + $0x78] sm:$0xff] %v712_v28  ;;  %v734_v35 = vld [vmem:[%s1495_s25 + $0x8] sm:$0xff] (!%p1043_p5)  ;;  %v759_v42 = vadd.f32 (!%p1043_p5), %v1044_v34, %v736_v39  ;;  %v774_v54 = vmax.f32 (!%p1043_p5), %v758_v41, 0.0  ;;  %v744_v58 = vld [vmem:[%s1495_s25 + $0x58] sm:$0xff] (!%p1043_p5)  ;;  %v764_v63 = vadd.f32 (!%p1043_p5), %v1044_v34, %v741_v51  ;;  %v766_v4 = vadd.f32 (!%p1043_p5), %v1044_v34, %v743_v53 }
 0x160   : > { %718 = vst [vmem:[%s1495_s25 + $0x28] sm:$0xff] %v702_v31  ;;  %726 = vst [vmem:[%s1495_s25 + $0x68] sm:$0xff] %v710_v32  ;;  %v757_v37 = vadd.f32 (!%p1043_p5), %v1044_v34, %v734_v35  ;;  %v772_v47 = vmax.f32 (!%p1043_p5), %v756_v36, 0.0  ;;  %v742_v52 = vld [vmem:[%s1495_s25 + $0x48] sm:$0xff] (!%p1043_p5)  ;;  %v767_v5 = vadd.f32 (!%p1043_p5), %v1044_v34, %v744_v58 }
 0x161   : > { %v775_v55 = vmax.f32 %v759_v42, 0.0  ;;  %v765_v0 = vadd.f32 %v1044_v34, %v742_v52  ;;  %790 = vst [vmem:[%s1495_s25 + $0x10] sm:$0xff] %v774_v54  ;;  %v780_v7 = vmax.f32 %v764_v63, 0.0  ;;  %v782_v11 = vmax.f32 %v766_v4, 0.0 }
 0x162   : > { %v773_v48 = vmax.f32 %v757_v37, 0.0  ;;  %788 = vst [vmem:[%s1495_s25] sm:$0xff] %v772_v47  ;;  %v783_v12 = vmax.f32 %v767_v5, 0.0 }
 0x163   : > { %791 = vst [vmem:[%s1495_s25 + $0x18] sm:$0xff] %v775_v55  ;;  %v781_v8 = vmax.f32 %v765_v0, 0.0  ;;  %796 = vst [vmem:[%s1495_s25 + $0x40] sm:$0xff] %v780_v7 }
 0x164   : > { %v739_v45 = vld [vmem:[%s1495_s25 + $0x30] sm:$0xff]  ;;  %789 = vst [vmem:[%s1495_s25 + $0x8] sm:$0xff] %v773_v48  ;;  %798 = vst [vmem:[%s1495_s25 + $0x50] sm:$0xff] %v782_v11 }
 0x165   : > { %v737_v40 = vld [vmem:[%s1495_s25 + $0x20] sm:$0xff]  ;;  %v762_v50 = vadd.f32 %v1044_v34, %v739_v45  ;;  %v747_v1 = vld [vmem:[%s1495_s25 + $0x70] sm:$0xff]  ;;  %797 = vst [vmem:[%s1495_s25 + $0x48] sm:$0xff] %v781_v8  ;;  %799 = vst [vmem:[%s1495_s25 + $0x58] sm:$0xff] %v783_v12 }
 0x166   : > { %v760_v43 = vadd.f32 %v1044_v34, %v737_v40  ;;  %v740_v46 = vld [vmem:[%s1495_s25 + $0x38] sm:$0xff]  ;;  %v745_v59 = vld [vmem:[%s1495_s25 + $0x60] sm:$0xff]  ;;  %v770_v10 = vadd.f32 %v1044_v34, %v747_v1 }
 0x167   : > { %v738_v44 = vld [vmem:[%s1495_s25 + $0x28] sm:$0xff]  ;;  %v763_v57 = vadd.f32 %v1044_v34, %v740_v46  ;;  %v778_v62 = vmax.f32 %v762_v50, 0.0  ;;  %v748_v2 = vld [vmem:[%s1495_s25 + $0x78] sm:$0xff]  ;;  %v768_v6 = vadd.f32 %v1044_v34, %v745_v59 }
 0x168   : > { %v761_v49 = vadd.f32 %v1044_v34, %v738_v44  ;;  %v776_v56 = vmax.f32 %v760_v43, 0.0  ;;  %v746_v60 = vld [vmem:[%s1495_s25 + $0x68] sm:$0xff]  ;;  %v771_v14 = vadd.f32 %v1044_v34, %v748_v2  ;;  %v786_v16 = vmax.f32 %v770_v10, 0.0 }
 0x169   : > { %v779_v3 = vmax.f32 %v763_v57, 0.0  ;;  %794 = vst [vmem:[%s1495_s25 + $0x30] sm:$0xff] %v778_v62  ;;  %v769_v9 = vadd.f32 %v1044_v34, %v746_v60  ;;  %v784_v13 = vmax.f32 %v768_v6, 0.0 }
 0x16a   : > { %v777_v61 = vmax.f32 %v761_v49, 0.0  ;;  %792 = vst [vmem:[%s1495_s25 + $0x20] sm:$0xff] %v776_v56  ;;  %v787_v17 = vmax.f32 %v771_v14, 0.0  ;;  %802 = vst [vmem:[%s1495_s25 + $0x70] sm:$0xff] %v786_v16 }
 0x16b   : > { %795 = vst [vmem:[%s1495_s25 + $0x38] sm:$0xff] %v779_v3  ;;  %v785_v15 = vmax.f32 %v769_v9, 0.0  ;;  %800 = vst [vmem:[%s1495_s25 + $0x60] sm:$0xff] %v784_v13 }
 0x16c   : > { %793 = vst [vmem:[%s1495_s25 + $0x28] sm:$0xff] %v777_v61  ;;  %803 = vst [vmem:[%s1495_s25 + $0x78] sm:$0xff] %v787_v17 }
 0x16d   : > { %801 = vst [vmem:[%s1495_s25 + $0x68] sm:$0xff] %v785_v15 }
 0x16e PF: > { %810 = sbr.rel (!%p1422_p12) target bundleno = 376 (0x178), region = 126  ;;  %s1046_s14 = sshll.u32 (%p1422_p12), %s1293_s19, 3  ;;  %v873_v18 = vld [vmem:[%s1495_s25] sm:$0xff] (%p1422_p12)  ;;  %v875_v19 = vld [vmem:[%s1495_s25 + $0x8] sm:$0xff] (%p1422_p12)  ;;  %v879_v21 = vld [vmem:[%s1495_s25 + $0x18] sm:$0xff] (%p1422_p12) }
 0x16f   : > { %s815_s5 = scalar_lea.vmem (%p1422_p12), %s1658_s3, %s1046_s14  ;;  %v889_v26 = vld [vmem:[%s1495_s25 + $0x40] sm:$0xff] (%p1422_p12)  ;;  %v891_v27 = vld [vmem:[%s1495_s25 + $0x48] sm:$0xff] (%p1422_p12)  ;;  %v893_v28 = vld [vmem:[%s1495_s25 + $0x50] sm:$0xff] (%p1422_p12) }
 0x170   : > { %874 = vst [vmem:[%s815_s5] sm:$0xff] (%p1422_p12), %v873_v18  ;;  %876 = vst [vmem:[%s815_s5 + $0x10] sm:$0xff] (%p1422_p12), %v875_v19  ;;  %v895_v29 = vld [vmem:[%s1495_s25 + $0x58] sm:$0xff] (%p1422_p12) }
 0x171   : > { %880 = vst [vmem:[%s815_s5 + $0x30] sm:$0xff] (%p1422_p12), %v879_v21  ;;  %v885_v24 = vld [vmem:[%s1495_s25 + $0x30] sm:$0xff] (%p1422_p12)  ;;  %890 = vst [vmem:[%s815_s5 + $0x80] sm:$0xff] (%p1422_p12), %v889_v26 }
 0x172   : > { %v881_v22 = vld [vmem:[%s1495_s25 + $0x20] sm:$0xff] (%p1422_p12)  ;;  %886 = vst [vmem:[%s815_s5 + $0x60] sm:$0xff] (%p1422_p12), %v885_v24  ;;  %892 = vst [vmem:[%s815_s5 + $0x90] sm:$0xff] (%p1422_p12), %v891_v27  ;;  %v901_v32 = vld [vmem:[%s1495_s25 + $0x70] sm:$0xff] (%p1422_p12) }
 0x173   : > { %882 = vst [vmem:[%s815_s5 + $0x40] sm:$0xff] (%p1422_p12), %v881_v22  ;;  %v887_v25 = vld [vmem:[%s1495_s25 + $0x38] sm:$0xff] (%p1422_p12)  ;;  %894 = vst [vmem:[%s815_s5 + $0xa0] sm:$0xff] (%p1422_p12), %v893_v28  ;;  %v897_v30 = vld [vmem:[%s1495_s25 + $0x60] sm:$0xff] (%p1422_p12) }
 0x174   : > { %v883_v23 = vld [vmem:[%s1495_s25 + $0x28] sm:$0xff] (%p1422_p12)  ;;  %888 = vst [vmem:[%s815_s5 + $0x70] sm:$0xff] (%p1422_p12), %v887_v25  ;;  %896 = vst [vmem:[%s815_s5 + $0xb0] sm:$0xff] (%p1422_p12), %v895_v29  ;;  %v903_v33 = vld [vmem:[%s1495_s25 + $0x78] sm:$0xff] (%p1422_p12) }
 0x175   : > { %v877_v20 = vld [vmem:[%s1495_s25 + $0x10] sm:$0xff]  ;;  %884 = vst [vmem:[%s815_s5 + $0x50] sm:$0xff] %v883_v23  ;;  %v899_v31 = vld [vmem:[%s1495_s25 + $0x68] sm:$0xff]  ;;  %898 = vst [vmem:[%s815_s5 + $0xc0] sm:$0xff] %v897_v30 }
 0x176   : > { %878 = vst [vmem:[%s815_s5 + $0x20] sm:$0xff] %v877_v20  ;;  %900 = vst [vmem:[%s815_s5 + $0xd0] sm:$0xff] %v899_v31 }
 0x177   : > { %902 = vst [vmem:[%s815_s5 + $0xe0] sm:$0xff] %v901_v32  ;;  %904 = vst [vmem:[%s815_s5 + $0xf0] sm:$0xff] %v903_v33 }
 0x178 PF: > { %s13_s22 = sadd.s32 1, %s1305_s22   ;;  %s1668_s10 = sld [smem:[#allocation5_spill]] }
 0x179   : > { %p10_p6 = scmp.ge.s32.totalorder %s13_s22, 12   ;;  %s1669_s12 = smov %s1269_s13 }
 0x17a   : > { %s1670_s13 = smov %s1420_s9  ;;  %s1671_s14 = smov %s1277_s15 }
 0x17b   : > { %s1672_s15 = smov %s1417_s8  ;;  %s1673_s16 = smov %s1285_s17 }
 0x17c   : > { %s1674_s17 = smov %s1403_s30  ;;  %s1675_s18 = smov %s1297_s20 }
 0x17d   : > { %s1676_s19 = smov %s1301_s21  ;;  %s1677_s20 = smov %s1680_s24 }
 0x17e   : > { %s1678_s21 = smov %s1668_s10  ;;  %12 = sbr.rel (!%p10_p6) target bundleno = 9 (0x9), region = 206 }

// kernel: forward.35
= control target key start
LH: loop header
LB: loop body
LE: loop exit
PB: predicated region body
PF: predicated region fallthrough
CT: control target
= control target key end

     0   :  { %s1021_s12 = smov 0   ;;  %s1023_s13 = smov 0   ;;  %s1200_s0 = inlined_call_operand.vmem [shape: bf16[32,256], index: 0, kind: input, shape index: {}]   ;;  %s1201_s1 = inlined_call_operand.vmem [shape: bf16[256,256], index: 1, kind: input, shape index: {}]   ;;  %s1202_s2 = inlined_call_operand.vmem [shape: f32[1,256], index: 2, kind: input, shape index: {}]   ;;  %s1203_s3 = inlined_call_operand.vmem [shape: f32[32,256], index: 3, kind: output, shape index: {}]  }
   0x1   :  { %s1025_s14 = smov 0   ;;  %s1027_s15 = smov 0  }
   0x2   :  { %s1029_s16 = smov 0  }
   0x3 LB: > { %s28_s17 = sadd.s32 1, %s995_s15  ;;  %s819_s18 = sadd.s32 4294967295, %s999_s16   ;;  %s999_s16 = sphi %s1029_s16, %s13_s16   ;;  %s995_s15 = sphi %s1027_s15, %s1208_s15   ;;  %s991_s14 = sphi %s1025_s14, %s1207_s14   ;;  %s987_s13 = sphi %s1023_s13, %s1206_s13   ;;  %s983_s12 = sphi %s1021_s12, %s1205_s12  }
   0x4   : > { %p30_p0 = scmp.ge.s32.totalorder %s28_s17, 2  ;;  %p76_p1 = scmp.ne.s32.totalorder %s987_s13, %s983_s12 }
   0x5   : > { %p77_p2 = scmp.eq.s32.totalorder %s999_s16, 0  ;;  %p134_p4 = scmp.eq.s32.totalorder %s819_s18, 1 }
   0x6   : > { %s1210_s17 = smov (%p30_p0, %s28_s17), 0  ;;  %s69_s20 = sadd.s32 1, %s987_s13 }
   0x7   : > { %p78_p3 = por %p77_p2, %p76_p1  ;;  %s65_s19 = ssub.s32 %s995_s15, %s1210_s17 }
   0x8   : > { %p67_p5 = scmp.eq.s32.totalorder %s65_s19, 0  ;;  %p1056_p6 = por %p134_p4, %p76_p1 }
   0x9   : > { %p823_p7 = scmp.ge.s32.totalorder %s999_s16, 2 }
   0xa   : > { %s1061_s22 = scalar_select %p67_p5, %s987_s13, %s69_s20  }
   0xb   : > { %171 = sbr.rel (%p823_p7) target bundleno = 43 (0x2b), region = 20 }
  0x12   : > { %174 = sbr.rel (!%p78_p3) target bundleno = 43 (0x2b), region = 24  ;;  %s176_s23 = sand.u32 (%p78_p3), 1, %s987_s13  }
  0x13   : > { %s825_s24 = sshll.u32 (%p78_p3), %s995_s15, 2  ;;  %s824_s25 = sshll.u32 (%p78_p3), %s176_s23, 7 }
  0x14   : > { %s1069_s28 = scalar_lea.vmem (%p78_p3), %s1201_s1, %s825_s24  ;;  %s1073_s29 = scalar_lea.vmem (%p78_p3), [#allocation2], %s824_s25 }
  0x15   : > { %v199_v0 = vld [vmem:[%s1069_s28] sm:$0xf] (%p78_p3)  ;;  %v201_v1 = vld [vmem:[%s1069_s28 + $0x8] sm:$0xf] (%p78_p3)  ;;  %v203_v2 = vld [vmem:[%s1069_s28 + $0x10] sm:$0xf] (%p78_p3) }
  0x16   : > { %200 = vst [vmem:[%s1073_s29] sm:$0xf] (%p78_p3), %v199_v0  ;;  %202 = vst [vmem:[%s1073_s29 + $0x4] sm:$0xf] (%p78_p3), %v201_v1  ;;  %v205_v3 = vld [vmem:[%s1069_s28 + $0x18] sm:$0xf] (%p78_p3) }
  0x17   : > { %v207_v4 = vld [vmem:[%s1069_s28 + $0x20] sm:$0xf] (%p78_p3)  ;;  %204 = vst [vmem:[%s1073_s29 + $0x8] sm:$0xf] (%p78_p3), %v203_v2  ;;  %206 = vst [vmem:[%s1073_s29 + $0xc] sm:$0xf] (%p78_p3), %v205_v3 }
  0x18   : > { %208 = vst [vmem:[%s1073_s29 + $0x10] sm:$0xf] (%p78_p3), %v207_v4  ;;  %v209_v5 = vld [vmem:[%s1069_s28 + $0x28] sm:$0xf] (%p78_p3)  ;;  %v211_v6 = vld [vmem:[%s1069_s28 + $0x30] sm:$0xf] (%p78_p3) }
  0x19   : > { %v213_v7 = vld [vmem:[%s1069_s28 + $0x38] sm:$0xf]  ;;  %210 = vst [vmem:[%s1073_s29 + $0x14] sm:$0xf] %v209_v5  ;;  %212 = vst [vmem:[%s1073_s29 + $0x18] sm:$0xf] %v211_v6 }
  0x1a   : > { %214 = vst [vmem:[%s1073_s29 + $0x1c] sm:$0xf] %v213_v7  ;;  %v215_v8 = vld [vmem:[%s1069_s28 + $0x40] sm:$0xf]  ;;  %v217_v9 = vld [vmem:[%s1069_s28 + $0x48] sm:$0xf] }
  0x1b   : > { %v219_v10 = vld [vmem:[%s1069_s28 + $0x50] sm:$0xf]  ;;  %216 = vst [vmem:[%s1073_s29 + $0x20] sm:$0xf] %v215_v8  ;;  %218 = vst [vmem:[%s1073_s29 + $0x24] sm:$0xf] %v217_v9 }
  0x1c   : > { %220 = vst [vmem:[%s1073_s29 + $0x28] sm:$0xf] %v219_v10  ;;  %v221_v11 = vld [vmem:[%s1069_s28 + $0x58] sm:$0xf]  ;;  %v223_v12 = vld [vmem:[%s1069_s28 + $0x60] sm:$0xf] }
  0x1d   : > { %v225_v13 = vld [vmem:[%s1069_s28 + $0x68] sm:$0xf]  ;;  %222 = vst [vmem:[%s1073_s29 + $0x2c] sm:$0xf] %v221_v11  ;;  %224 = vst [vmem:[%s1073_s29 + $0x30] sm:$0xf] %v223_v12 }
  0x1e   : > { %226 = vst [vmem:[%s1073_s29 + $0x34] sm:$0xf] %v225_v13  ;;  %v227_v14 = vld [vmem:[%s1069_s28 + $0x70] sm:$0xf]  ;;  %v229_v15 = vld [vmem:[%s1069_s28 + $0x78] sm:$0xf] }
  0x1f   : > { %v231_v16 = vld [vmem:[%s1069_s28 + $0x80] sm:$0xf]  ;;  %228 = vst [vmem:[%s1073_s29 + $0x38] sm:$0xf] %v227_v14  ;;  %230 = vst [vmem:[%s1073_s29 + $0x3c] sm:$0xf] %v229_v15 }
  0x20   : > { %232 = vst [vmem:[%s1073_s29 + $0x40] sm:$0xf] %v231_v16  ;;  %v233_v17 = vld [vmem:[%s1069_s28 + $0x88] sm:$0xf]  ;;  %v235_v18 = vld [vmem:[%s1069_s28 + $0x90] sm:$0xf] }
  0x21   : > { %v237_v19 = vld [vmem:[%s1069_s28 + $0x98] sm:$0xf]  ;;  %234 = vst [vmem:[%s1073_s29 + $0x44] sm:$0xf] %v233_v17  ;;  %236 = vst [vmem:[%s1073_s29 + $0x48] sm:$0xf] %v235_v18 }
  0x22   : > { %238 = vst [vmem:[%s1073_s29 + $0x4c] sm:$0xf] %v237_v19  ;;  %v239_v20 = vld [vmem:[%s1069_s28 + $0xa0] sm:$0xf]  ;;  %v241_v21 = vld [vmem:[%s1069_s28 + $0xa8] sm:$0xf] }
  0x23   : > { %v243_v22 = vld [vmem:[%s1069_s28 + $0xb0] sm:$0xf]  ;;  %240 = vst [vmem:[%s1073_s29 + $0x50] sm:$0xf] %v239_v20  ;;  %242 = vst [vmem:[%s1073_s29 + $0x54] sm:$0xf] %v241_v21 }
  0x24   : > { %244 = vst [vmem:[%s1073_s29 + $0x58] sm:$0xf] %v243_v22  ;;  %v245_v23 = vld [vmem:[%s1069_s28 + $0xb8] sm:$0xf]  ;;  %v247_v24 = vld [vmem:[%s1069_s28 + $0xc0] sm:$0xf] }
  0x25   : > { %v249_v25 = vld [vmem:[%s1069_s28 + $0xc8] sm:$0xf]  ;;  %246 = vst [vmem:[%s1073_s29 + $0x5c] sm:$0xf] %v245_v23  ;;  %248 = vst [vmem:[%s1073_s29 + $0x60] sm:$0xf] %v247_v24 }
  0x26   : > { %250 = vst [vmem:[%s1073_s29 + $0x64] sm:$0xf] %v249_v25  ;;  %v251_v26 = vld [vmem:[%s1069_s28 + $0xd0] sm:$0xf]  ;;  %v253_v27 = vld [vmem:[%s1069_s28 + $0xd8] sm:$0xf] }
  0x27   : > { %v255_v28 = vld [vmem:[%s1069_s28 + $0xe0] sm:$0xf]  ;;  %252 = vst [vmem:[%s1073_s29 + $0x68] sm:$0xf] %v251_v26  ;;  %254 = vst [vmem:[%s1073_s29 + $0x6c] sm:$0xf] %v253_v27 }
  0x28   : > { %256 = vst [vmem:[%s1073_s29 + $0x70] sm:$0xf] %v255_v28  ;;  %v257_v29 = vld [vmem:[%s1069_s28 + $0xe8] sm:$0xf]  ;;  %v259_v30 = vld [vmem:[%s1069_s28 + $0xf0] sm:$0xf] }
  0x29   : > { %v261_v31 = vld [vmem:[%s1069_s28 + $0xf8] sm:$0xf]  ;;  %258 = vst [vmem:[%s1073_s29 + $0x74] sm:$0xf] %v257_v29  ;;  %260 = vst [vmem:[%s1073_s29 + $0x78] sm:$0xf] %v259_v30 }
  0x2a   : > { %262 = vst [vmem:[%s1073_s29 + $0x7c] sm:$0xf] %v261_v31 }
  0x2b PF: > { %p826_p8 = scmp.ge.s32.totalorder %s999_s16, 1  ;;  %p354_p9 = scmp.lt.s32.totalorder %s999_s16, 3 }
  0x2d   : > { %p355_p10 = pnand %p826_p8, %p354_p9 }
  0x2e   : > { %s361_s30 = sand.u32 (!%p355_p10), 1, %s983_s12   ;;  %v957_v32 = vld [vmem:[%s1200_s0 + $0x4] ss:$8 sps:$4 sm:$0xff] (!%p355_p10)   ;;  %v960_v33 = vld [vmem:[%s1200_s0 + $0x14] ss:$8 sps:$4 sm:$0xff] (!%p355_p10)   ;;  %p409_p11 = scmp.lt.s32.totalorder (!%p355_p10), %s991_s14, 1 }
  0x2f   : > { %358 = sbr.rel (%p355_p10) target bundleno = 312 (0x138), region = 69  ;;  %s827_s4 = sshll.u32 (!%p355_p10), %s361_s30, 7  ;;  %610 = vmatprep.mubr.bf16.mxu0 (!%p355_p10), %v957_v32  ;;  %618 = vmatprep.mubr.bf16.mxu1 (!%p355_p10), %v960_v33  ;;  %v955_v50 = vld [vmem:[%s1200_s0] ss:$8 sps:$4 sm:$0xff] (!%p355_p10)   ;;  %v958_v51 = vld [vmem:[%s1200_s0 + $0x10] ss:$8 sps:$4 sm:$0xff] (!%p355_p10)  }
  0x30   : > { %s1148_s9 = scalar_lea.vmem (!%p355_p10), [#allocation2], %s827_s4  ;;  %s828_s26 = sshll.u32 (!%p355_p10), %s361_s30, 5 }
  0x31   : > { %v939_v34 = vld [vmem:[%s1148_s9 + $0x40] sm:$0xff] (!%p355_p10)   ;;  %v941_v36 = vld [vmem:[%s1148_s9 + $0x48] sm:$0xff] (!%p355_p10)   ;;  %v943_v38 = vld [vmem:[%s1148_s9 + $0x50] sm:$0xff] (!%p355_p10)   ;;  %s395_s27 = scalar_lea.vmem (!%p355_p10), [#allocation3], %s828_s26 }
  0x32   : > { %v940_v35 = vld [vmem:[%s1148_s9] sm:$0xff] (!%p355_p10)   ;;  %854 = vmatprep.subr.bf16.mxu0 (!%p355_p10), %v939_v34  ;;  %882 = vmatprep.subr.bf16.mxu1 (!%p355_p10), %v939_v34  ;;  %v942_v37 = vld [vmem:[%s1148_s9 + $0x8] sm:$0xff] (!%p355_p10)   ;;  %v944_v39 = vld [vmem:[%s1148_s9 + $0x10] sm:$0xff] (!%p355_p10)  }
  0x33   : > { %855 = vmatpush3.bf16.msra.mxu0 (!%p355_p10), %v940_v35  ;;  %890 = vmatpush3.bf16.msra.mxu1 (!%p355_p10), %v940_v35  ;;  %v945_v40 = vld [vmem:[%s1148_s9 + $0x58] sm:$0xff] (!%p355_p10)   ;;  %v947_v42 = vld [vmem:[%s1148_s9 + $0x60] sm:$0xff] (!%p355_p10)   ;;  %v949_v44 = vld [vmem:[%s1148_s9 + $0x68] sm:$0xff] (!%p355_p10)  }
  0x34   : > { %856 = vmatprep.subr.bf16.mxu0 (!%p355_p10), %v941_v36  ;;  %883 = vmatprep.subr.bf16.mxu1 (!%p355_p10), %v941_v36  ;;  %v946_v41 = vld [vmem:[%s1148_s9 + $0x18] sm:$0xff] (!%p355_p10)   ;;  %v948_v43 = vld [vmem:[%s1148_s9 + $0x20] sm:$0xff] (!%p355_p10)   ;;  %v950_v45 = vld [vmem:[%s1148_s9 + $0x28] sm:$0xff] (!%p355_p10)  }
  0x35   : > { %v951_v46 = vld [vmem:[%s1148_s9 + $0x70] sm:$0xff] (!%p355_p10)   ;;  %v953_v48 = vld [vmem:[%s1148_s9 + $0x78] sm:$0xff] (!%p355_p10)  }
  0x36   : > { %v952_v47 = vld [vmem:[%s1148_s9 + $0x30] sm:$0xff]   ;;  %v954_v49 = vld [vmem:[%s1148_s9 + $0x38] sm:$0xff]   ;;  %s410_s20 = scalar_select %p409_p11, %s991_s14, 1 }
  0x37   : > { %857 = vmatpush3.bf16.msra.mxu0 %v942_v37  ;;  %891 = vmatpush3.bf16.msra.mxu1 %v942_v37  ;;  %s851_s12 = sshll.u32 (%p1056_p6), %s991_s14, 3 }
  0x38   : > { %858 = vmatprep.subr.bf16.mxu0 %v943_v38  ;;  %884 = vmatprep.subr.bf16.mxu1 %v943_v38  ;;  %s411_s25 = scalar_lea.vmem %s1202_s2, %s410_s20  ;;  %s672_s30 = scalar_lea.vmem (%p1056_p6), %s1203_s3, %s851_s12 }
  0x39   : > { %v849_v60 = vld [vmem:[%s411_s25] ss:$0 sm:$0xff] }
  0x3b   : > { %859 = vmatpush3.bf16.msra.mxu0 %v944_v39  ;;  %892 = vmatpush3.bf16.msra.mxu1 %v944_v39 }
  0x3c   : > { %860 = vmatprep.subr.bf16.mxu0 %v945_v40  ;;  %885 = vmatprep.subr.bf16.mxu1 %v945_v40 }
  0x3f   : > { %861 = vmatpush3.bf16.msra.mxu0 %v946_v41  ;;  %893 = vmatpush3.bf16.msra.mxu1 %v946_v41 }
  0x40   : > { %862 = vmatprep.subr.bf16.mxu0 %v947_v42  ;;  %886 = vmatprep.subr.bf16.mxu1 %v947_v42 }
  0x43   : > { %863 = vmatpush3.bf16.msra.mxu0 %v948_v43  ;;  %894 = vmatpush3.bf16.msra.mxu1 %v948_v43 }
  0x44   : > { %864 = vmatprep.subr.bf16.mxu0 %v949_v44  ;;  %887 = vmatprep.subr.bf16.mxu1 %v949_v44 }
  0x47   : > { %865 = vmatpush3.bf16.msra.mxu0 %v950_v45  ;;  %895 = vmatpush3.bf16.msra.mxu1 %v950_v45 }
  0x48   : > { %866 = vmatprep.subr.bf16.mxu0 %v951_v46  ;;  %888 = vmatprep.subr.bf16.mxu1 %v951_v46 }
  0x4b   : > { %867 = vmatpush3.bf16.msra.mxu0 %v952_v47  ;;  %896 = vmatpush3.bf16.msra.mxu1 %v952_v47 }
  0x4c   : > { %868 = vmatprep.subr.bf16.mxu0 %v953_v48  ;;  %889 = vmatprep.subr.bf16.mxu1 %v953_v48 }
  0x4f   : > { %869 = vmatpush3.bf16.msra.mxu0 %v954_v49  ;;  %897 = vmatpush3.bf16.msra.mxu1 %v954_v49 }
  0x52   : > { %611 = vmatmul.mubr.bf16.vlgmr.msra.gmra.mrb[0].mxu0 %v955_v50  ;;  %619 = vmatmul.mubr.bf16.vlgmr.msra.gmra.mrb[0].mxu1 %v958_v51 }
 0x125   : > { %v870_v52 = vpop.f32.mrb[0].mxu0  ;;  %v876_v53 = vpop.f32.mrb[0].mxu1 }
 0x126   : > { %v871_v54 = vpop.f32.mrb[1].mxu0  ;;  %v877_v55 = vpop.f32.mrb[1].mxu1 }
 0x127   : > { %v872_v56 = vadd.f32 %v871_v54, %v870_v52  ;;  %v878_v57 = vadd.f32 %v877_v55, %v876_v53  ;;  %v873_v58 = vpop.f32.mrb[2].mxu0  ;;  %v879_v59 = vpop.f32.mrb[2].mxu1 }
 0x128   : > { %v874_v61 = vpop.f32.mrb[3].mxu0  ;;  %v880_v62 = vpop.f32.mrb[3].mxu1 }
 0x129   : > { %v875_v63 = vadd.f32 %v874_v61, %v873_v58  ;;  %v881_v0 = vadd.f32 %v880_v62, %v879_v59  ;;  %v649_v1 = vadd.f32 %v872_v56, %v849_v60  ;;  %v651_v2 = vadd.f32 %v878_v57, %v849_v60  ;;  %667 = sbr.rel (!%p1056_p6) target bundleno = 312 (0x138), region = 85 }
 0x12b   : > { %v653_v3 = vmax.f32 %v649_v1, 0.0  ;;  %v655_v4 = vmax.f32 %v651_v2, 0.0  ;;  %v650_v5 = vadd.f32 %v875_v63, %v849_v60  ;;  %v652_v6 = vadd.f32 %v881_v0, %v849_v60 }
 0x12d   : > { %657 = vst [vmem:[%s395_s27] sm:$0xff] %v653_v3  ;;  %659 = vst [vmem:[%s395_s27 + $0x10] sm:$0xff] %v655_v4  ;;  %v654_v7 = vmax.f32 %v650_v5, 0.0  ;;  %v656_v8 = vmax.f32 %v652_v6, 0.0 }
 0x12f   : > { %658 = vst [vmem:[%s395_s27 + $0x8] sm:$0xff] %v654_v7  ;;  %660 = vst [vmem:[%s395_s27 + $0x18] sm:$0xff] %v656_v8 }
 0x134   : > { %v706_v9 = vld [vmem:[%s395_s27] sm:$0xff]  ;;  %v710_v11 = vld [vmem:[%s395_s27 + $0x10] sm:$0xff] }
 0x135   : > { %707 = vst [vmem:[%s672_s30] sm:$0xff] %v706_v9  ;;  %711 = vst [vmem:[%s672_s30 + $0x20] sm:$0xff] %v710_v11 }
 0x136   : > { %v708_v10 = vld [vmem:[%s395_s27 + $0x8] sm:$0xff]  ;;  %v712_v12 = vld [vmem:[%s395_s27 + $0x18] sm:$0xff] }
 0x137   : > { %709 = vst [vmem:[%s672_s30 + $0x10] sm:$0xff] %v708_v10  ;;  %713 = vst [vmem:[%s672_s30 + $0x30] sm:$0xff] %v712_v12 }
 0x138 PF: > { %s13_s16 = sadd.s32 1, %s999_s16   ;;  %s1205_s12 = smov %s987_s13 }
 0x139   : > { %p10_p12 = scmp.ge.s32.totalorder %s13_s16, 4   ;;  %s1206_s13 = smov %s1061_s22 }
 0x13a   : > { %s1207_s14 = smov %s995_s15  ;;  %s1208_s15 = smov %s1210_s17 }
 0x13b   :  { %12 = sbr.rel (!%p10_p12) target bundleno = 3 (0x3), region = 160 }

// kernel: forward.36
= control target key start
LH: loop header
LB: loop body
LE: loop exit
PB: predicated region body
PF: predicated region fallthrough
CT: control target
= control target key end

     0   :  { %s1455_s0 = inlined_call_operand.vmem [shape: bf16[32,1024], index: 0, kind: input, shape index: {}]   ;;  %s1456_s1 = inlined_call_operand.vmem [shape: bf16[1024,256], index: 1, kind: input, shape index: {}]   ;;  %s1457_s2 = inlined_call_operand.vmem [shape: f32[1,256], index: 2, kind: input, shape index: {}]   ;;  %s1458_s3 = inlined_call_operand.vmem [shape: f32[32,256], index: 3, kind: output, shape index: {}]  }
   0x1   :  { %1460 = sst [smem:[#allocation6_spill]] %s1455_s0 }
   0x2   :  { %1461 = sst [smem:[#allocation7_spill]] %s1456_s1 }
   0x3   :  { %s1164_s12 = smov 0   ;;  %s1166_s13 = smov 0  }
   0x4   :  { %s1168_s14 = smov 0   ;;  %s1170_s15 = smov 0  }
   0x5   :  { %s1172_s16 = smov 0   ;;  %s1174_s17 = smov 0  }
   0x6   :  { %s1176_s18 = smov 0   ;;  %s1178_s19 = smov 0  }
   0x7   :  { %s1180_s20 = smov 0   ;;  %s1182_s21 = smov 0  }
   0x8   :  { %s1184_s22 = smov 0  }
   0x9 LB: > { %s856_s23 = sadd.s32 4294967295, %s1141_s22   ;;  %s25_s24 = sadd.s32 1, %s1133_s20  ;;  %s1141_s22 = sphi %s1184_s22, %s13_s22   ;;  %s1137_s21 = sphi %s1182_s21, %s1478_s21   ;;  %s1133_s20 = sphi %s1180_s20, %s1477_s20   ;;  %s1129_s19 = sphi %s1178_s19, %s1476_s19   ;;  %s1125_s18 = sphi %s1176_s18, %s1475_s18   ;;  %s1121_s17 = sphi %s1174_s17, %s1474_s17   ;;  %s1117_s16 = sphi %s1172_s16, %s1473_s16   ;;  %s1113_s15 = sphi %s1170_s15, %s1472_s15   ;;  %s1109_s14 = sphi %s1168_s14, %s1471_s14   ;;  %s1105_s13 = sphi %s1166_s13, %s1470_s13   ;;  %s1101_s12 = sphi %s1164_s12, %s1469_s12  }
   0xa   : > { %p26_p0 = scmp.ge.s32.totalorder %s25_s24, 4  ;;  %s28_s25 = sadd.s32 1, %s1137_s21 }
   0xb   : > { %s41_s26 = sadd.s32 1, %s1121_s17  ;;  %p48_p1 = scmp.ne.s32.totalorder %s1121_s17, %s1117_s16 }
   0xc   : > { %s1480_s24 = smov (%p26_p0, %s25_s24), 0  ;;  %s1482_s25 = smov (!%p26_p0, %s28_s25), %s1137_s21 }
   0xd   : > { %s37_s27 = ssub.s32 %s1133_s20, %s1480_s24  ;;  %p49_p2 = scmp.eq.s32.totalorder %s1141_s22, 0 }
   0xe   : > { %p30_p3 = scmp.ge.s32.totalorder %s1482_s25, 2  ;;  %p39_p4 = scmp.eq.s32.totalorder %s37_s27, 0 }
   0xf   : > { %p1231_p5 = por %p49_p2, %p48_p1  ;;  %s69_s29 = sadd.s32 1, %s1113_s15 }
  0x10   : > { %s1484_s25 = smov (%p30_p3, %s1482_s25), 0  ;;  %p76_p6 = scmp.ne.s32.totalorder %s1113_s15, %s1109_s14 }
  0x11   : > { %1463 = sst [smem:[#allocation5_spill]] %s1484_s25  ;;  %s65_s4 = ssub.s32 %s1137_s21, %s1484_s25 }
  0x12   : > { %s1239_s30 = scalar_select %p39_p4, %s1121_s17, %s41_s26  }
  0x13   : > { %s66_s5 = sor.u32 %s65_s4, %s37_s27  ;;  %p121_p7 = scmp.eq.s32.totalorder %s65_s4, 0 }
  0x14   : > { %p67_p8 = scmp.eq.s32.totalorder %s66_s5, 0  ;;  %p1245_p9 = por %p76_p6, %p49_p2 }
  0x15   : > { %s123_s7 = sadd.s32 1, %s1105_s13  ;;  %p133_p10 = scmp.ne.s32.totalorder %s1105_s13, %s1101_s12 }
  0x16   : > { %s1253_s8 = scalar_select %p67_p8, %s1113_s15, %s69_s29  }
  0x17   : > { %s1256_s9 = scalar_select %p121_p7, %s1105_s13, %s123_s7  }
  0x18   : > { %p134_p11 = scmp.eq.s32.totalorder %s856_s23, 7  ;;  %p859_p13 = scmp.ge.s32.totalorder %s1141_s22, 8 }
  0x1a   : > { %p1258_p12 = por %p134_p11, %p133_p10  ;;  %156 = sbr.rel (%p859_p13) target bundleno = 78 (0x4e), region = 16 }
  0x21   : > { %159 = sbr.rel (!%p1231_p5) target bundleno = 47 (0x2f), region = 20  ;;  %s161_s11 = sand.u32 (%p1231_p5), 1, %s1121_s17  }
  0x22   : > { %s898_s26 = sshll.u32 (%p1231_p5), %s1133_s20, 3  ;;  %s860_s27 = sshll.u32 (%p1231_p5), %s161_s11, 5 }
  0x23   : > { %s1466_s0 = sld [smem:[#allocation6_spill]] (%p1231_p5)  ;;  %s163_s23 = scalar_lea.vmem (%p1231_p5), [#allocation2], %s860_s27 }
  0x29   : > { %s169_s5 = scalar_lea.vmem %s1466_s0, %s898_s26 }
  0x2a   : > { %v203_v0 = vld [vmem:[%s169_s5] sm:$0xff] }
  0x2b   : > { %v205_v1 = vld [vmem:[%s169_s5 + $0x20] sm:$0xff]  ;;  %204 = vst [vmem:[%s163_s23] sm:$0xff] %v203_v0 }
  0x2c   : > { %v207_v2 = vld [vmem:[%s169_s5 + $0x40] sm:$0xff]  ;;  %206 = vst [vmem:[%s163_s23 + $0x8] sm:$0xff] %v205_v1 }
  0x2d   : > { %208 = vst [vmem:[%s163_s23 + $0x10] sm:$0xff] %v207_v2  ;;  %v209_v3 = vld [vmem:[%s169_s5 + $0x60] sm:$0xff] }
  0x2e   : > { %210 = vst [vmem:[%s163_s23 + $0x18] sm:$0xff] %v209_v3 }
  0x2f PF: > { %216 = sbr.rel (!%p1245_p9) target bundleno = 78 (0x4e), region = 58  ;;  %s218_s28 = sand.u32 (%p1245_p9), 1, %s1113_s15  }
  0x30   : > { %s899_s7 = sshll.u32 (%p1245_p9), %s1133_s20, 6  ;;  %s863_s11 = sshll.u32 (%p1245_p9), %s218_s28, 7 }
  0x31   : > { %s223_s26 = sadd.s32 (%p1245_p9), %s1137_s21, %s899_s7  ;;  %s1467_s1 = sld [smem:[#allocation7_spill]] (%p1245_p9) }
  0x32   : > { %s866_s29 = sshll.u32 (%p1245_p9), %s223_s26, 2  ;;  %s1283_s6 = scalar_lea.vmem (%p1245_p9), [#allocation3], %s863_s11 }
  0x37   : > { %s1278_s27 = scalar_lea.vmem %s1467_s1, %s866_s29 }
  0x38   : > { %v241_v4 = vld [vmem:[%s1278_s27] sm:$0xf]  ;;  %v243_v5 = vld [vmem:[%s1278_s27 + $0x8] sm:$0xf]  ;;  %v245_v6 = vld [vmem:[%s1278_s27 + $0x10] sm:$0xf] }
  0x39   : > { %242 = vst [vmem:[%s1283_s6] sm:$0xf] %v241_v4  ;;  %244 = vst [vmem:[%s1283_s6 + $0x4] sm:$0xf] %v243_v5  ;;  %v247_v7 = vld [vmem:[%s1278_s27 + $0x18] sm:$0xf] }
  0x3a   : > { %246 = vst [vmem:[%s1283_s6 + $0x8] sm:$0xf] %v245_v6  ;;  %v249_v8 = vld [vmem:[%s1278_s27 + $0x20] sm:$0xf]  ;;  %v251_v9 = vld [vmem:[%s1278_s27 + $0x28] sm:$0xf] }
  0x3b   : > { %248 = vst [vmem:[%s1283_s6 + $0xc] sm:$0xf] %v247_v7  ;;  %250 = vst [vmem:[%s1283_s6 + $0x10] sm:$0xf] %v249_v8  ;;  %v253_v10 = vld [vmem:[%s1278_s27 + $0x30] sm:$0xf] }
  0x3c   : > { %252 = vst [vmem:[%s1283_s6 + $0x14] sm:$0xf] %v251_v9  ;;  %v255_v11 = vld [vmem:[%s1278_s27 + $0x38] sm:$0xf]  ;;  %v257_v12 = vld [vmem:[%s1278_s27 + $0x40] sm:$0xf] }
  0x3d   : > { %254 = vst [vmem:[%s1283_s6 + $0x18] sm:$0xf] %v253_v10  ;;  %256 = vst [vmem:[%s1283_s6 + $0x1c] sm:$0xf] %v255_v11  ;;  %v259_v13 = vld [vmem:[%s1278_s27 + $0x48] sm:$0xf] }
  0x3e   : > { %258 = vst [vmem:[%s1283_s6 + $0x20] sm:$0xf] %v257_v12  ;;  %v261_v14 = vld [vmem:[%s1278_s27 + $0x50] sm:$0xf]  ;;  %v263_v15 = vld [vmem:[%s1278_s27 + $0x58] sm:$0xf] }
  0x3f   : > { %260 = vst [vmem:[%s1283_s6 + $0x24] sm:$0xf] %v259_v13  ;;  %262 = vst [vmem:[%s1283_s6 + $0x28] sm:$0xf] %v261_v14  ;;  %v265_v16 = vld [vmem:[%s1278_s27 + $0x60] sm:$0xf] }
  0x40   : > { %264 = vst [vmem:[%s1283_s6 + $0x2c] sm:$0xf] %v263_v15  ;;  %v267_v17 = vld [vmem:[%s1278_s27 + $0x68] sm:$0xf]  ;;  %v269_v18 = vld [vmem:[%s1278_s27 + $0x70] sm:$0xf] }
  0x41   : > { %266 = vst [vmem:[%s1283_s6 + $0x30] sm:$0xf] %v265_v16  ;;  %268 = vst [vmem:[%s1283_s6 + $0x34] sm:$0xf] %v267_v17  ;;  %v271_v19 = vld [vmem:[%s1278_s27 + $0x78] sm:$0xf] }
  0x42   : > { %270 = vst [vmem:[%s1283_s6 + $0x38] sm:$0xf] %v269_v18  ;;  %v273_v20 = vld [vmem:[%s1278_s27 + $0x80] sm:$0xf]  ;;  %v275_v21 = vld [vmem:[%s1278_s27 + $0x88] sm:$0xf] }
  0x43   : > { %272 = vst [vmem:[%s1283_s6 + $0x3c] sm:$0xf] %v271_v19  ;;  %274 = vst [vmem:[%s1283_s6 + $0x40] sm:$0xf] %v273_v20  ;;  %v277_v22 = vld [vmem:[%s1278_s27 + $0x90] sm:$0xf] }
  0x44   : > { %276 = vst [vmem:[%s1283_s6 + $0x44] sm:$0xf] %v275_v21  ;;  %v279_v23 = vld [vmem:[%s1278_s27 + $0x98] sm:$0xf]  ;;  %v281_v24 = vld [vmem:[%s1278_s27 + $0xa0] sm:$0xf] }
  0x45   : > { %278 = vst [vmem:[%s1283_s6 + $0x48] sm:$0xf] %v277_v22  ;;  %280 = vst [vmem:[%s1283_s6 + $0x4c] sm:$0xf] %v279_v23  ;;  %v283_v25 = vld [vmem:[%s1278_s27 + $0xa8] sm:$0xf] }
  0x46   : > { %282 = vst [vmem:[%s1283_s6 + $0x50] sm:$0xf] %v281_v24  ;;  %v285_v26 = vld [vmem:[%s1278_s27 + $0xb0] sm:$0xf]  ;;  %v287_v27 = vld [vmem:[%s1278_s27 + $0xb8] sm:$0xf] }
  0x47   : > { %284 = vst [vmem:[%s1283_s6 + $0x54] sm:$0xf] %v283_v25  ;;  %286 = vst [vmem:[%s1283_s6 + $0x58] sm:$0xf] %v285_v26  ;;  %v289_v28 = vld [vmem:[%s1278_s27 + $0xc0] sm:$0xf] }
  0x48   : > { %288 = vst [vmem:[%s1283_s6 + $0x5c] sm:$0xf] %v287_v27  ;;  %v291_v29 = vld [vmem:[%s1278_s27 + $0xc8] sm:$0xf]  ;;  %v293_v30 = vld [vmem:[%s1278_s27 + $0xd0] sm:$0xf] }
  0x49   : > { %290 = vst [vmem:[%s1283_s6 + $0x60] sm:$0xf] %v289_v28  ;;  %292 = vst [vmem:[%s1283_s6 + $0x64] sm:$0xf] %v291_v29  ;;  %v295_v31 = vld [vmem:[%s1278_s27 + $0xd8] sm:$0xf] }
  0x4a   : > { %294 = vst [vmem:[%s1283_s6 + $0x68] sm:$0xf] %v293_v30  ;;  %v297_v32 = vld [vmem:[%s1278_s27 + $0xe0] sm:$0xf]  ;;  %v299_v33 = vld [vmem:[%s1278_s27 + $0xe8] sm:$0xf] }
  0x4b   : > { %296 = vst [vmem:[%s1283_s6 + $0x6c] sm:$0xf] %v295_v31  ;;  %298 = vst [vmem:[%s1283_s6 + $0x70] sm:$0xf] %v297_v32  ;;  %v301_v34 = vld [vmem:[%s1278_s27 + $0xf0] sm:$0xf] }
  0x4c   : > { %300 = vst [vmem:[%s1283_s6 + $0x74] sm:$0xf] %v299_v33  ;;  %v303_v35 = vld [vmem:[%s1278_s27 + $0xf8] sm:$0xf]  ;;  %302 = vst [vmem:[%s1283_s6 + $0x78] sm:$0xf] %v301_v34 }
  0x4d   : > { %304 = vst [vmem:[%s1283_s6 + $0x7c] sm:$0xf] %v303_v35 }
  0x4e PF: > { %p867_p0 = scmp.ge.s32.totalorder %s1141_s22, 1  ;;  %p396_p1 = scmp.lt.s32.totalorder %s1141_s22, 9 }
  0x50   : > { %p397_p2 = pnand %p867_p0, %p396_p1 }
  0x51   : > { %s403_s0 = sand.u32 (!%p397_p2), 1, %s1117_s16   ;;  %s410_s5 = sand.u32 (!%p397_p2), 1, %s1109_s14  }
  0x52   : > { %400 = sbr.rel (%p397_p2) target bundleno = 370 (0x172), region = 103  ;;  %s868_s23 = sshll.u32 (!%p397_p2), %s403_s0, 5 }
  0x53   : > { %s869_s28 = sshll.u32 (!%p397_p2), %s410_s5, 7  ;;  %s436_s7 = sand.u32 (!%p397_p2), 1, %s1101_s12  }
  0x54   : > { %p442_p3 = scmp.lt.s32.totalorder (!%p397_p2), %s1129_s19, 1  ;;  %s870_s11 = sshll.u32 (!%p397_p2), %s436_s7, 5 }
  0x55   : > { %s1359_s6 = scalar_lea.vmem (!%p397_p2), [#allocation2], %s868_s23  ;;  %s1361_s1 = scalar_lea.vmem (!%p397_p2), [#allocation3], %s869_s28 }
  0x56   : > { %s1363_s25 = scalar_lea.vmem (!%p397_p2), [#allocation4], %s870_s11  ;;  %p871_p4 = scmp.ne.s32.totalorder (!%p397_p2), %s1125_s18, 0 }
  0x59   : > { %s1353_s26 = scalar_select %p442_p3, %s1129_s19, 1 }
  0x5a   : > { %450 = sbr.rel (%p871_p4) target bundleno = 97 (0x61), region = 115  ;;  %v1143_v36 = vmov (!%p871_p4), 0.0  }
  0x5b   : > { %s444_s27 = scalar_lea.vmem %s1457_s2, %s1353_s26  ;;  %451 = vst [vmem:[%s1363_s25] sm:$0xff] (!%p871_p4), %v1143_v36  ;;  %452 = vst [vmem:[%s1363_s25 + $0x8] sm:$0xff] (!%p871_p4), %v1143_v36 }
  0x5c   : > { %453 = vst [vmem:[%s1363_s25 + $0x10] sm:$0xff] (!%p871_p4), %v1143_v36  ;;  %454 = vst [vmem:[%s1363_s25 + $0x18] sm:$0xff] (!%p871_p4), %v1143_v36 }
  0x61 PF: > { %v1033_v37 = vld [vmem:[%s1361_s1 + $0x40] sm:$0xff]   ;;  %v1035_v39 = vld [vmem:[%s1361_s1 + $0x48] sm:$0xff]   ;;  %v1037_v41 = vld [vmem:[%s1361_s1 + $0x50] sm:$0xff]   ;;  %p892_p5 = scmp.ne.s32.totalorder %s1125_s18, 3 }
  0x62   : > { %v1034_v38 = vld [vmem:[%s1361_s1] sm:$0xff]   ;;  %900 = vmatprep.subr.bf16.mxu0 %v1033_v37  ;;  %928 = vmatprep.subr.bf16.mxu1 %v1033_v37  ;;  %v1036_v40 = vld [vmem:[%s1361_s1 + $0x8] sm:$0xff]   ;;  %v1038_v42 = vld [vmem:[%s1361_s1 + $0x10] sm:$0xff]  }
  0x63   : > { %901 = vmatpush3.bf16.msra.mxu0 %v1034_v38  ;;  %936 = vmatpush3.bf16.msra.mxu1 %v1034_v38  ;;  %v1039_v43 = vld [vmem:[%s1361_s1 + $0x58] sm:$0xff]   ;;  %v1041_v45 = vld [vmem:[%s1361_s1 + $0x60] sm:$0xff]   ;;  %v1043_v47 = vld [vmem:[%s1361_s1 + $0x68] sm:$0xff]  }
  0x64   : > { %902 = vmatprep.subr.bf16.mxu0 %v1035_v39  ;;  %929 = vmatprep.subr.bf16.mxu1 %v1035_v39  ;;  %v1040_v44 = vld [vmem:[%s1361_s1 + $0x18] sm:$0xff]   ;;  %v1042_v46 = vld [vmem:[%s1361_s1 + $0x20] sm:$0xff]   ;;  %v1044_v50 = vld [vmem:[%s1361_s1 + $0x28] sm:$0xff]  }
  0x65   : > { %v1051_v48 = vld [vmem:[%s1359_s6 + $0x4] ss:$8 sps:$4 sm:$0xff]   ;;  %v1054_v49 = vld [vmem:[%s1359_s6 + $0x14] ss:$8 sps:$4 sm:$0xff]   ;;  %v1049_v55 = vld [vmem:[%s1359_s6] ss:$8 sps:$4 sm:$0xff]  }
  0x66   : > { %v1045_v51 = vld [vmem:[%s1361_s1 + $0x70] sm:$0xff]   ;;  %643 = vmatprep.mubr.bf16.mxu0 %v1051_v48  ;;  %651 = vmatprep.mubr.bf16.mxu1 %v1054_v49  ;;  %v1047_v53 = vld [vmem:[%s1361_s1 + $0x78] sm:$0xff]   ;;  %v455_v59 = vld [vmem:[%s1363_s25] sm:$0xff] }
  0x67   : > { %903 = vmatpush3.bf16.msra.mxu0 %v1036_v40  ;;  %937 = vmatpush3.bf16.msra.mxu1 %v1036_v40  ;;  %v1046_v52 = vld [vmem:[%s1361_s1 + $0x30] sm:$0xff]   ;;  %v1048_v54 = vld [vmem:[%s1361_s1 + $0x38] sm:$0xff]   ;;  %v456_v3 = vld [vmem:[%s1363_s25 + $0x8] sm:$0xff] }
  0x68   : > { %904 = vmatprep.subr.bf16.mxu0 %v1037_v41  ;;  %930 = vmatprep.subr.bf16.mxu1 %v1037_v41  ;;  %v1052_v56 = vld [vmem:[%s1359_s6 + $0x10] ss:$8 sps:$4 sm:$0xff]   ;;  %v893_v14 = vld [vmem:[%s444_s27] ss:$0 sm:$0xff] (!%p892_p5) }
  0x69   : > { %v457_v61 = vld [vmem:[%s1363_s25 + $0x10] sm:$0xff]  ;;  %v458_v5 = vld [vmem:[%s1363_s25 + $0x18] sm:$0xff] }
  0x6b   : > { %905 = vmatpush3.bf16.msra.mxu0 %v1038_v42  ;;  %938 = vmatpush3.bf16.msra.mxu1 %v1038_v42 }
  0x6c   : > { %906 = vmatprep.subr.bf16.mxu0 %v1039_v43  ;;  %931 = vmatprep.subr.bf16.mxu1 %v1039_v43 }
  0x6f   : > { %907 = vmatpush3.bf16.msra.mxu0 %v1040_v44  ;;  %939 = vmatpush3.bf16.msra.mxu1 %v1040_v44 }
  0x70   : > { %908 = vmatprep.subr.bf16.mxu0 %v1041_v45  ;;  %932 = vmatprep.subr.bf16.mxu1 %v1041_v45 }
  0x73   : > { %909 = vmatpush3.bf16.msra.mxu0 %v1042_v46  ;;  %940 = vmatpush3.bf16.msra.mxu1 %v1042_v46 }
  0x74   : > { %910 = vmatprep.subr.bf16.mxu0 %v1043_v47  ;;  %933 = vmatprep.subr.bf16.mxu1 %v1043_v47 }
  0x77   : > { %911 = vmatpush3.bf16.msra.mxu0 %v1044_v50  ;;  %941 = vmatpush3.bf16.msra.mxu1 %v1044_v50 }
  0x78   : > { %912 = vmatprep.subr.bf16.mxu0 %v1045_v51  ;;  %934 = vmatprep.subr.bf16.mxu1 %v1045_v51 }
  0x7b   : > { %913 = vmatpush3.bf16.msra.mxu0 %v1046_v52  ;;  %942 = vmatpush3.bf16.msra.mxu1 %v1046_v52 }
  0x7c   : > { %914 = vmatprep.subr.bf16.mxu0 %v1047_v53  ;;  %935 = vmatprep.subr.bf16.mxu1 %v1047_v53 }
  0x7f   : > { %915 = vmatpush3.bf16.msra.mxu0 %v1048_v54  ;;  %943 = vmatpush3.bf16.msra.mxu1 %v1048_v54 }
  0x82   : > { %644 = vmatmul.mubr.bf16.vlgmr.msra.gmra.mrb[0].mxu0 %v1049_v55  ;;  %652 = vmatmul.mubr.bf16.vlgmr.msra.gmra.mrb[0].mxu1 %v1052_v56 }
 0x155   : > { %v916_v57 = vpop.f32.mrb[0].mxu0  ;;  %v922_v58 = vpop.f32.mrb[0].mxu1 }
 0x156   : > { %v917_v60 = vpop.f32.mrb[1].mxu0  ;;  %v923_v62 = vpop.f32.mrb[1].mxu1 }
 0x157   : > { %v918_v63 = vadd.f32 %v917_v60, %v916_v57  ;;  %v924_v0 = vadd.f32 %v923_v62, %v922_v58  ;;  %v919_v1 = vpop.f32.mrb[2].mxu0  ;;  %v925_v2 = vpop.f32.mrb[2].mxu1  ;;  %671 = sbr.rel (%p892_p5) target bundleno = 362 (0x16a), region = 119 }
 0x158   : > { %v920_v4 = vpop.f32.mrb[3].mxu0  ;;  %v926_v6 = vpop.f32.mrb[3].mxu1 }
 0x159   : > { %v660_v7 = vadd.f32 %v918_v63, %v455_v59  ;;  %v662_v8 = vadd.f32 %v924_v0, %v457_v61  ;;  %v921_v9 = vadd.f32 %v920_v4, %v919_v1  ;;  %v927_v10 = vadd.f32 %v926_v6, %v925_v2 }
 0x15b   : > { %664 = vst [vmem:[%s1363_s25] sm:$0xff] %v660_v7  ;;  %666 = vst [vmem:[%s1363_s25 + $0x10] sm:$0xff] %v662_v8  ;;  %v661_v11 = vadd.f32 %v921_v9, %v456_v3  ;;  %v663_v12 = vadd.f32 %v927_v10, %v458_v5 }
 0x15d   : > { %665 = vst [vmem:[%s1363_s25 + $0x8] sm:$0xff] %v661_v11  ;;  %667 = vst [vmem:[%s1363_s25 + $0x18] sm:$0xff] %v663_v12 }
 0x162   : > { %v672_v13 = vld [vmem:[%s1363_s25] sm:$0xff]  ;;  %v674_v18 = vld [vmem:[%s1363_s25 + $0x10] sm:$0xff] }
 0x163   : > { %v683_v16 = vadd.f32 %v893_v14, %v672_v13  ;;  %v685_v20 = vadd.f32 %v893_v14, %v674_v18 }
 0x164   : > { %v673_v15 = vld [vmem:[%s1363_s25 + $0x8] sm:$0xff]  ;;  %v675_v19 = vld [vmem:[%s1363_s25 + $0x18] sm:$0xff] }
 0x165   : > { %v684_v17 = vadd.f32 %v893_v14, %v673_v15  ;;  %v686_v21 = vadd.f32 %v893_v14, %v675_v19  ;;  %v687_v22 = vmax.f32 %v683_v16, 0.0  ;;  %v689_v24 = vmax.f32 %v685_v20, 0.0 }
 0x167   : > { %v688_v23 = vmax.f32 %v684_v17, 0.0  ;;  %v690_v25 = vmax.f32 %v686_v21, 0.0  ;;  %691 = vst [vmem:[%s1363_s25] sm:$0xff] %v687_v22  ;;  %693 = vst [vmem:[%s1363_s25 + $0x10] sm:$0xff] %v689_v24 }
 0x169   : > { %692 = vst [vmem:[%s1363_s25 + $0x8] sm:$0xff] %v688_v23  ;;  %694 = vst [vmem:[%s1363_s25 + $0x18] sm:$0xff] %v690_v25 }
 0x16a PF: > { %701 = sbr.rel (!%p1258_p12) target bundleno = 370 (0x172), region = 123  ;;  %s895_s14 = sshll.u32 (%p1258_p12), %s1129_s19, 3 }
 0x16b   : > { %s706_s0 = scalar_lea.vmem (%p1258_p12), %s1458_s3, %s895_s14 }
 0x16e   : > { %v740_v26 = vld [vmem:[%s1363_s25] sm:$0xff] (%p1258_p12)  ;;  %v744_v28 = vld [vmem:[%s1363_s25 + $0x10] sm:$0xff] (%p1258_p12) }
 0x16f   : > { %741 = vst [vmem:[%s706_s0] sm:$0xff] (%p1258_p12), %v740_v26  ;;  %745 = vst [vmem:[%s706_s0 + $0x20] sm:$0xff] (%p1258_p12), %v744_v28 }
 0x170   : > { %v742_v27 = vld [vmem:[%s1363_s25 + $0x8] sm:$0xff] (%p1258_p12)  ;;  %v746_v29 = vld [vmem:[%s1363_s25 + $0x18] sm:$0xff] (%p1258_p12) }
 0x171   : > { %743 = vst [vmem:[%s706_s0 + $0x10] sm:$0xff] %v742_v27  ;;  %747 = vst [vmem:[%s706_s0 + $0x30] sm:$0xff] %v746_v29 }
 0x172 PF: > { %s13_s22 = sadd.s32 1, %s1141_s22   ;;  %s1468_s10 = sld [smem:[#allocation5_spill]] }
 0x173   : > { %p10_p6 = scmp.ge.s32.totalorder %s13_s22, 10   ;;  %s1469_s12 = smov %s1105_s13 }
 0x174   : > { %s1470_s13 = smov %s1256_s9  ;;  %s1471_s14 = smov %s1113_s15 }
 0x175   : > { %s1472_s15 = smov %s1253_s8  ;;  %s1473_s16 = smov %s1121_s17 }
 0x176   : > { %s1474_s17 = smov %s1239_s30  ;;  %s1475_s18 = smov %s1133_s20 }
 0x177   : > { %s1476_s19 = smov %s1137_s21  ;;  %s1477_s20 = smov %s1480_s24 }
 0x178   : > { %s1478_s21 = smov %s1468_s10  ;;  %12 = sbr.rel (!%p10_p6) target bundleno = 9 (0x9), region = 203 }

// kernel: forward.37
= control target key start
LH: loop header
LB: loop body
LE: loop exit
PB: predicated region body
PF: predicated region fallthrough
CT: control target
= control target key end

     0   :  { %s449_s1 = inlined_call_operand.vmem [shape: bf16[256,128], index: 1, kind: input, shape index: {}]   ;;  %s450_s0 = inlined_call_operand.vmem [shape: bf16[32,256], index: 0, kind: input, shape index: {}]   ;;  %s451_s2 = inlined_call_operand.vmem [shape: f32[1,128], index: 2, kind: input, shape index: {}]   ;;  %s452_s3 = inlined_call_operand.vmem [shape: f32[32,128], index: 3, kind: output, shape index: {}]  }
   0x1   :  { %v332_v0 = vld [vmem:[%s449_s1 + $0x40] sm:$0xff]   ;;  %v334_v2 = vld [vmem:[%s449_s1 + $0x48] sm:$0xff]   ;;  %v336_v4 = vld [vmem:[%s449_s1 + $0x50] sm:$0xff]  }
   0x2   :  { %v333_v1 = vld [vmem:[%s449_s1] sm:$0xff]   ;;  %287 = vmatprep.subr.bf16.mxu0 %v332_v0  ;;  %315 = vmatprep.subr.bf16.mxu1 %v332_v0  ;;  %v335_v3 = vld [vmem:[%s449_s1 + $0x8] sm:$0xff]   ;;  %v337_v5 = vld [vmem:[%s449_s1 + $0x10] sm:$0xff]  }
   0x3   :  { %288 = vmatpush3.bf16.msra.mxu0 %v333_v1  ;;  %323 = vmatpush3.bf16.msra.mxu1 %v333_v1  ;;  %v338_v6 = vld [vmem:[%s449_s1 + $0x58] sm:$0xff]   ;;  %v340_v8 = vld [vmem:[%s449_s1 + $0x60] sm:$0xff]   ;;  %v342_v10 = vld [vmem:[%s449_s1 + $0x68] sm:$0xff]  }
   0x4   :  { %289 = vmatprep.subr.bf16.mxu0 %v334_v2  ;;  %316 = vmatprep.subr.bf16.mxu1 %v334_v2  ;;  %v339_v7 = vld [vmem:[%s449_s1 + $0x18] sm:$0xff]   ;;  %v341_v9 = vld [vmem:[%s449_s1 + $0x20] sm:$0xff]   ;;  %v343_v13 = vld [vmem:[%s449_s1 + $0x28] sm:$0xff]  }
   0x5   :  { %v350_v11 = vld [vmem:[%s450_s0 + $0x4] ss:$8 sps:$4 sm:$0xff]   ;;  %v353_v12 = vld [vmem:[%s450_s0 + $0x14] ss:$8 sps:$4 sm:$0xff]   ;;  %v348_v18 = vld [vmem:[%s450_s0] ss:$8 sps:$4 sm:$0xff]  }
   0x6   :  { %v344_v14 = vld [vmem:[%s449_s1 + $0x70] sm:$0xff]   ;;  %211 = vmatprep.mubr.bf16.mxu0 %v350_v11  ;;  %219 = vmatprep.mubr.bf16.mxu1 %v353_v12  ;;  %v346_v16 = vld [vmem:[%s449_s1 + $0x78] sm:$0xff]   ;;  %v286_v28 = vld [vmem:[%s451_s2] ss:$0 sm:$0xff] }
   0x7   :  { %290 = vmatpush3.bf16.msra.mxu0 %v335_v3  ;;  %324 = vmatpush3.bf16.msra.mxu1 %v335_v3  ;;  %v345_v15 = vld [vmem:[%s449_s1 + $0x30] sm:$0xff]   ;;  %v347_v17 = vld [vmem:[%s449_s1 + $0x38] sm:$0xff]  }
   0x8   :  { %291 = vmatprep.subr.bf16.mxu0 %v336_v4  ;;  %317 = vmatprep.subr.bf16.mxu1 %v336_v4  ;;  %v351_v19 = vld [vmem:[%s450_s0 + $0x10] ss:$8 sps:$4 sm:$0xff]  }
   0xb   :  { %292 = vmatpush3.bf16.msra.mxu0 %v337_v5  ;;  %325 = vmatpush3.bf16.msra.mxu1 %v337_v5 }
   0xc   :  { %293 = vmatprep.subr.bf16.mxu0 %v338_v6  ;;  %318 = vmatprep.subr.bf16.mxu1 %v338_v6 }
   0xf   :  { %294 = vmatpush3.bf16.msra.mxu0 %v339_v7  ;;  %326 = vmatpush3.bf16.msra.mxu1 %v339_v7 }
  0x10   :  { %295 = vmatprep.subr.bf16.mxu0 %v340_v8  ;;  %319 = vmatprep.subr.bf16.mxu1 %v340_v8 }
  0x13   :  { %296 = vmatpush3.bf16.msra.mxu0 %v341_v9  ;;  %327 = vmatpush3.bf16.msra.mxu1 %v341_v9 }
  0x14   :  { %297 = vmatprep.subr.bf16.mxu0 %v342_v10  ;;  %320 = vmatprep.subr.bf16.mxu1 %v342_v10 }
  0x17   :  { %298 = vmatpush3.bf16.msra.mxu0 %v343_v13  ;;  %328 = vmatpush3.bf16.msra.mxu1 %v343_v13 }
  0x18   :  { %299 = vmatprep.subr.bf16.mxu0 %v344_v14  ;;  %321 = vmatprep.subr.bf16.mxu1 %v344_v14 }
  0x1b   :  { %300 = vmatpush3.bf16.msra.mxu0 %v345_v15  ;;  %329 = vmatpush3.bf16.msra.mxu1 %v345_v15 }
  0x1c   :  { %301 = vmatprep.subr.bf16.mxu0 %v346_v16  ;;  %322 = vmatprep.subr.bf16.mxu1 %v346_v16 }
  0x1f   :  { %302 = vmatpush3.bf16.msra.mxu0 %v347_v17  ;;  %330 = vmatpush3.bf16.msra.mxu1 %v347_v17 }
  0x22   :  { %212 = vmatmul.mubr.bf16.vlgmr.msra.gmra.mrb[0].mxu0 %v348_v18  ;;  %220 = vmatmul.mubr.bf16.vlgmr.msra.gmra.mrb[0].mxu1 %v351_v19 }
  0xf5   :  { %v303_v20 = vpop.f32.mrb[0].mxu0  ;;  %v309_v21 = vpop.f32.mrb[0].mxu1 }
  0xf6   :  { %v304_v22 = vpop.f32.mrb[1].mxu0  ;;  %v310_v23 = vpop.f32.mrb[1].mxu1 }
  0xf7   :  { %v305_v24 = vadd.f32 %v304_v22, %v303_v20  ;;  %v311_v25 = vadd.f32 %v310_v23, %v309_v21  ;;  %v306_v26 = vpop.f32.mrb[2].mxu0  ;;  %v312_v27 = vpop.f32.mrb[2].mxu1 }
  0xf8   :  { %v307_v29 = vpop.f32.mrb[3].mxu0  ;;  %v313_v30 = vpop.f32.mrb[3].mxu1 }
  0xf9   :  { %v308_v31 = vadd.f32 %v307_v29, %v306_v26  ;;  %v314_v32 = vadd.f32 %v313_v30, %v312_v27  ;;  %v250_v33 = vadd.f32 %v305_v24, %v286_v28  ;;  %v252_v34 = vadd.f32 %v311_v25, %v286_v28 }
  0xfb   :  { %v254_v35 = vmax.f32 %v250_v33, 0.0  ;;  %v256_v36 = vmax.f32 %v252_v34, 0.0  ;;  %v251_v37 = vadd.f32 %v308_v31, %v286_v28  ;;  %v253_v38 = vadd.f32 %v314_v32, %v286_v28 }
  0xfd   :  { %258 = vst [vmem:[%s452_s3] sm:$0xff] %v254_v35  ;;  %260 = vst [vmem:[%s452_s3 + $0x10] sm:$0xff] %v256_v36  ;;  %v255_v39 = vmax.f32 %v251_v37, 0.0  ;;  %v257_v40 = vmax.f32 %v253_v38, 0.0 }
  0xff   :  { %259 = vst [vmem:[%s452_s3 + $0x8] sm:$0xff] %v255_v39  ;;  %261 = vst [vmem:[%s452_s3 + $0x18] sm:$0xff] %v257_v40 }

// kernel: forward.38
= control target key start
LH: loop header
LB: loop body
LE: loop exit
PB: predicated region body
PF: predicated region fallthrough
CT: control target
= control target key end

     0   :  { %s1021_s12 = smov 0   ;;  %s1023_s13 = smov 0   ;;  %s1200_s0 = inlined_call_operand.vmem [shape: bf16[32,256], index: 0, kind: input, shape index: {}]   ;;  %s1201_s1 = inlined_call_operand.vmem [shape: bf16[256,384], index: 1, kind: input, shape index: {}]   ;;  %s1202_s2 = inlined_call_operand.vmem [shape: f32[1,384], index: 2, kind: input, shape index: {}]   ;;  %s1203_s3 = inlined_call_operand.vmem [shape: f32[32,384], index: 3, kind: output, shape index: {}]  }
   0x1   :  { %s1025_s14 = smov 0   ;;  %s1027_s15 = smov 0  }
   0x2   :  { %s1029_s16 = smov 0  }
   0x3 LB: > { %s28_s17 = sadd.s32 1, %s995_s15  ;;  %s819_s18 = sadd.s32 4294967295, %s999_s16   ;;  %s999_s16 = sphi %s1029_s16, %s13_s16   ;;  %s995_s15 = sphi %s1027_s15, %s1208_s15   ;;  %s991_s14 = sphi %s1025_s14, %s1207_s14   ;;  %s987_s13 = sphi %s1023_s13, %s1206_s13   ;;  %s983_s12 = sphi %s1021_s12, %s1205_s12  }
   0x4   : > { %p30_p0 = scmp.ge.s32.totalorder %s28_s17, 3  ;;  %p76_p1 = scmp.ne.s32.totalorder %s987_s13, %s983_s12 }
   0x5   : > { %p77_p2 = scmp.eq.s32.totalorder %s999_s16, 0  ;;  %p134_p4 = scmp.eq.s32.totalorder %s819_s18, 2 }
   0x6   : > { %s1210_s17 = smov (%p30_p0, %s28_s17), 0  ;;  %s69_s20 = sadd.s32 1, %s987_s13 }
   0x7   : > { %p78_p3 = por %p77_p2, %p76_p1  ;;  %s65_s19 = ssub.s32 %s995_s15, %s1210_s17 }
   0x8   : > { %p67_p5 = scmp.eq.s32.totalorder %s65_s19, 0  ;;  %p1056_p6 = por %p134_p4, %p76_p1 }
   0x9   : > { %p823_p7 = scmp.ge.s32.totalorder %s999_s16, 3 }
   0xa   : > { %s1061_s22 = scalar_select %p67_p5, %s987_s13, %s69_s20  }
   0xb   : > { %171 = sbr.rel (%p823_p7) target bundleno = 43 (0x2b), region = 20 }
  0x12   : > { %174 = sbr.rel (!%p78_p3) target bundleno = 43 (0x2b), region = 24  ;;  %s176_s23 = sand.u32 (%p78_p3), 1, %s987_s13  }
  0x13   : > { %s825_s24 = sshll.u32 (%p78_p3), %s995_s15, 2  ;;  %s824_s25 = sshll.u32 (%p78_p3), %s176_s23, 7 }
  0x14   : > { %s1069_s28 = scalar_lea.vmem (%p78_p3), %s1201_s1, %s825_s24  ;;  %s1073_s29 = scalar_lea.vmem (%p78_p3), [#allocation2], %s824_s25 }
  0x15   : > { %v199_v0 = vld [vmem:[%s1069_s28] sm:$0xf] (%p78_p3)  ;;  %v201_v1 = vld [vmem:[%s1069_s28 + $0xc] sm:$0xf] (%p78_p3)  ;;  %v203_v2 = vld [vmem:[%s1069_s28 + $0x18] sm:$0xf] (%p78_p3) }
  0x16   : > { %200 = vst [vmem:[%s1073_s29] sm:$0xf] (%p78_p3), %v199_v0  ;;  %202 = vst [vmem:[%s1073_s29 + $0x4] sm:$0xf] (%p78_p3), %v201_v1  ;;  %v205_v3 = vld [vmem:[%s1069_s28 + $0x24] sm:$0xf] (%p78_p3) }
  0x17   : > { %v207_v4 = vld [vmem:[%s1069_s28 + $0x30] sm:$0xf] (%p78_p3)  ;;  %204 = vst [vmem:[%s1073_s29 + $0x8] sm:$0xf] (%p78_p3), %v203_v2  ;;  %206 = vst [vmem:[%s1073_s29 + $0xc] sm:$0xf] (%p78_p3), %v205_v3 }
  0x18   : > { %208 = vst [vmem:[%s1073_s29 + $0x10] sm:$0xf] (%p78_p3), %v207_v4  ;;  %v209_v5 = vld [vmem:[%s1069_s28 + $0x3c] sm:$0xf] (%p78_p3)  ;;  %v211_v6 = vld [vmem:[%s1069_s28 + $0x48] sm:$0xf] (%p78_p3) }
  0x19   : > { %v213_v7 = vld [vmem:[%s1069_s28 + $0x54] sm:$0xf]  ;;  %210 = vst [vmem:[%s1073_s29 + $0x14] sm:$0xf] %v209_v5  ;;  %212 = vst [vmem:[%s1073_s29 + $0x18] sm:$0xf] %v211_v6 }
  0x1a   : > { %214 = vst [vmem:[%s1073_s29 + $0x1c] sm:$0xf] %v213_v7  ;;  %v215_v8 = vld [vmem:[%s1069_s28 + $0x60] sm:$0xf]  ;;  %v217_v9 = vld [vmem:[%s1069_s28 + $0x6c] sm:$0xf] }
  0x1b   : > { %v219_v10 = vld [vmem:[%s1069_s28 + $0x78] sm:$0xf]  ;;  %216 = vst [vmem:[%s1073_s29 + $0x20] sm:$0xf] %v215_v8  ;;  %218 = vst [vmem:[%s1073_s29 + $0x24] sm:$0xf] %v217_v9 }
  0x1c   : > { %220 = vst [vmem:[%s1073_s29 + $0x28] sm:$0xf] %v219_v10  ;;  %v221_v11 = vld [vmem:[%s1069_s28 + $0x84] sm:$0xf]  ;;  %v223_v12 = vld [vmem:[%s1069_s28 + $0x90] sm:$0xf] }
  0x1d   : > { %v225_v13 = vld [vmem:[%s1069_s28 + $0x9c] sm:$0xf]  ;;  %222 = vst [vmem:[%s1073_s29 + $0x2c] sm:$0xf] %v221_v11  ;;  %224 = vst [vmem:[%s1073_s29 + $0x30] sm:$0xf] %v223_v12 }
  0x1e   : > { %226 = vst [vmem:[%s1073_s29 + $0x34] sm:$0xf] %v225_v13  ;;  %v227_v14 = vld [vmem:[%s1069_s28 + $0xa8] sm:$0xf]  ;;  %v229_v15 = vld [vmem:[%s1069_s28 + $0xb4] sm:$0xf] }
  0x1f   : > { %v231_v16 = vld [vmem:[%s1069_s28 + $0xc0] sm:$0xf]  ;;  %228 = vst [vmem:[%s1073_s29 + $0x38] sm:$0xf] %v227_v14  ;;  %230 = vst [vmem:[%s1073_s29 + $0x3c] sm:$0xf] %v229_v15 }
  0x20   : > { %232 = vst [vmem:[%s1073_s29 + $0x40] sm:$0xf] %v231_v16  ;;  %v233_v17 = vld [vmem:[%s1069_s28 + $0xcc] sm:$0xf]  ;;  %v235_v18 = vld [vmem:[%s1069_s28 + $0xd8] sm:$0xf] }
  0x21   : > { %v237_v19 = vld [vmem:[%s1069_s28 + $0xe4] sm:$0xf]  ;;  %234 = vst [vmem:[%s1073_s29 + $0x44] sm:$0xf] %v233_v17  ;;  %236 = vst [vmem:[%s1073_s29 + $0x48] sm:$0xf] %v235_v18 }
  0x22   : > { %238 = vst [vmem:[%s1073_s29 + $0x4c] sm:$0xf] %v237_v19  ;;  %v239_v20 = vld [vmem:[%s1069_s28 + $0xf0] sm:$0xf]  ;;  %v241_v21 = vld [vmem:[%s1069_s28 + $0xfc] sm:$0xf] }
  0x23   : > { %v243_v22 = vld [vmem:[%s1069_s28 + $0x108] sm:$0xf]  ;;  %240 = vst [vmem:[%s1073_s29 + $0x50] sm:$0xf] %v239_v20  ;;  %242 = vst [vmem:[%s1073_s29 + $0x54] sm:$0xf] %v241_v21 }
  0x24   : > { %244 = vst [vmem:[%s1073_s29 + $0x58] sm:$0xf] %v243_v22  ;;  %v245_v23 = vld [vmem:[%s1069_s28 + $0x114] sm:$0xf]  ;;  %v247_v24 = vld [vmem:[%s1069_s28 + $0x120] sm:$0xf] }
  0x25   : > { %v249_v25 = vld [vmem:[%s1069_s28 + $0x12c] sm:$0xf]  ;;  %246 = vst [vmem:[%s1073_s29 + $0x5c] sm:$0xf] %v245_v23  ;;  %248 = vst [vmem:[%s1073_s29 + $0x60] sm:$0xf] %v247_v24 }
  0x26   : > { %250 = vst [vmem:[%s1073_s29 + $0x64] sm:$0xf] %v249_v25  ;;  %v251_v26 = vld [vmem:[%s1069_s28 + $0x138] sm:$0xf]  ;;  %v253_v27 = vld [vmem:[%s1069_s28 + $0x144] sm:$0xf] }
  0x27   : > { %v255_v28 = vld [vmem:[%s1069_s28 + $0x150] sm:$0xf]  ;;  %252 = vst [vmem:[%s1073_s29 + $0x68] sm:$0xf] %v251_v26  ;;  %254 = vst [vmem:[%s1073_s29 + $0x6c] sm:$0xf] %v253_v27 }
  0x28   : > { %256 = vst [vmem:[%s1073_s29 + $0x70] sm:$0xf] %v255_v28  ;;  %v257_v29 = vld [vmem:[%s1069_s28 + $0x15c] sm:$0xf]  ;;  %v259_v30 = vld [vmem:[%s1069_s28 + $0x168] sm:$0xf] }
  0x29   : > { %v261_v31 = vld [vmem:[%s1069_s28 + $0x174] sm:$0xf]  ;;  %258 = vst [vmem:[%s1073_s29 + $0x74] sm:$0xf] %v257_v29  ;;  %260 = vst [vmem:[%s1073_s29 + $0x78] sm:$0xf] %v259_v30 }
  0x2a   : > { %262 = vst [vmem:[%s1073_s29 + $0x7c] sm:$0xf] %v261_v31 }
  0x2b PF: > { %p826_p8 = scmp.ge.s32.totalorder %s999_s16, 1  ;;  %p354_p9 = scmp.lt.s32.totalorder %s999_s16, 4 }
  0x2d   : > { %p355_p10 = pnand %p826_p8, %p354_p9 }
  0x2e   : > { %s361_s30 = sand.u32 (!%p355_p10), 1, %s983_s12   ;;  %v957_v32 = vld [vmem:[%s1200_s0 + $0x4] ss:$8 sps:$4 sm:$0xff] (!%p355_p10)   ;;  %v960_v33 = vld [vmem:[%s1200_s0 + $0x14] ss:$8 sps:$4 sm:$0xff] (!%p355_p10)   ;;  %p409_p11 = scmp.lt.s32.totalorder (!%p355_p10), %s991_s14, 2 }
  0x2f   : > { %358 = sbr.rel (%p355_p10) target bundleno = 312 (0x138), region = 69  ;;  %s827_s4 = sshll.u32 (!%p355_p10), %s361_s30, 7  ;;  %610 = vmatprep.mubr.bf16.mxu0 (!%p355_p10), %v957_v32  ;;  %618 = vmatprep.mubr.bf16.mxu1 (!%p355_p10), %v960_v33  ;;  %v955_v50 = vld [vmem:[%s1200_s0] ss:$8 sps:$4 sm:$0xff] (!%p355_p10)   ;;  %v958_v51 = vld [vmem:[%s1200_s0 + $0x10] ss:$8 sps:$4 sm:$0xff] (!%p355_p10)  }
  0x30   : > { %s1148_s9 = scalar_lea.vmem (!%p355_p10), [#allocation2], %s827_s4  ;;  %s828_s26 = sshll.u32 (!%p355_p10), %s361_s30, 5 }
  0x31   : > { %v939_v34 = vld [vmem:[%s1148_s9 + $0x40] sm:$0xff] (!%p355_p10)   ;;  %v941_v36 = vld [vmem:[%s1148_s9 + $0x48] sm:$0xff] (!%p355_p10)   ;;  %v943_v38 = vld [vmem:[%s1148_s9 + $0x50] sm:$0xff] (!%p355_p10)   ;;  %s395_s27 = scalar_lea.vmem (!%p355_p10), [#allocation3], %s828_s26 }
  0x32   : > { %v940_v35 = vld [vmem:[%s1148_s9] sm:$0xff] (!%p355_p10)   ;;  %854 = vmatprep.subr.bf16.mxu0 (!%p355_p10), %v939_v34  ;;  %882 = vmatprep.subr.bf16.mxu1 (!%p355_p10), %v939_v34  ;;  %v942_v37 = vld [vmem:[%s1148_s9 + $0x8] sm:$0xff] (!%p355_p10)   ;;  %v944_v39 = vld [vmem:[%s1148_s9 + $0x10] sm:$0xff] (!%p355_p10)  }
  0x33   : > { %855 = vmatpush3.bf16.msra.mxu0 (!%p355_p10), %v940_v35  ;;  %890 = vmatpush3.bf16.msra.mxu1 (!%p355_p10), %v940_v35  ;;  %v945_v40 = vld [vmem:[%s1148_s9 + $0x58] sm:$0xff] (!%p355_p10)   ;;  %v947_v42 = vld [vmem:[%s1148_s9 + $0x60] sm:$0xff] (!%p355_p10)   ;;  %v949_v44 = vld [vmem:[%s1148_s9 + $0x68] sm:$0xff] (!%p355_p10)  }
  0x34   : > { %856 = vmatprep.subr.bf16.mxu0 (!%p355_p10), %v941_v36  ;;  %883 = vmatprep.subr.bf16.mxu1 (!%p355_p10), %v941_v36  ;;  %v946_v41 = vld [vmem:[%s1148_s9 + $0x18] sm:$0xff] (!%p355_p10)   ;;  %v948_v43 = vld [vmem:[%s1148_s9 + $0x20] sm:$0xff] (!%p355_p10)   ;;  %v950_v45 = vld [vmem:[%s1148_s9 + $0x28] sm:$0xff] (!%p355_p10)  }
  0x35   : > { %v951_v46 = vld [vmem:[%s1148_s9 + $0x70] sm:$0xff] (!%p355_p10)   ;;  %v953_v48 = vld [vmem:[%s1148_s9 + $0x78] sm:$0xff] (!%p355_p10)  }
  0x36   : > { %v952_v47 = vld [vmem:[%s1148_s9 + $0x30] sm:$0xff]   ;;  %v954_v49 = vld [vmem:[%s1148_s9 + $0x38] sm:$0xff]   ;;  %s410_s20 = scalar_select %p409_p11, %s991_s14, 2 }
  0x37   : > { %857 = vmatpush3.bf16.msra.mxu0 %v942_v37  ;;  %891 = vmatpush3.bf16.msra.mxu1 %v942_v37  ;;  %s851_s12 = sshll.u32 (%p1056_p6), %s991_s14, 3 }
  0x38   : > { %858 = vmatprep.subr.bf16.mxu0 %v943_v38  ;;  %884 = vmatprep.subr.bf16.mxu1 %v943_v38  ;;  %s411_s25 = scalar_lea.vmem %s1202_s2, %s410_s20  ;;  %s672_s30 = scalar_lea.vmem (%p1056_p6), %s1203_s3, %s851_s12 }
  0x39   : > { %v849_v60 = vld [vmem:[%s411_s25] ss:$0 sm:$0xff] }
  0x3b   : > { %859 = vmatpush3.bf16.msra.mxu0 %v944_v39  ;;  %892 = vmatpush3.bf16.msra.mxu1 %v944_v39 }
  0x3c   : > { %860 = vmatprep.subr.bf16.mxu0 %v945_v40  ;;  %885 = vmatprep.subr.bf16.mxu1 %v945_v40 }
  0x3f   : > { %861 = vmatpush3.bf16.msra.mxu0 %v946_v41  ;;  %893 = vmatpush3.bf16.msra.mxu1 %v946_v41 }
  0x40   : > { %862 = vmatprep.subr.bf16.mxu0 %v947_v42  ;;  %886 = vmatprep.subr.bf16.mxu1 %v947_v42 }
  0x43   : > { %863 = vmatpush3.bf16.msra.mxu0 %v948_v43  ;;  %894 = vmatpush3.bf16.msra.mxu1 %v948_v43 }
  0x44   : > { %864 = vmatprep.subr.bf16.mxu0 %v949_v44  ;;  %887 = vmatprep.subr.bf16.mxu1 %v949_v44 }
  0x47   : > { %865 = vmatpush3.bf16.msra.mxu0 %v950_v45  ;;  %895 = vmatpush3.bf16.msra.mxu1 %v950_v45 }
  0x48   : > { %866 = vmatprep.subr.bf16.mxu0 %v951_v46  ;;  %888 = vmatprep.subr.bf16.mxu1 %v951_v46 }
  0x4b   : > { %867 = vmatpush3.bf16.msra.mxu0 %v952_v47  ;;  %896 = vmatpush3.bf16.msra.mxu1 %v952_v47 }
  0x4c   : > { %868 = vmatprep.subr.bf16.mxu0 %v953_v48  ;;  %889 = vmatprep.subr.bf16.mxu1 %v953_v48 }
  0x4f   : > { %869 = vmatpush3.bf16.msra.mxu0 %v954_v49  ;;  %897 = vmatpush3.bf16.msra.mxu1 %v954_v49 }
  0x52   : > { %611 = vmatmul.mubr.bf16.vlgmr.msra.gmra.mrb[0].mxu0 %v955_v50  ;;  %619 = vmatmul.mubr.bf16.vlgmr.msra.gmra.mrb[0].mxu1 %v958_v51 }
 0x125   : > { %v870_v52 = vpop.f32.mrb[0].mxu0  ;;  %v876_v53 = vpop.f32.mrb[0].mxu1 }
 0x126   : > { %v871_v54 = vpop.f32.mrb[1].mxu0  ;;  %v877_v55 = vpop.f32.mrb[1].mxu1 }
 0x127   : > { %v872_v56 = vadd.f32 %v871_v54, %v870_v52  ;;  %v878_v57 = vadd.f32 %v877_v55, %v876_v53  ;;  %v873_v58 = vpop.f32.mrb[2].mxu0  ;;  %v879_v59 = vpop.f32.mrb[2].mxu1 }
 0x128   : > { %v874_v61 = vpop.f32.mrb[3].mxu0  ;;  %v880_v62 = vpop.f32.mrb[3].mxu1 }
 0x129   : > { %v875_v63 = vadd.f32 %v874_v61, %v873_v58  ;;  %v881_v0 = vadd.f32 %v880_v62, %v879_v59  ;;  %v649_v1 = vadd.f32 %v872_v56, %v849_v60  ;;  %v651_v2 = vadd.f32 %v878_v57, %v849_v60  ;;  %667 = sbr.rel (!%p1056_p6) target bundleno = 312 (0x138), region = 85 }
 0x12b   : > { %v653_v3 = vmax.f32 %v649_v1, 0.0  ;;  %v655_v4 = vmax.f32 %v651_v2, 0.0  ;;  %v650_v5 = vadd.f32 %v875_v63, %v849_v60  ;;  %v652_v6 = vadd.f32 %v881_v0, %v849_v60 }
 0x12d   : > { %657 = vst [vmem:[%s395_s27] sm:$0xff] %v653_v3  ;;  %659 = vst [vmem:[%s395_s27 + $0x10] sm:$0xff] %v655_v4  ;;  %v654_v7 = vmax.f32 %v650_v5, 0.0  ;;  %v656_v8 = vmax.f32 %v652_v6, 0.0 }
 0x12f   : > { %658 = vst [vmem:[%s395_s27 + $0x8] sm:$0xff] %v654_v7  ;;  %660 = vst [vmem:[%s395_s27 + $0x18] sm:$0xff] %v656_v8 }
 0x134   : > { %v706_v9 = vld [vmem:[%s395_s27] sm:$0xff]  ;;  %v710_v11 = vld [vmem:[%s395_s27 + $0x10] sm:$0xff] }
 0x135   : > { %707 = vst [vmem:[%s672_s30] sm:$0xff] %v706_v9  ;;  %711 = vst [vmem:[%s672_s30 + $0x30] sm:$0xff] %v710_v11 }
 0x136   : > { %v708_v10 = vld [vmem:[%s395_s27 + $0x8] sm:$0xff]  ;;  %v712_v12 = vld [vmem:[%s395_s27 + $0x18] sm:$0xff] }
 0x137   : > { %709 = vst [vmem:[%s672_s30 + $0x18] sm:$0xff] %v708_v10  ;;  %713 = vst [vmem:[%s672_s30 + $0x48] sm:$0xff] %v712_v12 }
 0x138 PF: > { %s13_s16 = sadd.s32 1, %s999_s16   ;;  %s1205_s12 = smov %s987_s13 }
 0x139   : > { %p10_p12 = scmp.ge.s32.totalorder %s13_s16, 5   ;;  %s1206_s13 = smov %s1061_s22 }
 0x13a   : > { %s1207_s14 = smov %s995_s15  ;;  %s1208_s15 = smov %s1210_s17 }
 0x13b   :  { %12 = sbr.rel (!%p10_p12) target bundleno = 3 (0x3), region = 160 }

// kernel: forward.39
= control target key start
LH: loop header
LB: loop body
LE: loop exit
PB: predicated region body
PF: predicated region fallthrough
CT: control target
= control target key end

     0   :  { %s1455_s0 = inlined_call_operand.vmem [shape: bf16[32,1536], index: 0, kind: input, shape index: {}]   ;;  %s1456_s1 = inlined_call_operand.vmem [shape: bf16[1536,384], index: 1, kind: input, shape index: {}]   ;;  %s1457_s2 = inlined_call_operand.vmem [shape: f32[1,384], index: 2, kind: input, shape index: {}]   ;;  %s1458_s3 = inlined_call_operand.vmem [shape: f32[32,384], index: 3, kind: output, shape index: {}]  }
   0x1   :  { %1460 = sst [smem:[#allocation6_spill]] %s1455_s0 }
   0x2   :  { %1461 = sst [smem:[#allocation7_spill]] %s1456_s1 }
   0x3   :  { %s1164_s12 = smov 0   ;;  %s1166_s13 = smov 0  }
   0x4   :  { %s1168_s14 = smov 0   ;;  %s1170_s15 = smov 0  }
   0x5   :  { %s1172_s16 = smov 0   ;;  %s1174_s17 = smov 0  }
   0x6   :  { %s1176_s18 = smov 0   ;;  %s1178_s19 = smov 0  }
   0x7   :  { %s1180_s20 = smov 0   ;;  %s1182_s21 = smov 0  }
   0x8   :  { %s1184_s22 = smov 0  }
   0x9 LB: > { %s856_s23 = sadd.s32 4294967295, %s1141_s22   ;;  %s25_s24 = sadd.s32 1, %s1133_s20  ;;  %s1141_s22 = sphi %s1184_s22, %s13_s22   ;;  %s1137_s21 = sphi %s1182_s21, %s1478_s21   ;;  %s1133_s20 = sphi %s1180_s20, %s1477_s20   ;;  %s1129_s19 = sphi %s1178_s19, %s1476_s19   ;;  %s1125_s18 = sphi %s1176_s18, %s1475_s18   ;;  %s1121_s17 = sphi %s1174_s17, %s1474_s17   ;;  %s1117_s16 = sphi %s1172_s16, %s1473_s16   ;;  %s1113_s15 = sphi %s1170_s15, %s1472_s15   ;;  %s1109_s14 = sphi %s1168_s14, %s1471_s14   ;;  %s1105_s13 = sphi %s1166_s13, %s1470_s13   ;;  %s1101_s12 = sphi %s1164_s12, %s1469_s12  }
   0xa   : > { %p26_p0 = scmp.ge.s32.totalorder %s25_s24, 6  ;;  %s28_s25 = sadd.s32 1, %s1137_s21 }
   0xb   : > { %s41_s26 = sadd.s32 1, %s1121_s17  ;;  %p48_p1 = scmp.ne.s32.totalorder %s1121_s17, %s1117_s16 }
   0xc   : > { %s1480_s24 = smov (%p26_p0, %s25_s24), 0  ;;  %s1482_s25 = smov (!%p26_p0, %s28_s25), %s1137_s21 }
   0xd   : > { %s37_s27 = ssub.s32 %s1133_s20, %s1480_s24  ;;  %p49_p2 = scmp.eq.s32.totalorder %s1141_s22, 0 }
   0xe   : > { %p30_p3 = scmp.ge.s32.totalorder %s1482_s25, 3  ;;  %p39_p4 = scmp.eq.s32.totalorder %s37_s27, 0 }
   0xf   : > { %p1231_p5 = por %p49_p2, %p48_p1  ;;  %s69_s29 = sadd.s32 1, %s1113_s15 }
  0x10   : > { %s1484_s25 = smov (%p30_p3, %s1482_s25), 0  ;;  %p76_p6 = scmp.ne.s32.totalorder %s1113_s15, %s1109_s14 }
  0x11   : > { %1463 = sst [smem:[#allocation5_spill]] %s1484_s25  ;;  %s65_s4 = ssub.s32 %s1137_s21, %s1484_s25 }
  0x12   : > { %s1239_s30 = scalar_select %p39_p4, %s1121_s17, %s41_s26  }
  0x13   : > { %s66_s5 = sor.u32 %s65_s4, %s37_s27  ;;  %p121_p7 = scmp.eq.s32.totalorder %s65_s4, 0 }
  0x14   : > { %p67_p8 = scmp.eq.s32.totalorder %s66_s5, 0  ;;  %p1245_p9 = por %p76_p6, %p49_p2 }
  0x15   : > { %s123_s7 = sadd.s32 1, %s1105_s13  ;;  %p133_p10 = scmp.ne.s32.totalorder %s1105_s13, %s1101_s12 }
  0x16   : > { %s1253_s8 = scalar_select %p67_p8, %s1113_s15, %s69_s29  }
  0x17   : > { %s1256_s9 = scalar_select %p121_p7, %s1105_s13, %s123_s7  }
  0x18   : > { %p134_p11 = scmp.eq.s32.totalorder %s856_s23, 17  ;;  %p859_p13 = scmp.ge.s32.totalorder %s1141_s22, 18 }
  0x1a   : > { %p1258_p12 = por %p134_p11, %p133_p10  ;;  %156 = sbr.rel (%p859_p13) target bundleno = 76 (0x4c), region = 16 }
  0x21   : > { %159 = sbr.rel (!%p1231_p5) target bundleno = 45 (0x2d), region = 20  ;;  %s161_s11 = sand.u32 (%p1231_p5), 1, %s1121_s17  }
  0x22   : > { %s898_s26 = sshll.u32 (%p1231_p5), %s1133_s20, 3  ;;  %s860_s27 = sshll.u32 (%p1231_p5), %s161_s11, 5 }
  0x23   : > { %s1466_s0 = sld [smem:[#allocation6_spill]] (%p1231_p5)  ;;  %s163_s23 = scalar_lea.vmem (%p1231_p5), [#allocation2], %s860_s27 }
  0x29   : > { %s169_s5 = scalar_lea.vmem %s1466_s0, %s898_s26 }
  0x2a   : > { %v203_v0 = vld [vmem:[%s169_s5] sm:$0xff]  ;;  %v205_v1 = vld [vmem:[%s169_s5 + $0x30] sm:$0xff] }
  0x2b   : > { %v207_v2 = vld [vmem:[%s169_s5 + $0x60] sm:$0xff]  ;;  %204 = vst [vmem:[%s163_s23] sm:$0xff] %v203_v0  ;;  %206 = vst [vmem:[%s163_s23 + $0x8] sm:$0xff] %v205_v1  ;;  %v209_v3 = vld [vmem:[%s169_s5 + $0x90] sm:$0xff] }
  0x2c   : > { %208 = vst [vmem:[%s163_s23 + $0x10] sm:$0xff] %v207_v2  ;;  %210 = vst [vmem:[%s163_s23 + $0x18] sm:$0xff] %v209_v3 }
  0x2d PF: > { %216 = sbr.rel (!%p1245_p9) target bundleno = 76 (0x4c), region = 58  ;;  %s218_s28 = sand.u32 (%p1245_p9), 1, %s1113_s15  }
  0x2e   : > { %s943_s7 = smul.u32 (%p1245_p9), 96, %s1133_s20  ;;  %s863_s11 = sshll.u32 (%p1245_p9), %s218_s28, 7 }
  0x2f   : > { %s1467_s1 = sld [smem:[#allocation7_spill]] (%p1245_p9)  ;;  %s1283_s6 = scalar_lea.vmem (%p1245_p9), [#allocation3], %s863_s11 }
  0x30   : > { %s223_s26 = sadd.s32 (%p1245_p9), %s1137_s21, %s943_s7 }
  0x31   : > { %s866_s29 = sshll.u32 (%p1245_p9), %s223_s26, 2 }
  0x35   : > { %s1278_s27 = scalar_lea.vmem %s1467_s1, %s866_s29 }
  0x36   : > { %v241_v4 = vld [vmem:[%s1278_s27] sm:$0xf]  ;;  %v243_v5 = vld [vmem:[%s1278_s27 + $0xc] sm:$0xf]  ;;  %v245_v6 = vld [vmem:[%s1278_s27 + $0x18] sm:$0xf] }
  0x37   : > { %242 = vst [vmem:[%s1283_s6] sm:$0xf] %v241_v4  ;;  %244 = vst [vmem:[%s1283_s6 + $0x4] sm:$0xf] %v243_v5  ;;  %v247_v7 = vld [vmem:[%s1278_s27 + $0x24] sm:$0xf] }
  0x38   : > { %246 = vst [vmem:[%s1283_s6 + $0x8] sm:$0xf] %v245_v6  ;;  %v249_v8 = vld [vmem:[%s1278_s27 + $0x30] sm:$0xf]  ;;  %v251_v9 = vld [vmem:[%s1278_s27 + $0x3c] sm:$0xf] }
  0x39   : > { %248 = vst [vmem:[%s1283_s6 + $0xc] sm:$0xf] %v247_v7  ;;  %250 = vst [vmem:[%s1283_s6 + $0x10] sm:$0xf] %v249_v8  ;;  %v253_v10 = vld [vmem:[%s1278_s27 + $0x48] sm:$0xf] }
  0x3a   : > { %252 = vst [vmem:[%s1283_s6 + $0x14] sm:$0xf] %v251_v9  ;;  %v255_v11 = vld [vmem:[%s1278_s27 + $0x54] sm:$0xf]  ;;  %v257_v12 = vld [vmem:[%s1278_s27 + $0x60] sm:$0xf] }
  0x3b   : > { %254 = vst [vmem:[%s1283_s6 + $0x18] sm:$0xf] %v253_v10  ;;  %256 = vst [vmem:[%s1283_s6 + $0x1c] sm:$0xf] %v255_v11  ;;  %v259_v13 = vld [vmem:[%s1278_s27 + $0x6c] sm:$0xf] }
  0x3c   : > { %258 = vst [vmem:[%s1283_s6 + $0x20] sm:$0xf] %v257_v12  ;;  %v261_v14 = vld [vmem:[%s1278_s27 + $0x78] sm:$0xf]  ;;  %v263_v15 = vld [vmem:[%s1278_s27 + $0x84] sm:$0xf] }
  0x3d   : > { %260 = vst [vmem:[%s1283_s6 + $0x24] sm:$0xf] %v259_v13  ;;  %262 = vst [vmem:[%s1283_s6 + $0x28] sm:$0xf] %v261_v14  ;;  %v265_v16 = vld [vmem:[%s1278_s27 + $0x90] sm:$0xf] }
  0x3e   : > { %264 = vst [vmem:[%s1283_s6 + $0x2c] sm:$0xf] %v263_v15  ;;  %v267_v17 = vld [vmem:[%s1278_s27 + $0x9c] sm:$0xf]  ;;  %v269_v18 = vld [vmem:[%s1278_s27 + $0xa8] sm:$0xf] }
  0x3f   : > { %266 = vst [vmem:[%s1283_s6 + $0x30] sm:$0xf] %v265_v16  ;;  %268 = vst [vmem:[%s1283_s6 + $0x34] sm:$0xf] %v267_v17  ;;  %v271_v19 = vld [vmem:[%s1278_s27 + $0xb4] sm:$0xf] }
  0x40   : > { %270 = vst [vmem:[%s1283_s6 + $0x38] sm:$0xf] %v269_v18  ;;  %v273_v20 = vld [vmem:[%s1278_s27 + $0xc0] sm:$0xf]  ;;  %v275_v21 = vld [vmem:[%s1278_s27 + $0xcc] sm:$0xf] }
  0x41   : > { %272 = vst [vmem:[%s1283_s6 + $0x3c] sm:$0xf] %v271_v19  ;;  %274 = vst [vmem:[%s1283_s6 + $0x40] sm:$0xf] %v273_v20  ;;  %v277_v22 = vld [vmem:[%s1278_s27 + $0xd8] sm:$0xf] }
  0x42   : > { %276 = vst [vmem:[%s1283_s6 + $0x44] sm:$0xf] %v275_v21  ;;  %v279_v23 = vld [vmem:[%s1278_s27 + $0xe4] sm:$0xf]  ;;  %v281_v24 = vld [vmem:[%s1278_s27 + $0xf0] sm:$0xf] }
  0x43   : > { %278 = vst [vmem:[%s1283_s6 + $0x48] sm:$0xf] %v277_v22  ;;  %280 = vst [vmem:[%s1283_s6 + $0x4c] sm:$0xf] %v279_v23  ;;  %v283_v25 = vld [vmem:[%s1278_s27 + $0xfc] sm:$0xf] }
  0x44   : > { %282 = vst [vmem:[%s1283_s6 + $0x50] sm:$0xf] %v281_v24  ;;  %v285_v26 = vld [vmem:[%s1278_s27 + $0x108] sm:$0xf]  ;;  %v287_v27 = vld [vmem:[%s1278_s27 + $0x114] sm:$0xf] }
  0x45   : > { %284 = vst [vmem:[%s1283_s6 + $0x54] sm:$0xf] %v283_v25  ;;  %286 = vst [vmem:[%s1283_s6 + $0x58] sm:$0xf] %v285_v26  ;;  %v289_v28 = vld [vmem:[%s1278_s27 + $0x120] sm:$0xf] }
  0x46   : > { %288 = vst [vmem:[%s1283_s6 + $0x5c] sm:$0xf] %v287_v27  ;;  %v291_v29 = vld [vmem:[%s1278_s27 + $0x12c] sm:$0xf]  ;;  %v293_v30 = vld [vmem:[%s1278_s27 + $0x138] sm:$0xf] }
  0x47   : > { %290 = vst [vmem:[%s1283_s6 + $0x60] sm:$0xf] %v289_v28  ;;  %292 = vst [vmem:[%s1283_s6 + $0x64] sm:$0xf] %v291_v29  ;;  %v295_v31 = vld [vmem:[%s1278_s27 + $0x144] sm:$0xf] }
  0x48   : > { %294 = vst [vmem:[%s1283_s6 + $0x68] sm:$0xf] %v293_v30  ;;  %v297_v32 = vld [vmem:[%s1278_s27 + $0x150] sm:$0xf]  ;;  %v299_v33 = vld [vmem:[%s1278_s27 + $0x15c] sm:$0xf] }
  0x49   : > { %296 = vst [vmem:[%s1283_s6 + $0x6c] sm:$0xf] %v295_v31  ;;  %298 = vst [vmem:[%s1283_s6 + $0x70] sm:$0xf] %v297_v32  ;;  %v301_v34 = vld [vmem:[%s1278_s27 + $0x168] sm:$0xf] }
  0x4a   : > { %300 = vst [vmem:[%s1283_s6 + $0x74] sm:$0xf] %v299_v33  ;;  %v303_v35 = vld [vmem:[%s1278_s27 + $0x174] sm:$0xf]  ;;  %302 = vst [vmem:[%s1283_s6 + $0x78] sm:$0xf] %v301_v34 }
  0x4b   : > { %304 = vst [vmem:[%s1283_s6 + $0x7c] sm:$0xf] %v303_v35 }
  0x4c PF: > { %p867_p0 = scmp.ge.s32.totalorder %s1141_s22, 1  ;;  %p396_p1 = scmp.lt.s32.totalorder %s1141_s22, 19 }
  0x4e   : > { %p397_p2 = pnand %p867_p0, %p396_p1 }
  0x4f   : > { %s403_s0 = sand.u32 (!%p397_p2), 1, %s1117_s16   ;;  %s410_s5 = sand.u32 (!%p397_p2), 1, %s1109_s14  }
  0x50   : > { %400 = sbr.rel (%p397_p2) target bundleno = 368 (0x170), region = 103  ;;  %s868_s23 = sshll.u32 (!%p397_p2), %s403_s0, 5 }
  0x51   : > { %s869_s28 = sshll.u32 (!%p397_p2), %s410_s5, 7  ;;  %s436_s7 = sand.u32 (!%p397_p2), 1, %s1101_s12  }
  0x52   : > { %p442_p3 = scmp.lt.s32.totalorder (!%p397_p2), %s1129_s19, 2  ;;  %s870_s11 = sshll.u32 (!%p397_p2), %s436_s7, 5 }
  0x53   : > { %s1359_s6 = scalar_lea.vmem (!%p397_p2), [#allocation2], %s868_s23  ;;  %s1361_s1 = scalar_lea.vmem (!%p397_p2), [#allocation3], %s869_s28 }
  0x54   : > { %s1363_s25 = scalar_lea.vmem (!%p397_p2), [#allocation4], %s870_s11  ;;  %p871_p4 = scmp.ne.s32.totalorder (!%p397_p2), %s1125_s18, 0 }
  0x57   : > { %s1353_s26 = scalar_select %p442_p3, %s1129_s19, 2 }
  0x58   : > { %450 = sbr.rel (%p871_p4) target bundleno = 95 (0x5f), region = 115  ;;  %v1143_v36 = vmov (!%p871_p4), 0.0  }
  0x59   : > { %s444_s27 = scalar_lea.vmem %s1457_s2, %s1353_s26  ;;  %451 = vst [vmem:[%s1363_s25] sm:$0xff] (!%p871_p4), %v1143_v36  ;;  %452 = vst [vmem:[%s1363_s25 + $0x8] sm:$0xff] (!%p871_p4), %v1143_v36 }
  0x5a   : > { %453 = vst [vmem:[%s1363_s25 + $0x10] sm:$0xff] (!%p871_p4), %v1143_v36  ;;  %454 = vst [vmem:[%s1363_s25 + $0x18] sm:$0xff] (!%p871_p4), %v1143_v36 }
  0x5f PF: > { %v1033_v37 = vld [vmem:[%s1361_s1 + $0x40] sm:$0xff]   ;;  %v1035_v39 = vld [vmem:[%s1361_s1 + $0x48] sm:$0xff]   ;;  %v1037_v41 = vld [vmem:[%s1361_s1 + $0x50] sm:$0xff]   ;;  %p892_p5 = scmp.ne.s32.totalorder %s1125_s18, 5 }
  0x60   : > { %v1034_v38 = vld [vmem:[%s1361_s1] sm:$0xff]   ;;  %899 = vmatprep.subr.bf16.mxu0 %v1033_v37  ;;  %927 = vmatprep.subr.bf16.mxu1 %v1033_v37  ;;  %v1036_v40 = vld [vmem:[%s1361_s1 + $0x8] sm:$0xff]   ;;  %v1038_v42 = vld [vmem:[%s1361_s1 + $0x10] sm:$0xff]  }
  0x61   : > { %900 = vmatpush3.bf16.msra.mxu0 %v1034_v38  ;;  %935 = vmatpush3.bf16.msra.mxu1 %v1034_v38  ;;  %v1039_v43 = vld [vmem:[%s1361_s1 + $0x58] sm:$0xff]   ;;  %v1041_v45 = vld [vmem:[%s1361_s1 + $0x60] sm:$0xff]   ;;  %v1043_v47 = vld [vmem:[%s1361_s1 + $0x68] sm:$0xff]  }
  0x62   : > { %901 = vmatprep.subr.bf16.mxu0 %v1035_v39  ;;  %928 = vmatprep.subr.bf16.mxu1 %v1035_v39  ;;  %v1040_v44 = vld [vmem:[%s1361_s1 + $0x18] sm:$0xff]   ;;  %v1042_v46 = vld [vmem:[%s1361_s1 + $0x20] sm:$0xff]   ;;  %v1044_v50 = vld [vmem:[%s1361_s1 + $0x28] sm:$0xff]  }
  0x63   : > { %v1051_v48 = vld [vmem:[%s1359_s6 + $0x4] ss:$8 sps:$4 sm:$0xff]   ;;  %v1054_v49 = vld [vmem:[%s1359_s6 + $0x14] ss:$8 sps:$4 sm:$0xff]   ;;  %v1049_v55 = vld [vmem:[%s1359_s6] ss:$8 sps:$4 sm:$0xff]  }
  0x64   : > { %v1045_v51 = vld [vmem:[%s1361_s1 + $0x70] sm:$0xff]   ;;  %643 = vmatprep.mubr.bf16.mxu0 %v1051_v48  ;;  %651 = vmatprep.mubr.bf16.mxu1 %v1054_v49  ;;  %v1047_v53 = vld [vmem:[%s1361_s1 + $0x78] sm:$0xff]   ;;  %v455_v59 = vld [vmem:[%s1363_s25] sm:$0xff] }
  0x65   : > { %902 = vmatpush3.bf16.msra.mxu0 %v1036_v40  ;;  %936 = vmatpush3.bf16.msra.mxu1 %v1036_v40  ;;  %v1046_v52 = vld [vmem:[%s1361_s1 + $0x30] sm:$0xff]   ;;  %v1048_v54 = vld [vmem:[%s1361_s1 + $0x38] sm:$0xff]   ;;  %v456_v3 = vld [vmem:[%s1363_s25 + $0x8] sm:$0xff] }
  0x66   : > { %903 = vmatprep.subr.bf16.mxu0 %v1037_v41  ;;  %929 = vmatprep.subr.bf16.mxu1 %v1037_v41  ;;  %v1052_v56 = vld [vmem:[%s1359_s6 + $0x10] ss:$8 sps:$4 sm:$0xff]   ;;  %v893_v14 = vld [vmem:[%s444_s27] ss:$0 sm:$0xff] (!%p892_p5) }
  0x67   : > { %v457_v61 = vld [vmem:[%s1363_s25 + $0x10] sm:$0xff]  ;;  %v458_v5 = vld [vmem:[%s1363_s25 + $0x18] sm:$0xff] }
  0x69   : > { %904 = vmatpush3.bf16.msra.mxu0 %v1038_v42  ;;  %937 = vmatpush3.bf16.msra.mxu1 %v1038_v42 }
  0x6a   : > { %905 = vmatprep.subr.bf16.mxu0 %v1039_v43  ;;  %930 = vmatprep.subr.bf16.mxu1 %v1039_v43 }
  0x6d   : > { %906 = vmatpush3.bf16.msra.mxu0 %v1040_v44  ;;  %938 = vmatpush3.bf16.msra.mxu1 %v1040_v44 }
  0x6e   : > { %907 = vmatprep.subr.bf16.mxu0 %v1041_v45  ;;  %931 = vmatprep.subr.bf16.mxu1 %v1041_v45 }
  0x71   : > { %908 = vmatpush3.bf16.msra.mxu0 %v1042_v46  ;;  %939 = vmatpush3.bf16.msra.mxu1 %v1042_v46 }
  0x72   : > { %909 = vmatprep.subr.bf16.mxu0 %v1043_v47  ;;  %932 = vmatprep.subr.bf16.mxu1 %v1043_v47 }
  0x75   : > { %910 = vmatpush3.bf16.msra.mxu0 %v1044_v50  ;;  %940 = vmatpush3.bf16.msra.mxu1 %v1044_v50 }
  0x76   : > { %911 = vmatprep.subr.bf16.mxu0 %v1045_v51  ;;  %933 = vmatprep.subr.bf16.mxu1 %v1045_v51 }
  0x79   : > { %912 = vmatpush3.bf16.msra.mxu0 %v1046_v52  ;;  %941 = vmatpush3.bf16.msra.mxu1 %v1046_v52 }
  0x7a   : > { %913 = vmatprep.subr.bf16.mxu0 %v1047_v53  ;;  %934 = vmatprep.subr.bf16.mxu1 %v1047_v53 }
  0x7d   : > { %914 = vmatpush3.bf16.msra.mxu0 %v1048_v54  ;;  %942 = vmatpush3.bf16.msra.mxu1 %v1048_v54 }
  0x80   : > { %644 = vmatmul.mubr.bf16.vlgmr.msra.gmra.mrb[0].mxu0 %v1049_v55  ;;  %652 = vmatmul.mubr.bf16.vlgmr.msra.gmra.mrb[0].mxu1 %v1052_v56 }
 0x153   : > { %v915_v57 = vpop.f32.mrb[0].mxu0  ;;  %v921_v58 = vpop.f32.mrb[0].mxu1 }
 0x154   : > { %v916_v60 = vpop.f32.mrb[1].mxu0  ;;  %v922_v62 = vpop.f32.mrb[1].mxu1 }
 0x155   : > { %v917_v63 = vadd.f32 %v916_v60, %v915_v57  ;;  %v923_v0 = vadd.f32 %v922_v62, %v921_v58  ;;  %v918_v1 = vpop.f32.mrb[2].mxu0  ;;  %v924_v2 = vpop.f32.mrb[2].mxu1  ;;  %671 = sbr.rel (%p892_p5) target bundleno = 360 (0x168), region = 119 }
 0x156   : > { %v919_v4 = vpop.f32.mrb[3].mxu0  ;;  %v925_v6 = vpop.f32.mrb[3].mxu1 }
 0x157   : > { %v660_v7 = vadd.f32 %v917_v63, %v455_v59  ;;  %v662_v8 = vadd.f32 %v923_v0, %v457_v61  ;;  %v920_v9 = vadd.f32 %v919_v4, %v918_v1  ;;  %v926_v10 = vadd.f32 %v925_v6, %v924_v2 }
 0x159   : > { %664 = vst [vmem:[%s1363_s25] sm:$0xff] %v660_v7  ;;  %666 = vst [vmem:[%s1363_s25 + $0x10] sm:$0xff] %v662_v8  ;;  %v661_v11 = vadd.f32 %v920_v9, %v456_v3  ;;  %v663_v12 = vadd.f32 %v926_v10, %v458_v5 }
 0x15b   : > { %665 = vst [vmem:[%s1363_s25 + $0x8] sm:$0xff] %v661_v11  ;;  %667 = vst [vmem:[%s1363_s25 + $0x18] sm:$0xff] %v663_v12 }
 0x160   : > { %v672_v13 = vld [vmem:[%s1363_s25] sm:$0xff]  ;;  %v674_v18 = vld [vmem:[%s1363_s25 + $0x10] sm:$0xff] }
 0x161   : > { %v683_v16 = vadd.f32 %v893_v14, %v672_v13  ;;  %v685_v20 = vadd.f32 %v893_v14, %v674_v18 }
 0x162   : > { %v673_v15 = vld [vmem:[%s1363_s25 + $0x8] sm:$0xff]  ;;  %v675_v19 = vld [vmem:[%s1363_s25 + $0x18] sm:$0xff] }
 0x163   : > { %v684_v17 = vadd.f32 %v893_v14, %v673_v15  ;;  %v686_v21 = vadd.f32 %v893_v14, %v675_v19  ;;  %v687_v22 = vmax.f32 %v683_v16, 0.0  ;;  %v689_v24 = vmax.f32 %v685_v20, 0.0 }
 0x165   : > { %v688_v23 = vmax.f32 %v684_v17, 0.0  ;;  %v690_v25 = vmax.f32 %v686_v21, 0.0  ;;  %691 = vst [vmem:[%s1363_s25] sm:$0xff] %v687_v22  ;;  %693 = vst [vmem:[%s1363_s25 + $0x10] sm:$0xff] %v689_v24 }
 0x167   : > { %692 = vst [vmem:[%s1363_s25 + $0x8] sm:$0xff] %v688_v23  ;;  %694 = vst [vmem:[%s1363_s25 + $0x18] sm:$0xff] %v690_v25 }
 0x168 PF: > { %701 = sbr.rel (!%p1258_p12) target bundleno = 368 (0x170), region = 123  ;;  %s895_s14 = sshll.u32 (%p1258_p12), %s1129_s19, 3 }
 0x169   : > { %s706_s0 = scalar_lea.vmem (%p1258_p12), %s1458_s3, %s895_s14 }
 0x16c   : > { %v740_v26 = vld [vmem:[%s1363_s25] sm:$0xff] (%p1258_p12)  ;;  %v744_v28 = vld [vmem:[%s1363_s25 + $0x10] sm:$0xff] (%p1258_p12) }
 0x16d   : > { %741 = vst [vmem:[%s706_s0] sm:$0xff] (%p1258_p12), %v740_v26  ;;  %745 = vst [vmem:[%s706_s0 + $0x30] sm:$0xff] (%p1258_p12), %v744_v28 }
 0x16e   : > { %v742_v27 = vld [vmem:[%s1363_s25 + $0x8] sm:$0xff] (%p1258_p12)  ;;  %v746_v29 = vld [vmem:[%s1363_s25 + $0x18] sm:$0xff] (%p1258_p12) }
 0x16f   : > { %743 = vst [vmem:[%s706_s0 + $0x18] sm:$0xff] %v742_v27  ;;  %747 = vst [vmem:[%s706_s0 + $0x48] sm:$0xff] %v746_v29 }
 0x170 PF: > { %s13_s22 = sadd.s32 1, %s1141_s22   ;;  %s1468_s10 = sld [smem:[#allocation5_spill]] }
 0x171   : > { %p10_p6 = scmp.ge.s32.totalorder %s13_s22, 20   ;;  %s1469_s12 = smov %s1105_s13 }
 0x172   : > { %s1470_s13 = smov %s1256_s9  ;;  %s1471_s14 = smov %s1113_s15 }
 0x173   : > { %s1472_s15 = smov %s1253_s8  ;;  %s1473_s16 = smov %s1121_s17 }
 0x174   : > { %s1474_s17 = smov %s1239_s30  ;;  %s1475_s18 = smov %s1133_s20 }
 0x175   : > { %s1476_s19 = smov %s1137_s21  ;;  %s1477_s20 = smov %s1480_s24 }
 0x176   : > { %s1478_s21 = smov %s1468_s10  ;;  %12 = sbr.rel (!%p10_p6) target bundleno = 9 (0x9), region = 203 }

// kernel: forward.41
= control target key start
LH: loop header
LB: loop body
LE: loop exit
PB: predicated region body
PF: predicated region fallthrough
CT: control target
= control target key end

     0   :  { %s948_s12 = smov 0   ;;  %s950_s13 = smov 0   ;;  %s1151_s0 = inlined_call_operand.vmem [shape: bf16[8,512], index: 0, kind: input, shape index: {}]   ;;  %s1152_s1 = inlined_call_operand.vmem [shape: bf16[512,384], index: 1, kind: input, shape index: {}]   ;;  %s1153_s2 = inlined_call_operand.vmem [shape: f32[1,384], index: 2, kind: input, shape index: {}]   ;;  %s1154_s3 = inlined_call_operand.vmem [shape: f32[8,384], index: 3, kind: output, shape index: {}]  }
   0x1   :  { %s952_s14 = smov 0   ;;  %s954_s15 = smov 0  }
   0x2   :  { %s956_s16 = smov 0   ;;  %s958_s17 = smov 0  }
   0x3   :  { %s960_s18 = smov 0  }
   0x4 LB: > { %s25_s19 = sadd.s32 1, %s917_s16  ;;  %s28_s20 = sadd.s32 1, %s921_s17  ;;  %s925_s18 = sphi %s960_s18, %s13_s18   ;;  %s921_s17 = sphi %s958_s17, %s1160_s17   ;;  %s917_s16 = sphi %s956_s16, %s1159_s16   ;;  %s913_s15 = sphi %s954_s15, %s1158_s15   ;;  %s909_s14 = sphi %s952_s14, %s1157_s14   ;;  %s905_s13 = sphi %s950_s13, %s1156_s13   ;;  %s901_s12 = sphi %s948_s12, %s1155_s12  }
   0x5   : > { %p26_p0 = scmp.ge.s32.totalorder %s25_s19, 2  ;;  %p76_p1 = scmp.ne.s32.totalorder %s905_s13, %s901_s12 }
   0x6   : > { %p77_p2 = scmp.eq.s32.totalorder %s925_s18, 0  ;;  %s69_s24 = sadd.s32 1, %s905_s13 }
   0x7   : > { %s1162_s19 = smov (%p26_p0, %s25_s19), 0  ;;  %s1164_s20 = smov (!%p26_p0, %s28_s20), %s921_s17 }
   0x8   : > { %p78_p3 = por %p77_p2, %p76_p1  ;;  %p30_p4 = scmp.ge.s32.totalorder %s1164_s20, 3 }
   0x9   : > { %s64_s21 = ssub.s32 %s917_s16, %s1162_s19  ;;  %p740_p6 = scmp.ge.s32.totalorder %s925_s18, 6 }
   0xa   : > { %s1166_s20 = smov (%p30_p4, %s1164_s20), 0 }
   0xb   : > { %s65_s22 = ssub.s32 %s921_s17, %s1166_s20  ;;  %156 = sbr.rel (%p740_p6) target bundleno = 46 (0x2e), region = 16 }
   0xc   : > { %s66_s23 = sor.u32 %s65_s22, %s64_s21 }
   0xd   : > { %p67_p5 = scmp.eq.s32.totalorder %s66_s23, 0 }
   0xf   : > { %s999_s25 = scalar_select %p67_p5, %s905_s13, %s69_s24  }
  0x12   : > { %172 = sbr.rel (!%p78_p3) target bundleno = 46 (0x2e), region = 24  ;;  %s174_s26 = sand.u32 (%p78_p3), 1, %s905_s13  }
  0x13   : > { %s795_s27 = smul.u32 (%p78_p3), 96, %s917_s16  ;;  %s741_s28 = sshll.u32 (%p78_p3), %s174_s26, 7 }
  0x14   : > { %s1013_s7 = scalar_lea.vmem (%p78_p3), [#allocation2], %s741_s28 }
  0x15   : > { %s179_s29 = sadd.s32 (%p78_p3), %s921_s17, %s795_s27 }
  0x16   : > { %s744_s30 = sshll.u32 (%p78_p3), %s179_s29, 2 }
  0x17   : > { %s1008_s6 = scalar_lea.vmem (%p78_p3), %s1152_s1, %s744_s30 }
  0x18   : > { %v197_v0 = vld [vmem:[%s1008_s6] sm:$0xf] (%p78_p3)  ;;  %v199_v1 = vld [vmem:[%s1008_s6 + $0xc] sm:$0xf] (%p78_p3)  ;;  %v201_v2 = vld [vmem:[%s1008_s6 + $0x18] sm:$0xf] (%p78_p3) }
  0x19   : > { %198 = vst [vmem:[%s1013_s7] sm:$0xf] %v197_v0  ;;  %200 = vst [vmem:[%s1013_s7 + $0x4] sm:$0xf] %v199_v1  ;;  %v203_v3 = vld [vmem:[%s1008_s6 + $0x24] sm:$0xf] }
  0x1a   : > { %202 = vst [vmem:[%s1013_s7 + $0x8] sm:$0xf] %v201_v2  ;;  %v205_v4 = vld [vmem:[%s1008_s6 + $0x30] sm:$0xf]  ;;  %v207_v5 = vld [vmem:[%s1008_s6 + $0x3c] sm:$0xf] }
  0x1b   : > { %204 = vst [vmem:[%s1013_s7 + $0xc] sm:$0xf] %v203_v3  ;;  %206 = vst [vmem:[%s1013_s7 + $0x10] sm:$0xf] %v205_v4  ;;  %v209_v6 = vld [vmem:[%s1008_s6 + $0x48] sm:$0xf] }
  0x1c   : > { %208 = vst [vmem:[%s1013_s7 + $0x14] sm:$0xf] %v207_v5  ;;  %v211_v7 = vld [vmem:[%s1008_s6 + $0x54] sm:$0xf]  ;;  %v213_v8 = vld [vmem:[%s1008_s6 + $0x60] sm:$0xf] }
  0x1d   : > { %210 = vst [vmem:[%s1013_s7 + $0x18] sm:$0xf] %v209_v6  ;;  %212 = vst [vmem:[%s1013_s7 + $0x1c] sm:$0xf] %v211_v7  ;;  %v215_v9 = vld [vmem:[%s1008_s6 + $0x6c] sm:$0xf] }
  0x1e   : > { %214 = vst [vmem:[%s1013_s7 + $0x20] sm:$0xf] %v213_v8  ;;  %v217_v10 = vld [vmem:[%s1008_s6 + $0x78] sm:$0xf]  ;;  %v219_v11 = vld [vmem:[%s1008_s6 + $0x84] sm:$0xf] }
  0x1f   : > { %216 = vst [vmem:[%s1013_s7 + $0x24] sm:$0xf] %v215_v9  ;;  %218 = vst [vmem:[%s1013_s7 + $0x28] sm:$0xf] %v217_v10  ;;  %v221_v12 = vld [vmem:[%s1008_s6 + $0x90] sm:$0xf] }
  0x20   : > { %220 = vst [vmem:[%s1013_s7 + $0x2c] sm:$0xf] %v219_v11  ;;  %v223_v13 = vld [vmem:[%s1008_s6 + $0x9c] sm:$0xf]  ;;  %v225_v14 = vld [vmem:[%s1008_s6 + $0xa8] sm:$0xf] }
  0x21   : > { %222 = vst [vmem:[%s1013_s7 + $0x30] sm:$0xf] %v221_v12  ;;  %224 = vst [vmem:[%s1013_s7 + $0x34] sm:$0xf] %v223_v13  ;;  %v227_v15 = vld [vmem:[%s1008_s6 + $0xb4] sm:$0xf] }
  0x22   : > { %226 = vst [vmem:[%s1013_s7 + $0x38] sm:$0xf] %v225_v14  ;;  %v229_v16 = vld [vmem:[%s1008_s6 + $0xc0] sm:$0xf]  ;;  %v231_v17 = vld [vmem:[%s1008_s6 + $0xcc] sm:$0xf] }
  0x23   : > { %228 = vst [vmem:[%s1013_s7 + $0x3c] sm:$0xf] %v227_v15  ;;  %230 = vst [vmem:[%s1013_s7 + $0x40] sm:$0xf] %v229_v16  ;;  %v233_v18 = vld [vmem:[%s1008_s6 + $0xd8] sm:$0xf] }
  0x24   : > { %232 = vst [vmem:[%s1013_s7 + $0x44] sm:$0xf] %v231_v17  ;;  %v235_v19 = vld [vmem:[%s1008_s6 + $0xe4] sm:$0xf]  ;;  %v237_v20 = vld [vmem:[%s1008_s6 + $0xf0] sm:$0xf] }
  0x25   : > { %234 = vst [vmem:[%s1013_s7 + $0x48] sm:$0xf] %v233_v18  ;;  %236 = vst [vmem:[%s1013_s7 + $0x4c] sm:$0xf] %v235_v19  ;;  %v239_v21 = vld [vmem:[%s1008_s6 + $0xfc] sm:$0xf] }
  0x26   : > { %238 = vst [vmem:[%s1013_s7 + $0x50] sm:$0xf] %v237_v20  ;;  %v241_v22 = vld [vmem:[%s1008_s6 + $0x108] sm:$0xf]  ;;  %v243_v23 = vld [vmem:[%s1008_s6 + $0x114] sm:$0xf] }
  0x27   : > { %240 = vst [vmem:[%s1013_s7 + $0x54] sm:$0xf] %v239_v21  ;;  %242 = vst [vmem:[%s1013_s7 + $0x58] sm:$0xf] %v241_v22  ;;  %v245_v24 = vld [vmem:[%s1008_s6 + $0x120] sm:$0xf] }
  0x28   : > { %244 = vst [vmem:[%s1013_s7 + $0x5c] sm:$0xf] %v243_v23  ;;  %v247_v25 = vld [vmem:[%s1008_s6 + $0x12c] sm:$0xf]  ;;  %v249_v26 = vld [vmem:[%s1008_s6 + $0x138] sm:$0xf] }
  0x29   : > { %246 = vst [vmem:[%s1013_s7 + $0x60] sm:$0xf] %v245_v24  ;;  %248 = vst [vmem:[%s1013_s7 + $0x64] sm:$0xf] %v247_v25  ;;  %v251_v27 = vld [vmem:[%s1008_s6 + $0x144] sm:$0xf] }
  0x2a   : > { %250 = vst [vmem:[%s1013_s7 + $0x68] sm:$0xf] %v249_v26  ;;  %v253_v28 = vld [vmem:[%s1008_s6 + $0x150] sm:$0xf]  ;;  %v255_v29 = vld [vmem:[%s1008_s6 + $0x15c] sm:$0xf] }
  0x2b   : > { %252 = vst [vmem:[%s1013_s7 + $0x6c] sm:$0xf] %v251_v27  ;;  %254 = vst [vmem:[%s1013_s7 + $0x70] sm:$0xf] %v253_v28  ;;  %v257_v30 = vld [vmem:[%s1008_s6 + $0x168] sm:$0xf] }
  0x2c   : > { %256 = vst [vmem:[%s1013_s7 + $0x74] sm:$0xf] %v255_v29  ;;  %v259_v31 = vld [vmem:[%s1008_s6 + $0x174] sm:$0xf]  ;;  %258 = vst [vmem:[%s1013_s7 + $0x78] sm:$0xf] %v257_v30 }
  0x2d   : > { %260 = vst [vmem:[%s1013_s7 + $0x7c] sm:$0xf] %v259_v31 }
  0x2e PF: > { %p745_p7 = scmp.ge.s32.totalorder %s925_s18, 1  ;;  %p352_p8 = scmp.lt.s32.totalorder %s925_s18, 7 }
  0x30   : > { %p353_p9 = pnand %p745_p7, %p352_p8 }
  0x31   : > { %s359_s8 = sand.u32 (!%p353_p9), 1, %s901_s12   ;;  %s747_s9 = sshll.u32 (!%p353_p9), %s909_s14, 1 }
  0x32   : > { %356 = sbr.rel (%p353_p9) target bundleno = 330 (0x14a), region = 69  ;;  %s746_s10 = sshll.u32 (!%p353_p9), %s359_s8, 7 }
  0x33   : > { %p400_p10 = scmp.lt.s32.totalorder (!%p353_p9), %s747_s9, 3  ;;  %p408_p11 = scmp.lt.s32.totalorder (!%p353_p9), %s913_s15, 2 }
  0x34   : > { %s1099_s4 = scalar_lea.vmem (!%p353_p9), [#allocation2], %s746_s10  ;;  %p750_p12 = scmp.ne.s32.totalorder (!%p353_p9), %s909_s14, 0 }
  0x39   : > { %s1168_s9 = smov (!%p400_p10, %s747_s9), 3  ;;  %s1170_s15 = smov (!%p408_p11, %s913_s15), 2 }
  0x3a   : > { %s748_s11 = sshll.u32 %s1168_s9, 2  ;;  %s410_s27 = scalar_lea.vmem %s1153_s2, %s1170_s15  ;;  %v927_v32 = vmov (!%p750_p12), 0.0  }
  0x3b   : > { %s1087_s23 = scalar_lea.vmem %s1151_s0, %s748_s11  ;;  %s749_s12 = sshll.u32 %s1170_s15, 3 }
  0x3c   : > { %s1097_s30 = scalar_lea.vmem %s1154_s3, %s749_s12  ;;  %423 = sbr.rel (%p750_p12) target bundleno = 67 (0x43), region = 77 }
  0x3d   : > { %424 = vst [vmem:[%s1097_s30] sm:$0xff] (!%p750_p12), %v927_v32 }
  0x43 PF: > { %v853_v33 = vld [vmem:[%s1099_s4 + $0x40] sm:$0xff]   ;;  %v855_v35 = vld [vmem:[%s1099_s4 + $0x48] sm:$0xff]   ;;  %v857_v37 = vld [vmem:[%s1099_s4 + $0x50] sm:$0xff]   ;;  %p769_p13 = scmp.ne.s32.totalorder %s909_s14, 1 }
  0x44   : > { %v854_v34 = vld [vmem:[%s1099_s4] sm:$0xff]   ;;  %773 = vmatprep.subr.bf16.mxu0 %v853_v33  ;;  %v856_v36 = vld [vmem:[%s1099_s4 + $0x8] sm:$0xff]   ;;  %v858_v38 = vld [vmem:[%s1099_s4 + $0x10] sm:$0xff]  }
  0x45   : > { %774 = vmatpush3.bf16.msra.mxu0 %v854_v34  ;;  %v859_v39 = vld [vmem:[%s1099_s4 + $0x58] sm:$0xff]   ;;  %v861_v41 = vld [vmem:[%s1099_s4 + $0x60] sm:$0xff]   ;;  %v863_v43 = vld [vmem:[%s1099_s4 + $0x68] sm:$0xff]  }
  0x46   : > { %775 = vmatprep.subr.bf16.mxu0 %v855_v35  ;;  %v860_v40 = vld [vmem:[%s1099_s4 + $0x18] sm:$0xff]   ;;  %v862_v42 = vld [vmem:[%s1099_s4 + $0x20] sm:$0xff]   ;;  %v864_v46 = vld [vmem:[%s1099_s4 + $0x28] sm:$0xff]  }
  0x47   : > { %v426_v44 = vld [vmem:[%s1087_s23] sm:$0xff]  ;;  %v865_v47 = vld [vmem:[%s1099_s4 + $0x70] sm:$0xff]   ;;  %v867_v49 = vld [vmem:[%s1099_s4 + $0x78] sm:$0xff]  }
  0x48   : > { %v752_v45 = vcombine.high %v426_v44, %v426_v44  ;;  %v866_v48 = vld [vmem:[%s1099_s4 + $0x30] sm:$0xff]   ;;  %v868_v50 = vld [vmem:[%s1099_s4 + $0x38] sm:$0xff]   ;;  %v751_v51 = vcombine.low %v426_v44, %v426_v44  ;;  %v425_v53 = vld [vmem:[%s1097_s30] sm:$0xff] }
  0x49   : > { %776 = vmatpush3.bf16.msra.mxu0 %v856_v36  ;;  %v770_v60 = vld [vmem:[%s410_s27] ss:$0 sm:$0xff] (!%p769_p13) }
  0x4a   : > { %777 = vmatprep.subr.bf16.mxu0 %v857_v37  ;;  %594 = vmatprep.mubr.bf16.mxu0 %v752_v45 }
  0x4d   : > { %778 = vmatpush3.bf16.msra.mxu0 %v858_v38 }
  0x4e   : > { %779 = vmatprep.subr.bf16.mxu0 %v859_v39 }
  0x51   : > { %780 = vmatpush3.bf16.msra.mxu0 %v860_v40 }
  0x52   : > { %781 = vmatprep.subr.bf16.mxu0 %v861_v41 }
  0x55   : > { %782 = vmatpush3.bf16.msra.mxu0 %v862_v42 }
  0x56   : > { %783 = vmatprep.subr.bf16.mxu0 %v863_v43 }
  0x59   : > { %784 = vmatpush3.bf16.msra.mxu0 %v864_v46 }
  0x5a   : > { %785 = vmatprep.subr.bf16.mxu0 %v865_v47 }
  0x5d   : > { %786 = vmatpush3.bf16.msra.mxu0 %v866_v48 }
  0x5e   : > { %787 = vmatprep.subr.bf16.mxu0 %v867_v49 }
  0x61   : > { %788 = vmatpush3.bf16.msra.mxu0 %v868_v50 }
  0x64   : > { %595 = vmatmul.mubr.bf16.vlgmr.msra.gmra.mrb[0].mxu0 %v751_v51 }
 0x137   : > { %v789_v52 = vpop.f32.mrb[0].mxu0  ;;  %607 = sbr.rel (%p769_p13) target bundleno = 330 (0x14a), region = 81 }
 0x138   : > { %v790_v54 = vpop.f32.mrb[1].mxu0 }
 0x139   : > { %v791_v55 = vadd.f32 %v790_v54, %v789_v52  ;;  %v792_v56 = vpop.f32.mrb[2].mxu0 }
 0x13a   : > { %v793_v57 = vpop.f32.mrb[3].mxu0 }
 0x13b   : > { %v602_v58 = vadd.f32 %v791_v55, %v425_v53 }
 0x13d   : > { %603 = vst [vmem:[%s1097_s30] sm:$0xff] %v602_v58 }
 0x144   : > { %v608_v59 = vld [vmem:[%s1097_s30] sm:$0xff] }
 0x145   : > { %v616_v61 = vadd.f32 %v770_v60, %v608_v59 }
 0x147   : > { %v617_v62 = vmax.f32 %v616_v61, 0.0 }
 0x149   : > { %618 = vst [vmem:[%s1097_s30] sm:$0xff] %v617_v62 }
 0x14a PF: > { %s13_s18 = sadd.s32 1, %s925_s18   ;;  %s1155_s12 = smov %s905_s13 }
 0x14b   : > { %p10_p0 = scmp.ge.s32.totalorder %s13_s18, 8   ;;  %s1156_s13 = smov %s999_s25 }
 0x14c   : > { %s1157_s14 = smov %s917_s16  ;;  %s1158_s15 = smov %s921_s17 }
 0x14d   : > { %s1159_s16 = smov %s1162_s19  ;;  %s1160_s17 = smov %s1166_s20 }
 0x14e   :  { %12 = sbr.rel (!%p10_p0) target bundleno = 4 (0x4), region = 122 }

// kernel: forward.42
= control target key start
LH: loop header
LB: loop body
LE: loop exit
PB: predicated region body
PF: predicated region fallthrough
CT: control target
= control target key end

     0   :  { %s948_s12 = smov 0   ;;  %s950_s13 = smov 0   ;;  %s1151_s0 = inlined_call_operand.vmem [shape: bf16[8,1024], index: 0, kind: input, shape index: {}]   ;;  %s1152_s1 = inlined_call_operand.vmem [shape: bf16[1024,256], index: 1, kind: input, shape index: {}]   ;;  %s1153_s2 = inlined_call_operand.vmem [shape: f32[1,256], index: 2, kind: input, shape index: {}]   ;;  %s1154_s3 = inlined_call_operand.vmem [shape: f32[8,256], index: 3, kind: output, shape index: {}]  }
   0x1   :  { %s952_s14 = smov 0   ;;  %s954_s15 = smov 0  }
   0x2   :  { %s956_s16 = smov 0   ;;  %s958_s17 = smov 0  }
   0x3   :  { %s960_s18 = smov 0  }
   0x4 LB: > { %s25_s19 = sadd.s32 1, %s917_s16  ;;  %s28_s20 = sadd.s32 1, %s921_s17  ;;  %s925_s18 = sphi %s960_s18, %s13_s18   ;;  %s921_s17 = sphi %s958_s17, %s1160_s17   ;;  %s917_s16 = sphi %s956_s16, %s1159_s16   ;;  %s913_s15 = sphi %s954_s15, %s1158_s15   ;;  %s909_s14 = sphi %s952_s14, %s1157_s14   ;;  %s905_s13 = sphi %s950_s13, %s1156_s13   ;;  %s901_s12 = sphi %s948_s12, %s1155_s12  }
   0x5   : > { %p26_p0 = scmp.ge.s32.totalorder %s25_s19, 4  ;;  %p76_p1 = scmp.ne.s32.totalorder %s905_s13, %s901_s12 }
   0x6   : > { %p77_p2 = scmp.eq.s32.totalorder %s925_s18, 0  ;;  %s69_s24 = sadd.s32 1, %s905_s13 }
   0x7   : > { %s1162_s19 = smov (%p26_p0, %s25_s19), 0  ;;  %s1164_s20 = smov (!%p26_p0, %s28_s20), %s921_s17 }
   0x8   : > { %p78_p3 = por %p77_p2, %p76_p1  ;;  %p30_p4 = scmp.ge.s32.totalorder %s1164_s20, 2 }
   0x9   : > { %s64_s21 = ssub.s32 %s917_s16, %s1162_s19  ;;  %p740_p6 = scmp.ge.s32.totalorder %s925_s18, 8 }
   0xa   : > { %s1166_s20 = smov (%p30_p4, %s1164_s20), 0 }
   0xb   : > { %s65_s22 = ssub.s32 %s921_s17, %s1166_s20  ;;  %156 = sbr.rel (%p740_p6) target bundleno = 45 (0x2d), region = 16 }
   0xc   : > { %s66_s23 = sor.u32 %s65_s22, %s64_s21 }
   0xd   : > { %p67_p5 = scmp.eq.s32.totalorder %s66_s23, 0 }
   0xf   : > { %s999_s25 = scalar_select %p67_p5, %s905_s13, %s69_s24  }
  0x12   : > { %172 = sbr.rel (!%p78_p3) target bundleno = 45 (0x2d), region = 24  ;;  %s174_s26 = sand.u32 (%p78_p3), 1, %s905_s13  }
  0x13   : > { %s773_s27 = sshll.u32 (%p78_p3), %s917_s16, 6  ;;  %s741_s28 = sshll.u32 (%p78_p3), %s174_s26, 7 }
  0x14   : > { %s179_s29 = sadd.s32 (%p78_p3), %s921_s17, %s773_s27  ;;  %s1013_s7 = scalar_lea.vmem (%p78_p3), [#allocation2], %s741_s28 }
  0x15   : > { %s744_s30 = sshll.u32 (%p78_p3), %s179_s29, 2 }
  0x16   : > { %s1008_s6 = scalar_lea.vmem (%p78_p3), %s1152_s1, %s744_s30 }
  0x17   : > { %v197_v0 = vld [vmem:[%s1008_s6] sm:$0xf] (%p78_p3)  ;;  %v199_v1 = vld [vmem:[%s1008_s6 + $0x8] sm:$0xf] (%p78_p3)  ;;  %v201_v2 = vld [vmem:[%s1008_s6 + $0x10] sm:$0xf] (%p78_p3) }
  0x18   : > { %198 = vst [vmem:[%s1013_s7] sm:$0xf] (%p78_p3), %v197_v0  ;;  %200 = vst [vmem:[%s1013_s7 + $0x4] sm:$0xf] (%p78_p3), %v199_v1  ;;  %v203_v3 = vld [vmem:[%s1008_s6 + $0x18] sm:$0xf] (%p78_p3) }
  0x19   : > { %202 = vst [vmem:[%s1013_s7 + $0x8] sm:$0xf] %v201_v2  ;;  %v205_v4 = vld [vmem:[%s1008_s6 + $0x20] sm:$0xf]  ;;  %v207_v5 = vld [vmem:[%s1008_s6 + $0x28] sm:$0xf] }
  0x1a   : > { %204 = vst [vmem:[%s1013_s7 + $0xc] sm:$0xf] %v203_v3  ;;  %206 = vst [vmem:[%s1013_s7 + $0x10] sm:$0xf] %v205_v4  ;;  %v209_v6 = vld [vmem:[%s1008_s6 + $0x30] sm:$0xf] }
  0x1b   : > { %208 = vst [vmem:[%s1013_s7 + $0x14] sm:$0xf] %v207_v5  ;;  %v211_v7 = vld [vmem:[%s1008_s6 + $0x38] sm:$0xf]  ;;  %v213_v8 = vld [vmem:[%s1008_s6 + $0x40] sm:$0xf] }
  0x1c   : > { %210 = vst [vmem:[%s1013_s7 + $0x18] sm:$0xf] %v209_v6  ;;  %212 = vst [vmem:[%s1013_s7 + $0x1c] sm:$0xf] %v211_v7  ;;  %v215_v9 = vld [vmem:[%s1008_s6 + $0x48] sm:$0xf] }
  0x1d   : > { %214 = vst [vmem:[%s1013_s7 + $0x20] sm:$0xf] %v213_v8  ;;  %v217_v10 = vld [vmem:[%s1008_s6 + $0x50] sm:$0xf]  ;;  %v219_v11 = vld [vmem:[%s1008_s6 + $0x58] sm:$0xf] }
  0x1e   : > { %216 = vst [vmem:[%s1013_s7 + $0x24] sm:$0xf] %v215_v9  ;;  %218 = vst [vmem:[%s1013_s7 + $0x28] sm:$0xf] %v217_v10  ;;  %v221_v12 = vld [vmem:[%s1008_s6 + $0x60] sm:$0xf] }
  0x1f   : > { %220 = vst [vmem:[%s1013_s7 + $0x2c] sm:$0xf] %v219_v11  ;;  %v223_v13 = vld [vmem:[%s1008_s6 + $0x68] sm:$0xf]  ;;  %v225_v14 = vld [vmem:[%s1008_s6 + $0x70] sm:$0xf] }
  0x20   : > { %222 = vst [vmem:[%s1013_s7 + $0x30] sm:$0xf] %v221_v12  ;;  %224 = vst [vmem:[%s1013_s7 + $0x34] sm:$0xf] %v223_v13  ;;  %v227_v15 = vld [vmem:[%s1008_s6 + $0x78] sm:$0xf] }
  0x21   : > { %226 = vst [vmem:[%s1013_s7 + $0x38] sm:$0xf] %v225_v14  ;;  %v229_v16 = vld [vmem:[%s1008_s6 + $0x80] sm:$0xf]  ;;  %v231_v17 = vld [vmem:[%s1008_s6 + $0x88] sm:$0xf] }
  0x22   : > { %228 = vst [vmem:[%s1013_s7 + $0x3c] sm:$0xf] %v227_v15  ;;  %230 = vst [vmem:[%s1013_s7 + $0x40] sm:$0xf] %v229_v16  ;;  %v233_v18 = vld [vmem:[%s1008_s6 + $0x90] sm:$0xf] }
  0x23   : > { %232 = vst [vmem:[%s1013_s7 + $0x44] sm:$0xf] %v231_v17  ;;  %v235_v19 = vld [vmem:[%s1008_s6 + $0x98] sm:$0xf]  ;;  %v237_v20 = vld [vmem:[%s1008_s6 + $0xa0] sm:$0xf] }
  0x24   : > { %234 = vst [vmem:[%s1013_s7 + $0x48] sm:$0xf] %v233_v18  ;;  %236 = vst [vmem:[%s1013_s7 + $0x4c] sm:$0xf] %v235_v19  ;;  %v239_v21 = vld [vmem:[%s1008_s6 + $0xa8] sm:$0xf] }
  0x25   : > { %238 = vst [vmem:[%s1013_s7 + $0x50] sm:$0xf] %v237_v20  ;;  %v241_v22 = vld [vmem:[%s1008_s6 + $0xb0] sm:$0xf]  ;;  %v243_v23 = vld [vmem:[%s1008_s6 + $0xb8] sm:$0xf] }
  0x26   : > { %240 = vst [vmem:[%s1013_s7 + $0x54] sm:$0xf] %v239_v21  ;;  %242 = vst [vmem:[%s1013_s7 + $0x58] sm:$0xf] %v241_v22  ;;  %v245_v24 = vld [vmem:[%s1008_s6 + $0xc0] sm:$0xf] }
  0x27   : > { %244 = vst [vmem:[%s1013_s7 + $0x5c] sm:$0xf] %v243_v23  ;;  %v247_v25 = vld [vmem:[%s1008_s6 + $0xc8] sm:$0xf]  ;;  %v249_v26 = vld [vmem:[%s1008_s6 + $0xd0] sm:$0xf] }
  0x28   : > { %246 = vst [vmem:[%s1013_s7 + $0x60] sm:$0xf] %v245_v24  ;;  %248 = vst [vmem:[%s1013_s7 + $0x64] sm:$0xf] %v247_v25  ;;  %v251_v27 = vld [vmem:[%s1008_s6 + $0xd8] sm:$0xf] }
  0x29   : > { %250 = vst [vmem:[%s1013_s7 + $0x68] sm:$0xf] %v249_v26  ;;  %v253_v28 = vld [vmem:[%s1008_s6 + $0xe0] sm:$0xf]  ;;  %v255_v29 = vld [vmem:[%s1008_s6 + $0xe8] sm:$0xf] }
  0x2a   : > { %252 = vst [vmem:[%s1013_s7 + $0x6c] sm:$0xf] %v251_v27  ;;  %254 = vst [vmem:[%s1013_s7 + $0x70] sm:$0xf] %v253_v28  ;;  %v257_v30 = vld [vmem:[%s1008_s6 + $0xf0] sm:$0xf] }
  0x2b   : > { %256 = vst [vmem:[%s1013_s7 + $0x74] sm:$0xf] %v255_v29  ;;  %v259_v31 = vld [vmem:[%s1008_s6 + $0xf8] sm:$0xf]  ;;  %258 = vst [vmem:[%s1013_s7 + $0x78] sm:$0xf] %v257_v30 }
  0x2c   : > { %260 = vst [vmem:[%s1013_s7 + $0x7c] sm:$0xf] %v259_v31 }
  0x2d PF: > { %p745_p7 = scmp.ge.s32.totalorder %s925_s18, 1  ;;  %p352_p8 = scmp.lt.s32.totalorder %s925_s18, 9 }
  0x2f   : > { %p353_p9 = pnand %p745_p7, %p352_p8 }
  0x30   : > { %s359_s8 = sand.u32 (!%p353_p9), 1, %s901_s12   ;;  %s747_s9 = sshll.u32 (!%p353_p9), %s909_s14, 1 }
  0x31   : > { %356 = sbr.rel (%p353_p9) target bundleno = 329 (0x149), region = 69  ;;  %s746_s10 = sshll.u32 (!%p353_p9), %s359_s8, 7 }
  0x32   : > { %p400_p10 = scmp.lt.s32.totalorder (!%p353_p9), %s747_s9, 7  ;;  %p408_p11 = scmp.lt.s32.totalorder (!%p353_p9), %s913_s15, 1 }
  0x33   : > { %s1099_s4 = scalar_lea.vmem (!%p353_p9), [#allocation2], %s746_s10  ;;  %p750_p12 = scmp.ne.s32.totalorder (!%p353_p9), %s909_s14, 0 }
  0x38   : > { %s1168_s9 = smov (!%p400_p10, %s747_s9), 7  ;;  %s1170_s15 = smov (!%p408_p11, %s913_s15), 1 }
  0x39   : > { %s748_s11 = sshll.u32 %s1168_s9, 2  ;;  %s410_s27 = scalar_lea.vmem %s1153_s2, %s1170_s15  ;;  %v927_v32 = vmov (!%p750_p12), 0.0  }
  0x3a   : > { %s1087_s23 = scalar_lea.vmem %s1151_s0, %s748_s11  ;;  %s749_s12 = sshll.u32 %s1170_s15, 3 }
  0x3b   : > { %s1097_s30 = scalar_lea.vmem %s1154_s3, %s749_s12  ;;  %423 = sbr.rel (%p750_p12) target bundleno = 66 (0x42), region = 77 }
  0x3c   : > { %424 = vst [vmem:[%s1097_s30] sm:$0xff] (!%p750_p12), %v927_v32 }
  0x42 PF: > { %v853_v33 = vld [vmem:[%s1099_s4 + $0x40] sm:$0xff]   ;;  %v855_v35 = vld [vmem:[%s1099_s4 + $0x48] sm:$0xff]   ;;  %v857_v37 = vld [vmem:[%s1099_s4 + $0x50] sm:$0xff]   ;;  %p769_p13 = scmp.ne.s32.totalorder %s909_s14, 3 }
  0x43   : > { %v854_v34 = vld [vmem:[%s1099_s4] sm:$0xff]   ;;  %774 = vmatprep.subr.bf16.mxu0 %v853_v33  ;;  %v856_v36 = vld [vmem:[%s1099_s4 + $0x8] sm:$0xff]   ;;  %v858_v38 = vld [vmem:[%s1099_s4 + $0x10] sm:$0xff]  }
  0x44   : > { %775 = vmatpush3.bf16.msra.mxu0 %v854_v34  ;;  %v859_v39 = vld [vmem:[%s1099_s4 + $0x58] sm:$0xff]   ;;  %v861_v41 = vld [vmem:[%s1099_s4 + $0x60] sm:$0xff]   ;;  %v863_v43 = vld [vmem:[%s1099_s4 + $0x68] sm:$0xff]  }
  0x45   : > { %776 = vmatprep.subr.bf16.mxu0 %v855_v35  ;;  %v860_v40 = vld [vmem:[%s1099_s4 + $0x18] sm:$0xff]   ;;  %v862_v42 = vld [vmem:[%s1099_s4 + $0x20] sm:$0xff]   ;;  %v864_v46 = vld [vmem:[%s1099_s4 + $0x28] sm:$0xff]  }
  0x46   : > { %v426_v44 = vld [vmem:[%s1087_s23] sm:$0xff]  ;;  %v865_v47 = vld [vmem:[%s1099_s4 + $0x70] sm:$0xff]   ;;  %v867_v49 = vld [vmem:[%s1099_s4 + $0x78] sm:$0xff]  }
  0x47   : > { %v752_v45 = vcombine.high %v426_v44, %v426_v44  ;;  %v866_v48 = vld [vmem:[%s1099_s4 + $0x30] sm:$0xff]   ;;  %v868_v50 = vld [vmem:[%s1099_s4 + $0x38] sm:$0xff]   ;;  %v751_v51 = vcombine.low %v426_v44, %v426_v44  ;;  %v425_v53 = vld [vmem:[%s1097_s30] sm:$0xff] }
  0x48   : > { %777 = vmatpush3.bf16.msra.mxu0 %v856_v36  ;;  %v770_v60 = vld [vmem:[%s410_s27] ss:$0 sm:$0xff] (!%p769_p13) }
  0x49   : > { %778 = vmatprep.subr.bf16.mxu0 %v857_v37  ;;  %594 = vmatprep.mubr.bf16.mxu0 %v752_v45 }
  0x4c   : > { %779 = vmatpush3.bf16.msra.mxu0 %v858_v38 }
  0x4d   : > { %780 = vmatprep.subr.bf16.mxu0 %v859_v39 }
  0x50   : > { %781 = vmatpush3.bf16.msra.mxu0 %v860_v40 }
  0x51   : > { %782 = vmatprep.subr.bf16.mxu0 %v861_v41 }
  0x54   : > { %783 = vmatpush3.bf16.msra.mxu0 %v862_v42 }
  0x55   : > { %784 = vmatprep.subr.bf16.mxu0 %v863_v43 }
  0x58   : > { %785 = vmatpush3.bf16.msra.mxu0 %v864_v46 }
  0x59   : > { %786 = vmatprep.subr.bf16.mxu0 %v865_v47 }
  0x5c   : > { %787 = vmatpush3.bf16.msra.mxu0 %v866_v48 }
  0x5d   : > { %788 = vmatprep.subr.bf16.mxu0 %v867_v49 }
  0x60   : > { %789 = vmatpush3.bf16.msra.mxu0 %v868_v50 }
  0x63   : > { %595 = vmatmul.mubr.bf16.vlgmr.msra.gmra.mrb[0].mxu0 %v751_v51 }
 0x136   : > { %v790_v52 = vpop.f32.mrb[0].mxu0  ;;  %607 = sbr.rel (%p769_p13) target bundleno = 329 (0x149), region = 81 }
 0x137   : > { %v791_v54 = vpop.f32.mrb[1].mxu0 }
 0x138   : > { %v792_v55 = vadd.f32 %v791_v54, %v790_v52  ;;  %v793_v56 = vpop.f32.mrb[2].mxu0 }
 0x139   : > { %v794_v57 = vpop.f32.mrb[3].mxu0 }
 0x13a   : > { %v602_v58 = vadd.f32 %v792_v55, %v425_v53 }
 0x13c   : > { %603 = vst [vmem:[%s1097_s30] sm:$0xff] %v602_v58 }
 0x143   : > { %v608_v59 = vld [vmem:[%s1097_s30] sm:$0xff] }
 0x144   : > { %v616_v61 = vadd.f32 %v770_v60, %v608_v59 }
 0x146   : > { %v617_v62 = vmax.f32 %v616_v61, 0.0 }
 0x148   : > { %618 = vst [vmem:[%s1097_s30] sm:$0xff] %v617_v62 }
 0x149 PF: > { %s13_s18 = sadd.s32 1, %s925_s18   ;;  %s1155_s12 = smov %s905_s13 }
 0x14a   : > { %p10_p0 = scmp.ge.s32.totalorder %s13_s18, 10   ;;  %s1156_s13 = smov %s999_s25 }
 0x14b   : > { %s1157_s14 = smov %s917_s16  ;;  %s1158_s15 = smov %s921_s17 }
 0x14c   : > { %s1159_s16 = smov %s1162_s19  ;;  %s1160_s17 = smov %s1166_s20 }
 0x14d   :  { %12 = sbr.rel (!%p10_p0) target bundleno = 4 (0x4), region = 122 }

// kernel: forward.43
= control target key start
LH: loop header
LB: loop body
LE: loop exit
PB: predicated region body
PF: predicated region fallthrough
CT: control target
= control target key end

     0   :  { %s707_s12 = smov 0   ;;  %s709_s13 = smov 0   ;;  %s782_s0 = inlined_call_operand.vmem [shape: bf16[8,512], index: 0, kind: input, shape index: {}]   ;;  %s783_s1 = inlined_call_operand.vmem [shape: bf16[512,128], index: 1, kind: input, shape index: {}]   ;;  %s784_s2 = inlined_call_operand.vmem [shape: f32[1,128], index: 2, kind: input, shape index: {}]   ;;  %s785_s3 = inlined_call_operand.vmem [shape: f32[8,128], index: 3, kind: output, shape index: {}]  }
   0x1   :  { %s711_s14 = smov 0  }
   0x2 LB: > { %s25_s15 = sadd.s32 1, %s680_s13  ;;  %p568_p0 = scmp.ge.s32.totalorder %s684_s14, 1  ;;  %s684_s14 = sphi %s711_s14, %s13_s14   ;;  %s680_s13 = sphi %s709_s13, %s787_s13   ;;  %s676_s12 = sphi %s707_s12, %s786_s12  }
   0x3   : > { %p26_p1 = scmp.ge.s32.totalorder %s25_s15, 2  ;;  %p189_p2 = scmp.lt.s32.totalorder %s684_s14, 3 }
   0x5   : > { %s789_s15 = smov (%p26_p1, %s25_s15), 0  ;;  %p190_p3 = pnand %p568_p0, %p189_p2 }
   0x6   : > { %s569_s16 = sshll.u32 (!%p190_p3), %s676_s12, 1  ;;  %s571_s17 = sshll.u32 (!%p190_p3), %s676_s12, 5 }
   0x7   : > { %193 = sbr.rel (%p190_p3) target bundleno = 287 (0x11f), region = 32  ;;  %p233_p4 = scmp.lt.s32.totalorder (!%p190_p3), %s569_s16, 3 }
   0x8   : > { %p241_p5 = scmp.lt.s32.totalorder (!%p190_p3), %s571_s17, 63  ;;  %p573_p6 = scmp.ne.s32.totalorder (!%p190_p3), %s676_s12, 0 }
   0xe   : > { %s791_s16 = smov (!%p233_p4, %s569_s16), 3  ;;  %s793_s17 = smov (!%p241_p5, %s571_s17), 63 }
   0xf   : > { %s570_s18 = sshll.u32 %s791_s16, 2  ;;  %s572_s22 = sshll.u32 %s793_s17, 2  ;;  %v686_v0 = vmov (!%p573_p6), 0.0  }
  0x10   : > { %s238_s21 = scalar_lea.vmem %s782_s0, %s570_s18  ;;  %s735_s25 = scalar_lea.vmem %s783_s1, %s572_s22  ;;  %264 = vst [vmem:[%s785_s3] sm:$0xff] (!%p573_p6), %v686_v0 }
  0x11   : > { %263 = sbr.rel (%p573_p6) target bundleno = 24 (0x18), region = 36 }
  0x18 PF: > { %v644_v1 = vld [vmem:[%s735_s25 + $0x40] sm:$0xff]   ;;  %v646_v3 = vld [vmem:[%s735_s25 + $0x48] sm:$0xff]   ;;  %v648_v5 = vld [vmem:[%s735_s25 + $0x50] sm:$0xff]   ;;  %p592_p7 = scmp.ne.s32.totalorder %s676_s12, 1 }
  0x19   : > { %v645_v2 = vld [vmem:[%s735_s25] sm:$0xff]   ;;  %597 = vmatprep.subr.bf16.mxu0 %v644_v1  ;;  %v647_v4 = vld [vmem:[%s735_s25 + $0x8] sm:$0xff]   ;;  %v649_v6 = vld [vmem:[%s735_s25 + $0x10] sm:$0xff]  }
  0x1a   : > { %598 = vmatpush3.bf16.msra.mxu0 %v645_v2  ;;  %v650_v7 = vld [vmem:[%s735_s25 + $0x58] sm:$0xff]   ;;  %v652_v9 = vld [vmem:[%s735_s25 + $0x60] sm:$0xff]   ;;  %v654_v11 = vld [vmem:[%s735_s25 + $0x68] sm:$0xff]  }
  0x1b   : > { %599 = vmatprep.subr.bf16.mxu0 %v646_v3  ;;  %v651_v8 = vld [vmem:[%s735_s25 + $0x18] sm:$0xff]   ;;  %v653_v10 = vld [vmem:[%s735_s25 + $0x20] sm:$0xff]   ;;  %v655_v14 = vld [vmem:[%s735_s25 + $0x28] sm:$0xff]  }
  0x1c   : > { %v266_v12 = vld [vmem:[%s238_s21] sm:$0xff]  ;;  %v656_v15 = vld [vmem:[%s735_s25 + $0x70] sm:$0xff]   ;;  %v658_v17 = vld [vmem:[%s735_s25 + $0x78] sm:$0xff]  }
  0x1d   : > { %v575_v13 = vcombine.high %v266_v12, %v266_v12  ;;  %v657_v16 = vld [vmem:[%s735_s25 + $0x30] sm:$0xff]   ;;  %v659_v18 = vld [vmem:[%s735_s25 + $0x38] sm:$0xff]   ;;  %v574_v19 = vcombine.low %v266_v12, %v266_v12  ;;  %v265_v21 = vld [vmem:[%s785_s3] sm:$0xff] }
  0x1e   : > { %600 = vmatpush3.bf16.msra.mxu0 %v647_v4  ;;  %v593_v28 = vld [vmem:[%s784_s2] ss:$0 sm:$0xff] (!%p592_p7) }
  0x1f   : > { %601 = vmatprep.subr.bf16.mxu0 %v648_v5  ;;  %434 = vmatprep.mubr.bf16.mxu0 %v575_v13 }
  0x22   : > { %602 = vmatpush3.bf16.msra.mxu0 %v649_v6 }
  0x23   : > { %603 = vmatprep.subr.bf16.mxu0 %v650_v7 }
  0x26   : > { %604 = vmatpush3.bf16.msra.mxu0 %v651_v8 }
  0x27   : > { %605 = vmatprep.subr.bf16.mxu0 %v652_v9 }
  0x2a   : > { %606 = vmatpush3.bf16.msra.mxu0 %v653_v10 }
  0x2b   : > { %607 = vmatprep.subr.bf16.mxu0 %v654_v11 }
  0x2e   : > { %608 = vmatpush3.bf16.msra.mxu0 %v655_v14 }
  0x2f   : > { %609 = vmatprep.subr.bf16.mxu0 %v656_v15 }
  0x32   : > { %610 = vmatpush3.bf16.msra.mxu0 %v657_v16 }
  0x33   : > { %611 = vmatprep.subr.bf16.mxu0 %v658_v17 }
  0x36   : > { %612 = vmatpush3.bf16.msra.mxu0 %v659_v18 }
  0x39   : > { %435 = vmatmul.mubr.bf16.vlgmr.msra.gmra.mrb[0].mxu0 %v574_v19 }
 0x10c   : > { %v613_v20 = vpop.f32.mrb[0].mxu0  ;;  %447 = sbr.rel (%p592_p7) target bundleno = 287 (0x11f), region = 40 }
 0x10d   : > { %v614_v22 = vpop.f32.mrb[1].mxu0 }
 0x10e   : > { %v615_v23 = vadd.f32 %v614_v22, %v613_v20  ;;  %v616_v24 = vpop.f32.mrb[2].mxu0 }
 0x10f   : > { %v617_v25 = vpop.f32.mrb[3].mxu0 }
 0x110   : > { %v442_v26 = vadd.f32 %v615_v23, %v265_v21 }
 0x112   : > { %443 = vst [vmem:[%s785_s3] sm:$0xff] %v442_v26 }
 0x119   : > { %v448_v27 = vld [vmem:[%s785_s3] sm:$0xff] }
 0x11a   : > { %v456_v29 = vadd.f32 %v593_v28, %v448_v27 }
 0x11c   : > { %v457_v30 = vmax.f32 %v456_v29, 0.0 }
 0x11e   : > { %458 = vst [vmem:[%s785_s3] sm:$0xff] %v457_v30 }
 0x11f PF: > { %s13_s14 = sadd.s32 1, %s684_s14   ;;  %s786_s12 = smov %s680_s13 }
 0x120   : > { %p10_p8 = scmp.ge.s32.totalorder %s13_s14, 4   ;;  %s787_s13 = smov %s789_s15 }
 0x122   :  { %12 = sbr.rel (!%p10_p8) target bundleno = 2 (0x2), region = 76 }

// kernel: forward.45
= control target key start
LH: loop header
LB: loop body
LE: loop exit
PB: predicated region body
PF: predicated region fallthrough
CT: control target
= control target key end

     0   :  { %s948_s12 = smov 0   ;;  %s950_s13 = smov 0   ;;  %s1151_s0 = inlined_call_operand.vmem [shape: bf16[8,1280], index: 0, kind: input, shape index: {}]   ;;  %s1152_s1 = inlined_call_operand.vmem [shape: bf16[1280,384], index: 1, kind: input, shape index: {}]   ;;  %s1153_s2 = inlined_call_operand.vmem [shape: f32[1,384], index: 2, kind: input, shape index: {}]   ;;  %s1154_s3 = inlined_call_operand.vmem [shape: f32[8,384], index: 3, kind: output, shape index: {}]  }
   0x1   :  { %s952_s14 = smov 0   ;;  %s954_s15 = smov 0  }
   0x2   :  { %s956_s16 = smov 0   ;;  %s958_s17 = smov 0  }
   0x3   :  { %s960_s18 = smov 0  }
   0x4 LB: > { %s25_s19 = sadd.s32 1, %s917_s16  ;;  %s28_s20 = sadd.s32 1, %s921_s17  ;;  %s925_s18 = sphi %s960_s18, %s13_s18   ;;  %s921_s17 = sphi %s958_s17, %s1160_s17   ;;  %s917_s16 = sphi %s956_s16, %s1159_s16   ;;  %s913_s15 = sphi %s954_s15, %s1158_s15   ;;  %s909_s14 = sphi %s952_s14, %s1157_s14   ;;  %s905_s13 = sphi %s950_s13, %s1156_s13   ;;  %s901_s12 = sphi %s948_s12, %s1155_s12  }
   0x5   : > { %p26_p0 = scmp.ge.s32.totalorder %s25_s19, 5  ;;  %p76_p1 = scmp.ne.s32.totalorder %s905_s13, %s901_s12 }
   0x6   : > { %p77_p2 = scmp.eq.s32.totalorder %s925_s18, 0  ;;  %s69_s24 = sadd.s32 1, %s905_s13 }
   0x7   : > { %s1162_s19 = smov (%p26_p0, %s25_s19), 0  ;;  %s1164_s20 = smov (!%p26_p0, %s28_s20), %s921_s17 }
   0x8   : > { %p78_p3 = por %p77_p2, %p76_p1  ;;  %p30_p4 = scmp.ge.s32.totalorder %s1164_s20, 3 }
   0x9   : > { %s64_s21 = ssub.s32 %s917_s16, %s1162_s19  ;;  %p740_p6 = scmp.ge.s32.totalorder %s925_s18, 15 }
   0xa   : > { %s1166_s20 = smov (%p30_p4, %s1164_s20), 0 }
   0xb   : > { %s65_s22 = ssub.s32 %s921_s17, %s1166_s20  ;;  %156 = sbr.rel (%p740_p6) target bundleno = 46 (0x2e), region = 16 }
   0xc   : > { %s66_s23 = sor.u32 %s65_s22, %s64_s21 }
   0xd   : > { %p67_p5 = scmp.eq.s32.totalorder %s66_s23, 0 }
   0xf   : > { %s999_s25 = scalar_select %p67_p5, %s905_s13, %s69_s24  }
  0x12   : > { %172 = sbr.rel (!%p78_p3) target bundleno = 46 (0x2e), region = 24  ;;  %s174_s26 = sand.u32 (%p78_p3), 1, %s905_s13  }
  0x13   : > { %s795_s27 = smul.u32 (%p78_p3), 96, %s917_s16  ;;  %s741_s28 = sshll.u32 (%p78_p3), %s174_s26, 7 }
  0x14   : > { %s1013_s7 = scalar_lea.vmem (%p78_p3), [#allocation2], %s741_s28 }
  0x15   : > { %s179_s29 = sadd.s32 (%p78_p3), %s921_s17, %s795_s27 }
  0x16   : > { %s744_s30 = sshll.u32 (%p78_p3), %s179_s29, 2 }
  0x17   : > { %s1008_s6 = scalar_lea.vmem (%p78_p3), %s1152_s1, %s744_s30 }
  0x18   : > { %v197_v0 = vld [vmem:[%s1008_s6] sm:$0xf] (%p78_p3)  ;;  %v199_v1 = vld [vmem:[%s1008_s6 + $0xc] sm:$0xf] (%p78_p3)  ;;  %v201_v2 = vld [vmem:[%s1008_s6 + $0x18] sm:$0xf] (%p78_p3) }
  0x19   : > { %198 = vst [vmem:[%s1013_s7] sm:$0xf] %v197_v0  ;;  %200 = vst [vmem:[%s1013_s7 + $0x4] sm:$0xf] %v199_v1  ;;  %v203_v3 = vld [vmem:[%s1008_s6 + $0x24] sm:$0xf] }
  0x1a   : > { %202 = vst [vmem:[%s1013_s7 + $0x8] sm:$0xf] %v201_v2  ;;  %v205_v4 = vld [vmem:[%s1008_s6 + $0x30] sm:$0xf]  ;;  %v207_v5 = vld [vmem:[%s1008_s6 + $0x3c] sm:$0xf] }
  0x1b   : > { %204 = vst [vmem:[%s1013_s7 + $0xc] sm:$0xf] %v203_v3  ;;  %206 = vst [vmem:[%s1013_s7 + $0x10] sm:$0xf] %v205_v4  ;;  %v209_v6 = vld [vmem:[%s1008_s6 + $0x48] sm:$0xf] }
  0x1c   : > { %208 = vst [vmem:[%s1013_s7 + $0x14] sm:$0xf] %v207_v5  ;;  %v211_v7 = vld [vmem:[%s1008_s6 + $0x54] sm:$0xf]  ;;  %v213_v8 = vld [vmem:[%s1008_s6 + $0x60] sm:$0xf] }
  0x1d   : > { %210 = vst [vmem:[%s1013_s7 + $0x18] sm:$0xf] %v209_v6  ;;  %212 = vst [vmem:[%s1013_s7 + $0x1c] sm:$0xf] %v211_v7  ;;  %v215_v9 = vld [vmem:[%s1008_s6 + $0x6c] sm:$0xf] }
  0x1e   : > { %214 = vst [vmem:[%s1013_s7 + $0x20] sm:$0xf] %v213_v8  ;;  %v217_v10 = vld [vmem:[%s1008_s6 + $0x78] sm:$0xf]  ;;  %v219_v11 = vld [vmem:[%s1008_s6 + $0x84] sm:$0xf] }
  0x1f   : > { %216 = vst [vmem:[%s1013_s7 + $0x24] sm:$0xf] %v215_v9  ;;  %218 = vst [vmem:[%s1013_s7 + $0x28] sm:$0xf] %v217_v10  ;;  %v221_v12 = vld [vmem:[%s1008_s6 + $0x90] sm:$0xf] }
  0x20   : > { %220 = vst [vmem:[%s1013_s7 + $0x2c] sm:$0xf] %v219_v11  ;;  %v223_v13 = vld [vmem:[%s1008_s6 + $0x9c] sm:$0xf]  ;;  %v225_v14 = vld [vmem:[%s1008_s6 + $0xa8] sm:$0xf] }
  0x21   : > { %222 = vst [vmem:[%s1013_s7 + $0x30] sm:$0xf] %v221_v12  ;;  %224 = vst [vmem:[%s1013_s7 + $0x34] sm:$0xf] %v223_v13  ;;  %v227_v15 = vld [vmem:[%s1008_s6 + $0xb4] sm:$0xf] }
  0x22   : > { %226 = vst [vmem:[%s1013_s7 + $0x38] sm:$0xf] %v225_v14  ;;  %v229_v16 = vld [vmem:[%s1008_s6 + $0xc0] sm:$0xf]  ;;  %v231_v17 = vld [vmem:[%s1008_s6 + $0xcc] sm:$0xf] }
  0x23   : > { %228 = vst [vmem:[%s1013_s7 + $0x3c] sm:$0xf] %v227_v15  ;;  %230 = vst [vmem:[%s1013_s7 + $0x40] sm:$0xf] %v229_v16  ;;  %v233_v18 = vld [vmem:[%s1008_s6 + $0xd8] sm:$0xf] }
  0x24   : > { %232 = vst [vmem:[%s1013_s7 + $0x44] sm:$0xf] %v231_v17  ;;  %v235_v19 = vld [vmem:[%s1008_s6 + $0xe4] sm:$0xf]  ;;  %v237_v20 = vld [vmem:[%s1008_s6 + $0xf0] sm:$0xf] }
  0x25   : > { %234 = vst [vmem:[%s1013_s7 + $0x48] sm:$0xf] %v233_v18  ;;  %236 = vst [vmem:[%s1013_s7 + $0x4c] sm:$0xf] %v235_v19  ;;  %v239_v21 = vld [vmem:[%s1008_s6 + $0xfc] sm:$0xf] }
  0x26   : > { %238 = vst [vmem:[%s1013_s7 + $0x50] sm:$0xf] %v237_v20  ;;  %v241_v22 = vld [vmem:[%s1008_s6 + $0x108] sm:$0xf]  ;;  %v243_v23 = vld [vmem:[%s1008_s6 + $0x114] sm:$0xf] }
  0x27   : > { %240 = vst [vmem:[%s1013_s7 + $0x54] sm:$0xf] %v239_v21  ;;  %242 = vst [vmem:[%s1013_s7 + $0x58] sm:$0xf] %v241_v22  ;;  %v245_v24 = vld [vmem:[%s1008_s6 + $0x120] sm:$0xf] }
  0x28   : > { %244 = vst [vmem:[%s1013_s7 + $0x5c] sm:$0xf] %v243_v23  ;;  %v247_v25 = vld [vmem:[%s1008_s6 + $0x12c] sm:$0xf]  ;;  %v249_v26 = vld [vmem:[%s1008_s6 + $0x138] sm:$0xf] }
  0x29   : > { %246 = vst [vmem:[%s1013_s7 + $0x60] sm:$0xf] %v245_v24  ;;  %248 = vst [vmem:[%s1013_s7 + $0x64] sm:$0xf] %v247_v25  ;;  %v251_v27 = vld [vmem:[%s1008_s6 + $0x144] sm:$0xf] }
  0x2a   : > { %250 = vst [vmem:[%s1013_s7 + $0x68] sm:$0xf] %v249_v26  ;;  %v253_v28 = vld [vmem:[%s1008_s6 + $0x150] sm:$0xf]  ;;  %v255_v29 = vld [vmem:[%s1008_s6 + $0x15c] sm:$0xf] }
  0x2b   : > { %252 = vst [vmem:[%s1013_s7 + $0x6c] sm:$0xf] %v251_v27  ;;  %254 = vst [vmem:[%s1013_s7 + $0x70] sm:$0xf] %v253_v28  ;;  %v257_v30 = vld [vmem:[%s1008_s6 + $0x168] sm:$0xf] }
  0x2c   : > { %256 = vst [vmem:[%s1013_s7 + $0x74] sm:$0xf] %v255_v29  ;;  %v259_v31 = vld [vmem:[%s1008_s6 + $0x174] sm:$0xf]  ;;  %258 = vst [vmem:[%s1013_s7 + $0x78] sm:$0xf] %v257_v30 }
  0x2d   : > { %260 = vst [vmem:[%s1013_s7 + $0x7c] sm:$0xf] %v259_v31 }
  0x2e PF: > { %p745_p7 = scmp.ge.s32.totalorder %s925_s18, 1  ;;  %p352_p8 = scmp.lt.s32.totalorder %s925_s18, 16 }
  0x30   : > { %p353_p9 = pnand %p745_p7, %p352_p8 }
  0x31   : > { %s359_s8 = sand.u32 (!%p353_p9), 1, %s901_s12   ;;  %s747_s9 = sshll.u32 (!%p353_p9), %s909_s14, 1 }
  0x32   : > { %356 = sbr.rel (%p353_p9) target bundleno = 330 (0x14a), region = 69  ;;  %s746_s10 = sshll.u32 (!%p353_p9), %s359_s8, 7 }
  0x33   : > { %p400_p10 = scmp.lt.s32.totalorder (!%p353_p9), %s747_s9, 9  ;;  %p408_p11 = scmp.lt.s32.totalorder (!%p353_p9), %s913_s15, 2 }
  0x34   : > { %s1099_s4 = scalar_lea.vmem (!%p353_p9), [#allocation2], %s746_s10  ;;  %p750_p12 = scmp.ne.s32.totalorder (!%p353_p9), %s909_s14, 0 }
  0x39   : > { %s1168_s9 = smov (!%p400_p10, %s747_s9), 9  ;;  %s1170_s15 = smov (!%p408_p11, %s913_s15), 2 }
  0x3a   : > { %s748_s11 = sshll.u32 %s1168_s9, 2  ;;  %s410_s27 = scalar_lea.vmem %s1153_s2, %s1170_s15  ;;  %v927_v32 = vmov (!%p750_p12), 0.0  }
  0x3b   : > { %s1087_s23 = scalar_lea.vmem %s1151_s0, %s748_s11  ;;  %s749_s12 = sshll.u32 %s1170_s15, 3 }
  0x3c   : > { %s1097_s30 = scalar_lea.vmem %s1154_s3, %s749_s12  ;;  %423 = sbr.rel (%p750_p12) target bundleno = 67 (0x43), region = 77 }
  0x3d   : > { %424 = vst [vmem:[%s1097_s30] sm:$0xff] (!%p750_p12), %v927_v32 }
  0x43 PF: > { %v853_v33 = vld [vmem:[%s1099_s4 + $0x40] sm:$0xff]   ;;  %v855_v35 = vld [vmem:[%s1099_s4 + $0x48] sm:$0xff]   ;;  %v857_v37 = vld [vmem:[%s1099_s4 + $0x50] sm:$0xff]   ;;  %p769_p13 = scmp.ne.s32.totalorder %s909_s14, 4 }
  0x44   : > { %v854_v34 = vld [vmem:[%s1099_s4] sm:$0xff]   ;;  %773 = vmatprep.subr.bf16.mxu0 %v853_v33  ;;  %v856_v36 = vld [vmem:[%s1099_s4 + $0x8] sm:$0xff]   ;;  %v858_v38 = vld [vmem:[%s1099_s4 + $0x10] sm:$0xff]  }
  0x45   : > { %774 = vmatpush3.bf16.msra.mxu0 %v854_v34  ;;  %v859_v39 = vld [vmem:[%s1099_s4 + $0x58] sm:$0xff]   ;;  %v861_v41 = vld [vmem:[%s1099_s4 + $0x60] sm:$0xff]   ;;  %v863_v43 = vld [vmem:[%s1099_s4 + $0x68] sm:$0xff]  }
  0x46   : > { %775 = vmatprep.subr.bf16.mxu0 %v855_v35  ;;  %v860_v40 = vld [vmem:[%s1099_s4 + $0x18] sm:$0xff]   ;;  %v862_v42 = vld [vmem:[%s1099_s4 + $0x20] sm:$0xff]   ;;  %v864_v46 = vld [vmem:[%s1099_s4 + $0x28] sm:$0xff]  }
  0x47   : > { %v426_v44 = vld [vmem:[%s1087_s23] sm:$0xff]  ;;  %v865_v47 = vld [vmem:[%s1099_s4 + $0x70] sm:$0xff]   ;;  %v867_v49 = vld [vmem:[%s1099_s4 + $0x78] sm:$0xff]  }
  0x48   : > { %v752_v45 = vcombine.high %v426_v44, %v426_v44  ;;  %v866_v48 = vld [vmem:[%s1099_s4 + $0x30] sm:$0xff]   ;;  %v868_v50 = vld [vmem:[%s1099_s4 + $0x38] sm:$0xff]   ;;  %v751_v51 = vcombine.low %v426_v44, %v426_v44  ;;  %v425_v53 = vld [vmem:[%s1097_s30] sm:$0xff] }
  0x49   : > { %776 = vmatpush3.bf16.msra.mxu0 %v856_v36  ;;  %v770_v60 = vld [vmem:[%s410_s27] ss:$0 sm:$0xff] (!%p769_p13) }
  0x4a   : > { %777 = vmatprep.subr.bf16.mxu0 %v857_v37  ;;  %594 = vmatprep.mubr.bf16.mxu0 %v752_v45 }
  0x4d   : > { %778 = vmatpush3.bf16.msra.mxu0 %v858_v38 }
  0x4e   : > { %779 = vmatprep.subr.bf16.mxu0 %v859_v39 }
  0x51   : > { %780 = vmatpush3.bf16.msra.mxu0 %v860_v40 }
  0x52   : > { %781 = vmatprep.subr.bf16.mxu0 %v861_v41 }
  0x55   : > { %782 = vmatpush3.bf16.msra.mxu0 %v862_v42 }
  0x56   : > { %783 = vmatprep.subr.bf16.mxu0 %v863_v43 }
  0x59   : > { %784 = vmatpush3.bf16.msra.mxu0 %v864_v46 }
  0x5a   : > { %785 = vmatprep.subr.bf16.mxu0 %v865_v47 }
  0x5d   : > { %786 = vmatpush3.bf16.msra.mxu0 %v866_v48 }
  0x5e   : > { %787 = vmatprep.subr.bf16.mxu0 %v867_v49 }
  0x61   : > { %788 = vmatpush3.bf16.msra.mxu0 %v868_v50 }
  0x64   : > { %595 = vmatmul.mubr.bf16.vlgmr.msra.gmra.mrb[0].mxu0 %v751_v51 }
 0x137   : > { %v789_v52 = vpop.f32.mrb[0].mxu0  ;;  %607 = sbr.rel (%p769_p13) target bundleno = 330 (0x14a), region = 81 }
 0x138   : > { %v790_v54 = vpop.f32.mrb[1].mxu0 }
 0x139   : > { %v791_v55 = vadd.f32 %v790_v54, %v789_v52  ;;  %v792_v56 = vpop.f32.mrb[2].mxu0 }
 0x13a   : > { %v793_v57 = vpop.f32.mrb[3].mxu0 }
 0x13b   : > { %v602_v58 = vadd.f32 %v791_v55, %v425_v53 }
 0x13d   : > { %603 = vst [vmem:[%s1097_s30] sm:$0xff] %v602_v58 }
 0x144   : > { %v608_v59 = vld [vmem:[%s1097_s30] sm:$0xff] }
 0x145   : > { %v616_v61 = vadd.f32 %v770_v60, %v608_v59 }
 0x147   : > { %v617_v62 = vmax.f32 %v616_v61, 0.0 }
 0x149   : > { %618 = vst [vmem:[%s1097_s30] sm:$0xff] %v617_v62 }
 0x14a PF: > { %s13_s18 = sadd.s32 1, %s925_s18   ;;  %s1155_s12 = smov %s905_s13 }
 0x14b   : > { %p10_p0 = scmp.ge.s32.totalorder %s13_s18, 17   ;;  %s1156_s13 = smov %s999_s25 }
 0x14c   : > { %s1157_s14 = smov %s917_s16  ;;  %s1158_s15 = smov %s921_s17 }
 0x14d   : > { %s1159_s16 = smov %s1162_s19  ;;  %s1160_s17 = smov %s1166_s20 }
 0x14e   :  { %12 = sbr.rel (!%p10_p0) target bundleno = 4 (0x4), region = 122 }

// kernel: forward.48
= control target key start
LH: loop header
LB: loop body
LE: loop exit
PB: predicated region body
PF: predicated region fallthrough
CT: control target
= control target key end

     0   :  { %s798_s12 = smov 0   ;;  %s800_s13 = smov 0   ;;  %s934_s0 = inlined_call_operand.vmem [shape: bf16[8,1408], index: 0, kind: input, shape index: {}]   ;;  %s935_s1 = inlined_call_operand.vmem [shape: bf16[1408,384], index: 1, kind: input, shape index: {}]   ;;  %s936_s2 = inlined_call_operand.vmem [shape: f32[1,384], index: 2, kind: input, shape index: {}]   ;;  %s937_s3 = inlined_call_operand.vmem [shape: f32[8,384], index: 3, kind: output, shape index: {}]  }
   0x1   :  { %s802_s14 = smov 0   ;;  %s804_s15 = smov 0  }
   0x2   :  { %s806_s16 = smov 0   ;;  %s808_s17 = smov 0  }
   0x3   :  { %s810_s18 = smov 0  }
   0x4 LB: > { %s25_s19 = sadd.s32 1, %s765_s16  ;;  %s28_s20 = sadd.s32 1, %s769_s17  ;;  %s773_s18 = sphi %s810_s18, %s13_s18   ;;  %s769_s17 = sphi %s808_s17, %s943_s17   ;;  %s765_s16 = sphi %s806_s16, %s942_s16   ;;  %s761_s15 = sphi %s804_s15, %s941_s15   ;;  %s757_s14 = sphi %s802_s14, %s940_s14   ;;  %s753_s13 = sphi %s800_s13, %s939_s13   ;;  %s749_s12 = sphi %s798_s12, %s938_s12  }
   0x5   : > { %p26_p0 = scmp.ge.s32.totalorder %s25_s19, 11  ;;  %p76_p1 = scmp.ne.s32.totalorder %s753_s13, %s749_s12 }
   0x6   : > { %p77_p2 = scmp.eq.s32.totalorder %s773_s18, 0  ;;  %s69_s24 = sadd.s32 1, %s753_s13 }
   0x7   : > { %s945_s19 = smov (%p26_p0, %s25_s19), 0  ;;  %s947_s20 = smov (!%p26_p0, %s28_s20), %s769_s17 }
   0x8   : > { %p78_p3 = por %p77_p2, %p76_p1  ;;  %p30_p4 = scmp.ge.s32.totalorder %s947_s20, 3 }
   0x9   : > { %s64_s21 = ssub.s32 %s765_s16, %s945_s19  ;;  %p600_p6 = scmp.ge.s32.totalorder %s773_s18, 33 }
   0xa   : > { %s949_s20 = smov (%p30_p4, %s947_s20), 0 }
   0xb   : > { %s65_s22 = ssub.s32 %s769_s17, %s949_s20  ;;  %156 = sbr.rel (%p600_p6) target bundleno = 35 (0x23), region = 16 }
   0xc   : > { %s66_s23 = sor.u32 %s65_s22, %s64_s21 }
   0xd   : > { %p67_p5 = scmp.eq.s32.totalorder %s66_s23, 0 }
   0xf   : > { %s849_s25 = scalar_select %p67_p5, %s753_s13, %s69_s24  }
  0x12   : > { %170 = sbr.rel (!%p78_p3) target bundleno = 35 (0x23), region = 24  ;;  %s172_s26 = sand.u32 (%p78_p3), 1, %s753_s13  }
  0x13   : > { %s651_s27 = smul.u32 (%p78_p3), 48, %s765_s16  ;;  %s601_s28 = sshll.u32 (%p78_p3), %s172_s26, 6 }
  0x14   : > { %s174_s7 = scalar_lea.vmem (%p78_p3), [#allocation2], %s601_s28 }
  0x15   : > { %s177_s29 = sadd.s32 (%p78_p3), %s769_s17, %s651_s27 }
  0x16   : > { %s604_s30 = sshll.u32 (%p78_p3), %s177_s29, 2 }
  0x17   : > { %s858_s6 = scalar_lea.vmem (%p78_p3), %s935_s1, %s604_s30 }
  0x18   : > { %v195_v0 = vld [vmem:[%s858_s6] sm:$0xf] (%p78_p3)  ;;  %v197_v1 = vld [vmem:[%s858_s6 + $0xc] sm:$0xf] (%p78_p3)  ;;  %v199_v2 = vld [vmem:[%s858_s6 + $0x18] sm:$0xf] (%p78_p3) }
  0x19   : > { %196 = vst [vmem:[%s174_s7] sm:$0xf] %v195_v0  ;;  %198 = vst [vmem:[%s174_s7 + $0x4] sm:$0xf] %v197_v1  ;;  %v201_v3 = vld [vmem:[%s858_s6 + $0x24] sm:$0xf] }
  0x1a   : > { %200 = vst [vmem:[%s174_s7 + $0x8] sm:$0xf] %v199_v2  ;;  %v203_v4 = vld [vmem:[%s858_s6 + $0x30] sm:$0xf]  ;;  %v205_v5 = vld [vmem:[%s858_s6 + $0x3c] sm:$0xf] }
  0x1b   : > { %202 = vst [vmem:[%s174_s7 + $0xc] sm:$0xf] %v201_v3  ;;  %204 = vst [vmem:[%s174_s7 + $0x10] sm:$0xf] %v203_v4  ;;  %v207_v6 = vld [vmem:[%s858_s6 + $0x48] sm:$0xf] }
  0x1c   : > { %206 = vst [vmem:[%s174_s7 + $0x14] sm:$0xf] %v205_v5  ;;  %v209_v7 = vld [vmem:[%s858_s6 + $0x54] sm:$0xf]  ;;  %v211_v8 = vld [vmem:[%s858_s6 + $0x60] sm:$0xf] }
  0x1d   : > { %208 = vst [vmem:[%s174_s7 + $0x18] sm:$0xf] %v207_v6  ;;  %210 = vst [vmem:[%s174_s7 + $0x1c] sm:$0xf] %v209_v7  ;;  %v213_v9 = vld [vmem:[%s858_s6 + $0x6c] sm:$0xf] }
  0x1e   : > { %212 = vst [vmem:[%s174_s7 + $0x20] sm:$0xf] %v211_v8  ;;  %v215_v10 = vld [vmem:[%s858_s6 + $0x78] sm:$0xf]  ;;  %v217_v11 = vld [vmem:[%s858_s6 + $0x84] sm:$0xf] }
  0x1f   : > { %214 = vst [vmem:[%s174_s7 + $0x24] sm:$0xf] %v213_v9  ;;  %216 = vst [vmem:[%s174_s7 + $0x28] sm:$0xf] %v215_v10  ;;  %v219_v12 = vld [vmem:[%s858_s6 + $0x90] sm:$0xf] }
  0x20   : > { %218 = vst [vmem:[%s174_s7 + $0x2c] sm:$0xf] %v217_v11  ;;  %v221_v13 = vld [vmem:[%s858_s6 + $0x9c] sm:$0xf]  ;;  %v223_v14 = vld [vmem:[%s858_s6 + $0xa8] sm:$0xf] }
  0x21   : > { %220 = vst [vmem:[%s174_s7 + $0x30] sm:$0xf] %v219_v12  ;;  %222 = vst [vmem:[%s174_s7 + $0x34] sm:$0xf] %v221_v13  ;;  %v225_v15 = vld [vmem:[%s858_s6 + $0xb4] sm:$0xf] }
  0x22   : > { %224 = vst [vmem:[%s174_s7 + $0x38] sm:$0xf] %v223_v14  ;;  %226 = vst [vmem:[%s174_s7 + $0x3c] sm:$0xf] %v225_v15 }
  0x23 PF: > { %p605_p7 = scmp.ge.s32.totalorder %s773_s18, 1  ;;  %p286_p8 = scmp.lt.s32.totalorder %s773_s18, 34 }
  0x25   : > { %p287_p9 = pnand %p605_p7, %p286_p8 }
  0x26   : > { %s293_s8 = sand.u32 (!%p287_p9), 1, %s749_s12   ;;  %p332_p10 = scmp.lt.s32.totalorder (!%p287_p9), %s757_s14, 10 }
  0x27   : > { %290 = sbr.rel (%p287_p9) target bundleno = 314 (0x13a), region = 69  ;;  %s606_s9 = sshll.u32 (!%p287_p9), %s293_s8, 6 }
  0x28   : > { %p339_p11 = scmp.lt.s32.totalorder (!%p287_p9), %s761_s15, 2  ;;  %s295_s4 = scalar_lea.vmem (!%p287_p9), [#allocation2], %s606_s9 }
  0x29   : > { %p609_p12 = scmp.ne.s32.totalorder (!%p287_p9), %s757_s14, 0 }
  0x2e   : > { %s333_s10 = scalar_select %p332_p10, %s757_s14, 10 }
  0x2f   : > { %s951_s15 = smov (!%p339_p11, %s761_s15), 2  ;;  %354 = sbr.rel (%p609_p12) target bundleno = 54 (0x36), region = 77 }
  0x30   : > { %s607_s11 = sshll.u32 %s333_s10, 2  ;;  %s341_s27 = scalar_lea.vmem %s936_s2, %s951_s15  ;;  %v775_v16 = vmov (!%p609_p12), 0.0  }
  0x31   : > { %s888_s23 = scalar_lea.vmem %s934_s0, %s607_s11  ;;  %s608_s28 = sshll.u32 %s951_s15, 3 }
  0x32   : > { %s898_s30 = scalar_lea.vmem %s937_s3, %s608_s28 }
  0x33   : > { %355 = vst [vmem:[%s898_s30] sm:$0xff] (!%p609_p12), %v775_v16 }
  0x36 PF: > { %v711_v17 = vld [vmem:[%s295_s4] sm:$0xff]   ;;  %v776_v18 = vmov 0.0   ;;  %v712_v19 = vld [vmem:[%s295_s4 + $0x8] sm:$0xff]   ;;  %vm777_vm0 = vmmov 0   ;;  %v713_v20 = vld [vmem:[%s295_s4 + $0x10] sm:$0xff]   ;;  %p618_p13 = scmp.ne.s32.totalorder %s757_s14, 10 }
  0x37   : > { %631 = vmatprep.subr.bf16.mxu0 %v776_v18  ;;  %647 = vmatprep.mubr.msk.bf16.mxu0 %vm777_vm0, %v776_v18  ;;  %v714_v21 = vld [vmem:[%s295_s4 + $0x18] sm:$0xff]   ;;  %v715_v22 = vld [vmem:[%s295_s4 + $0x20] sm:$0xff]   ;;  %v716_v23 = vld [vmem:[%s295_s4 + $0x28] sm:$0xff]  }
  0x38   : > { %632 = vmatpush3.bf16.msra.mxu0 %v711_v17  ;;  %v717_v24 = vld [vmem:[%s295_s4 + $0x30] sm:$0xff]   ;;  %v718_v25 = vld [vmem:[%s295_s4 + $0x38] sm:$0xff]   ;;  %v357_v26 = vld [vmem:[%s888_s23] sm:$0xf] }
  0x39   : > { %633 = vmatprep.subr.bf16.mxu0 %v776_v18  ;;  %v619_v34 = vld [vmem:[%s341_s27] ss:$0 sm:$0xff] (!%p618_p13) }
  0x3a   : > { %v356_v27 = vld [vmem:[%s898_s30] sm:$0xff] }
  0x3c   : > { %634 = vmatpush3.bf16.msra.mxu0 %v712_v19 }
  0x3d   : > { %635 = vmatprep.subr.bf16.mxu0 %v776_v18 }
  0x40   : > { %636 = vmatpush3.bf16.msra.mxu0 %v713_v20 }
  0x41   : > { %637 = vmatprep.subr.bf16.mxu0 %v776_v18 }
  0x44   : > { %638 = vmatpush3.bf16.msra.mxu0 %v714_v21 }
  0x45   : > { %639 = vmatprep.subr.bf16.mxu0 %v776_v18 }
  0x48   : > { %640 = vmatpush3.bf16.msra.mxu0 %v715_v22 }
  0x49   : > { %641 = vmatprep.subr.bf16.mxu0 %v776_v18 }
  0x4c   : > { %642 = vmatpush3.bf16.msra.mxu0 %v716_v23 }
  0x4d   : > { %643 = vmatprep.subr.bf16.mxu0 %v776_v18 }
  0x50   : > { %644 = vmatpush3.bf16.msra.mxu0 %v717_v24 }
  0x51   : > { %645 = vmatprep.subr.bf16.mxu0 %v776_v18 }
  0x54   : > { %646 = vmatpush3.bf16.msra.mxu0 %v718_v25 }
  0x57   : > { %648 = vmatmul.mubr.bf16.vlgmr.msra.gmra.mrb[0].mxu0 %v357_v26 }
 0x127   : > { %467 = sbr.rel (%p618_p13) target bundleno = 314 (0x13a), region = 81 }
 0x12a   : > { %v456_v28 = vpop.f32.mrb[0].mxu0 }
 0x12b   : > { %v462_v29 = vadd.f32 %v456_v28, %v356_v27  ;;  %v649_v30 = vpop.f32.mrb[1].mxu0 }
 0x12c   : > { %v459_v31 = vpop.f32.mrb[2].mxu0 }
 0x12d   : > { %463 = vst [vmem:[%s898_s30] sm:$0xff] %v462_v29  ;;  %v650_v32 = vpop.f32.mrb[3].mxu0 }
 0x134   : > { %v468_v33 = vld [vmem:[%s898_s30] sm:$0xff] }
 0x135   : > { %v476_v35 = vadd.f32 %v619_v34, %v468_v33 }
 0x137   : > { %v477_v36 = vmax.f32 %v476_v35, 0.0 }
 0x139   : > { %478 = vst [vmem:[%s898_s30] sm:$0xff] %v477_v36 }
 0x13a PF: > { %s13_s18 = sadd.s32 1, %s773_s18   ;;  %s938_s12 = smov %s753_s13 }
 0x13b   : > { %p10_p0 = scmp.ge.s32.totalorder %s13_s18, 35   ;;  %s939_s13 = smov %s849_s25 }
 0x13c   : > { %s940_s14 = smov %s765_s16  ;;  %s941_s15 = smov %s769_s17 }
 0x13d   : > { %s942_s16 = smov %s945_s19  ;;  %s943_s17 = smov %s949_s20 }
 0x13e   :  { %12 = sbr.rel (!%p10_p0) target bundleno = 4 (0x4), region = 122 }

// kernel: forward.51
= control target key start
LH: loop header
LB: loop body
LE: loop exit
PB: predicated region body
PF: predicated region fallthrough
CT: control target
= control target key end

     0   :  { %s798_s12 = smov 0   ;;  %s800_s13 = smov 0   ;;  %s934_s0 = inlined_call_operand.vmem [shape: bf16[8,1664], index: 0, kind: input, shape index: {}]   ;;  %s935_s1 = inlined_call_operand.vmem [shape: bf16[1664,384], index: 1, kind: input, shape index: {}]   ;;  %s936_s2 = inlined_call_operand.vmem [shape: f32[1,384], index: 2, kind: input, shape index: {}]   ;;  %s937_s3 = inlined_call_operand.vmem [shape: f32[8,384], index: 3, kind: output, shape index: {}]  }
   0x1   :  { %s802_s14 = smov 0   ;;  %s804_s15 = smov 0  }
   0x2   :  { %s806_s16 = smov 0   ;;  %s808_s17 = smov 0  }
   0x3   :  { %s810_s18 = smov 0  }
   0x4 LB: > { %s25_s19 = sadd.s32 1, %s765_s16  ;;  %s28_s20 = sadd.s32 1, %s769_s17  ;;  %s773_s18 = sphi %s810_s18, %s13_s18   ;;  %s769_s17 = sphi %s808_s17, %s943_s17   ;;  %s765_s16 = sphi %s806_s16, %s942_s16   ;;  %s761_s15 = sphi %s804_s15, %s941_s15   ;;  %s757_s14 = sphi %s802_s14, %s940_s14   ;;  %s753_s13 = sphi %s800_s13, %s939_s13   ;;  %s749_s12 = sphi %s798_s12, %s938_s12  }
   0x5   : > { %p26_p0 = scmp.ge.s32.totalorder %s25_s19, 13  ;;  %p76_p1 = scmp.ne.s32.totalorder %s753_s13, %s749_s12 }
   0x6   : > { %p77_p2 = scmp.eq.s32.totalorder %s773_s18, 0  ;;  %s69_s24 = sadd.s32 1, %s753_s13 }
   0x7   : > { %s945_s19 = smov (%p26_p0, %s25_s19), 0  ;;  %s947_s20 = smov (!%p26_p0, %s28_s20), %s769_s17 }
   0x8   : > { %p78_p3 = por %p77_p2, %p76_p1  ;;  %p30_p4 = scmp.ge.s32.totalorder %s947_s20, 3 }
   0x9   : > { %s64_s21 = ssub.s32 %s765_s16, %s945_s19  ;;  %p600_p6 = scmp.ge.s32.totalorder %s773_s18, 39 }
   0xa   : > { %s949_s20 = smov (%p30_p4, %s947_s20), 0 }
   0xb   : > { %s65_s22 = ssub.s32 %s769_s17, %s949_s20  ;;  %156 = sbr.rel (%p600_p6) target bundleno = 35 (0x23), region = 16 }
   0xc   : > { %s66_s23 = sor.u32 %s65_s22, %s64_s21 }
   0xd   : > { %p67_p5 = scmp.eq.s32.totalorder %s66_s23, 0 }
   0xf   : > { %s849_s25 = scalar_select %p67_p5, %s753_s13, %s69_s24  }
  0x12   : > { %170 = sbr.rel (!%p78_p3) target bundleno = 35 (0x23), region = 24  ;;  %s172_s26 = sand.u32 (%p78_p3), 1, %s753_s13  }
  0x13   : > { %s651_s27 = smul.u32 (%p78_p3), 48, %s765_s16  ;;  %s601_s28 = sshll.u32 (%p78_p3), %s172_s26, 6 }
  0x14   : > { %s174_s7 = scalar_lea.vmem (%p78_p3), [#allocation2], %s601_s28 }
  0x15   : > { %s177_s29 = sadd.s32 (%p78_p3), %s769_s17, %s651_s27 }
  0x16   : > { %s604_s30 = sshll.u32 (%p78_p3), %s177_s29, 2 }
  0x17   : > { %s858_s6 = scalar_lea.vmem (%p78_p3), %s935_s1, %s604_s30 }
  0x18   : > { %v195_v0 = vld [vmem:[%s858_s6] sm:$0xf] (%p78_p3)  ;;  %v197_v1 = vld [vmem:[%s858_s6 + $0xc] sm:$0xf] (%p78_p3)  ;;  %v199_v2 = vld [vmem:[%s858_s6 + $0x18] sm:$0xf] (%p78_p3) }
  0x19   : > { %196 = vst [vmem:[%s174_s7] sm:$0xf] %v195_v0  ;;  %198 = vst [vmem:[%s174_s7 + $0x4] sm:$0xf] %v197_v1  ;;  %v201_v3 = vld [vmem:[%s858_s6 + $0x24] sm:$0xf] }
  0x1a   : > { %200 = vst [vmem:[%s174_s7 + $0x8] sm:$0xf] %v199_v2  ;;  %v203_v4 = vld [vmem:[%s858_s6 + $0x30] sm:$0xf]  ;;  %v205_v5 = vld [vmem:[%s858_s6 + $0x3c] sm:$0xf] }
  0x1b   : > { %202 = vst [vmem:[%s174_s7 + $0xc] sm:$0xf] %v201_v3  ;;  %204 = vst [vmem:[%s174_s7 + $0x10] sm:$0xf] %v203_v4  ;;  %v207_v6 = vld [vmem:[%s858_s6 + $0x48] sm:$0xf] }
  0x1c   : > { %206 = vst [vmem:[%s174_s7 + $0x14] sm:$0xf] %v205_v5  ;;  %v209_v7 = vld [vmem:[%s858_s6 + $0x54] sm:$0xf]  ;;  %v211_v8 = vld [vmem:[%s858_s6 + $0x60] sm:$0xf] }
  0x1d   : > { %208 = vst [vmem:[%s174_s7 + $0x18] sm:$0xf] %v207_v6  ;;  %210 = vst [vmem:[%s174_s7 + $0x1c] sm:$0xf] %v209_v7  ;;  %v213_v9 = vld [vmem:[%s858_s6 + $0x6c] sm:$0xf] }
  0x1e   : > { %212 = vst [vmem:[%s174_s7 + $0x20] sm:$0xf] %v211_v8  ;;  %v215_v10 = vld [vmem:[%s858_s6 + $0x78] sm:$0xf]  ;;  %v217_v11 = vld [vmem:[%s858_s6 + $0x84] sm:$0xf] }
  0x1f   : > { %214 = vst [vmem:[%s174_s7 + $0x24] sm:$0xf] %v213_v9  ;;  %216 = vst [vmem:[%s174_s7 + $0x28] sm:$0xf] %v215_v10  ;;  %v219_v12 = vld [vmem:[%s858_s6 + $0x90] sm:$0xf] }
  0x20   : > { %218 = vst [vmem:[%s174_s7 + $0x2c] sm:$0xf] %v217_v11  ;;  %v221_v13 = vld [vmem:[%s858_s6 + $0x9c] sm:$0xf]  ;;  %v223_v14 = vld [vmem:[%s858_s6 + $0xa8] sm:$0xf] }
  0x21   : > { %220 = vst [vmem:[%s174_s7 + $0x30] sm:$0xf] %v219_v12  ;;  %222 = vst [vmem:[%s174_s7 + $0x34] sm:$0xf] %v221_v13  ;;  %v225_v15 = vld [vmem:[%s858_s6 + $0xb4] sm:$0xf] }
  0x22   : > { %224 = vst [vmem:[%s174_s7 + $0x38] sm:$0xf] %v223_v14  ;;  %226 = vst [vmem:[%s174_s7 + $0x3c] sm:$0xf] %v225_v15 }
  0x23 PF: > { %p605_p7 = scmp.ge.s32.totalorder %s773_s18, 1  ;;  %p286_p8 = scmp.lt.s32.totalorder %s773_s18, 40 }
  0x25   : > { %p287_p9 = pnand %p605_p7, %p286_p8 }
  0x26   : > { %s293_s8 = sand.u32 (!%p287_p9), 1, %s749_s12   ;;  %p332_p10 = scmp.lt.s32.totalorder (!%p287_p9), %s757_s14, 12 }
  0x27   : > { %290 = sbr.rel (%p287_p9) target bundleno = 314 (0x13a), region = 69  ;;  %s606_s9 = sshll.u32 (!%p287_p9), %s293_s8, 6 }
  0x28   : > { %p339_p11 = scmp.lt.s32.totalorder (!%p287_p9), %s761_s15, 2  ;;  %s295_s4 = scalar_lea.vmem (!%p287_p9), [#allocation2], %s606_s9 }
  0x29   : > { %p609_p12 = scmp.ne.s32.totalorder (!%p287_p9), %s757_s14, 0 }
  0x2e   : > { %s333_s10 = scalar_select %p332_p10, %s757_s14, 12 }
  0x2f   : > { %s951_s15 = smov (!%p339_p11, %s761_s15), 2  ;;  %354 = sbr.rel (%p609_p12) target bundleno = 54 (0x36), region = 77 }
  0x30   : > { %s607_s11 = sshll.u32 %s333_s10, 2  ;;  %s341_s27 = scalar_lea.vmem %s936_s2, %s951_s15  ;;  %v775_v16 = vmov (!%p609_p12), 0.0  }
  0x31   : > { %s888_s23 = scalar_lea.vmem %s934_s0, %s607_s11  ;;  %s608_s28 = sshll.u32 %s951_s15, 3 }
  0x32   : > { %s898_s30 = scalar_lea.vmem %s937_s3, %s608_s28 }
  0x33   : > { %355 = vst [vmem:[%s898_s30] sm:$0xff] (!%p609_p12), %v775_v16 }
  0x36 PF: > { %v711_v17 = vld [vmem:[%s295_s4] sm:$0xff]   ;;  %v776_v18 = vmov 0.0   ;;  %v712_v19 = vld [vmem:[%s295_s4 + $0x8] sm:$0xff]   ;;  %vm777_vm0 = vmmov 0   ;;  %v713_v20 = vld [vmem:[%s295_s4 + $0x10] sm:$0xff]   ;;  %p618_p13 = scmp.ne.s32.totalorder %s757_s14, 12 }
  0x37   : > { %631 = vmatprep.subr.bf16.mxu0 %v776_v18  ;;  %647 = vmatprep.mubr.msk.bf16.mxu0 %vm777_vm0, %v776_v18  ;;  %v714_v21 = vld [vmem:[%s295_s4 + $0x18] sm:$0xff]   ;;  %v715_v22 = vld [vmem:[%s295_s4 + $0x20] sm:$0xff]   ;;  %v716_v23 = vld [vmem:[%s295_s4 + $0x28] sm:$0xff]  }
  0x38   : > { %632 = vmatpush3.bf16.msra.mxu0 %v711_v17  ;;  %v717_v24 = vld [vmem:[%s295_s4 + $0x30] sm:$0xff]   ;;  %v718_v25 = vld [vmem:[%s295_s4 + $0x38] sm:$0xff]   ;;  %v357_v26 = vld [vmem:[%s888_s23] sm:$0xf] }
  0x39   : > { %633 = vmatprep.subr.bf16.mxu0 %v776_v18  ;;  %v619_v34 = vld [vmem:[%s341_s27] ss:$0 sm:$0xff] (!%p618_p13) }
  0x3a   : > { %v356_v27 = vld [vmem:[%s898_s30] sm:$0xff] }
  0x3c   : > { %634 = vmatpush3.bf16.msra.mxu0 %v712_v19 }
  0x3d   : > { %635 = vmatprep.subr.bf16.mxu0 %v776_v18 }
  0x40   : > { %636 = vmatpush3.bf16.msra.mxu0 %v713_v20 }
  0x41   : > { %637 = vmatprep.subr.bf16.mxu0 %v776_v18 }
  0x44   : > { %638 = vmatpush3.bf16.msra.mxu0 %v714_v21 }
  0x45   : > { %639 = vmatprep.subr.bf16.mxu0 %v776_v18 }
  0x48   : > { %640 = vmatpush3.bf16.msra.mxu0 %v715_v22 }
  0x49   : > { %641 = vmatprep.subr.bf16.mxu0 %v776_v18 }
  0x4c   : > { %642 = vmatpush3.bf16.msra.mxu0 %v716_v23 }
  0x4d   : > { %643 = vmatprep.subr.bf16.mxu0 %v776_v18 }
  0x50   : > { %644 = vmatpush3.bf16.msra.mxu0 %v717_v24 }
  0x51   : > { %645 = vmatprep.subr.bf16.mxu0 %v776_v18 }
  0x54   : > { %646 = vmatpush3.bf16.msra.mxu0 %v718_v25 }
  0x57   : > { %648 = vmatmul.mubr.bf16.vlgmr.msra.gmra.mrb[0].mxu0 %v357_v26 }
 0x127   : > { %467 = sbr.rel (%p618_p13) target bundleno = 314 (0x13a), region = 81 }
 0x12a   : > { %v456_v28 = vpop.f32.mrb[0].mxu0 }
 0x12b   : > { %v462_v29 = vadd.f32 %v456_v28, %v356_v27  ;;  %v649_v30 = vpop.f32.mrb[1].mxu0 }
 0x12c   : > { %v459_v31 = vpop.f32.mrb[2].mxu0 }
 0x12d   : > { %463 = vst [vmem:[%s898_s30] sm:$0xff] %v462_v29  ;;  %v650_v32 = vpop.f32.mrb[3].mxu0 }
 0x134   : > { %v468_v33 = vld [vmem:[%s898_s30] sm:$0xff] }
 0x135   : > { %v476_v35 = vadd.f32 %v619_v34, %v468_v33 }
 0x137   : > { %v477_v36 = vmax.f32 %v476_v35, 0.0 }
 0x139   : > { %478 = vst [vmem:[%s898_s30] sm:$0xff] %v477_v36 }
 0x13a PF: > { %s13_s18 = sadd.s32 1, %s773_s18   ;;  %s938_s12 = smov %s753_s13 }
 0x13b   : > { %p10_p0 = scmp.ge.s32.totalorder %s13_s18, 41   ;;  %s939_s13 = smov %s849_s25 }
 0x13c   : > { %s940_s14 = smov %s765_s16  ;;  %s941_s15 = smov %s769_s17 }
 0x13d   : > { %s942_s16 = smov %s945_s19  ;;  %s943_s17 = smov %s949_s20 }
 0x13e   :  { %12 = sbr.rel (!%p10_p0) target bundleno = 4 (0x4), region = 122 }

// kernel: forward.53
= control target key start
LH: loop header
LB: loop body
LE: loop exit
PB: predicated region body
PF: predicated region fallthrough
CT: control target
= control target key end

     0   :  { %s847_s12 = smov 0   ;;  %s849_s13 = smov 0   ;;  %s1005_s0 = inlined_call_operand.vmem [shape: bf16[8,640], index: 0, kind: input, shape index: {}]   ;;  %s1006_s1 = inlined_call_operand.vmem [shape: bf16[640,512], index: 1, kind: input, shape index: {}]   ;;  %s1007_s2 = inlined_call_operand.vmem [shape: f32[1,512], index: 2, kind: input, shape index: {}]   ;;  %s1008_s3 = inlined_call_operand.vmem [shape: f32[8,512], index: 3, kind: output, shape index: {}]  }
   0x1   :  { %s851_s14 = smov 0   ;;  %s853_s15 = smov 0  }
   0x2   :  { %s855_s16 = smov 0   ;;  %s857_s17 = smov 0  }
   0x3   :  { %s859_s18 = smov 0  }
   0x4 LB: > { %s25_s19 = sadd.s32 1, %s815_s16  ;;  %s28_s20 = sadd.s32 1, %s819_s17  ;;  %s823_s18 = sphi %s859_s18, %s13_s18   ;;  %s819_s17 = sphi %s857_s17, %s1014_s17   ;;  %s815_s16 = sphi %s855_s16, %s1013_s16   ;;  %s811_s15 = sphi %s853_s15, %s1012_s15   ;;  %s807_s14 = sphi %s851_s14, %s1011_s14   ;;  %s803_s13 = sphi %s849_s13, %s1010_s13   ;;  %s799_s12 = sphi %s847_s12, %s1009_s12  }
   0x5   : > { %p26_p0 = scmp.ge.s32.totalorder %s25_s19, 5  ;;  %p76_p1 = scmp.ne.s32.totalorder %s803_s13, %s799_s12 }
   0x6   : > { %p77_p2 = scmp.eq.s32.totalorder %s823_s18, 0  ;;  %s69_s24 = sadd.s32 1, %s803_s13 }
   0x7   : > { %s1016_s19 = smov (%p26_p0, %s25_s19), 0  ;;  %s1018_s20 = smov (!%p26_p0, %s28_s20), %s819_s17 }
   0x8   : > { %p78_p3 = por %p77_p2, %p76_p1  ;;  %p30_p4 = scmp.ge.s32.totalorder %s1018_s20, 2 }
   0x9   : > { %s64_s21 = ssub.s32 %s815_s16, %s1016_s19  ;;  %p654_p6 = scmp.ge.s32.totalorder %s823_s18, 10 }
   0xa   : > { %s1020_s20 = smov (%p30_p4, %s1018_s20), 0 }
   0xb   : > { %s65_s22 = ssub.s32 %s819_s17, %s1020_s20  ;;  %156 = sbr.rel (%p654_p6) target bundleno = 33 (0x21), region = 16 }
   0xc   : > { %s66_s23 = sor.u32 %s65_s22, %s64_s21 }
   0xd   : > { %p67_p5 = scmp.eq.s32.totalorder %s66_s23, 0 }
   0xf   : > { %s898_s25 = scalar_select %p67_p5, %s803_s13, %s69_s24  }
  0x12   : > { %170 = sbr.rel (!%p78_p3) target bundleno = 33 (0x21), region = 24  ;;  %s172_s26 = sand.u32 (%p78_p3), 1, %s803_s13  }
  0x13   : > { %s657_s27 = sshll.u32 (%p78_p3), %s819_s17, 1  ;;  %s655_s28 = sshll.u32 (%p78_p3), %s172_s26, 7 }
  0x14   : > { %s686_s29 = sshll.u32 (%p78_p3), %s815_s16, 6  ;;  %s174_s8 = scalar_lea.vmem (%p78_p3), [#allocation2], %s655_s28 }
  0x15   : > { %s178_s30 = sadd.s32 (%p78_p3), %s686_s29, %s657_s27 }
  0x16   : > { %s659_s4 = sshll.u32 (%p78_p3), %s178_s30, 2 }
  0x17   : > { %s907_s7 = scalar_lea.vmem (%p78_p3), %s1006_s1, %s659_s4 }
  0x18   : > { %v238_v0 = vld [vmem:[%s907_s7] sm:$0xff] (%p78_p3)  ;;  %v240_v1 = vld [vmem:[%s907_s7 + $0x10] sm:$0xff] (%p78_p3) }
  0x19   : > { %v242_v2 = vld [vmem:[%s907_s7 + $0x20] sm:$0xff]  ;;  %239 = vst [vmem:[%s174_s8] sm:$0xff] %v238_v0  ;;  %241 = vst [vmem:[%s174_s8 + $0x8] sm:$0xff] %v240_v1  ;;  %v244_v3 = vld [vmem:[%s907_s7 + $0x30] sm:$0xff] }
  0x1a   : > { %243 = vst [vmem:[%s174_s8 + $0x10] sm:$0xff] %v242_v2  ;;  %v246_v4 = vld [vmem:[%s907_s7 + $0x40] sm:$0xff]  ;;  %v248_v5 = vld [vmem:[%s907_s7 + $0x50] sm:$0xff]  ;;  %245 = vst [vmem:[%s174_s8 + $0x18] sm:$0xff] %v244_v3 }
  0x1b   : > { %247 = vst [vmem:[%s174_s8 + $0x20] sm:$0xff] %v246_v4  ;;  %249 = vst [vmem:[%s174_s8 + $0x28] sm:$0xff] %v248_v5  ;;  %v250_v6 = vld [vmem:[%s907_s7 + $0x60] sm:$0xff]  ;;  %v252_v7 = vld [vmem:[%s907_s7 + $0x70] sm:$0xff] }
  0x1c   : > { %v254_v8 = vld [vmem:[%s907_s7 + $0x80] sm:$0xff]  ;;  %251 = vst [vmem:[%s174_s8 + $0x30] sm:$0xff] %v250_v6  ;;  %253 = vst [vmem:[%s174_s8 + $0x38] sm:$0xff] %v252_v7  ;;  %v256_v9 = vld [vmem:[%s907_s7 + $0x90] sm:$0xff] }
  0x1d   : > { %255 = vst [vmem:[%s174_s8 + $0x40] sm:$0xff] %v254_v8  ;;  %v258_v10 = vld [vmem:[%s907_s7 + $0xa0] sm:$0xff]  ;;  %v260_v11 = vld [vmem:[%s907_s7 + $0xb0] sm:$0xff]  ;;  %257 = vst [vmem:[%s174_s8 + $0x48] sm:$0xff] %v256_v9 }
  0x1e   : > { %259 = vst [vmem:[%s174_s8 + $0x50] sm:$0xff] %v258_v10  ;;  %261 = vst [vmem:[%s174_s8 + $0x58] sm:$0xff] %v260_v11  ;;  %v262_v12 = vld [vmem:[%s907_s7 + $0xc0] sm:$0xff]  ;;  %v264_v13 = vld [vmem:[%s907_s7 + $0xd0] sm:$0xff] }
  0x1f   : > { %v266_v14 = vld [vmem:[%s907_s7 + $0xe0] sm:$0xff]  ;;  %263 = vst [vmem:[%s174_s8 + $0x60] sm:$0xff] %v262_v12  ;;  %265 = vst [vmem:[%s174_s8 + $0x68] sm:$0xff] %v264_v13  ;;  %v268_v15 = vld [vmem:[%s907_s7 + $0xf0] sm:$0xff] }
  0x20   : > { %267 = vst [vmem:[%s174_s8 + $0x70] sm:$0xff] %v266_v14  ;;  %269 = vst [vmem:[%s174_s8 + $0x78] sm:$0xff] %v268_v15 }
  0x21 PF: > { %p660_p7 = scmp.ge.s32.totalorder %s823_s18, 1  ;;  %p282_p8 = scmp.lt.s32.totalorder %s823_s18, 11 }
  0x23   : > { %p283_p9 = pnand %p660_p7, %p282_p8 }
  0x24   : > { %s289_s9 = sand.u32 (!%p283_p9), 1, %s799_s12   ;;  %p330_p10 = scmp.lt.s32.totalorder (!%p283_p9), %s807_s14, 4 }
  0x25   : > { %286 = sbr.rel (%p283_p9) target bundleno = 313 (0x139), region = 66  ;;  %s661_s10 = sshll.u32 (!%p283_p9), %s289_s9, 7 }
  0x26   : > { %s663_s11 = sshll.u32 (!%p283_p9), %s811_s15, 1  ;;  %s948_s5 = scalar_lea.vmem (!%p283_p9), [#allocation2], %s661_s10 }
  0x27   : > { %p339_p11 = scmp.lt.s32.totalorder (!%p283_p9), %s663_s11, 3  ;;  %p666_p12 = scmp.ne.s32.totalorder (!%p283_p9), %s807_s14, 0 }
  0x2c   : > { %s331_s21 = scalar_select %p330_p10, %s807_s14, 4 }
  0x2d   : > { %s1022_s11 = smov (!%p339_p11, %s663_s11), 3  ;;  %357 = sbr.rel (%p666_p12) target bundleno = 52 (0x34), region = 74 }
  0x2e   : > { %s662_s22 = sshll.u32 %s331_s21, 2  ;;  %s341_s29 = scalar_lea.vmem %s1007_s2, %s1022_s11  ;;  %v825_v16 = vmov (!%p666_p12), 0.0  }
  0x2f   : > { %s936_s26 = scalar_lea.vmem %s1005_s0, %s662_s22  ;;  %s665_s12 = sshll.u32 %s1022_s11, 3 }
  0x30   : > { %s946_s15 = scalar_lea.vmem %s1008_s3, %s665_s12 }
  0x31   : > { %358 = vst [vmem:[%s946_s15] sm:$0xff] (!%p666_p12), %v825_v16  ;;  %359 = vst [vmem:[%s946_s15 + $0x8] sm:$0xff] (!%p666_p12), %v825_v16 }
  0x34 PF: > { %v745_v17 = vld [vmem:[%s948_s5 + $0x4] ss:$8 sps:$4 sm:$0xff]   ;;  %v747_v18 = vld [vmem:[%s948_s5] ss:$8 sps:$4 sm:$0xff]   ;;  %v826_v19 = vmov 0   ;;  %p683_p13 = scmp.ne.s32.totalorder %s807_s14, 4 }
  0x35   : > { %491 = vmatprep.mubr.bf16.mxu0 %v826_v19  ;;  %459 = vmatprep.subr.bf16.mxu0 %v745_v17  ;;  %v748_v20 = vld [vmem:[%s948_s5 + $0x14] ss:$8 sps:$4 sm:$0xff]   ;;  %v750_v21 = vld [vmem:[%s948_s5 + $0x10] ss:$8 sps:$4 sm:$0xff]   ;;  %v751_v22 = vld [vmem:[%s948_s5 + $0x24] ss:$8 sps:$4 sm:$0xff]   ;;  %v512_v43 = vlaneseq (!%p683_p13) }
  0x36   : > { %460 = vmatpush1.bf16.msra.mxu0 %v747_v18  ;;  %v753_v23 = vld [vmem:[%s948_s5 + $0x20] ss:$8 sps:$4 sm:$0xff]   ;;  %v754_v24 = vld [vmem:[%s948_s5 + $0x34] ss:$8 sps:$4 sm:$0xff]   ;;  %v756_v25 = vld [vmem:[%s948_s5 + $0x30] ss:$8 sps:$4 sm:$0xff]  }
  0x37   : > { %461 = vmatprep.subr.bf16.mxu0 %v748_v20  ;;  %v757_v26 = vld [vmem:[%s948_s5 + $0x44] ss:$8 sps:$4 sm:$0xff]   ;;  %v759_v27 = vld [vmem:[%s948_s5 + $0x40] ss:$8 sps:$4 sm:$0xff]   ;;  %v760_v28 = vld [vmem:[%s948_s5 + $0x54] ss:$8 sps:$4 sm:$0xff]  }
  0x38   : > { %v762_v29 = vld [vmem:[%s948_s5 + $0x50] ss:$8 sps:$4 sm:$0xff]   ;;  %v763_v30 = vld [vmem:[%s948_s5 + $0x64] ss:$8 sps:$4 sm:$0xff]   ;;  %v765_v31 = vld [vmem:[%s948_s5 + $0x60] ss:$8 sps:$4 sm:$0xff]  }
  0x39   : > { %v766_v32 = vld [vmem:[%s948_s5 + $0x74] ss:$8 sps:$4 sm:$0xff]   ;;  %v768_v33 = vld [vmem:[%s948_s5 + $0x70] ss:$8 sps:$4 sm:$0xff]   ;;  %v362_v34 = vld [vmem:[%s936_s26] sm:$0xf] }
  0x3a   : > { %462 = vmatpush1.bf16.msra.mxu0 %v750_v21  ;;  %v360_v35 = vld [vmem:[%s946_s15] sm:$0xff]  ;;  %v361_v36 = vld [vmem:[%s946_s15 + $0x8] sm:$0xff]  ;;  %v513_v44 = vshrl.u32 (!%p683_p13), %v512_v43, 7 }
  0x3b   : > { %463 = vmatprep.subr.bf16.mxu0 %v751_v22  ;;  %v510_v45 = vld [vmem:[%s341_s29] sm:$0x3] (!%p683_p13) }
  0x3c   : > { %v514_v46 = vsub.s32 (!%p683_p13), 0, %v513_v44  ;;  %v518_v47 = vsub.s32 (!%p683_p13), 1, %v513_v44 }
  0x3e   : > { %464 = vmatpush1.bf16.msra.mxu0 %v753_v23  ;;  %v515_v50 = vrot.slane (!%p683_p13), %v510_v45, %v514_v46  ;;  %v519_v51 = vrot.slane (!%p683_p13), %v510_v45, %v518_v47 }
  0x3f   : > { %465 = vmatprep.subr.bf16.mxu0 %v754_v24 }
  0x42   : > { %466 = vmatpush1.bf16.msra.mxu0 %v756_v25 }
  0x43   : > { %467 = vmatprep.subr.bf16.mxu0 %v757_v26 }
  0x46   : > { %468 = vmatpush1.bf16.msra.mxu0 %v759_v27 }
  0x47   : > { %469 = vmatprep.subr.bf16.mxu0 %v760_v28 }
  0x4a   : > { %470 = vmatpush1.bf16.msra.mxu0 %v762_v29 }
  0x4b   : > { %471 = vmatprep.subr.bf16.mxu0 %v763_v30 }
  0x4e   : > { %472 = vmatpush1.bf16.msra.mxu0 %v765_v31 }
  0x4f   : > { %473 = vmatprep.subr.bf16.mxu0 %v766_v32 }
  0x52   : > { %474 = vmatpush1.bf16.msra.mxu0 %v768_v33 }
  0x55   : > { %492 = vmatmul.mubr.bf16.vlgmr.msra.gmra.mrb[0].mxu0 %v362_v34 }
 0x126   : > { %507 = sbr.rel (%p683_p13) target bundleno = 313 (0x139), region = 78 }
 0x128   : > { %v493_v37 = vpop.f32.mrb[0].mxu0 }
 0x129   : > { %v500_v38 = vadd.f32 %v493_v37, %v360_v35  ;;  %v495_v39 = vpop.f32.mrb[1].mxu0 }
 0x12a   : > { %v501_v40 = vadd.f32 %v495_v39, %v361_v36  ;;  %v497_v41 = vpop.f32.mrb[2].mxu0 }
 0x12b   : > { %502 = vst [vmem:[%s946_s15] sm:$0xff] %v500_v38  ;;  %v498_v42 = vpop.f32.mrb[3].mxu0 }
 0x12c   : > { %503 = vst [vmem:[%s946_s15 + $0x8] sm:$0xff] %v501_v40 }
 0x132   : > { %v508_v48 = vld [vmem:[%s946_s15] sm:$0xff] }
 0x133   : > { %v509_v49 = vld [vmem:[%s946_s15 + $0x8] sm:$0xff]  ;;  %v522_v52 = vadd.f32 %v515_v50, %v508_v48 }
 0x134   : > { %v523_v53 = vadd.f32 %v519_v51, %v509_v49 }
 0x135   : > { %v524_v54 = vmax.f32 %v522_v52, 0.0 }
 0x136   : > { %v525_v55 = vmax.f32 %v523_v53, 0.0 }
 0x137   : > { %526 = vst [vmem:[%s946_s15] sm:$0xff] %v524_v54 }
 0x138   : > { %527 = vst [vmem:[%s946_s15 + $0x8] sm:$0xff] %v525_v55 }
 0x139 PF: > { %s13_s18 = sadd.s32 1, %s823_s18   ;;  %s1009_s12 = smov %s803_s13 }
 0x13a   : > { %p10_p0 = scmp.ge.s32.totalorder %s13_s18, 12   ;;  %s1010_s13 = smov %s898_s25 }
 0x13b   : > { %s1011_s14 = smov %s815_s16  ;;  %s1012_s15 = smov %s819_s17 }
 0x13c   : > { %s1013_s16 = smov %s1016_s19  ;;  %s1014_s17 = smov %s1020_s20 }
 0x13d   :  { %12 = sbr.rel (!%p10_p0) target bundleno = 4 (0x4), region = 119 }

// kernel: forward.54
= control target key start
LH: loop header
LB: loop body
LE: loop exit
PB: predicated region body
PF: predicated region fallthrough
CT: control target
= control target key end

     0   :  { %s1061_s12 = smov 0   ;;  %s1063_s13 = smov 0   ;;  %s1284_s0 = inlined_call_operand.vmem [shape: bf16[8,1792], index: 0, kind: input, shape index: {}]   ;;  %s1285_s1 = inlined_call_operand.vmem [shape: bf16[1792,512], index: 1, kind: input, shape index: {}]   ;;  %s1286_s2 = inlined_call_operand.vmem [shape: f32[1,512], index: 2, kind: input, shape index: {}]   ;;  %s1287_s3 = inlined_call_operand.vmem [shape: f32[8,512], index: 3, kind: output, shape index: {}]  }
   0x1   :  { %s1065_s14 = smov 0   ;;  %s1067_s15 = smov 0  }
   0x2   :  { %s1069_s16 = smov 0   ;;  %s1071_s17 = smov 0  }
   0x3   :  { %s1073_s18 = smov 0  }
   0x4 LB: > { %s25_s19 = sadd.s32 1, %s1030_s16  ;;  %s28_s20 = sadd.s32 1, %s1034_s17  ;;  %s1038_s18 = sphi %s1073_s18, %s13_s18   ;;  %s1034_s17 = sphi %s1071_s17, %s1293_s17   ;;  %s1030_s16 = sphi %s1069_s16, %s1292_s16   ;;  %s1026_s15 = sphi %s1067_s15, %s1291_s15   ;;  %s1022_s14 = sphi %s1065_s14, %s1290_s14   ;;  %s1018_s13 = sphi %s1063_s13, %s1289_s13   ;;  %s1014_s12 = sphi %s1061_s12, %s1288_s12  }
   0x5   : > { %p26_p0 = scmp.ge.s32.totalorder %s25_s19, 7  ;;  %p76_p1 = scmp.ne.s32.totalorder %s1018_s13, %s1014_s12 }
   0x6   : > { %p77_p2 = scmp.eq.s32.totalorder %s1038_s18, 0  ;;  %s69_s24 = sadd.s32 1, %s1018_s13 }
   0x7   : > { %s1295_s19 = smov (%p26_p0, %s25_s19), 0  ;;  %s1297_s20 = smov (!%p26_p0, %s28_s20), %s1034_s17 }
   0x8   : > { %p78_p3 = por %p77_p2, %p76_p1  ;;  %p30_p4 = scmp.ge.s32.totalorder %s1297_s20, 2 }
   0x9   : > { %s64_s21 = ssub.s32 %s1030_s16, %s1295_s19  ;;  %p825_p6 = scmp.ge.s32.totalorder %s1038_s18, 14 }
   0xa   : > { %s1299_s20 = smov (%p30_p4, %s1297_s20), 0 }
   0xb   : > { %s65_s22 = ssub.s32 %s1034_s17, %s1299_s20  ;;  %156 = sbr.rel (%p825_p6) target bundleno = 41 (0x29), region = 16 }
   0xc   : > { %s66_s23 = sor.u32 %s65_s22, %s64_s21 }
   0xd   : > { %p67_p5 = scmp.eq.s32.totalorder %s66_s23, 0 }
   0xf   : > { %s1112_s25 = scalar_select %p67_p5, %s1018_s13, %s69_s24  }
  0x12   : > { %172 = sbr.rel (!%p78_p3) target bundleno = 41 (0x29), region = 24  ;;  %s174_s26 = sand.u32 (%p78_p3), 1, %s1018_s13  }
  0x13   : > { %s828_s27 = sshll.u32 (%p78_p3), %s1034_s17, 1  ;;  %s826_s28 = sshll.u32 (%p78_p3), %s174_s26, 8 }
  0x14   : > { %s876_s29 = sshll.u32 (%p78_p3), %s1030_s16, 7  ;;  %s1126_s8 = scalar_lea.vmem (%p78_p3), [#allocation2], %s826_s28 }
  0x15   : > { %s180_s30 = sadd.s32 (%p78_p3), %s876_s29, %s828_s27 }
  0x16   : > { %s830_s4 = sshll.u32 (%p78_p3), %s180_s30, 2 }
  0x17   : > { %s1121_s7 = scalar_lea.vmem (%p78_p3), %s1285_s1, %s830_s4 }
  0x18   : > { %v272_v0 = vld [vmem:[%s1121_s7] sm:$0xff] (%p78_p3)  ;;  %v274_v1 = vld [vmem:[%s1121_s7 + $0x10] sm:$0xff] (%p78_p3) }
  0x19   : > { %v276_v2 = vld [vmem:[%s1121_s7 + $0x20] sm:$0xff]  ;;  %273 = vst [vmem:[%s1126_s8] sm:$0xff] %v272_v0  ;;  %275 = vst [vmem:[%s1126_s8 + $0x8] sm:$0xff] %v274_v1  ;;  %v278_v3 = vld [vmem:[%s1121_s7 + $0x30] sm:$0xff] }
  0x1a   : > { %277 = vst [vmem:[%s1126_s8 + $0x10] sm:$0xff] %v276_v2  ;;  %v280_v4 = vld [vmem:[%s1121_s7 + $0x40] sm:$0xff]  ;;  %v282_v5 = vld [vmem:[%s1121_s7 + $0x50] sm:$0xff]  ;;  %279 = vst [vmem:[%s1126_s8 + $0x18] sm:$0xff] %v278_v3 }
  0x1b   : > { %281 = vst [vmem:[%s1126_s8 + $0x20] sm:$0xff] %v280_v4  ;;  %283 = vst [vmem:[%s1126_s8 + $0x28] sm:$0xff] %v282_v5  ;;  %v284_v6 = vld [vmem:[%s1121_s7 + $0x60] sm:$0xff]  ;;  %v286_v7 = vld [vmem:[%s1121_s7 + $0x70] sm:$0xff] }
  0x1c   : > { %v288_v8 = vld [vmem:[%s1121_s7 + $0x80] sm:$0xff]  ;;  %285 = vst [vmem:[%s1126_s8 + $0x30] sm:$0xff] %v284_v6  ;;  %287 = vst [vmem:[%s1126_s8 + $0x38] sm:$0xff] %v286_v7  ;;  %v290_v9 = vld [vmem:[%s1121_s7 + $0x90] sm:$0xff] }
  0x1d   : > { %289 = vst [vmem:[%s1126_s8 + $0x40] sm:$0xff] %v288_v8  ;;  %v292_v10 = vld [vmem:[%s1121_s7 + $0xa0] sm:$0xff]  ;;  %v294_v11 = vld [vmem:[%s1121_s7 + $0xb0] sm:$0xff]  ;;  %291 = vst [vmem:[%s1126_s8 + $0x48] sm:$0xff] %v290_v9 }
  0x1e   : > { %293 = vst [vmem:[%s1126_s8 + $0x50] sm:$0xff] %v292_v10  ;;  %295 = vst [vmem:[%s1126_s8 + $0x58] sm:$0xff] %v294_v11  ;;  %v296_v12 = vld [vmem:[%s1121_s7 + $0xc0] sm:$0xff]  ;;  %v298_v13 = vld [vmem:[%s1121_s7 + $0xd0] sm:$0xff] }
  0x1f   : > { %v300_v14 = vld [vmem:[%s1121_s7 + $0xe0] sm:$0xff]  ;;  %297 = vst [vmem:[%s1126_s8 + $0x60] sm:$0xff] %v296_v12  ;;  %299 = vst [vmem:[%s1126_s8 + $0x68] sm:$0xff] %v298_v13  ;;  %v302_v15 = vld [vmem:[%s1121_s7 + $0xf0] sm:$0xff] }
  0x20   : > { %301 = vst [vmem:[%s1126_s8 + $0x70] sm:$0xff] %v300_v14  ;;  %v304_v16 = vld [vmem:[%s1121_s7 + $0x100] sm:$0xff]  ;;  %v306_v17 = vld [vmem:[%s1121_s7 + $0x110] sm:$0xff]  ;;  %303 = vst [vmem:[%s1126_s8 + $0x78] sm:$0xff] %v302_v15 }
  0x21   : > { %305 = vst [vmem:[%s1126_s8 + $0x80] sm:$0xff] %v304_v16  ;;  %307 = vst [vmem:[%s1126_s8 + $0x88] sm:$0xff] %v306_v17  ;;  %v308_v18 = vld [vmem:[%s1121_s7 + $0x120] sm:$0xff]  ;;  %v310_v19 = vld [vmem:[%s1121_s7 + $0x130] sm:$0xff] }
  0x22   : > { %v312_v20 = vld [vmem:[%s1121_s7 + $0x140] sm:$0xff]  ;;  %309 = vst [vmem:[%s1126_s8 + $0x90] sm:$0xff] %v308_v18  ;;  %311 = vst [vmem:[%s1126_s8 + $0x98] sm:$0xff] %v310_v19  ;;  %v314_v21 = vld [vmem:[%s1121_s7 + $0x150] sm:$0xff] }
  0x23   : > { %313 = vst [vmem:[%s1126_s8 + $0xa0] sm:$0xff] %v312_v20  ;;  %v316_v22 = vld [vmem:[%s1121_s7 + $0x160] sm:$0xff]  ;;  %v318_v23 = vld [vmem:[%s1121_s7 + $0x170] sm:$0xff]  ;;  %315 = vst [vmem:[%s1126_s8 + $0xa8] sm:$0xff] %v314_v21 }
  0x24   : > { %317 = vst [vmem:[%s1126_s8 + $0xb0] sm:$0xff] %v316_v22  ;;  %319 = vst [vmem:[%s1126_s8 + $0xb8] sm:$0xff] %v318_v23  ;;  %v320_v24 = vld [vmem:[%s1121_s7 + $0x180] sm:$0xff]  ;;  %v322_v25 = vld [vmem:[%s1121_s7 + $0x190] sm:$0xff] }
  0x25   : > { %v324_v26 = vld [vmem:[%s1121_s7 + $0x1a0] sm:$0xff]  ;;  %321 = vst [vmem:[%s1126_s8 + $0xc0] sm:$0xff] %v320_v24  ;;  %323 = vst [vmem:[%s1126_s8 + $0xc8] sm:$0xff] %v322_v25  ;;  %v326_v27 = vld [vmem:[%s1121_s7 + $0x1b0] sm:$0xff] }
  0x26   : > { %325 = vst [vmem:[%s1126_s8 + $0xd0] sm:$0xff] %v324_v26  ;;  %v328_v28 = vld [vmem:[%s1121_s7 + $0x1c0] sm:$0xff]  ;;  %v330_v29 = vld [vmem:[%s1121_s7 + $0x1d0] sm:$0xff]  ;;  %327 = vst [vmem:[%s1126_s8 + $0xd8] sm:$0xff] %v326_v27 }
  0x27   : > { %329 = vst [vmem:[%s1126_s8 + $0xe0] sm:$0xff] %v328_v28  ;;  %331 = vst [vmem:[%s1126_s8 + $0xe8] sm:$0xff] %v330_v29  ;;  %v332_v30 = vld [vmem:[%s1121_s7 + $0x1e0] sm:$0xff]  ;;  %v334_v31 = vld [vmem:[%s1121_s7 + $0x1f0] sm:$0xff] }
  0x28   : > { %333 = vst [vmem:[%s1126_s8 + $0xf0] sm:$0xff] %v332_v30  ;;  %335 = vst [vmem:[%s1126_s8 + $0xf8] sm:$0xff] %v334_v31 }
  0x29 PF: > { %p831_p7 = scmp.ge.s32.totalorder %s1038_s18, 1  ;;  %p348_p8 = scmp.lt.s32.totalorder %s1038_s18, 15 }
  0x2b   : > { %p349_p9 = pnand %p831_p7, %p348_p8 }
  0x2c   : > { %s355_s9 = sand.u32 (!%p349_p9), 1, %s1014_s12   ;;  %s833_s10 = sshll.u32 (!%p349_p9), %s1022_s14, 1 }
  0x2d   : > { %352 = sbr.rel (%p349_p9) target bundleno = 355 (0x163), region = 66  ;;  %s832_s11 = sshll.u32 (!%p349_p9), %s355_s9, 8 }
  0x2e   : > { %p398_p10 = scmp.lt.s32.totalorder (!%p349_p9), %s833_s10, 13  ;;  %s835_s21 = sshll.u32 (!%p349_p9), %s1026_s15, 1 }
  0x2f   : > { %p408_p11 = scmp.lt.s32.totalorder (!%p349_p9), %s835_s21, 3  ;;  %s1211_s5 = scalar_lea.vmem (!%p349_p9), [#allocation2], %s832_s11 }
  0x30   : > { %p838_p12 = scmp.ne.s32.totalorder (!%p349_p9), %s1022_s14, 0 }
  0x34   : > { %s1301_s10 = smov (!%p398_p10, %s833_s10), 13  ;;  %s1303_s21 = smov (!%p408_p11, %s835_s21), 3 }
  0x35   : > { %s834_s22 = sshll.u32 %s1301_s10, 2  ;;  %s410_s12 = scalar_lea.vmem %s1286_s2, %s1303_s21  ;;  %v1040_v32 = vmov (!%p838_p12), 0.0  }
  0x36   : > { %s1197_s26 = scalar_lea.vmem %s1284_s0, %s834_s22  ;;  %s837_s29 = sshll.u32 %s1303_s21, 3 }
  0x37   : > { %s1209_s15 = scalar_lea.vmem %s1287_s3, %s837_s29  ;;  %425 = sbr.rel (%p838_p12) target bundleno = 62 (0x3e), region = 74 }
  0x38   : > { %426 = vst [vmem:[%s1209_s15] sm:$0xff] (!%p838_p12), %v1040_v32  ;;  %427 = vst [vmem:[%s1209_s15 + $0x8] sm:$0xff] (!%p838_p12), %v1040_v32 }
  0x3e PF: > { %v934_v33 = vld [vmem:[%s1211_s5 + $0x4] ss:$8 sps:$4 sm:$0xff]   ;;  %v936_v34 = vld [vmem:[%s1211_s5] ss:$8 sps:$4 sm:$0xff]   ;;  %v937_v35 = vld [vmem:[%s1211_s5 + $0x14] ss:$8 sps:$4 sm:$0xff]  }
  0x3f   : > { %630 = vmatprep.subr.bf16.mxu0 %v934_v33  ;;  %v939_v36 = vld [vmem:[%s1211_s5 + $0x10] ss:$8 sps:$4 sm:$0xff]   ;;  %v940_v37 = vld [vmem:[%s1211_s5 + $0x24] ss:$8 sps:$4 sm:$0xff]   ;;  %v942_v38 = vld [vmem:[%s1211_s5 + $0x20] ss:$8 sps:$4 sm:$0xff]  }
  0x40   : > { %631 = vmatpush1.bf16.msra.mxu0 %v936_v34  ;;  %v943_v39 = vld [vmem:[%s1211_s5 + $0x34] ss:$8 sps:$4 sm:$0xff]   ;;  %v945_v40 = vld [vmem:[%s1211_s5 + $0x30] ss:$8 sps:$4 sm:$0xff]   ;;  %v946_v41 = vld [vmem:[%s1211_s5 + $0x44] ss:$8 sps:$4 sm:$0xff]  }
  0x41   : > { %632 = vmatprep.subr.bf16.mxu0 %v937_v35  ;;  %v948_v42 = vld [vmem:[%s1211_s5 + $0x40] ss:$8 sps:$4 sm:$0xff]   ;;  %v949_v43 = vld [vmem:[%s1211_s5 + $0x54] ss:$8 sps:$4 sm:$0xff]   ;;  %v951_v44 = vld [vmem:[%s1211_s5 + $0x50] ss:$8 sps:$4 sm:$0xff]  }
  0x42   : > { %v952_v45 = vld [vmem:[%s1211_s5 + $0x64] ss:$8 sps:$4 sm:$0xff]   ;;  %v954_v48 = vld [vmem:[%s1211_s5 + $0x60] ss:$8 sps:$4 sm:$0xff]   ;;  %v955_v49 = vld [vmem:[%s1211_s5 + $0x74] ss:$8 sps:$4 sm:$0xff]  }
  0x43   : > { %v430_v46 = vld [vmem:[%s1197_s26] sm:$0xff]  ;;  %v957_v50 = vld [vmem:[%s1211_s5 + $0x70] ss:$8 sps:$4 sm:$0xff]   ;;  %v961_v53 = vld [vmem:[%s1211_s5 + $0x94] ss:$8 sps:$4 sm:$0xff]   ;;  %p873_p13 = scmp.ne.s32.totalorder %s1022_s14, 6 }
  0x44   : > { %633 = vmatpush1.bf16.msra.mxu0 %v939_v36  ;;  %v840_v47 = vcombine.high %v430_v46, %v430_v46  ;;  %v958_v51 = vld [vmem:[%s1211_s5 + $0x84] ss:$8 sps:$4 sm:$0xff]   ;;  %v960_v52 = vld [vmem:[%s1211_s5 + $0x80] ss:$8 sps:$4 sm:$0xff]   ;;  %v963_v54 = vld [vmem:[%s1211_s5 + $0x90] ss:$8 sps:$4 sm:$0xff]   ;;  %v839_v3 = vcombine.low %v430_v46, %v430_v46  ;;  %v683_v12 = vlaneseq (!%p873_p13) }
  0x45   : > { %634 = vmatprep.subr.bf16.mxu0 %v940_v37  ;;  %v964_v55 = vld [vmem:[%s1211_s5 + $0xa4] ss:$8 sps:$4 sm:$0xff]   ;;  %v966_v56 = vld [vmem:[%s1211_s5 + $0xa0] ss:$8 sps:$4 sm:$0xff]   ;;  %v967_v57 = vld [vmem:[%s1211_s5 + $0xb4] ss:$8 sps:$4 sm:$0xff]  }
  0x46   : > { %662 = vmatprep.mubr.bf16.mxu0 %v840_v47  ;;  %v969_v58 = vld [vmem:[%s1211_s5 + $0xb0] ss:$8 sps:$4 sm:$0xff]   ;;  %v970_v59 = vld [vmem:[%s1211_s5 + $0xc4] ss:$8 sps:$4 sm:$0xff]   ;;  %v972_v60 = vld [vmem:[%s1211_s5 + $0xc0] ss:$8 sps:$4 sm:$0xff]  }
  0x47   : > { %v973_v61 = vld [vmem:[%s1211_s5 + $0xd4] ss:$8 sps:$4 sm:$0xff]   ;;  %v975_v62 = vld [vmem:[%s1211_s5 + $0xd0] ss:$8 sps:$4 sm:$0xff]   ;;  %v976_v63 = vld [vmem:[%s1211_s5 + $0xe4] ss:$8 sps:$4 sm:$0xff]  }
  0x48   : > { %635 = vmatpush1.bf16.msra.mxu0 %v942_v38  ;;  %v978_v0 = vld [vmem:[%s1211_s5 + $0xe0] ss:$8 sps:$4 sm:$0xff]   ;;  %v979_v1 = vld [vmem:[%s1211_s5 + $0xf4] ss:$8 sps:$4 sm:$0xff]   ;;  %v981_v2 = vld [vmem:[%s1211_s5 + $0xf0] ss:$8 sps:$4 sm:$0xff]  }
  0x49   : > { %636 = vmatprep.subr.bf16.mxu0 %v943_v39  ;;  %v428_v4 = vld [vmem:[%s1209_s15] sm:$0xff]  ;;  %v429_v5 = vld [vmem:[%s1209_s15 + $0x8] sm:$0xff]  ;;  %v684_v13 = vshrl.u32 (!%p873_p13), %v683_v12, 7 }
  0x4a   : > { %v681_v14 = vld [vmem:[%s410_s12] sm:$0x3] (!%p873_p13) }
  0x4b   : > { %v685_v15 = vsub.s32 (!%p873_p13), 0, %v684_v13  ;;  %v689_v16 = vsub.s32 (!%p873_p13), 1, %v684_v13 }
  0x4c   : > { %637 = vmatpush1.bf16.msra.mxu0 %v945_v40 }
  0x4d   : > { %638 = vmatprep.subr.bf16.mxu0 %v946_v41  ;;  %v686_v19 = vrot.slane (!%p873_p13), %v681_v14, %v685_v15  ;;  %v690_v20 = vrot.slane (!%p873_p13), %v681_v14, %v689_v16 }
  0x50   : > { %639 = vmatpush1.bf16.msra.mxu0 %v948_v42 }
  0x51   : > { %640 = vmatprep.subr.bf16.mxu0 %v949_v43 }
  0x54   : > { %641 = vmatpush1.bf16.msra.mxu0 %v951_v44 }
  0x55   : > { %642 = vmatprep.subr.bf16.mxu0 %v952_v45 }
  0x58   : > { %643 = vmatpush1.bf16.msra.mxu0 %v954_v48 }
  0x59   : > { %644 = vmatprep.subr.bf16.mxu0 %v955_v49 }
  0x5c   : > { %645 = vmatpush1.bf16.msra.mxu0 %v957_v50 }
  0x5d   : > { %646 = vmatprep.subr.bf16.mxu0 %v958_v51 }
  0x60   : > { %647 = vmatpush1.bf16.msra.mxu0 %v960_v52 }
  0x61   : > { %648 = vmatprep.subr.bf16.mxu0 %v961_v53 }
  0x64   : > { %649 = vmatpush1.bf16.msra.mxu0 %v963_v54 }
  0x65   : > { %650 = vmatprep.subr.bf16.mxu0 %v964_v55 }
  0x68   : > { %651 = vmatpush1.bf16.msra.mxu0 %v966_v56 }
  0x69   : > { %652 = vmatprep.subr.bf16.mxu0 %v967_v57 }
  0x6c   : > { %653 = vmatpush1.bf16.msra.mxu0 %v969_v58 }
  0x6d   : > { %654 = vmatprep.subr.bf16.mxu0 %v970_v59 }
  0x70   : > { %655 = vmatpush1.bf16.msra.mxu0 %v972_v60 }
  0x71   : > { %656 = vmatprep.subr.bf16.mxu0 %v973_v61 }
  0x74   : > { %657 = vmatpush1.bf16.msra.mxu0 %v975_v62 }
  0x75   : > { %658 = vmatprep.subr.bf16.mxu0 %v976_v63 }
  0x78   : > { %659 = vmatpush1.bf16.msra.mxu0 %v978_v0 }
  0x79   : > { %660 = vmatprep.subr.bf16.mxu0 %v979_v1 }
  0x7c   : > { %661 = vmatpush1.bf16.msra.mxu0 %v981_v2 }
  0x7f   : > { %663 = vmatmul.mubr.bf16.vlgmr.msra.gmra.mrb[0].mxu0 %v839_v3 }
 0x150   : > { %678 = sbr.rel (%p873_p13) target bundleno = 355 (0x163), region = 78 }
 0x152   : > { %v664_v6 = vpop.f32.mrb[0].mxu0 }
 0x153   : > { %v671_v7 = vadd.f32 %v664_v6, %v428_v4  ;;  %v666_v8 = vpop.f32.mrb[1].mxu0 }
 0x154   : > { %v672_v9 = vadd.f32 %v666_v8, %v429_v5  ;;  %v668_v10 = vpop.f32.mrb[2].mxu0 }
 0x155   : > { %673 = vst [vmem:[%s1209_s15] sm:$0xff] %v671_v7  ;;  %v669_v11 = vpop.f32.mrb[3].mxu0 }
 0x156   : > { %674 = vst [vmem:[%s1209_s15 + $0x8] sm:$0xff] %v672_v9 }
 0x15c   : > { %v679_v17 = vld [vmem:[%s1209_s15] sm:$0xff] }
 0x15d   : > { %v680_v18 = vld [vmem:[%s1209_s15 + $0x8] sm:$0xff]  ;;  %v693_v21 = vadd.f32 %v686_v19, %v679_v17 }
 0x15e   : > { %v694_v22 = vadd.f32 %v690_v20, %v680_v18 }
 0x15f   : > { %v695_v23 = vmax.f32 %v693_v21, 0.0 }
 0x160   : > { %v696_v24 = vmax.f32 %v694_v22, 0.0 }
 0x161   : > { %697 = vst [vmem:[%s1209_s15] sm:$0xff] %v695_v23 }
 0x162   : > { %698 = vst [vmem:[%s1209_s15 + $0x8] sm:$0xff] %v696_v24 }
 0x163 PF: > { %s13_s18 = sadd.s32 1, %s1038_s18   ;;  %s1288_s12 = smov %s1018_s13 }
 0x164   : > { %p10_p0 = scmp.ge.s32.totalorder %s13_s18, 16   ;;  %s1289_s13 = smov %s1112_s25 }
 0x165   : > { %s1290_s14 = smov %s1030_s16  ;;  %s1291_s15 = smov %s1034_s17 }
 0x166   : > { %s1292_s16 = smov %s1295_s19  ;;  %s1293_s17 = smov %s1299_s20 }
 0x167   :  { %12 = sbr.rel (!%p10_p0) target bundleno = 4 (0x4), region = 119 }

// kernel: forward.55
= control target key start
LH: loop header
LB: loop body
LE: loop exit
PB: predicated region body
PF: predicated region fallthrough
CT: control target
= control target key end

     0   :  { %s621_s12 = smov 0   ;;  %s623_s13 = smov 0   ;;  %s682_s0 = inlined_call_operand.vmem [shape: bf16[8,640], index: 0, kind: input, shape index: {}]   ;;  %s683_s1 = inlined_call_operand.vmem [shape: bf16[640,128], index: 1, kind: input, shape index: {}]   ;;  %s684_s2 = inlined_call_operand.vmem [shape: f32[1,128], index: 2, kind: input, shape index: {}]   ;;  %s685_s3 = inlined_call_operand.vmem [shape: f32[8,128], index: 3, kind: output, shape index: {}]  }
   0x1   :  { %s625_s14 = smov 0  }
   0x2 LB: > { %s25_s15 = sadd.s32 1, %s592_s13  ;;  %p492_p0 = scmp.ge.s32.totalorder %s596_s14, 1  ;;  %s596_s14 = sphi %s625_s14, %s13_s14   ;;  %s592_s13 = sphi %s623_s13, %s687_s13   ;;  %s588_s12 = sphi %s621_s12, %s686_s12  }
   0x3   : > { %p26_p1 = scmp.ge.s32.totalorder %s25_s15, 5  ;;  %p187_p2 = scmp.lt.s32.totalorder %s596_s14, 6 }
   0x5   : > { %s689_s15 = smov (%p26_p1, %s25_s15), 0  ;;  %p188_p3 = pnand %p492_p0, %p187_p2 }
   0x6   : > { %p229_p4 = scmp.lt.s32.totalorder (!%p188_p3), %s588_s12, 4  ;;  %s494_s16 = sshll.u32 (!%p188_p3), %s588_s12, 4 }
   0x7   : > { %191 = sbr.rel (%p188_p3) target bundleno = 282 (0x11a), region = 32  ;;  %p236_p5 = scmp.lt.s32.totalorder (!%p188_p3), %s494_s16, 79 }
   0x8   : > { %p496_p6 = scmp.ne.s32.totalorder (!%p188_p3), %s588_s12, 0 }
   0xe   : > { %s230_s17 = scalar_select %p229_p4, %s588_s12, 4 }
   0xf   : > { %s691_s16 = smov (!%p236_p5, %s494_s16), 79  ;;  %258 = sbr.rel (%p496_p6) target bundleno = 22 (0x16), region = 36 }
  0x10   : > { %s493_s18 = sshll.u32 %s230_s17, 2  ;;  %s495_s22 = sshll.u32 %s691_s16, 2  ;;  %v598_v0 = vmov (!%p496_p6), 0.0  }
  0x11   : > { %s647_s21 = scalar_lea.vmem %s682_s0, %s493_s18  ;;  %s242_s25 = scalar_lea.vmem %s683_s1, %s495_s22  ;;  %259 = vst [vmem:[%s685_s3] sm:$0xff] (!%p496_p6), %v598_v0 }
  0x16 PF: > { %v566_v1 = vld [vmem:[%s242_s25] sm:$0xff]   ;;  %v599_v2 = vmov 0.0   ;;  %v567_v3 = vld [vmem:[%s242_s25 + $0x8] sm:$0xff]   ;;  %vm600_vm0 = vmmov 0   ;;  %v568_v4 = vld [vmem:[%s242_s25 + $0x10] sm:$0xff]   ;;  %p505_p7 = scmp.ne.s32.totalorder %s588_s12, 4 }
  0x17   : > { %519 = vmatprep.subr.bf16.mxu0 %v599_v2  ;;  %535 = vmatprep.mubr.msk.bf16.mxu0 %vm600_vm0, %v599_v2  ;;  %v569_v5 = vld [vmem:[%s242_s25 + $0x18] sm:$0xff]   ;;  %v570_v6 = vld [vmem:[%s242_s25 + $0x20] sm:$0xff]   ;;  %v571_v7 = vld [vmem:[%s242_s25 + $0x28] sm:$0xff]  }
  0x18   : > { %520 = vmatpush3.bf16.msra.mxu0 %v566_v1  ;;  %v572_v8 = vld [vmem:[%s242_s25 + $0x30] sm:$0xff]   ;;  %v573_v9 = vld [vmem:[%s242_s25 + $0x38] sm:$0xff]   ;;  %v261_v10 = vld [vmem:[%s647_s21] sm:$0xf] }
  0x19   : > { %521 = vmatprep.subr.bf16.mxu0 %v599_v2  ;;  %v260_v11 = vld [vmem:[%s685_s3] sm:$0xff] }
  0x1a   : > { %v506_v18 = vld [vmem:[%s684_s2] ss:$0 sm:$0xff] (!%p505_p7) }
  0x1c   : > { %522 = vmatpush3.bf16.msra.mxu0 %v567_v3 }
  0x1d   : > { %523 = vmatprep.subr.bf16.mxu0 %v599_v2 }
  0x20   : > { %524 = vmatpush3.bf16.msra.mxu0 %v568_v4 }
  0x21   : > { %525 = vmatprep.subr.bf16.mxu0 %v599_v2 }
  0x24   : > { %526 = vmatpush3.bf16.msra.mxu0 %v569_v5 }
  0x25   : > { %527 = vmatprep.subr.bf16.mxu0 %v599_v2 }
  0x28   : > { %528 = vmatpush3.bf16.msra.mxu0 %v570_v6 }
  0x29   : > { %529 = vmatprep.subr.bf16.mxu0 %v599_v2 }
  0x2c   : > { %530 = vmatpush3.bf16.msra.mxu0 %v571_v7 }
  0x2d   : > { %531 = vmatprep.subr.bf16.mxu0 %v599_v2 }
  0x30   : > { %532 = vmatpush3.bf16.msra.mxu0 %v572_v8 }
  0x31   : > { %533 = vmatprep.subr.bf16.mxu0 %v599_v2 }
  0x34   : > { %534 = vmatpush3.bf16.msra.mxu0 %v573_v9 }
  0x37   : > { %536 = vmatmul.mubr.bf16.vlgmr.msra.gmra.mrb[0].mxu0 %v261_v10 }
 0x107   : > { %371 = sbr.rel (%p505_p7) target bundleno = 282 (0x11a), region = 40 }
 0x10a   : > { %v360_v12 = vpop.f32.mrb[0].mxu0 }
 0x10b   : > { %v366_v13 = vadd.f32 %v360_v12, %v260_v11  ;;  %v537_v14 = vpop.f32.mrb[1].mxu0 }
 0x10c   : > { %v363_v15 = vpop.f32.mrb[2].mxu0 }
 0x10d   : > { %367 = vst [vmem:[%s685_s3] sm:$0xff] %v366_v13  ;;  %v538_v16 = vpop.f32.mrb[3].mxu0 }
 0x114   : > { %v372_v17 = vld [vmem:[%s685_s3] sm:$0xff] }
 0x115   : > { %v380_v19 = vadd.f32 %v506_v18, %v372_v17 }
 0x117   : > { %v381_v20 = vmax.f32 %v380_v19, 0.0 }
 0x119   : > { %382 = vst [vmem:[%s685_s3] sm:$0xff] %v381_v20 }
 0x11a PF: > { %s13_s14 = sadd.s32 1, %s596_s14   ;;  %s686_s12 = smov %s592_s13 }
 0x11b   : > { %p10_p8 = scmp.ge.s32.totalorder %s13_s14, 7   ;;  %s687_s13 = smov %s689_s15 }
 0x11d   :  { %12 = sbr.rel (!%p10_p8) target bundleno = 2 (0x2), region = 76 }

// kernel: forward.56
= control target key start
LH: loop header
LB: loop body
LE: loop exit
PB: predicated region body
PF: predicated region fallthrough
CT: control target
= control target key end

     0   :  { %s847_s12 = smov 0   ;;  %s849_s13 = smov 0   ;;  %s1005_s0 = inlined_call_operand.vmem [shape: bf16[8,896], index: 0, kind: input, shape index: {}]   ;;  %s1006_s1 = inlined_call_operand.vmem [shape: bf16[896,512], index: 1, kind: input, shape index: {}]   ;;  %s1007_s2 = inlined_call_operand.vmem [shape: f32[1,512], index: 2, kind: input, shape index: {}]   ;;  %s1008_s3 = inlined_call_operand.vmem [shape: f32[8,512], index: 3, kind: output, shape index: {}]  }
   0x1   :  { %s851_s14 = smov 0   ;;  %s853_s15 = smov 0  }
   0x2   :  { %s855_s16 = smov 0   ;;  %s857_s17 = smov 0  }
   0x3   :  { %s859_s18 = smov 0  }
   0x4 LB: > { %s25_s19 = sadd.s32 1, %s815_s16  ;;  %s28_s20 = sadd.s32 1, %s819_s17  ;;  %s823_s18 = sphi %s859_s18, %s13_s18   ;;  %s819_s17 = sphi %s857_s17, %s1014_s17   ;;  %s815_s16 = sphi %s855_s16, %s1013_s16   ;;  %s811_s15 = sphi %s853_s15, %s1012_s15   ;;  %s807_s14 = sphi %s851_s14, %s1011_s14   ;;  %s803_s13 = sphi %s849_s13, %s1010_s13   ;;  %s799_s12 = sphi %s847_s12, %s1009_s12  }
   0x5   : > { %p26_p0 = scmp.ge.s32.totalorder %s25_s19, 7  ;;  %p76_p1 = scmp.ne.s32.totalorder %s803_s13, %s799_s12 }
   0x6   : > { %p77_p2 = scmp.eq.s32.totalorder %s823_s18, 0  ;;  %s69_s24 = sadd.s32 1, %s803_s13 }
   0x7   : > { %s1016_s19 = smov (%p26_p0, %s25_s19), 0  ;;  %s1018_s20 = smov (!%p26_p0, %s28_s20), %s819_s17 }
   0x8   : > { %p78_p3 = por %p77_p2, %p76_p1  ;;  %p30_p4 = scmp.ge.s32.totalorder %s1018_s20, 2 }
   0x9   : > { %s64_s21 = ssub.s32 %s815_s16, %s1016_s19  ;;  %p654_p6 = scmp.ge.s32.totalorder %s823_s18, 14 }
   0xa   : > { %s1020_s20 = smov (%p30_p4, %s1018_s20), 0 }
   0xb   : > { %s65_s22 = ssub.s32 %s819_s17, %s1020_s20  ;;  %156 = sbr.rel (%p654_p6) target bundleno = 33 (0x21), region = 16 }
   0xc   : > { %s66_s23 = sor.u32 %s65_s22, %s64_s21 }
   0xd   : > { %p67_p5 = scmp.eq.s32.totalorder %s66_s23, 0 }
   0xf   : > { %s898_s25 = scalar_select %p67_p5, %s803_s13, %s69_s24  }
  0x12   : > { %170 = sbr.rel (!%p78_p3) target bundleno = 33 (0x21), region = 24  ;;  %s172_s26 = sand.u32 (%p78_p3), 1, %s803_s13  }
  0x13   : > { %s657_s27 = sshll.u32 (%p78_p3), %s819_s17, 1  ;;  %s655_s28 = sshll.u32 (%p78_p3), %s172_s26, 7 }
  0x14   : > { %s686_s29 = sshll.u32 (%p78_p3), %s815_s16, 6  ;;  %s174_s8 = scalar_lea.vmem (%p78_p3), [#allocation2], %s655_s28 }
  0x15   : > { %s178_s30 = sadd.s32 (%p78_p3), %s686_s29, %s657_s27 }
  0x16   : > { %s659_s4 = sshll.u32 (%p78_p3), %s178_s30, 2 }
  0x17   : > { %s907_s7 = scalar_lea.vmem (%p78_p3), %s1006_s1, %s659_s4 }
  0x18   : > { %v238_v0 = vld [vmem:[%s907_s7] sm:$0xff] (%p78_p3)  ;;  %v240_v1 = vld [vmem:[%s907_s7 + $0x10] sm:$0xff] (%p78_p3) }
  0x19   : > { %v242_v2 = vld [vmem:[%s907_s7 + $0x20] sm:$0xff]  ;;  %239 = vst [vmem:[%s174_s8] sm:$0xff] %v238_v0  ;;  %241 = vst [vmem:[%s174_s8 + $0x8] sm:$0xff] %v240_v1  ;;  %v244_v3 = vld [vmem:[%s907_s7 + $0x30] sm:$0xff] }
  0x1a   : > { %243 = vst [vmem:[%s174_s8 + $0x10] sm:$0xff] %v242_v2  ;;  %v246_v4 = vld [vmem:[%s907_s7 + $0x40] sm:$0xff]  ;;  %v248_v5 = vld [vmem:[%s907_s7 + $0x50] sm:$0xff]  ;;  %245 = vst [vmem:[%s174_s8 + $0x18] sm:$0xff] %v244_v3 }
  0x1b   : > { %247 = vst [vmem:[%s174_s8 + $0x20] sm:$0xff] %v246_v4  ;;  %249 = vst [vmem:[%s174_s8 + $0x28] sm:$0xff] %v248_v5  ;;  %v250_v6 = vld [vmem:[%s907_s7 + $0x60] sm:$0xff]  ;;  %v252_v7 = vld [vmem:[%s907_s7 + $0x70] sm:$0xff] }
  0x1c   : > { %v254_v8 = vld [vmem:[%s907_s7 + $0x80] sm:$0xff]  ;;  %251 = vst [vmem:[%s174_s8 + $0x30] sm:$0xff] %v250_v6  ;;  %253 = vst [vmem:[%s174_s8 + $0x38] sm:$0xff] %v252_v7  ;;  %v256_v9 = vld [vmem:[%s907_s7 + $0x90] sm:$0xff] }
  0x1d   : > { %255 = vst [vmem:[%s174_s8 + $0x40] sm:$0xff] %v254_v8  ;;  %v258_v10 = vld [vmem:[%s907_s7 + $0xa0] sm:$0xff]  ;;  %v260_v11 = vld [vmem:[%s907_s7 + $0xb0] sm:$0xff]  ;;  %257 = vst [vmem:[%s174_s8 + $0x48] sm:$0xff] %v256_v9 }
  0x1e   : > { %259 = vst [vmem:[%s174_s8 + $0x50] sm:$0xff] %v258_v10  ;;  %261 = vst [vmem:[%s174_s8 + $0x58] sm:$0xff] %v260_v11  ;;  %v262_v12 = vld [vmem:[%s907_s7 + $0xc0] sm:$0xff]  ;;  %v264_v13 = vld [vmem:[%s907_s7 + $0xd0] sm:$0xff] }
  0x1f   : > { %v266_v14 = vld [vmem:[%s907_s7 + $0xe0] sm:$0xff]  ;;  %263 = vst [vmem:[%s174_s8 + $0x60] sm:$0xff] %v262_v12  ;;  %265 = vst [vmem:[%s174_s8 + $0x68] sm:$0xff] %v264_v13  ;;  %v268_v15 = vld [vmem:[%s907_s7 + $0xf0] sm:$0xff] }
  0x20   : > { %267 = vst [vmem:[%s174_s8 + $0x70] sm:$0xff] %v266_v14  ;;  %269 = vst [vmem:[%s174_s8 + $0x78] sm:$0xff] %v268_v15 }
  0x21 PF: > { %p660_p7 = scmp.ge.s32.totalorder %s823_s18, 1  ;;  %p282_p8 = scmp.lt.s32.totalorder %s823_s18, 15 }
  0x23   : > { %p283_p9 = pnand %p660_p7, %p282_p8 }
  0x24   : > { %s289_s9 = sand.u32 (!%p283_p9), 1, %s799_s12   ;;  %p330_p10 = scmp.lt.s32.totalorder (!%p283_p9), %s807_s14, 6 }
  0x25   : > { %286 = sbr.rel (%p283_p9) target bundleno = 313 (0x139), region = 66  ;;  %s661_s10 = sshll.u32 (!%p283_p9), %s289_s9, 7 }
  0x26   : > { %s663_s11 = sshll.u32 (!%p283_p9), %s811_s15, 1  ;;  %s948_s5 = scalar_lea.vmem (!%p283_p9), [#allocation2], %s661_s10 }
  0x27   : > { %p339_p11 = scmp.lt.s32.totalorder (!%p283_p9), %s663_s11, 3  ;;  %p666_p12 = scmp.ne.s32.totalorder (!%p283_p9), %s807_s14, 0 }
  0x2c   : > { %s331_s21 = scalar_select %p330_p10, %s807_s14, 6 }
  0x2d   : > { %s1022_s11 = smov (!%p339_p11, %s663_s11), 3  ;;  %357 = sbr.rel (%p666_p12) target bundleno = 52 (0x34), region = 74 }
  0x2e   : > { %s662_s22 = sshll.u32 %s331_s21, 2  ;;  %s341_s29 = scalar_lea.vmem %s1007_s2, %s1022_s11  ;;  %v825_v16 = vmov (!%p666_p12), 0.0  }
  0x2f   : > { %s936_s26 = scalar_lea.vmem %s1005_s0, %s662_s22  ;;  %s665_s12 = sshll.u32 %s1022_s11, 3 }
  0x30   : > { %s946_s15 = scalar_lea.vmem %s1008_s3, %s665_s12 }
  0x31   : > { %358 = vst [vmem:[%s946_s15] sm:$0xff] (!%p666_p12), %v825_v16  ;;  %359 = vst [vmem:[%s946_s15 + $0x8] sm:$0xff] (!%p666_p12), %v825_v16 }
  0x34 PF: > { %v745_v17 = vld [vmem:[%s948_s5 + $0x4] ss:$8 sps:$4 sm:$0xff]   ;;  %v747_v18 = vld [vmem:[%s948_s5] ss:$8 sps:$4 sm:$0xff]   ;;  %v826_v19 = vmov 0   ;;  %p683_p13 = scmp.ne.s32.totalorder %s807_s14, 6 }
  0x35   : > { %491 = vmatprep.mubr.bf16.mxu0 %v826_v19  ;;  %459 = vmatprep.subr.bf16.mxu0 %v745_v17  ;;  %v748_v20 = vld [vmem:[%s948_s5 + $0x14] ss:$8 sps:$4 sm:$0xff]   ;;  %v750_v21 = vld [vmem:[%s948_s5 + $0x10] ss:$8 sps:$4 sm:$0xff]   ;;  %v751_v22 = vld [vmem:[%s948_s5 + $0x24] ss:$8 sps:$4 sm:$0xff]   ;;  %v512_v43 = vlaneseq (!%p683_p13) }
  0x36   : > { %460 = vmatpush1.bf16.msra.mxu0 %v747_v18  ;;  %v753_v23 = vld [vmem:[%s948_s5 + $0x20] ss:$8 sps:$4 sm:$0xff]   ;;  %v754_v24 = vld [vmem:[%s948_s5 + $0x34] ss:$8 sps:$4 sm:$0xff]   ;;  %v756_v25 = vld [vmem:[%s948_s5 + $0x30] ss:$8 sps:$4 sm:$0xff]  }
  0x37   : > { %461 = vmatprep.subr.bf16.mxu0 %v748_v20  ;;  %v757_v26 = vld [vmem:[%s948_s5 + $0x44] ss:$8 sps:$4 sm:$0xff]   ;;  %v759_v27 = vld [vmem:[%s948_s5 + $0x40] ss:$8 sps:$4 sm:$0xff]   ;;  %v760_v28 = vld [vmem:[%s948_s5 + $0x54] ss:$8 sps:$4 sm:$0xff]  }
  0x38   : > { %v762_v29 = vld [vmem:[%s948_s5 + $0x50] ss:$8 sps:$4 sm:$0xff]   ;;  %v763_v30 = vld [vmem:[%s948_s5 + $0x64] ss:$8 sps:$4 sm:$0xff]   ;;  %v765_v31 = vld [vmem:[%s948_s5 + $0x60] ss:$8 sps:$4 sm:$0xff]  }
  0x39   : > { %v766_v32 = vld [vmem:[%s948_s5 + $0x74] ss:$8 sps:$4 sm:$0xff]   ;;  %v768_v33 = vld [vmem:[%s948_s5 + $0x70] ss:$8 sps:$4 sm:$0xff]   ;;  %v362_v34 = vld [vmem:[%s936_s26] sm:$0xf] }
  0x3a   : > { %462 = vmatpush1.bf16.msra.mxu0 %v750_v21  ;;  %v360_v35 = vld [vmem:[%s946_s15] sm:$0xff]  ;;  %v361_v36 = vld [vmem:[%s946_s15 + $0x8] sm:$0xff]  ;;  %v513_v44 = vshrl.u32 (!%p683_p13), %v512_v43, 7 }
  0x3b   : > { %463 = vmatprep.subr.bf16.mxu0 %v751_v22  ;;  %v510_v45 = vld [vmem:[%s341_s29] sm:$0x3] (!%p683_p13) }
  0x3c   : > { %v514_v46 = vsub.s32 (!%p683_p13), 0, %v513_v44  ;;  %v518_v47 = vsub.s32 (!%p683_p13), 1, %v513_v44 }
  0x3e   : > { %464 = vmatpush1.bf16.msra.mxu0 %v753_v23  ;;  %v515_v50 = vrot.slane (!%p683_p13), %v510_v45, %v514_v46  ;;  %v519_v51 = vrot.slane (!%p683_p13), %v510_v45, %v518_v47 }
  0x3f   : > { %465 = vmatprep.subr.bf16.mxu0 %v754_v24 }
  0x42   : > { %466 = vmatpush1.bf16.msra.mxu0 %v756_v25 }
  0x43   : > { %467 = vmatprep.subr.bf16.mxu0 %v757_v26 }
  0x46   : > { %468 = vmatpush1.bf16.msra.mxu0 %v759_v27 }
  0x47   : > { %469 = vmatprep.subr.bf16.mxu0 %v760_v28 }
  0x4a   : > { %470 = vmatpush1.bf16.msra.mxu0 %v762_v29 }
  0x4b   : > { %471 = vmatprep.subr.bf16.mxu0 %v763_v30 }
  0x4e   : > { %472 = vmatpush1.bf16.msra.mxu0 %v765_v31 }
  0x4f   : > { %473 = vmatprep.subr.bf16.mxu0 %v766_v32 }
  0x52   : > { %474 = vmatpush1.bf16.msra.mxu0 %v768_v33 }
  0x55   : > { %492 = vmatmul.mubr.bf16.vlgmr.msra.gmra.mrb[0].mxu0 %v362_v34 }
 0x126   : > { %507 = sbr.rel (%p683_p13) target bundleno = 313 (0x139), region = 78 }
 0x128   : > { %v493_v37 = vpop.f32.mrb[0].mxu0 }
 0x129   : > { %v500_v38 = vadd.f32 %v493_v37, %v360_v35  ;;  %v495_v39 = vpop.f32.mrb[1].mxu0 }
 0x12a   : > { %v501_v40 = vadd.f32 %v495_v39, %v361_v36  ;;  %v497_v41 = vpop.f32.mrb[2].mxu0 }
 0x12b   : > { %502 = vst [vmem:[%s946_s15] sm:$0xff] %v500_v38  ;;  %v498_v42 = vpop.f32.mrb[3].mxu0 }
 0x12c   : > { %503 = vst [vmem:[%s946_s15 + $0x8] sm:$0xff] %v501_v40 }
 0x132   : > { %v508_v48 = vld [vmem:[%s946_s15] sm:$0xff] }
 0x133   : > { %v509_v49 = vld [vmem:[%s946_s15 + $0x8] sm:$0xff]  ;;  %v522_v52 = vadd.f32 %v515_v50, %v508_v48 }
 0x134   : > { %v523_v53 = vadd.f32 %v519_v51, %v509_v49 }
 0x135   : > { %v524_v54 = vmax.f32 %v522_v52, 0.0 }
 0x136   : > { %v525_v55 = vmax.f32 %v523_v53, 0.0 }
 0x137   : > { %526 = vst [vmem:[%s946_s15] sm:$0xff] %v524_v54 }
 0x138   : > { %527 = vst [vmem:[%s946_s15 + $0x8] sm:$0xff] %v525_v55 }
 0x139 PF: > { %s13_s18 = sadd.s32 1, %s823_s18   ;;  %s1009_s12 = smov %s803_s13 }
 0x13a   : > { %p10_p0 = scmp.ge.s32.totalorder %s13_s18, 16   ;;  %s1010_s13 = smov %s898_s25 }
 0x13b   : > { %s1011_s14 = smov %s815_s16  ;;  %s1012_s15 = smov %s819_s17 }
 0x13c   : > { %s1013_s16 = smov %s1016_s19  ;;  %s1014_s17 = smov %s1020_s20 }
 0x13d   :  { %12 = sbr.rel (!%p10_p0) target bundleno = 4 (0x4), region = 119 }

// kernel: forward.58
= control target key start
LH: loop header
LB: loop body
LE: loop exit
PB: predicated region body
PF: predicated region fallthrough
CT: control target
= control target key end

     0   :  { %s621_s12 = smov 0   ;;  %s623_s13 = smov 0   ;;  %s682_s0 = inlined_call_operand.vmem [shape: bf16[8,896], index: 0, kind: input, shape index: {}]   ;;  %s683_s1 = inlined_call_operand.vmem [shape: bf16[896,128], index: 1, kind: input, shape index: {}]   ;;  %s684_s2 = inlined_call_operand.vmem [shape: f32[1,128], index: 2, kind: input, shape index: {}]   ;;  %s685_s3 = inlined_call_operand.vmem [shape: f32[8,128], index: 3, kind: output, shape index: {}]  }
   0x1   :  { %s625_s14 = smov 0  }
   0x2 LB: > { %s25_s15 = sadd.s32 1, %s592_s13  ;;  %p492_p0 = scmp.ge.s32.totalorder %s596_s14, 1  ;;  %s596_s14 = sphi %s625_s14, %s13_s14   ;;  %s592_s13 = sphi %s623_s13, %s687_s13   ;;  %s588_s12 = sphi %s621_s12, %s686_s12  }
   0x3   : > { %p26_p1 = scmp.ge.s32.totalorder %s25_s15, 7  ;;  %p187_p2 = scmp.lt.s32.totalorder %s596_s14, 8 }
   0x5   : > { %s689_s15 = smov (%p26_p1, %s25_s15), 0  ;;  %p188_p3 = pnand %p492_p0, %p187_p2 }
   0x6   : > { %p229_p4 = scmp.lt.s32.totalorder (!%p188_p3), %s588_s12, 6  ;;  %s494_s16 = sshll.u32 (!%p188_p3), %s588_s12, 4 }
   0x7   : > { %191 = sbr.rel (%p188_p3) target bundleno = 282 (0x11a), region = 32  ;;  %p236_p5 = scmp.lt.s32.totalorder (!%p188_p3), %s494_s16, 111 }
   0x8   : > { %p496_p6 = scmp.ne.s32.totalorder (!%p188_p3), %s588_s12, 0 }
   0xe   : > { %s230_s17 = scalar_select %p229_p4, %s588_s12, 6 }
   0xf   : > { %s691_s16 = smov (!%p236_p5, %s494_s16), 111  ;;  %258 = sbr.rel (%p496_p6) target bundleno = 22 (0x16), region = 36 }
  0x10   : > { %s493_s18 = sshll.u32 %s230_s17, 2  ;;  %s495_s22 = sshll.u32 %s691_s16, 2  ;;  %v598_v0 = vmov (!%p496_p6), 0.0  }
  0x11   : > { %s647_s21 = scalar_lea.vmem %s682_s0, %s493_s18  ;;  %s242_s25 = scalar_lea.vmem %s683_s1, %s495_s22  ;;  %259 = vst [vmem:[%s685_s3] sm:$0xff] (!%p496_p6), %v598_v0 }
  0x16 PF: > { %v566_v1 = vld [vmem:[%s242_s25] sm:$0xff]   ;;  %v599_v2 = vmov 0.0   ;;  %v567_v3 = vld [vmem:[%s242_s25 + $0x8] sm:$0xff]   ;;  %vm600_vm0 = vmmov 0   ;;  %v568_v4 = vld [vmem:[%s242_s25 + $0x10] sm:$0xff]   ;;  %p505_p7 = scmp.ne.s32.totalorder %s588_s12, 6 }
  0x17   : > { %519 = vmatprep.subr.bf16.mxu0 %v599_v2  ;;  %535 = vmatprep.mubr.msk.bf16.mxu0 %vm600_vm0, %v599_v2  ;;  %v569_v5 = vld [vmem:[%s242_s25 + $0x18] sm:$0xff]   ;;  %v570_v6 = vld [vmem:[%s242_s25 + $0x20] sm:$0xff]   ;;  %v571_v7 = vld [vmem:[%s242_s25 + $0x28] sm:$0xff]  }
  0x18   : > { %520 = vmatpush3.bf16.msra.mxu0 %v566_v1  ;;  %v572_v8 = vld [vmem:[%s242_s25 + $0x30] sm:$0xff]   ;;  %v573_v9 = vld [vmem:[%s242_s25 + $0x38] sm:$0xff]   ;;  %v261_v10 = vld [vmem:[%s647_s21] sm:$0xf] }
  0x19   : > { %521 = vmatprep.subr.bf16.mxu0 %v599_v2  ;;  %v260_v11 = vld [vmem:[%s685_s3] sm:$0xff] }
  0x1a   : > { %v506_v18 = vld [vmem:[%s684_s2] ss:$0 sm:$0xff] (!%p505_p7) }
  0x1c   : > { %522 = vmatpush3.bf16.msra.mxu0 %v567_v3 }
  0x1d   : > { %523 = vmatprep.subr.bf16.mxu0 %v599_v2 }
  0x20   : > { %524 = vmatpush3.bf16.msra.mxu0 %v568_v4 }
  0x21   : > { %525 = vmatprep.subr.bf16.mxu0 %v599_v2 }
  0x24   : > { %526 = vmatpush3.bf16.msra.mxu0 %v569_v5 }
  0x25   : > { %527 = vmatprep.subr.bf16.mxu0 %v599_v2 }
  0x28   : > { %528 = vmatpush3.bf16.msra.mxu0 %v570_v6 }
  0x29   : > { %529 = vmatprep.subr.bf16.mxu0 %v599_v2 }
  0x2c   : > { %530 = vmatpush3.bf16.msra.mxu0 %v571_v7 }
  0x2d   : > { %531 = vmatprep.subr.bf16.mxu0 %v599_v2 }
  0x30   : > { %532 = vmatpush3.bf16.msra.mxu0 %v572_v8 }
  0x31   : > { %533 = vmatprep.subr.bf16.mxu0 %v599_v2 }
  0x34   : > { %534 = vmatpush3.bf16.msra.mxu0 %v573_v9 }
  0x37   : > { %536 = vmatmul.mubr.bf16.vlgmr.msra.gmra.mrb[0].mxu0 %v261_v10 }
 0x107   : > { %371 = sbr.rel (%p505_p7) target bundleno = 282 (0x11a), region = 40 }
 0x10a   : > { %v360_v12 = vpop.f32.mrb[0].mxu0 }
 0x10b   : > { %v366_v13 = vadd.f32 %v360_v12, %v260_v11  ;;  %v537_v14 = vpop.f32.mrb[1].mxu0 }
 0x10c   : > { %v363_v15 = vpop.f32.mrb[2].mxu0 }
 0x10d   : > { %367 = vst [vmem:[%s685_s3] sm:$0xff] %v366_v13  ;;  %v538_v16 = vpop.f32.mrb[3].mxu0 }
 0x114   : > { %v372_v17 = vld [vmem:[%s685_s3] sm:$0xff] }
 0x115   : > { %v380_v19 = vadd.f32 %v506_v18, %v372_v17 }
 0x117   : > { %v381_v20 = vmax.f32 %v380_v19, 0.0 }
 0x119   : > { %382 = vst [vmem:[%s685_s3] sm:$0xff] %v381_v20 }
 0x11a PF: > { %s13_s14 = sadd.s32 1, %s596_s14   ;;  %s686_s12 = smov %s592_s13 }
 0x11b   : > { %p10_p8 = scmp.ge.s32.totalorder %s13_s14, 9   ;;  %s687_s13 = smov %s689_s15 }
 0x11d   :  { %12 = sbr.rel (!%p10_p8) target bundleno = 2 (0x2), region = 76 }

// kernel: forward.59
= control target key start
LH: loop header
LB: loop body
LE: loop exit
PB: predicated region body
PF: predicated region fallthrough
CT: control target
= control target key end

     0   :  { %s798_s12 = smov 0   ;;  %s800_s13 = smov 0   ;;  %s934_s0 = inlined_call_operand.vmem [shape: bf16[8,896], index: 0, kind: input, shape index: {}]   ;;  %s935_s1 = inlined_call_operand.vmem [shape: bf16[896,640], index: 1, kind: input, shape index: {}]   ;;  %s936_s2 = inlined_call_operand.vmem [shape: f32[1,640], index: 2, kind: input, shape index: {}]   ;;  %s937_s3 = inlined_call_operand.vmem [shape: f32[8,640], index: 3, kind: output, shape index: {}]  }
   0x1   :  { %s802_s14 = smov 0   ;;  %s804_s15 = smov 0  }
   0x2   :  { %s806_s16 = smov 0   ;;  %s808_s17 = smov 0  }
   0x3   :  { %s810_s18 = smov 0  }
   0x4 LB: > { %s25_s19 = sadd.s32 1, %s765_s16  ;;  %s28_s20 = sadd.s32 1, %s769_s17  ;;  %s773_s18 = sphi %s810_s18, %s13_s18   ;;  %s769_s17 = sphi %s808_s17, %s943_s17   ;;  %s765_s16 = sphi %s806_s16, %s942_s16   ;;  %s761_s15 = sphi %s804_s15, %s941_s15   ;;  %s757_s14 = sphi %s802_s14, %s940_s14   ;;  %s753_s13 = sphi %s800_s13, %s939_s13   ;;  %s749_s12 = sphi %s798_s12, %s938_s12  }
   0x5   : > { %p26_p0 = scmp.ge.s32.totalorder %s25_s19, 7  ;;  %p76_p1 = scmp.ne.s32.totalorder %s753_s13, %s749_s12 }
   0x6   : > { %p77_p2 = scmp.eq.s32.totalorder %s773_s18, 0  ;;  %s69_s24 = sadd.s32 1, %s753_s13 }
   0x7   : > { %s945_s19 = smov (%p26_p0, %s25_s19), 0  ;;  %s947_s20 = smov (!%p26_p0, %s28_s20), %s769_s17 }
   0x8   : > { %p78_p3 = por %p77_p2, %p76_p1  ;;  %p30_p4 = scmp.ge.s32.totalorder %s947_s20, 5 }
   0x9   : > { %s64_s21 = ssub.s32 %s765_s16, %s945_s19  ;;  %p600_p6 = scmp.ge.s32.totalorder %s773_s18, 35 }
   0xa   : > { %s949_s20 = smov (%p30_p4, %s947_s20), 0 }
   0xb   : > { %s65_s22 = ssub.s32 %s769_s17, %s949_s20  ;;  %156 = sbr.rel (%p600_p6) target bundleno = 35 (0x23), region = 16 }
   0xc   : > { %s66_s23 = sor.u32 %s65_s22, %s64_s21 }
   0xd   : > { %p67_p5 = scmp.eq.s32.totalorder %s66_s23, 0 }
   0xf   : > { %s849_s25 = scalar_select %p67_p5, %s753_s13, %s69_s24  }
  0x12   : > { %170 = sbr.rel (!%p78_p3) target bundleno = 35 (0x23), region = 24  ;;  %s172_s26 = sand.u32 (%p78_p3), 1, %s753_s13  }
  0x13   : > { %s651_s27 = smul.u32 (%p78_p3), 80, %s765_s16  ;;  %s601_s28 = sshll.u32 (%p78_p3), %s172_s26, 6 }
  0x14   : > { %s174_s7 = scalar_lea.vmem (%p78_p3), [#allocation2], %s601_s28 }
  0x15   : > { %s177_s29 = sadd.s32 (%p78_p3), %s769_s17, %s651_s27 }
  0x16   : > { %s604_s30 = sshll.u32 (%p78_p3), %s177_s29, 2 }
  0x17   : > { %s858_s6 = scalar_lea.vmem (%p78_p3), %s935_s1, %s604_s30 }
  0x18   : > { %v195_v0 = vld [vmem:[%s858_s6] sm:$0xf] (%p78_p3)  ;;  %v197_v1 = vld [vmem:[%s858_s6 + $0x14] sm:$0xf] (%p78_p3)  ;;  %v199_v2 = vld [vmem:[%s858_s6 + $0x28] sm:$0xf] (%p78_p3) }
  0x19   : > { %196 = vst [vmem:[%s174_s7] sm:$0xf] %v195_v0  ;;  %198 = vst [vmem:[%s174_s7 + $0x4] sm:$0xf] %v197_v1  ;;  %v201_v3 = vld [vmem:[%s858_s6 + $0x3c] sm:$0xf] }
  0x1a   : > { %200 = vst [vmem:[%s174_s7 + $0x8] sm:$0xf] %v199_v2  ;;  %v203_v4 = vld [vmem:[%s858_s6 + $0x50] sm:$0xf]  ;;  %v205_v5 = vld [vmem:[%s858_s6 + $0x64] sm:$0xf] }
  0x1b   : > { %202 = vst [vmem:[%s174_s7 + $0xc] sm:$0xf] %v201_v3  ;;  %204 = vst [vmem:[%s174_s7 + $0x10] sm:$0xf] %v203_v4  ;;  %v207_v6 = vld [vmem:[%s858_s6 + $0x78] sm:$0xf] }
  0x1c   : > { %206 = vst [vmem:[%s174_s7 + $0x14] sm:$0xf] %v205_v5  ;;  %v209_v7 = vld [vmem:[%s858_s6 + $0x8c] sm:$0xf]  ;;  %v211_v8 = vld [vmem:[%s858_s6 + $0xa0] sm:$0xf] }
  0x1d   : > { %208 = vst [vmem:[%s174_s7 + $0x18] sm:$0xf] %v207_v6  ;;  %210 = vst [vmem:[%s174_s7 + $0x1c] sm:$0xf] %v209_v7  ;;  %v213_v9 = vld [vmem:[%s858_s6 + $0xb4] sm:$0xf] }
  0x1e   : > { %212 = vst [vmem:[%s174_s7 + $0x20] sm:$0xf] %v211_v8  ;;  %v215_v10 = vld [vmem:[%s858_s6 + $0xc8] sm:$0xf]  ;;  %v217_v11 = vld [vmem:[%s858_s6 + $0xdc] sm:$0xf] }
  0x1f   : > { %214 = vst [vmem:[%s174_s7 + $0x24] sm:$0xf] %v213_v9  ;;  %216 = vst [vmem:[%s174_s7 + $0x28] sm:$0xf] %v215_v10  ;;  %v219_v12 = vld [vmem:[%s858_s6 + $0xf0] sm:$0xf] }
  0x20   : > { %218 = vst [vmem:[%s174_s7 + $0x2c] sm:$0xf] %v217_v11  ;;  %v221_v13 = vld [vmem:[%s858_s6 + $0x104] sm:$0xf]  ;;  %v223_v14 = vld [vmem:[%s858_s6 + $0x118] sm:$0xf] }
  0x21   : > { %220 = vst [vmem:[%s174_s7 + $0x30] sm:$0xf] %v219_v12  ;;  %222 = vst [vmem:[%s174_s7 + $0x34] sm:$0xf] %v221_v13  ;;  %v225_v15 = vld [vmem:[%s858_s6 + $0x12c] sm:$0xf] }
  0x22   : > { %224 = vst [vmem:[%s174_s7 + $0x38] sm:$0xf] %v223_v14  ;;  %226 = vst [vmem:[%s174_s7 + $0x3c] sm:$0xf] %v225_v15 }
  0x23 PF: > { %p605_p7 = scmp.ge.s32.totalorder %s773_s18, 1  ;;  %p286_p8 = scmp.lt.s32.totalorder %s773_s18, 36 }
  0x25   : > { %p287_p9 = pnand %p605_p7, %p286_p8 }
  0x26   : > { %s293_s8 = sand.u32 (!%p287_p9), 1, %s749_s12   ;;  %p332_p10 = scmp.lt.s32.totalorder (!%p287_p9), %s757_s14, 6 }
  0x27   : > { %290 = sbr.rel (%p287_p9) target bundleno = 314 (0x13a), region = 69  ;;  %s606_s9 = sshll.u32 (!%p287_p9), %s293_s8, 6 }
  0x28   : > { %p339_p11 = scmp.lt.s32.totalorder (!%p287_p9), %s761_s15, 4  ;;  %s295_s4 = scalar_lea.vmem (!%p287_p9), [#allocation2], %s606_s9 }
  0x29   : > { %p609_p12 = scmp.ne.s32.totalorder (!%p287_p9), %s757_s14, 0 }
  0x2e   : > { %s333_s10 = scalar_select %p332_p10, %s757_s14, 6 }
  0x2f   : > { %s951_s15 = smov (!%p339_p11, %s761_s15), 4  ;;  %354 = sbr.rel (%p609_p12) target bundleno = 54 (0x36), region = 77 }
  0x30   : > { %s607_s11 = sshll.u32 %s333_s10, 2  ;;  %s341_s27 = scalar_lea.vmem %s936_s2, %s951_s15  ;;  %v775_v16 = vmov (!%p609_p12), 0.0  }
  0x31   : > { %s888_s23 = scalar_lea.vmem %s934_s0, %s607_s11  ;;  %s608_s28 = sshll.u32 %s951_s15, 3 }
  0x32   : > { %s898_s30 = scalar_lea.vmem %s937_s3, %s608_s28 }
  0x33   : > { %355 = vst [vmem:[%s898_s30] sm:$0xff] (!%p609_p12), %v775_v16 }
  0x36 PF: > { %v711_v17 = vld [vmem:[%s295_s4] sm:$0xff]   ;;  %v776_v18 = vmov 0.0   ;;  %v712_v19 = vld [vmem:[%s295_s4 + $0x8] sm:$0xff]   ;;  %vm777_vm0 = vmmov 0   ;;  %v713_v20 = vld [vmem:[%s295_s4 + $0x10] sm:$0xff]   ;;  %p618_p13 = scmp.ne.s32.totalorder %s757_s14, 6 }
  0x37   : > { %631 = vmatprep.subr.bf16.mxu0 %v776_v18  ;;  %647 = vmatprep.mubr.msk.bf16.mxu0 %vm777_vm0, %v776_v18  ;;  %v714_v21 = vld [vmem:[%s295_s4 + $0x18] sm:$0xff]   ;;  %v715_v22 = vld [vmem:[%s295_s4 + $0x20] sm:$0xff]   ;;  %v716_v23 = vld [vmem:[%s295_s4 + $0x28] sm:$0xff]  }
  0x38   : > { %632 = vmatpush3.bf16.msra.mxu0 %v711_v17  ;;  %v717_v24 = vld [vmem:[%s295_s4 + $0x30] sm:$0xff]   ;;  %v718_v25 = vld [vmem:[%s295_s4 + $0x38] sm:$0xff]   ;;  %v357_v26 = vld [vmem:[%s888_s23] sm:$0xf] }
  0x39   : > { %633 = vmatprep.subr.bf16.mxu0 %v776_v18  ;;  %v619_v34 = vld [vmem:[%s341_s27] ss:$0 sm:$0xff] (!%p618_p13) }
  0x3a   : > { %v356_v27 = vld [vmem:[%s898_s30] sm:$0xff] }
  0x3c   : > { %634 = vmatpush3.bf16.msra.mxu0 %v712_v19 }
  0x3d   : > { %635 = vmatprep.subr.bf16.mxu0 %v776_v18 }
  0x40   : > { %636 = vmatpush3.bf16.msra.mxu0 %v713_v20 }
  0x41   : > { %637 = vmatprep.subr.bf16.mxu0 %v776_v18 }
  0x44   : > { %638 = vmatpush3.bf16.msra.mxu0 %v714_v21 }
  0x45   : > { %639 = vmatprep.subr.bf16.mxu0 %v776_v18 }
  0x48   : > { %640 = vmatpush3.bf16.msra.mxu0 %v715_v22 }
  0x49   : > { %641 = vmatprep.subr.bf16.mxu0 %v776_v18 }
  0x4c   : > { %642 = vmatpush3.bf16.msra.mxu0 %v716_v23 }
  0x4d   : > { %643 = vmatprep.subr.bf16.mxu0 %v776_v18 }
  0x50   : > { %644 = vmatpush3.bf16.msra.mxu0 %v717_v24 }
  0x51   : > { %645 = vmatprep.subr.bf16.mxu0 %v776_v18 }
  0x54   : > { %646 = vmatpush3.bf16.msra.mxu0 %v718_v25 }
  0x57   : > { %648 = vmatmul.mubr.bf16.vlgmr.msra.gmra.mrb[0].mxu0 %v357_v26 }
 0x127   : > { %467 = sbr.rel (%p618_p13) target bundleno = 314 (0x13a), region = 81 }
 0x12a   : > { %v456_v28 = vpop.f32.mrb[0].mxu0 }
 0x12b   : > { %v462_v29 = vadd.f32 %v456_v28, %v356_v27  ;;  %v649_v30 = vpop.f32.mrb[1].mxu0 }
 0x12c   : > { %v459_v31 = vpop.f32.mrb[2].mxu0 }
 0x12d   : > { %463 = vst [vmem:[%s898_s30] sm:$0xff] %v462_v29  ;;  %v650_v32 = vpop.f32.mrb[3].mxu0 }
 0x134   : > { %v468_v33 = vld [vmem:[%s898_s30] sm:$0xff] }
 0x135   : > { %v476_v35 = vadd.f32 %v619_v34, %v468_v33 }
 0x137   : > { %v477_v36 = vmax.f32 %v476_v35, 0.0 }
 0x139   : > { %478 = vst [vmem:[%s898_s30] sm:$0xff] %v477_v36 }
 0x13a PF: > { %s13_s18 = sadd.s32 1, %s773_s18   ;;  %s938_s12 = smov %s753_s13 }
 0x13b   : > { %p10_p0 = scmp.ge.s32.totalorder %s13_s18, 37   ;;  %s939_s13 = smov %s849_s25 }
 0x13c   : > { %s940_s14 = smov %s765_s16  ;;  %s941_s15 = smov %s769_s17 }
 0x13d   : > { %s942_s16 = smov %s945_s19  ;;  %s943_s17 = smov %s949_s20 }
 0x13e   :  { %12 = sbr.rel (!%p10_p0) target bundleno = 4 (0x4), region = 122 }

// kernel: forward.60
= control target key start
LH: loop header
LB: loop body
LE: loop exit
PB: predicated region body
PF: predicated region fallthrough
CT: control target
= control target key end

     0   :  { %s847_s12 = smov 0   ;;  %s849_s13 = smov 0   ;;  %s1005_s0 = inlined_call_operand.vmem [shape: bf16[8,2176], index: 0, kind: input, shape index: {}]   ;;  %s1006_s1 = inlined_call_operand.vmem [shape: bf16[2176,512], index: 1, kind: input, shape index: {}]   ;;  %s1007_s2 = inlined_call_operand.vmem [shape: f32[1,512], index: 2, kind: input, shape index: {}]   ;;  %s1008_s3 = inlined_call_operand.vmem [shape: f32[8,512], index: 3, kind: output, shape index: {}]  }
   0x1   :  { %s851_s14 = smov 0   ;;  %s853_s15 = smov 0  }
   0x2   :  { %s855_s16 = smov 0   ;;  %s857_s17 = smov 0  }
   0x3   :  { %s859_s18 = smov 0  }
   0x4 LB: > { %s25_s19 = sadd.s32 1, %s815_s16  ;;  %s28_s20 = sadd.s32 1, %s819_s17  ;;  %s823_s18 = sphi %s859_s18, %s13_s18   ;;  %s819_s17 = sphi %s857_s17, %s1014_s17   ;;  %s815_s16 = sphi %s855_s16, %s1013_s16   ;;  %s811_s15 = sphi %s853_s15, %s1012_s15   ;;  %s807_s14 = sphi %s851_s14, %s1011_s14   ;;  %s803_s13 = sphi %s849_s13, %s1010_s13   ;;  %s799_s12 = sphi %s847_s12, %s1009_s12  }
   0x5   : > { %p26_p0 = scmp.ge.s32.totalorder %s25_s19, 17  ;;  %p76_p1 = scmp.ne.s32.totalorder %s803_s13, %s799_s12 }
   0x6   : > { %p77_p2 = scmp.eq.s32.totalorder %s823_s18, 0  ;;  %s69_s24 = sadd.s32 1, %s803_s13 }
   0x7   : > { %s1016_s19 = smov (%p26_p0, %s25_s19), 0  ;;  %s1018_s20 = smov (!%p26_p0, %s28_s20), %s819_s17 }
   0x8   : > { %p78_p3 = por %p77_p2, %p76_p1  ;;  %p30_p4 = scmp.ge.s32.totalorder %s1018_s20, 2 }
   0x9   : > { %s64_s21 = ssub.s32 %s815_s16, %s1016_s19  ;;  %p654_p6 = scmp.ge.s32.totalorder %s823_s18, 34 }
   0xa   : > { %s1020_s20 = smov (%p30_p4, %s1018_s20), 0 }
   0xb   : > { %s65_s22 = ssub.s32 %s819_s17, %s1020_s20  ;;  %156 = sbr.rel (%p654_p6) target bundleno = 33 (0x21), region = 16 }
   0xc   : > { %s66_s23 = sor.u32 %s65_s22, %s64_s21 }
   0xd   : > { %p67_p5 = scmp.eq.s32.totalorder %s66_s23, 0 }
   0xf   : > { %s898_s25 = scalar_select %p67_p5, %s803_s13, %s69_s24  }
  0x12   : > { %170 = sbr.rel (!%p78_p3) target bundleno = 33 (0x21), region = 24  ;;  %s172_s26 = sand.u32 (%p78_p3), 1, %s803_s13  }
  0x13   : > { %s657_s27 = sshll.u32 (%p78_p3), %s819_s17, 1  ;;  %s655_s28 = sshll.u32 (%p78_p3), %s172_s26, 7 }
  0x14   : > { %s686_s29 = sshll.u32 (%p78_p3), %s815_s16, 6  ;;  %s174_s8 = scalar_lea.vmem (%p78_p3), [#allocation2], %s655_s28 }
  0x15   : > { %s178_s30 = sadd.s32 (%p78_p3), %s686_s29, %s657_s27 }
  0x16   : > { %s659_s4 = sshll.u32 (%p78_p3), %s178_s30, 2 }
  0x17   : > { %s907_s7 = scalar_lea.vmem (%p78_p3), %s1006_s1, %s659_s4 }
  0x18   : > { %v238_v0 = vld [vmem:[%s907_s7] sm:$0xff] (%p78_p3)  ;;  %v240_v1 = vld [vmem:[%s907_s7 + $0x10] sm:$0xff] (%p78_p3) }
  0x19   : > { %v242_v2 = vld [vmem:[%s907_s7 + $0x20] sm:$0xff]  ;;  %239 = vst [vmem:[%s174_s8] sm:$0xff] %v238_v0  ;;  %241 = vst [vmem:[%s174_s8 + $0x8] sm:$0xff] %v240_v1  ;;  %v244_v3 = vld [vmem:[%s907_s7 + $0x30] sm:$0xff] }
  0x1a   : > { %243 = vst [vmem:[%s174_s8 + $0x10] sm:$0xff] %v242_v2  ;;  %v246_v4 = vld [vmem:[%s907_s7 + $0x40] sm:$0xff]  ;;  %v248_v5 = vld [vmem:[%s907_s7 + $0x50] sm:$0xff]  ;;  %245 = vst [vmem:[%s174_s8 + $0x18] sm:$0xff] %v244_v3 }
  0x1b   : > { %247 = vst [vmem:[%s174_s8 + $0x20] sm:$0xff] %v246_v4  ;;  %249 = vst [vmem:[%s174_s8 + $0x28] sm:$0xff] %v248_v5  ;;  %v250_v6 = vld [vmem:[%s907_s7 + $0x60] sm:$0xff]  ;;  %v252_v7 = vld [vmem:[%s907_s7 + $0x70] sm:$0xff] }
  0x1c   : > { %v254_v8 = vld [vmem:[%s907_s7 + $0x80] sm:$0xff]  ;;  %251 = vst [vmem:[%s174_s8 + $0x30] sm:$0xff] %v250_v6  ;;  %253 = vst [vmem:[%s174_s8 + $0x38] sm:$0xff] %v252_v7  ;;  %v256_v9 = vld [vmem:[%s907_s7 + $0x90] sm:$0xff] }
  0x1d   : > { %255 = vst [vmem:[%s174_s8 + $0x40] sm:$0xff] %v254_v8  ;;  %v258_v10 = vld [vmem:[%s907_s7 + $0xa0] sm:$0xff]  ;;  %v260_v11 = vld [vmem:[%s907_s7 + $0xb0] sm:$0xff]  ;;  %257 = vst [vmem:[%s174_s8 + $0x48] sm:$0xff] %v256_v9 }
  0x1e   : > { %259 = vst [vmem:[%s174_s8 + $0x50] sm:$0xff] %v258_v10  ;;  %261 = vst [vmem:[%s174_s8 + $0x58] sm:$0xff] %v260_v11  ;;  %v262_v12 = vld [vmem:[%s907_s7 + $0xc0] sm:$0xff]  ;;  %v264_v13 = vld [vmem:[%s907_s7 + $0xd0] sm:$0xff] }
  0x1f   : > { %v266_v14 = vld [vmem:[%s907_s7 + $0xe0] sm:$0xff]  ;;  %263 = vst [vmem:[%s174_s8 + $0x60] sm:$0xff] %v262_v12  ;;  %265 = vst [vmem:[%s174_s8 + $0x68] sm:$0xff] %v264_v13  ;;  %v268_v15 = vld [vmem:[%s907_s7 + $0xf0] sm:$0xff] }
  0x20   : > { %267 = vst [vmem:[%s174_s8 + $0x70] sm:$0xff] %v266_v14  ;;  %269 = vst [vmem:[%s174_s8 + $0x78] sm:$0xff] %v268_v15 }
  0x21 PF: > { %p660_p7 = scmp.ge.s32.totalorder %s823_s18, 1  ;;  %p282_p8 = scmp.lt.s32.totalorder %s823_s18, 35 }
  0x23   : > { %p283_p9 = pnand %p660_p7, %p282_p8 }
  0x24   : > { %s289_s9 = sand.u32 (!%p283_p9), 1, %s799_s12   ;;  %p330_p10 = scmp.lt.s32.totalorder (!%p283_p9), %s807_s14, 16 }
  0x25   : > { %286 = sbr.rel (%p283_p9) target bundleno = 313 (0x139), region = 66  ;;  %s661_s10 = sshll.u32 (!%p283_p9), %s289_s9, 7 }
  0x26   : > { %s663_s11 = sshll.u32 (!%p283_p9), %s811_s15, 1  ;;  %s948_s5 = scalar_lea.vmem (!%p283_p9), [#allocation2], %s661_s10 }
  0x27   : > { %p339_p11 = scmp.lt.s32.totalorder (!%p283_p9), %s663_s11, 3  ;;  %p666_p12 = scmp.ne.s32.totalorder (!%p283_p9), %s807_s14, 0 }
  0x2c   : > { %s331_s21 = scalar_select %p330_p10, %s807_s14, 16 }
  0x2d   : > { %s1022_s11 = smov (!%p339_p11, %s663_s11), 3  ;;  %357 = sbr.rel (%p666_p12) target bundleno = 52 (0x34), region = 74 }
  0x2e   : > { %s662_s22 = sshll.u32 %s331_s21, 2  ;;  %s341_s29 = scalar_lea.vmem %s1007_s2, %s1022_s11  ;;  %v825_v16 = vmov (!%p666_p12), 0.0  }
  0x2f   : > { %s936_s26 = scalar_lea.vmem %s1005_s0, %s662_s22  ;;  %s665_s12 = sshll.u32 %s1022_s11, 3 }
  0x30   : > { %s946_s15 = scalar_lea.vmem %s1008_s3, %s665_s12 }
  0x31   : > { %358 = vst [vmem:[%s946_s15] sm:$0xff] (!%p666_p12), %v825_v16  ;;  %359 = vst [vmem:[%s946_s15 + $0x8] sm:$0xff] (!%p666_p12), %v825_v16 }
  0x34 PF: > { %v745_v17 = vld [vmem:[%s948_s5 + $0x4] ss:$8 sps:$4 sm:$0xff]   ;;  %v747_v18 = vld [vmem:[%s948_s5] ss:$8 sps:$4 sm:$0xff]   ;;  %v826_v19 = vmov 0   ;;  %p683_p13 = scmp.ne.s32.totalorder %s807_s14, 16 }
  0x35   : > { %491 = vmatprep.mubr.bf16.mxu0 %v826_v19  ;;  %459 = vmatprep.subr.bf16.mxu0 %v745_v17  ;;  %v748_v20 = vld [vmem:[%s948_s5 + $0x14] ss:$8 sps:$4 sm:$0xff]   ;;  %v750_v21 = vld [vmem:[%s948_s5 + $0x10] ss:$8 sps:$4 sm:$0xff]   ;;  %v751_v22 = vld [vmem:[%s948_s5 + $0x24] ss:$8 sps:$4 sm:$0xff]   ;;  %v512_v43 = vlaneseq (!%p683_p13) }
  0x36   : > { %460 = vmatpush1.bf16.msra.mxu0 %v747_v18  ;;  %v753_v23 = vld [vmem:[%s948_s5 + $0x20] ss:$8 sps:$4 sm:$0xff]   ;;  %v754_v24 = vld [vmem:[%s948_s5 + $0x34] ss:$8 sps:$4 sm:$0xff]   ;;  %v756_v25 = vld [vmem:[%s948_s5 + $0x30] ss:$8 sps:$4 sm:$0xff]  }
  0x37   : > { %461 = vmatprep.subr.bf16.mxu0 %v748_v20  ;;  %v757_v26 = vld [vmem:[%s948_s5 + $0x44] ss:$8 sps:$4 sm:$0xff]   ;;  %v759_v27 = vld [vmem:[%s948_s5 + $0x40] ss:$8 sps:$4 sm:$0xff]   ;;  %v760_v28 = vld [vmem:[%s948_s5 + $0x54] ss:$8 sps:$4 sm:$0xff]  }
  0x38   : > { %v762_v29 = vld [vmem:[%s948_s5 + $0x50] ss:$8 sps:$4 sm:$0xff]   ;;  %v763_v30 = vld [vmem:[%s948_s5 + $0x64] ss:$8 sps:$4 sm:$0xff]   ;;  %v765_v31 = vld [vmem:[%s948_s5 + $0x60] ss:$8 sps:$4 sm:$0xff]  }
  0x39   : > { %v766_v32 = vld [vmem:[%s948_s5 + $0x74] ss:$8 sps:$4 sm:$0xff]   ;;  %v768_v33 = vld [vmem:[%s948_s5 + $0x70] ss:$8 sps:$4 sm:$0xff]   ;;  %v362_v34 = vld [vmem:[%s936_s26] sm:$0xf] }
  0x3a   : > { %462 = vmatpush1.bf16.msra.mxu0 %v750_v21  ;;  %v360_v35 = vld [vmem:[%s946_s15] sm:$0xff]  ;;  %v361_v36 = vld [vmem:[%s946_s15 + $0x8] sm:$0xff]  ;;  %v513_v44 = vshrl.u32 (!%p683_p13), %v512_v43, 7 }
  0x3b   : > { %463 = vmatprep.subr.bf16.mxu0 %v751_v22  ;;  %v510_v45 = vld [vmem:[%s341_s29] sm:$0x3] (!%p683_p13) }
  0x3c   : > { %v514_v46 = vsub.s32 (!%p683_p13), 0, %v513_v44  ;;  %v518_v47 = vsub.s32 (!%p683_p13), 1, %v513_v44 }
  0x3e   : > { %464 = vmatpush1.bf16.msra.mxu0 %v753_v23  ;;  %v515_v50 = vrot.slane (!%p683_p13), %v510_v45, %v514_v46  ;;  %v519_v51 = vrot.slane (!%p683_p13), %v510_v45, %v518_v47 }
  0x3f   : > { %465 = vmatprep.subr.bf16.mxu0 %v754_v24 }
  0x42   : > { %466 = vmatpush1.bf16.msra.mxu0 %v756_v25 }
  0x43   : > { %467 = vmatprep.subr.bf16.mxu0 %v757_v26 }
  0x46   : > { %468 = vmatpush1.bf16.msra.mxu0 %v759_v27 }
  0x47   : > { %469 = vmatprep.subr.bf16.mxu0 %v760_v28 }
  0x4a   : > { %470 = vmatpush1.bf16.msra.mxu0 %v762_v29 }
  0x4b   : > { %471 = vmatprep.subr.bf16.mxu0 %v763_v30 }
  0x4e   : > { %472 = vmatpush1.bf16.msra.mxu0 %v765_v31 }
  0x4f   : > { %473 = vmatprep.subr.bf16.mxu0 %v766_v32 }
  0x52   : > { %474 = vmatpush1.bf16.msra.mxu0 %v768_v33 }
  0x55   : > { %492 = vmatmul.mubr.bf16.vlgmr.msra.gmra.mrb[0].mxu0 %v362_v34 }
 0x126   : > { %507 = sbr.rel (%p683_p13) target bundleno = 313 (0x139), region = 78 }
 0x128   : > { %v493_v37 = vpop.f32.mrb[0].mxu0 }
 0x129   : > { %v500_v38 = vadd.f32 %v493_v37, %v360_v35  ;;  %v495_v39 = vpop.f32.mrb[1].mxu0 }
 0x12a   : > { %v501_v40 = vadd.f32 %v495_v39, %v361_v36  ;;  %v497_v41 = vpop.f32.mrb[2].mxu0 }
 0x12b   : > { %502 = vst [vmem:[%s946_s15] sm:$0xff] %v500_v38  ;;  %v498_v42 = vpop.f32.mrb[3].mxu0 }
 0x12c   : > { %503 = vst [vmem:[%s946_s15 + $0x8] sm:$0xff] %v501_v40 }
 0x132   : > { %v508_v48 = vld [vmem:[%s946_s15] sm:$0xff] }
 0x133   : > { %v509_v49 = vld [vmem:[%s946_s15 + $0x8] sm:$0xff]  ;;  %v522_v52 = vadd.f32 %v515_v50, %v508_v48 }
 0x134   : > { %v523_v53 = vadd.f32 %v519_v51, %v509_v49 }
 0x135   : > { %v524_v54 = vmax.f32 %v522_v52, 0.0 }
 0x136   : > { %v525_v55 = vmax.f32 %v523_v53, 0.0 }
 0x137   : > { %526 = vst [vmem:[%s946_s15] sm:$0xff] %v524_v54 }
 0x138   : > { %527 = vst [vmem:[%s946_s15 + $0x8] sm:$0xff] %v525_v55 }
 0x139 PF: > { %s13_s18 = sadd.s32 1, %s823_s18   ;;  %s1009_s12 = smov %s803_s13 }
 0x13a   : > { %p10_p0 = scmp.ge.s32.totalorder %s13_s18, 36   ;;  %s1010_s13 = smov %s898_s25 }
 0x13b   : > { %s1011_s14 = smov %s815_s16  ;;  %s1012_s15 = smov %s819_s17 }
 0x13c   : > { %s1013_s16 = smov %s1016_s19  ;;  %s1014_s17 = smov %s1020_s20 }
 0x13d   :  { %12 = sbr.rel (!%p10_p0) target bundleno = 4 (0x4), region = 119 }

// kernel: forward.62
= control target key start
LH: loop header
LB: loop body
LE: loop exit
PB: predicated region body
PF: predicated region fallthrough
CT: control target
= control target key end

     0   :  { %s1059_s12 = smov 0   ;;  %s1061_s13 = smov 0   ;;  %s1282_s0 = inlined_call_operand.vmem [shape: bf16[8,1024], index: 0, kind: input, shape index: {}]   ;;  %s1283_s1 = inlined_call_operand.vmem [shape: bf16[1024,1024], index: 1, kind: input, shape index: {}]   ;;  %s1284_s2 = inlined_call_operand.vmem [shape: f32[1,1024], index: 2, kind: input, shape index: {}]   ;;  %s1285_s3 = inlined_call_operand.vmem [shape: f32[8,1024], index: 3, kind: output, shape index: {}]  }
   0x1   :  { %s1063_s14 = smov 0   ;;  %s1065_s15 = smov 0  }
   0x2   :  { %s1067_s16 = smov 0   ;;  %s1069_s17 = smov 0  }
   0x3   :  { %s1071_s18 = smov 0  }
   0x4 LB: > { %s25_s19 = sadd.s32 1, %s1028_s16  ;;  %s28_s20 = sadd.s32 1, %s1032_s17  ;;  %s1036_s18 = sphi %s1071_s18, %s13_s18   ;;  %s1032_s17 = sphi %s1069_s17, %s1291_s17   ;;  %s1028_s16 = sphi %s1067_s16, %s1290_s16   ;;  %s1024_s15 = sphi %s1065_s15, %s1289_s15   ;;  %s1020_s14 = sphi %s1063_s14, %s1288_s14   ;;  %s1016_s13 = sphi %s1061_s13, %s1287_s13   ;;  %s1012_s12 = sphi %s1059_s12, %s1286_s12  }
   0x5   : > { %p26_p0 = scmp.ge.s32.totalorder %s25_s19, 4  ;;  %p76_p1 = scmp.ne.s32.totalorder %s1016_s13, %s1012_s12 }
   0x6   : > { %p77_p2 = scmp.eq.s32.totalorder %s1036_s18, 0  ;;  %s69_s24 = sadd.s32 1, %s1016_s13 }
   0x7   : > { %s1293_s19 = smov (%p26_p0, %s25_s19), 0  ;;  %s1295_s20 = smov (!%p26_p0, %s28_s20), %s1032_s17 }
   0x8   : > { %p78_p3 = por %p77_p2, %p76_p1  ;;  %p30_p4 = scmp.ge.s32.totalorder %s1295_s20, 4 }
   0x9   : > { %s64_s21 = ssub.s32 %s1028_s16, %s1293_s19  ;;  %p823_p6 = scmp.ge.s32.totalorder %s1036_s18, 16 }
   0xa   : > { %s1297_s20 = smov (%p30_p4, %s1295_s20), 0 }
   0xb   : > { %s65_s22 = ssub.s32 %s1032_s17, %s1297_s20  ;;  %156 = sbr.rel (%p823_p6) target bundleno = 57 (0x39), region = 16 }
   0xc   : > { %s66_s23 = sor.u32 %s65_s22, %s64_s21 }
   0xd   : > { %p67_p5 = scmp.eq.s32.totalorder %s66_s23, 0 }
   0xf   : > { %s1110_s25 = scalar_select %p67_p5, %s1016_s13, %s69_s24  }
  0x12   : > { %172 = sbr.rel (!%p78_p3) target bundleno = 57 (0x39), region = 24  ;;  %s174_s26 = sand.u32 (%p78_p3), 1, %s1016_s13  }
  0x13   : > { %s826_s27 = sshll.u32 (%p78_p3), %s1032_s17, 1  ;;  %s824_s28 = sshll.u32 (%p78_p3), %s174_s26, 8 }
  0x14   : > { %s874_s29 = sshll.u32 (%p78_p3), %s1028_s16, 8  ;;  %s1124_s8 = scalar_lea.vmem (%p78_p3), [#allocation2], %s824_s28 }
  0x15   : > { %s180_s30 = sadd.s32 (%p78_p3), %s874_s29, %s826_s27 }
  0x16   : > { %s828_s4 = sshll.u32 (%p78_p3), %s180_s30, 2 }
  0x17   : > { %s1119_s7 = scalar_lea.vmem (%p78_p3), %s1283_s1, %s828_s4 }
  0x18   : > { %v272_v0 = vld [vmem:[%s1119_s7] sm:$0xff] (%p78_p3) }
  0x19   : > { %v274_v1 = vld [vmem:[%s1119_s7 + $0x20] sm:$0xff]  ;;  %273 = vst [vmem:[%s1124_s8] sm:$0xff] %v272_v0 }
  0x1a   : > { %v276_v2 = vld [vmem:[%s1119_s7 + $0x40] sm:$0xff]  ;;  %275 = vst [vmem:[%s1124_s8 + $0x8] sm:$0xff] %v274_v1 }
  0x1b   : > { %277 = vst [vmem:[%s1124_s8 + $0x10] sm:$0xff] %v276_v2  ;;  %v278_v3 = vld [vmem:[%s1119_s7 + $0x60] sm:$0xff] }
  0x1c   : > { %v280_v4 = vld [vmem:[%s1119_s7 + $0x80] sm:$0xff]  ;;  %279 = vst [vmem:[%s1124_s8 + $0x18] sm:$0xff] %v278_v3 }
  0x1d   : > { %v282_v5 = vld [vmem:[%s1119_s7 + $0xa0] sm:$0xff]  ;;  %281 = vst [vmem:[%s1124_s8 + $0x20] sm:$0xff] %v280_v4 }
  0x1e   : > { %283 = vst [vmem:[%s1124_s8 + $0x28] sm:$0xff] %v282_v5  ;;  %v284_v6 = vld [vmem:[%s1119_s7 + $0xc0] sm:$0xff] }
  0x1f   : > { %v286_v7 = vld [vmem:[%s1119_s7 + $0xe0] sm:$0xff]  ;;  %285 = vst [vmem:[%s1124_s8 + $0x30] sm:$0xff] %v284_v6 }
  0x20   : > { %v288_v8 = vld [vmem:[%s1119_s7 + $0x100] sm:$0xff]  ;;  %287 = vst [vmem:[%s1124_s8 + $0x38] sm:$0xff] %v286_v7 }
  0x21   : > { %289 = vst [vmem:[%s1124_s8 + $0x40] sm:$0xff] %v288_v8  ;;  %v290_v9 = vld [vmem:[%s1119_s7 + $0x120] sm:$0xff] }
  0x22   : > { %v292_v10 = vld [vmem:[%s1119_s7 + $0x140] sm:$0xff]  ;;  %291 = vst [vmem:[%s1124_s8 + $0x48] sm:$0xff] %v290_v9 }
  0x23   : > { %v294_v11 = vld [vmem:[%s1119_s7 + $0x160] sm:$0xff]  ;;  %293 = vst [vmem:[%s1124_s8 + $0x50] sm:$0xff] %v292_v10 }
  0x24   : > { %295 = vst [vmem:[%s1124_s8 + $0x58] sm:$0xff] %v294_v11  ;;  %v296_v12 = vld [vmem:[%s1119_s7 + $0x180] sm:$0xff] }
  0x25   : > { %v298_v13 = vld [vmem:[%s1119_s7 + $0x1a0] sm:$0xff]  ;;  %297 = vst [vmem:[%s1124_s8 + $0x60] sm:$0xff] %v296_v12 }
  0x26   : > { %v300_v14 = vld [vmem:[%s1119_s7 + $0x1c0] sm:$0xff]  ;;  %299 = vst [vmem:[%s1124_s8 + $0x68] sm:$0xff] %v298_v13 }
  0x27   : > { %301 = vst [vmem:[%s1124_s8 + $0x70] sm:$0xff] %v300_v14  ;;  %v302_v15 = vld [vmem:[%s1119_s7 + $0x1e0] sm:$0xff] }
  0x28   : > { %v304_v16 = vld [vmem:[%s1119_s7 + $0x200] sm:$0xff]  ;;  %303 = vst [vmem:[%s1124_s8 + $0x78] sm:$0xff] %v302_v15 }
  0x29   : > { %v306_v17 = vld [vmem:[%s1119_s7 + $0x220] sm:$0xff]  ;;  %305 = vst [vmem:[%s1124_s8 + $0x80] sm:$0xff] %v304_v16 }
  0x2a   : > { %307 = vst [vmem:[%s1124_s8 + $0x88] sm:$0xff] %v306_v17  ;;  %v308_v18 = vld [vmem:[%s1119_s7 + $0x240] sm:$0xff] }
  0x2b   : > { %v310_v19 = vld [vmem:[%s1119_s7 + $0x260] sm:$0xff]  ;;  %309 = vst [vmem:[%s1124_s8 + $0x90] sm:$0xff] %v308_v18 }
  0x2c   : > { %v312_v20 = vld [vmem:[%s1119_s7 + $0x280] sm:$0xff]  ;;  %311 = vst [vmem:[%s1124_s8 + $0x98] sm:$0xff] %v310_v19 }
  0x2d   : > { %313 = vst [vmem:[%s1124_s8 + $0xa0] sm:$0xff] %v312_v20  ;;  %v314_v21 = vld [vmem:[%s1119_s7 + $0x2a0] sm:$0xff] }
  0x2e   : > { %v316_v22 = vld [vmem:[%s1119_s7 + $0x2c0] sm:$0xff]  ;;  %315 = vst [vmem:[%s1124_s8 + $0xa8] sm:$0xff] %v314_v21 }
  0x2f   : > { %v318_v23 = vld [vmem:[%s1119_s7 + $0x2e0] sm:$0xff]  ;;  %317 = vst [vmem:[%s1124_s8 + $0xb0] sm:$0xff] %v316_v22 }
  0x30   : > { %319 = vst [vmem:[%s1124_s8 + $0xb8] sm:$0xff] %v318_v23  ;;  %v320_v24 = vld [vmem:[%s1119_s7 + $0x300] sm:$0xff] }
  0x31   : > { %v322_v25 = vld [vmem:[%s1119_s7 + $0x320] sm:$0xff]  ;;  %321 = vst [vmem:[%s1124_s8 + $0xc0] sm:$0xff] %v320_v24 }
  0x32   : > { %v324_v26 = vld [vmem:[%s1119_s7 + $0x340] sm:$0xff]  ;;  %323 = vst [vmem:[%s1124_s8 + $0xc8] sm:$0xff] %v322_v25 }
  0x33   : > { %325 = vst [vmem:[%s1124_s8 + $0xd0] sm:$0xff] %v324_v26  ;;  %v326_v27 = vld [vmem:[%s1119_s7 + $0x360] sm:$0xff] }
  0x34   : > { %v328_v28 = vld [vmem:[%s1119_s7 + $0x380] sm:$0xff]  ;;  %327 = vst [vmem:[%s1124_s8 + $0xd8] sm:$0xff] %v326_v27 }
  0x35   : > { %v330_v29 = vld [vmem:[%s1119_s7 + $0x3a0] sm:$0xff]  ;;  %329 = vst [vmem:[%s1124_s8 + $0xe0] sm:$0xff] %v328_v28 }
  0x36   : > { %331 = vst [vmem:[%s1124_s8 + $0xe8] sm:$0xff] %v330_v29  ;;  %v332_v30 = vld [vmem:[%s1119_s7 + $0x3c0] sm:$0xff] }
  0x37   : > { %v334_v31 = vld [vmem:[%s1119_s7 + $0x3e0] sm:$0xff]  ;;  %333 = vst [vmem:[%s1124_s8 + $0xf0] sm:$0xff] %v332_v30 }
  0x38   : > { %335 = vst [vmem:[%s1124_s8 + $0xf8] sm:$0xff] %v334_v31 }
  0x39 PF: > { %p829_p7 = scmp.ge.s32.totalorder %s1036_s18, 1  ;;  %p348_p8 = scmp.lt.s32.totalorder %s1036_s18, 17 }
  0x3b   : > { %p349_p9 = pnand %p829_p7, %p348_p8 }
  0x3c   : > { %s355_s9 = sand.u32 (!%p349_p9), 1, %s1012_s12   ;;  %s831_s10 = sshll.u32 (!%p349_p9), %s1020_s14, 1 }
  0x3d   : > { %352 = sbr.rel (%p349_p9) target bundleno = 369 (0x171), region = 66  ;;  %s830_s11 = sshll.u32 (!%p349_p9), %s355_s9, 8 }
  0x3e   : > { %p398_p10 = scmp.lt.s32.totalorder (!%p349_p9), %s831_s10, 7  ;;  %s833_s21 = sshll.u32 (!%p349_p9), %s1024_s15, 1 }
  0x3f   : > { %p408_p11 = scmp.lt.s32.totalorder (!%p349_p9), %s833_s21, 7  ;;  %s1209_s5 = scalar_lea.vmem (!%p349_p9), [#allocation2], %s830_s11 }
  0x40   : > { %p836_p12 = scmp.ne.s32.totalorder (!%p349_p9), %s1020_s14, 0 }
  0x44   : > { %s1299_s10 = smov (!%p398_p10, %s831_s10), 7  ;;  %s1301_s21 = smov (!%p408_p11, %s833_s21), 7 }
  0x45   : > { %s832_s22 = sshll.u32 %s1299_s10, 2  ;;  %s410_s12 = scalar_lea.vmem %s1284_s2, %s1301_s21  ;;  %v1038_v32 = vmov (!%p836_p12), 0.0  }
  0x46   : > { %s1195_s26 = scalar_lea.vmem %s1282_s0, %s832_s22  ;;  %s835_s29 = sshll.u32 %s1301_s21, 3 }
  0x47   : > { %s1207_s15 = scalar_lea.vmem %s1285_s3, %s835_s29  ;;  %425 = sbr.rel (%p836_p12) target bundleno = 78 (0x4e), region = 74 }
  0x48   : > { %426 = vst [vmem:[%s1207_s15] sm:$0xff] (!%p836_p12), %v1038_v32  ;;  %427 = vst [vmem:[%s1207_s15 + $0x8] sm:$0xff] (!%p836_p12), %v1038_v32 }
  0x4e PF: > { %v932_v33 = vld [vmem:[%s1209_s5 + $0x4] ss:$8 sps:$4 sm:$0xff]   ;;  %v934_v34 = vld [vmem:[%s1209_s5] ss:$8 sps:$4 sm:$0xff]   ;;  %v935_v35 = vld [vmem:[%s1209_s5 + $0x14] ss:$8 sps:$4 sm:$0xff]  }
  0x4f   : > { %630 = vmatprep.subr.bf16.mxu0 %v932_v33  ;;  %v937_v36 = vld [vmem:[%s1209_s5 + $0x10] ss:$8 sps:$4 sm:$0xff]   ;;  %v938_v37 = vld [vmem:[%s1209_s5 + $0x24] ss:$8 sps:$4 sm:$0xff]   ;;  %v940_v38 = vld [vmem:[%s1209_s5 + $0x20] ss:$8 sps:$4 sm:$0xff]  }
  0x50   : > { %631 = vmatpush1.bf16.msra.mxu0 %v934_v34  ;;  %v941_v39 = vld [vmem:[%s1209_s5 + $0x34] ss:$8 sps:$4 sm:$0xff]   ;;  %v943_v40 = vld [vmem:[%s1209_s5 + $0x30] ss:$8 sps:$4 sm:$0xff]   ;;  %v944_v41 = vld [vmem:[%s1209_s5 + $0x44] ss:$8 sps:$4 sm:$0xff]  }
  0x51   : > { %632 = vmatprep.subr.bf16.mxu0 %v935_v35  ;;  %v946_v42 = vld [vmem:[%s1209_s5 + $0x40] ss:$8 sps:$4 sm:$0xff]   ;;  %v947_v43 = vld [vmem:[%s1209_s5 + $0x54] ss:$8 sps:$4 sm:$0xff]   ;;  %v949_v44 = vld [vmem:[%s1209_s5 + $0x50] ss:$8 sps:$4 sm:$0xff]  }
  0x52   : > { %v950_v45 = vld [vmem:[%s1209_s5 + $0x64] ss:$8 sps:$4 sm:$0xff]   ;;  %v952_v48 = vld [vmem:[%s1209_s5 + $0x60] ss:$8 sps:$4 sm:$0xff]   ;;  %v953_v49 = vld [vmem:[%s1209_s5 + $0x74] ss:$8 sps:$4 sm:$0xff]  }
  0x53   : > { %v430_v46 = vld [vmem:[%s1195_s26] sm:$0xff]  ;;  %v955_v50 = vld [vmem:[%s1209_s5 + $0x70] ss:$8 sps:$4 sm:$0xff]   ;;  %v959_v53 = vld [vmem:[%s1209_s5 + $0x94] ss:$8 sps:$4 sm:$0xff]   ;;  %p871_p13 = scmp.ne.s32.totalorder %s1020_s14, 3 }
  0x54   : > { %633 = vmatpush1.bf16.msra.mxu0 %v937_v36  ;;  %v838_v47 = vcombine.high %v430_v46, %v430_v46  ;;  %v956_v51 = vld [vmem:[%s1209_s5 + $0x84] ss:$8 sps:$4 sm:$0xff]   ;;  %v958_v52 = vld [vmem:[%s1209_s5 + $0x80] ss:$8 sps:$4 sm:$0xff]   ;;  %v961_v54 = vld [vmem:[%s1209_s5 + $0x90] ss:$8 sps:$4 sm:$0xff]   ;;  %v837_v3 = vcombine.low %v430_v46, %v430_v46  ;;  %v683_v12 = vlaneseq (!%p871_p13) }
  0x55   : > { %634 = vmatprep.subr.bf16.mxu0 %v938_v37  ;;  %v962_v55 = vld [vmem:[%s1209_s5 + $0xa4] ss:$8 sps:$4 sm:$0xff]   ;;  %v964_v56 = vld [vmem:[%s1209_s5 + $0xa0] ss:$8 sps:$4 sm:$0xff]   ;;  %v965_v57 = vld [vmem:[%s1209_s5 + $0xb4] ss:$8 sps:$4 sm:$0xff]  }
  0x56   : > { %662 = vmatprep.mubr.bf16.mxu0 %v838_v47  ;;  %v967_v58 = vld [vmem:[%s1209_s5 + $0xb0] ss:$8 sps:$4 sm:$0xff]   ;;  %v968_v59 = vld [vmem:[%s1209_s5 + $0xc4] ss:$8 sps:$4 sm:$0xff]   ;;  %v970_v60 = vld [vmem:[%s1209_s5 + $0xc0] ss:$8 sps:$4 sm:$0xff]  }
  0x57   : > { %v971_v61 = vld [vmem:[%s1209_s5 + $0xd4] ss:$8 sps:$4 sm:$0xff]   ;;  %v973_v62 = vld [vmem:[%s1209_s5 + $0xd0] ss:$8 sps:$4 sm:$0xff]   ;;  %v974_v63 = vld [vmem:[%s1209_s5 + $0xe4] ss:$8 sps:$4 sm:$0xff]  }
  0x58   : > { %635 = vmatpush1.bf16.msra.mxu0 %v940_v38  ;;  %v976_v0 = vld [vmem:[%s1209_s5 + $0xe0] ss:$8 sps:$4 sm:$0xff]   ;;  %v977_v1 = vld [vmem:[%s1209_s5 + $0xf4] ss:$8 sps:$4 sm:$0xff]   ;;  %v979_v2 = vld [vmem:[%s1209_s5 + $0xf0] ss:$8 sps:$4 sm:$0xff]  }
  0x59   : > { %636 = vmatprep.subr.bf16.mxu0 %v941_v39  ;;  %v428_v4 = vld [vmem:[%s1207_s15] sm:$0xff]  ;;  %v429_v5 = vld [vmem:[%s1207_s15 + $0x8] sm:$0xff]  ;;  %v684_v13 = vshrl.u32 (!%p871_p13), %v683_v12, 7 }
  0x5a   : > { %v681_v14 = vld [vmem:[%s410_s12] sm:$0x3] (!%p871_p13) }
  0x5b   : > { %v685_v15 = vsub.s32 (!%p871_p13), 0, %v684_v13  ;;  %v689_v16 = vsub.s32 (!%p871_p13), 1, %v684_v13 }
  0x5c   : > { %637 = vmatpush1.bf16.msra.mxu0 %v943_v40 }
  0x5d   : > { %638 = vmatprep.subr.bf16.mxu0 %v944_v41  ;;  %v686_v19 = vrot.slane (!%p871_p13), %v681_v14, %v685_v15  ;;  %v690_v20 = vrot.slane (!%p871_p13), %v681_v14, %v689_v16 }
  0x60   : > { %639 = vmatpush1.bf16.msra.mxu0 %v946_v42 }
  0x61   : > { %640 = vmatprep.subr.bf16.mxu0 %v947_v43 }
  0x64   : > { %641 = vmatpush1.bf16.msra.mxu0 %v949_v44 }
  0x65   : > { %642 = vmatprep.subr.bf16.mxu0 %v950_v45 }
  0x68   : > { %643 = vmatpush1.bf16.msra.mxu0 %v952_v48 }
  0x69   : > { %644 = vmatprep.subr.bf16.mxu0 %v953_v49 }
  0x6c   : > { %645 = vmatpush1.bf16.msra.mxu0 %v955_v50 }
  0x6d   : > { %646 = vmatprep.subr.bf16.mxu0 %v956_v51 }
  0x70   : > { %647 = vmatpush1.bf16.msra.mxu0 %v958_v52 }
  0x71   : > { %648 = vmatprep.subr.bf16.mxu0 %v959_v53 }
  0x74   : > { %649 = vmatpush1.bf16.msra.mxu0 %v961_v54 }
  0x75   : > { %650 = vmatprep.subr.bf16.mxu0 %v962_v55 }
  0x78   : > { %651 = vmatpush1.bf16.msra.mxu0 %v964_v56 }
  0x79   : > { %652 = vmatprep.subr.bf16.mxu0 %v965_v57 }
  0x7c   : > { %653 = vmatpush1.bf16.msra.mxu0 %v967_v58 }
  0x7d   : > { %654 = vmatprep.subr.bf16.mxu0 %v968_v59 }
  0x80   : > { %655 = vmatpush1.bf16.msra.mxu0 %v970_v60 }
  0x81   : > { %656 = vmatprep.subr.bf16.mxu0 %v971_v61 }
  0x84   : > { %657 = vmatpush1.bf16.msra.mxu0 %v973_v62 }
  0x85   : > { %658 = vmatprep.subr.bf16.mxu0 %v974_v63 }
  0x88   : > { %659 = vmatpush1.bf16.msra.mxu0 %v976_v0 }
  0x89   : > { %660 = vmatprep.subr.bf16.mxu0 %v977_v1 }
  0x8c   : > { %661 = vmatpush1.bf16.msra.mxu0 %v979_v2 }
  0x8f   : > { %663 = vmatmul.mubr.bf16.vlgmr.msra.gmra.mrb[0].mxu0 %v837_v3 }
 0x160   : > { %678 = sbr.rel (%p871_p13) target bundleno = 369 (0x171), region = 78 }
 0x162   : > { %v664_v6 = vpop.f32.mrb[0].mxu0 }
 0x163   : > { %v671_v7 = vadd.f32 %v664_v6, %v428_v4  ;;  %v666_v8 = vpop.f32.mrb[1].mxu0 }
 0x164   : > { %v672_v9 = vadd.f32 %v666_v8, %v429_v5  ;;  %v668_v10 = vpop.f32.mrb[2].mxu0 }
 0x165   : > { %673 = vst [vmem:[%s1207_s15] sm:$0xff] %v671_v7  ;;  %v669_v11 = vpop.f32.mrb[3].mxu0 }
 0x166   : > { %674 = vst [vmem:[%s1207_s15 + $0x8] sm:$0xff] %v672_v9 }
 0x16c   : > { %v679_v17 = vld [vmem:[%s1207_s15] sm:$0xff] }
 0x16d   : > { %v680_v18 = vld [vmem:[%s1207_s15 + $0x8] sm:$0xff]  ;;  %v693_v21 = vadd.f32 %v686_v19, %v679_v17 }
 0x16e   : > { %v694_v22 = vadd.f32 %v690_v20, %v680_v18 }
 0x16f   : > { %695 = vst [vmem:[%s1207_s15] sm:$0xff] %v693_v21 }
 0x170   : > { %696 = vst [vmem:[%s1207_s15 + $0x8] sm:$0xff] %v694_v22 }
 0x171 PF: > { %s13_s18 = sadd.s32 1, %s1036_s18   ;;  %s1286_s12 = smov %s1016_s13 }
 0x172   : > { %p10_p0 = scmp.ge.s32.totalorder %s13_s18, 18   ;;  %s1287_s13 = smov %s1110_s25 }
 0x173   : > { %s1288_s14 = smov %s1028_s16  ;;  %s1289_s15 = smov %s1032_s17 }
 0x174   : > { %s1290_s16 = smov %s1293_s19  ;;  %s1291_s17 = smov %s1297_s20 }
 0x175   :  { %12 = sbr.rel (!%p10_p0) target bundleno = 4 (0x4), region = 119 }

// kernel: forward.63
= control target key start
LH: loop header
LB: loop body
LE: loop exit
PB: predicated region body
PF: predicated region fallthrough
CT: control target
= control target key end

     0   :  { %s706_s12 = smov 0   ;;  %s708_s13 = smov 0   ;;  %s781_s0 = inlined_call_operand.vmem [shape: bf16[8,1024], index: 0, kind: input, shape index: {}]   ;;  %s782_s1 = inlined_call_operand.vmem [shape: bf16[1024,128], index: 1, kind: input, shape index: {}]   ;;  %s783_s2 = inlined_call_operand.vmem [shape: f32[1,128], index: 2, kind: input, shape index: {}]   ;;  %s784_s3 = inlined_call_operand.vmem [shape: f32[8,128], index: 3, kind: output, shape index: {}]  }
   0x1   :  { %s710_s14 = smov 0  }
   0x2 LB: > { %s25_s15 = sadd.s32 1, %s679_s13  ;;  %p567_p0 = scmp.ge.s32.totalorder %s683_s14, 1  ;;  %s683_s14 = sphi %s710_s14, %s13_s14   ;;  %s679_s13 = sphi %s708_s13, %s786_s13   ;;  %s675_s12 = sphi %s706_s12, %s785_s12  }
   0x3   : > { %p26_p1 = scmp.ge.s32.totalorder %s25_s15, 4  ;;  %p189_p2 = scmp.lt.s32.totalorder %s683_s14, 5 }
   0x5   : > { %s788_s15 = smov (%p26_p1, %s25_s15), 0  ;;  %p190_p3 = pnand %p567_p0, %p189_p2 }
   0x6   : > { %s568_s16 = sshll.u32 (!%p190_p3), %s675_s12, 1  ;;  %s570_s17 = sshll.u32 (!%p190_p3), %s675_s12, 5 }
   0x7   : > { %193 = sbr.rel (%p190_p3) target bundleno = 285 (0x11d), region = 32  ;;  %p233_p4 = scmp.lt.s32.totalorder (!%p190_p3), %s568_s16, 7 }
   0x8   : > { %p241_p5 = scmp.lt.s32.totalorder (!%p190_p3), %s570_s17, 127  ;;  %p572_p6 = scmp.ne.s32.totalorder (!%p190_p3), %s675_s12, 0 }
   0xe   : > { %s790_s16 = smov (!%p233_p4, %s568_s16), 7  ;;  %s792_s17 = smov (!%p241_p5, %s570_s17), 127 }
   0xf   : > { %s569_s18 = sshll.u32 %s790_s16, 2  ;;  %s571_s22 = sshll.u32 %s792_s17, 2  ;;  %v685_v0 = vmov (!%p572_p6), 0.0  }
  0x10   : > { %s238_s21 = scalar_lea.vmem %s781_s0, %s569_s18  ;;  %s734_s25 = scalar_lea.vmem %s782_s1, %s571_s22  ;;  %264 = vst [vmem:[%s784_s3] sm:$0xff] (!%p572_p6), %v685_v0 }
  0x11   : > { %263 = sbr.rel (%p572_p6) target bundleno = 24 (0x18), region = 36 }
  0x18 PF: > { %v643_v1 = vld [vmem:[%s734_s25 + $0x40] sm:$0xff]   ;;  %v645_v3 = vld [vmem:[%s734_s25 + $0x48] sm:$0xff]   ;;  %v647_v5 = vld [vmem:[%s734_s25 + $0x50] sm:$0xff]   ;;  %p591_p7 = scmp.ne.s32.totalorder %s675_s12, 3 }
  0x19   : > { %v644_v2 = vld [vmem:[%s734_s25] sm:$0xff]   ;;  %596 = vmatprep.subr.bf16.mxu0 %v643_v1  ;;  %v646_v4 = vld [vmem:[%s734_s25 + $0x8] sm:$0xff]   ;;  %v648_v6 = vld [vmem:[%s734_s25 + $0x10] sm:$0xff]  }
  0x1a   : > { %597 = vmatpush3.bf16.msra.mxu0 %v644_v2  ;;  %v649_v7 = vld [vmem:[%s734_s25 + $0x58] sm:$0xff]   ;;  %v651_v9 = vld [vmem:[%s734_s25 + $0x60] sm:$0xff]   ;;  %v653_v11 = vld [vmem:[%s734_s25 + $0x68] sm:$0xff]  }
  0x1b   : > { %598 = vmatprep.subr.bf16.mxu0 %v645_v3  ;;  %v650_v8 = vld [vmem:[%s734_s25 + $0x18] sm:$0xff]   ;;  %v652_v10 = vld [vmem:[%s734_s25 + $0x20] sm:$0xff]   ;;  %v654_v14 = vld [vmem:[%s734_s25 + $0x28] sm:$0xff]  }
  0x1c   : > { %v266_v12 = vld [vmem:[%s238_s21] sm:$0xff]  ;;  %v655_v15 = vld [vmem:[%s734_s25 + $0x70] sm:$0xff]   ;;  %v657_v17 = vld [vmem:[%s734_s25 + $0x78] sm:$0xff]  }
  0x1d   : > { %v574_v13 = vcombine.high %v266_v12, %v266_v12  ;;  %v656_v16 = vld [vmem:[%s734_s25 + $0x30] sm:$0xff]   ;;  %v658_v18 = vld [vmem:[%s734_s25 + $0x38] sm:$0xff]   ;;  %v573_v19 = vcombine.low %v266_v12, %v266_v12  ;;  %v265_v21 = vld [vmem:[%s784_s3] sm:$0xff] }
  0x1e   : > { %599 = vmatpush3.bf16.msra.mxu0 %v646_v4  ;;  %v592_v28 = vld [vmem:[%s783_s2] ss:$0 sm:$0xff] (!%p591_p7) }
  0x1f   : > { %600 = vmatprep.subr.bf16.mxu0 %v647_v5  ;;  %434 = vmatprep.mubr.bf16.mxu0 %v574_v13 }
  0x22   : > { %601 = vmatpush3.bf16.msra.mxu0 %v648_v6 }
  0x23   : > { %602 = vmatprep.subr.bf16.mxu0 %v649_v7 }
  0x26   : > { %603 = vmatpush3.bf16.msra.mxu0 %v650_v8 }
  0x27   : > { %604 = vmatprep.subr.bf16.mxu0 %v651_v9 }
  0x2a   : > { %605 = vmatpush3.bf16.msra.mxu0 %v652_v10 }
  0x2b   : > { %606 = vmatprep.subr.bf16.mxu0 %v653_v11 }
  0x2e   : > { %607 = vmatpush3.bf16.msra.mxu0 %v654_v14 }
  0x2f   : > { %608 = vmatprep.subr.bf16.mxu0 %v655_v15 }
  0x32   : > { %609 = vmatpush3.bf16.msra.mxu0 %v656_v16 }
  0x33   : > { %610 = vmatprep.subr.bf16.mxu0 %v657_v17 }
  0x36   : > { %611 = vmatpush3.bf16.msra.mxu0 %v658_v18 }
  0x39   : > { %435 = vmatmul.mubr.bf16.vlgmr.msra.gmra.mrb[0].mxu0 %v573_v19 }
 0x10c   : > { %v612_v20 = vpop.f32.mrb[0].mxu0  ;;  %447 = sbr.rel (%p591_p7) target bundleno = 285 (0x11d), region = 40 }
 0x10d   : > { %v613_v22 = vpop.f32.mrb[1].mxu0 }
 0x10e   : > { %v614_v23 = vadd.f32 %v613_v22, %v612_v20  ;;  %v615_v24 = vpop.f32.mrb[2].mxu0 }
 0x10f   : > { %v616_v25 = vpop.f32.mrb[3].mxu0 }
 0x110   : > { %v442_v26 = vadd.f32 %v614_v23, %v265_v21 }
 0x112   : > { %443 = vst [vmem:[%s784_s3] sm:$0xff] %v442_v26 }
 0x119   : > { %v448_v27 = vld [vmem:[%s784_s3] sm:$0xff] }
 0x11a   : > { %v456_v29 = vadd.f32 %v592_v28, %v448_v27 }
 0x11c   : > { %457 = vst [vmem:[%s784_s3] sm:$0xff] %v456_v29 }
 0x11d PF: > { %s13_s14 = sadd.s32 1, %s683_s14   ;;  %s785_s12 = smov %s679_s13 }
 0x11e   : > { %p10_p8 = scmp.ge.s32.totalorder %s13_s14, 6   ;;  %s786_s13 = smov %s788_s15 }
 0x120   :  { %12 = sbr.rel (!%p10_p8) target bundleno = 2 (0x2), region = 76 }

</bundles_post_ra>
